<compile_context>
chip_gen: v7x
topology: tpu7x:2x2x1
jax: 0.10.0
libtpu: 0.0.40
codegen_flags: <defaults>
</compile_context>

<pallas_src>
import functools

import jax
import jax.numpy as jnp
from jax.experimental import pallas as pl
from jax.experimental.pallas import tpu as pltpu

LEAK = 0.2       # LeakyReLU negative slope
BN_EPS = 1e-5    # BatchNorm2d default eps
K = 4            # conv kernel size (kw in the PyTorch module)

_VMEM_LIMIT = 32 * 1024 * 1024


def _round_up(x, m):
    return (x + m - 1) // m * m


def _tile_m(m):
    return 512 if m >= 512 else _round_up(m, 8)


# ----------------------------- Pallas kernels ------------------------------

def _conv_bias_act_kernel(p_ref, w_ref, b_ref, o_ref, *, use_act):
    """One MXU matmul per M-tile: (TM, Kpad) @ (Kpad, Cpad) + bias [+ LeakyReLU]."""
    y = jnp.dot(p_ref[...], w_ref[...], preferred_element_type=jnp.float32)
    y = y + b_ref[...]
    if use_act:
        y = jnp.maximum(y, LEAK * y)            # LeakyReLU(0.2)
    o_ref[...] = y.astype(o_ref.dtype)


def _conv_bias_stats_kernel(p_ref, w_ref, b_ref, o_ref, stats_ref, *, m_valid, tm):
    """Conv + bias, plus per-tile (sum, sumsq) partials for BatchNorm stats.
    Rows beyond the valid M (tile padding) are masked out of the statistics."""
    i = pl.program_id(0)
    y = jnp.dot(p_ref[...], w_ref[...], preferred_element_type=jnp.float32)
    y = y + b_ref[...]
    o_ref[...] = y.astype(o_ref.dtype)

    row = jax.lax.broadcasted_iota(jnp.int32, (tm, 1), 0) + i * tm
    ym = jnp.where(row < m_valid, y, 0.0)
    s = jnp.sum(ym, axis=0, keepdims=True)         # (1, Cpad)
    sq = jnp.sum(ym * ym, axis=0, keepdims=True)   # (1, Cpad)
    stats_ref[...] = jnp.concatenate([s, sq], axis=0)[None, :, :]   # (1, 2, Cpad)


def _bn_act_kernel(y_ref, scale_ref, shift_ref, o_ref):
    """Elementwise folded BatchNorm affine + LeakyReLU(0.2), tiled over M."""
    y = y_ref[...] * scale_ref[...] + shift_ref[...]
    o_ref[...] = jnp.maximum(y, LEAK * y).astype(o_ref.dtype)


# ------------------------------ JAX wrappers --------------------------------

def _strided_window(xp, kh, kw, Ho, Wo, stride):
    return xp[:, kh:kh + (Ho - 1) * stride + 1:stride,
              kw:kw + (Wo - 1) * stride + 1:stride, :]


def _matmul_specs(TM, Kpad, Cpad):
    return [pl.BlockSpec((TM, Kpad), lambda i: (i, 0)),
            pl.BlockSpec((Kpad, Cpad), lambda i: (0, 0)),
            pl.BlockSpec((1, Cpad), lambda i: (0, 0))]


def conv_layer(x_nhwc, cfg, p):
    """Conv2d(k=4, pad=1) [+ BatchNorm2d (batch stats)] [+ LeakyReLU(0.2)]."""
    stride, use_bn, use_act = cfg["stride"], cfg["use_bn"], cfg["use_act"]
    w, b, gamma, beta = p["w"], p["b"], p["gamma"], p["beta"]

    N, H, W, Cin = x_nhwc.shape
    Cout = w.shape[-1]
    pad = 1
    Ho = (H + 2 * pad - K) // stride + 1
    Wo = (W + 2 * pad - K) // stride + 1
    M = N * Ho * Wo
    Kdim = K * K * Cin
    Kpad = _round_up(Kdim, 128)
    Cpad = _round_up(Cout, 128)
    TM = _tile_m(M)
    Mpad = _round_up(M, TM)
    nt = Mpad // TM

    # Lane-dense im2col: feature layout (kh, kw, cin) -> matches HWIO reshape.
    xp = jnp.pad(x_nhwc, ((0, 0), (pad, pad), (pad, pad), (0, 0)))
    taps = [_strided_window(xp, kh, kw, Ho, Wo, stride)
            for kh in range(K) for kw in range(K)]
    patches = jnp.concatenate(taps, axis=-1).reshape(M, Kdim)
    patches = jnp.pad(patches, ((0, Mpad - M), (0, Kpad - Kdim))).astype(jnp.bfloat16)

    w2 = jnp.pad(w.reshape(Kdim, Cout),
                 ((0, Kpad - Kdim), (0, Cpad - Cout))).astype(jnp.bfloat16)
    b2 = jnp.pad(b, (0, Cpad - Cout)).reshape(1, Cpad).astype(jnp.float32)

    cparams = pltpu.CompilerParams(dimension_semantics=("parallel",),
                                   vmem_limit_bytes=_VMEM_LIMIT)

    if not use_bn:
        out = pl.pallas_call(
            functools.partial(_conv_bias_act_kernel, use_act=use_act),
            grid=(nt,),
            out_shape=jax.ShapeDtypeStruct((Mpad, Cpad), jnp.float32),
            in_specs=_matmul_specs(TM, Kpad, Cpad),
            out_specs=pl.BlockSpec((TM, Cpad), lambda i: (i, 0)),
            compiler_params=cparams,
        )(patches, w2, b2)
    else:
        y, stats = pl.pallas_call(
            functools.partial(_conv_bias_stats_kernel, m_valid=M, tm=TM),
            grid=(nt,),
            out_shape=(jax.ShapeDtypeStruct((Mpad, Cpad), jnp.float32),
                       jax.ShapeDtypeStruct((nt, 2, Cpad), jnp.float32)),
            in_specs=_matmul_specs(TM, Kpad, Cpad),
            out_specs=(pl.BlockSpec((TM, Cpad), lambda i: (i, 0)),
                       pl.BlockSpec((1, 2, Cpad), lambda i: (i, 0, 0))),
            compiler_params=cparams,
        )(patches, w2, b2)

        # Global batch stats over all N*Ho*Wo rows (PyTorch training-mode BN:
        # biased variance), reduced from per-tile partials; all in f32.
        ssum = jnp.sum(stats[:, 0, :], axis=0)
        ssq = jnp.sum(stats[:, 1, :], axis=0)
        mean = ssum / M
        var = jnp.maximum(ssq / M - mean * mean, 0.0)
        gamma_p = jnp.pad(gamma, (0, Cpad - Cout), constant_values=1.0)
        beta_p = jnp.pad(beta, (0, Cpad - Cout))
        rs = jax.lax.rsqrt(var + BN_EPS)
        scale = (gamma_p * rs).reshape(1, Cpad)
        shift = (beta_p - mean * gamma_p * rs).reshape(1, Cpad)

        out = pl.pallas_call(
            _bn_act_kernel,
            grid=(nt,),
            out_shape=jax.ShapeDtypeStruct((Mpad, Cpad), jnp.float32),
            in_specs=[pl.BlockSpec((TM, Cpad), lambda i: (i, 0)),
                      pl.BlockSpec((1, Cpad), lambda i: (0, 0)),
                      pl.BlockSpec((1, Cpad), lambda i: (0, 0))],
            out_specs=pl.BlockSpec((TM, Cpad), lambda i: (i, 0)),
            compiler_params=cparams,
        )(y, scale, shift)

    return out[:M, :Cout].reshape(N, Ho, Wo, Cout)


def avg_pool_3x3_s2(x_nhwc):
    """AvgPool2d(kernel_size=3, stride=2, padding=1, count_include_pad=False)."""
    N, H, W, C = x_nhwc.shape
    pad, k, stride = 1, 3, 2
    Ho = (H + 2 * pad - k) // stride + 1
    Wo = (W + 2 * pad - k) // stride + 1
    M = N * Ho * Wo
    Kdim = k * k * C
    Kpad = _round_up(Kdim, 128)
    Cpad = _round_up(C, 128)
    TM = _tile_m(M)
    Mpad = _round_up(M, TM)
    nt = Mpad // TM

    xp = jnp.pad(x_nhwc, ((0, 0), (pad, pad), (pad, pad), (0, 0)))
    # Valid-count per output position (spatial only) -> reciprocal folded into
    # the window values so the kernel is a pure weighted sum (no divide/mask).
    ones = jnp.pad(jnp.ones((1, H, W, 1), jnp.float32),
                   ((0, 0), (pad, pad), (pad, pad), (0, 0)))
    count = sum(_strided_window(ones, kh, kw, Ho, Wo, stride)
                for kh in range(k) for kw in range(k))      # (1, Ho, Wo, 1)
    recip = 1.0 / count

    taps = [_strided_window(xp, kh, kw, Ho, Wo, stride) * recip
            for kh in range(k) for kw in range(k)]
    wins = jnp.concatenate(taps, axis=-1).reshape(M, Kdim)
    wins = jnp.pad(wins, ((0, Mpad - M), (0, Kpad - Kdim)))

    # 0/1 selection matrix: out[:, c] = sum over the 9 taps of wins[:, t*C + c]
    sel = jnp.tile(jnp.eye(C, dtype=jnp.float32), (k * k, 1))      # (9*C, C)
    sel = jnp.pad(sel, ((0, Kpad - Kdim), (0, Cpad - C)))
    zero_bias = jnp.zeros((1, Cpad), jnp.float32)

    out = pl.pallas_call(
        functools.partial(_conv_bias_act_kernel, use_act=False),
        grid=(nt,),
        out_shape=jax.ShapeDtypeStruct((Mpad, Cpad), jnp.float32),
        in_specs=_matmul_specs(TM, Kpad, Cpad),
        out_specs=pl.BlockSpec((TM, Cpad), lambda i: (i, 0)),
        compiler_params=pltpu.CompilerParams(dimension_semantics=("parallel",),
                                             vmem_limit_bytes=_VMEM_LIMIT),
    )(wins, sel, zero_bias)
    return out[:M, :C].reshape(N, Ho, Wo, C)


# --------------------------- module construction ----------------------------

def get_layer_cfgs(in_channel, ndf, n_layers):
    """Mirrors D_NLayersMulti.get_layers (Conv/BN/LeakyReLU structure)."""
    cfgs = [dict(cin=in_channel, cout=ndf, stride=2, use_bn=False, use_act=True)]
    nf = 1
    for n in range(1, n_layers):
        nf_prev, nf = nf, min(2 ** n, 8)
        cfgs.append(dict(cin=ndf * nf_prev, cout=ndf * nf, stride=2,
                         use_bn=True, use_act=True))
    nf_prev, nf = nf, min(2 ** n_layers, 8)
    cfgs.append(dict(cin=ndf * nf_prev, cout=ndf * nf, stride=1,
                     use_bn=True, use_act=True))
    cfgs.append(dict(cin=ndf * nf, cout=1, stride=1, use_bn=False, use_act=False))
    return cfgs


def init_params(key, cfgs_per_branch):
    """Deterministic synthetic parameters (no checkpoint loading).
    Conv weights ~ N(0, 0.02), small biases; BN gamma=1, beta=0."""
    params = []
    for branch_cfgs in cfgs_per_branch:
        branch = []
        for cfg in branch_cfgs:
            key, k_w, k_b = jax.random.split(key, 3)
            w = 0.02 * jax.random.normal(
                k_w, (K, K, cfg["cin"], cfg["cout"]), jnp.float32)  # HWIO
            b = 0.01 * jax.random.normal(k_b, (cfg["cout"],), jnp.float32)
            gamma = jnp.ones((cfg["cout"],), jnp.float32)
            beta = jnp.zeros((cfg["cout"],), jnp.float32)
            branch.append(dict(w=w, b=b, gamma=gamma, beta=beta))
        params.append(branch)
    return params


def d_nlayers_multi_forward(params, x_nchw, cfgs_per_branch, num_D):
    """Forward pass of D_NLayersMulti.  x is NCHW (PyTorch convention).
    Returns a single NCHW tensor when num_D == 1, else a list of tensors."""
    results = []
    down = jnp.transpose(x_nchw, (0, 2, 3, 1))  # NCHW -> NHWC
    for i in range(num_D):
        h = down
        for cfg, p in zip(cfgs_per_branch[i], params[i]):
            h = conv_layer(h, cfg, p)
        results.append(jnp.transpose(h, (0, 3, 1, 2)))  # back to NCHW
        if i != num_D - 1:
            down = avg_pool_3x3_s2(down)
    if num_D == 1:
        return results[0]
    return results


if __name__ == "__main__":
    in_channel, ndf, n_layers, num_D = 4, 8, 3, 2
    key = jax.random.PRNGKey(0)
    k_x, k_p = jax.random.split(key)

    # Spatial 64 so every branch keeps a valid spatial extent through the
    # stride-1 tail convs (64 -> ... -> 6x6; downsampled branch -> 2x2).
    x = jax.random.normal(k_x, (2, in_channel, 64, 64), jnp.float32)
    cfgs_per_branch = [get_layer_cfgs(in_channel, int(round(ndf / 2 ** i)), n_layers)
                       for i in range(num_D)]
    params = init_params(k_p, cfgs_per_branch)

    fwd = jax.jit(lambda p, xx: d_nlayers_multi_forward(p, xx, cfgs_per_branch, num_D))
    outs = fwd(params, x)
    outs = jax.block_until_ready(outs)

    assert outs[0].shape == (2, 1, 6, 6), outs[0].shape
    assert outs[1].shape == (2, 1, 2, 2), outs[1].shape
    print("KERNEL_OK")
</pallas_src>

<mosaic_0001>
module attributes {stable_mosaic.version = 11 : i64} {
  func.func @_conv_bias_act_kernel(%arg0: i32, %arg1: memref<512x128xf32, #tpu.memory_space<vmem>>, %arg2: memref<128x128xf32, #tpu.memory_space<vmem>>, %arg3: memref<1x128xf32, #tpu.memory_space<vmem>>, %arg4: memref<512x128xf32, #tpu.memory_space<vmem>>) attributes {dimension_semantics = [#tpu.dimension_semantics<parallel>], iteration_bounds = array<i64: 4>, scalar_prefetch = 0 : i64, scratch_operands = 0 : i64, tpu.core_type = #tpu.core_type<tc>, window_params = [{transform_indices = @transform_0, window_bounds = array<i64: 512, 128>}, {pipeline_mode = #tpu.pipeline_mode<synchronous>, transform_indices = @transform_1, window_bounds = array<i64: 128, 128>}, {pipeline_mode = #tpu.pipeline_mode<synchronous>, transform_indices = @transform_2, window_bounds = array<i64: 1, 128>}, {transform_indices = @transform_3, window_bounds = array<i64: 512, 128>}]} {
    %c0 = arith.constant 0 : index
    %c0_0 = arith.constant 0 : index
    %0 = vector.load %arg1[%c0, %c0_0] : memref<512x128xf32, #tpu.memory_space<vmem>>, vector<512x128xf32>
    %c0_1 = arith.constant 0 : index
    %c0_2 = arith.constant 0 : index
    %1 = vector.load %arg2[%c0_1, %c0_2] : memref<128x128xf32, #tpu.memory_space<vmem>>, vector<128x128xf32>
    %cst = arith.constant dense<0.000000e+00> : vector<512x128xf32>
    %2 = tpu.matmul %0, %1, %cst {dimension_numbers = #tpu.dot_dimension_numbers<[1], [0], [0], [1], [0, 0, 1, 1], [], []>} : vector<512x128xf32>, vector<128x128xf32>, vector<512x128xf32> -> vector<512x128xf32>
    %c0_3 = arith.constant 0 : index
    %c0_4 = arith.constant 0 : index
    %3 = vector.load %arg3[%c0_3, %c0_4] : memref<1x128xf32, #tpu.memory_space<vmem>>, vector<1x128xf32>
    %4 = vector.broadcast %3 : vector<1x128xf32> to vector<512x128xf32>
    %5 = arith.addf %2, %4 : vector<512x128xf32>
    %c0_5 = arith.constant 0 : index
    %c0_6 = arith.constant 0 : index
    %6 = vector.load %arg4[%c0_5, %c0_6] : memref<512x128xf32, #tpu.memory_space<vmem>>, vector<512x128xf32>
    tpu.vector_store %arg4[%c0_5, %c0_6], %5 {strides = array<i32>} : memref<512x128xf32, #tpu.memory_space<vmem>>, vector<512x128xf32>,
    return
  }
  func.func @transform_0(%arg0: i32) -> (i32, i32) {
    %c0_i32 = arith.constant 0 : i32
    %c0_i32_0 = arith.constant 0 : i32
    return %arg0, %c0_i32 : i32, i32
  }
  func.func @transform_1(%arg0: i32) -> (i32, i32) {
    %c0_i32 = arith.constant 0 : i32
    %c0_i32_0 = arith.constant 0 : i32
    %c0_i32_1 = arith.constant 0 : i32
    return %c0_i32, %c0_i32_0 : i32, i32
  }
  func.func @transform_2(%arg0: i32) -> (i32, i32) {
    %c0_i32 = arith.constant 0 : i32
    %c0_i32_0 = arith.constant 0 : i32
    %c0_i32_1 = arith.constant 0 : i32
    return %c0_i32, %c0_i32_0 : i32, i32
  }
  func.func @transform_3(%arg0: i32) -> (i32, i32) {
    %c0_i32 = arith.constant 0 : i32
    %c0_i32_0 = arith.constant 0 : i32
    return %arg0, %c0_i32 : i32, i32
  }
}

module attributes {stable_mosaic.version = 11 : i64} {
  func.func @_conv_bias_act_kernel(%arg0: i32, %arg1: memref<512x128xbf16, #tpu.memory_space<vmem>>, %arg2: memref<128x128xbf16, #tpu.memory_space<vmem>>, %arg3: memref<1x128xf32, #tpu.memory_space<vmem>>, %arg4: memref<512x128xf32, #tpu.memory_space<vmem>>) attributes {dimension_semantics = [#tpu.dimension_semantics<parallel>], iteration_bounds = array<i64: 1>, scalar_prefetch = 0 : i64, scratch_operands = 0 : i64, tpu.core_type = #tpu.core_type<tc>, window_params = [{transform_indices = @transform_0, window_bounds = array<i64: 512, 128>}, {pipeline_mode = #tpu.pipeline_mode<synchronous>, transform_indices = @transform_1, window_bounds = array<i64: 128, 128>}, {pipeline_mode = #tpu.pipeline_mode<synchronous>, transform_indices = @transform_2, window_bounds = array<i64: 1, 128>}, {transform_indices = @transform_3, window_bounds = array<i64: 512, 128>}]} {
    %c0 = arith.constant 0 : index
    %c0_0 = arith.constant 0 : index
    %0 = vector.load %arg1[%c0, %c0_0] : memref<512x128xbf16, #tpu.memory_space<vmem>>, vector<512x128xbf16>
    %c0_1 = arith.constant 0 : index
    %c0_2 = arith.constant 0 : index
    %1 = vector.load %arg2[%c0_1, %c0_2] : memref<128x128xbf16, #tpu.memory_space<vmem>>, vector<128x128xbf16>
    %cst = arith.constant dense<0.000000e+00> : vector<512x128xf32>
    %2 = tpu.matmul %0, %1, %cst {dimension_numbers = #tpu.dot_dimension_numbers<[1], [0], [0], [1], [0, 0, 1, 1], [], []>} : vector<512x128xbf16>, vector<128x128xbf16>, vector<512x128xf32> -> vector<512x128xf32>
    %c0_3 = arith.constant 0 : index
    %c0_4 = arith.constant 0 : index
    %3 = vector.load %arg3[%c0_3, %c0_4] : memref<1x128xf32, #tpu.memory_space<vmem>>, vector<1x128xf32>
    %4 = vector.broadcast %3 : vector<1x128xf32> to vector<512x128xf32>
    %5 = arith.addf %2, %4 : vector<512x128xf32>
    %cst_5 = arith.constant 2.000000e-01 : f32
    %6 = vector.broadcast %cst_5 : f32 to vector<512x128xf32>
    %7 = arith.mulf %6, %5 : vector<512x128xf32>
    %8 = arith.maximumf %5, %7 : vector<512x128xf32>
    %c0_6 = arith.constant 0 : index
    %c0_7 = arith.constant 0 : index
    %9 = vector.load %arg4[%c0_6, %c0_7] : memref<512x128xf32, #tpu.memory_space<vmem>>, vector<512x128xf32>
    tpu.vector_store %arg4[%c0_6, %c0_7], %8 {strides = array<i32>} : memref<512x128xf32, #tpu.memory_space<vmem>>, vector<512x128xf32>,
    return
  }
  func.func @transform_0(%arg0: i32) -> (i32, i32) {
    %c0_i32 = arith.constant 0 : i32
    %c0_i32_0 = arith.constant 0 : i32
    return %arg0, %c0_i32 : i32, i32
  }
  func.func @transform_1(%arg0: i32) -> (i32, i32) {
    %c0_i32 = arith.constant 0 : i32
    %c0_i32_0 = arith.constant 0 : i32
    %c0_i32_1 = arith.constant 0 : i32
    return %c0_i32, %c0_i32_0 : i32, i32
  }
  func.func @transform_2(%arg0: i32) -> (i32, i32) {
    %c0_i32 = arith.constant 0 : i32
    %c0_i32_0 = arith.constant 0 : i32
    %c0_i32_1 = arith.constant 0 : i32
    return %c0_i32, %c0_i32_0 : i32, i32
  }
  func.func @transform_3(%arg0: i32) -> (i32, i32) {
    %c0_i32 = arith.constant 0 : i32
    %c0_i32_0 = arith.constant 0 : i32
    return %arg0, %c0_i32 : i32, i32
  }
}

module attributes {stable_mosaic.version = 11 : i64} {
  func.func @_conv_bias_stats_kernel(%arg0: i32, %arg1: memref<128x128xbf16, #tpu.memory_space<vmem>>, %arg2: memref<128x128xbf16, #tpu.memory_space<vmem>>, %arg3: memref<1x128xf32, #tpu.memory_space<vmem>>, %arg4: memref<128x128xf32, #tpu.memory_space<vmem>>, %arg5: memref<1x2x128xf32, #tpu.memory_space<vmem>>) attributes {dimension_semantics = [#tpu.dimension_semantics<parallel>], iteration_bounds = array<i64: 1>, scalar_prefetch = 0 : i64, scratch_operands = 0 : i64, tpu.core_type = #tpu.core_type<tc>, window_params = [{transform_indices = @transform_0, window_bounds = array<i64: 128, 128>}, {pipeline_mode = #tpu.pipeline_mode<synchronous>, transform_indices = @transform_1, window_bounds = array<i64: 128, 128>}, {pipeline_mode = #tpu.pipeline_mode<synchronous>, transform_indices = @transform_2, window_bounds = array<i64: 1, 128>}, {transform_indices = @transform_3, window_bounds = array<i64: 128, 128>}, {transform_indices = @transform_4, window_bounds = array<i64: 1, 2, 128>}]} {
    %c0 = arith.constant 0 : index
    %c0_0 = arith.constant 0 : index
    %0 = vector.load %arg1[%c0, %c0_0] : memref<128x128xbf16, #tpu.memory_space<vmem>>, vector<128x128xbf16>
    %c0_1 = arith.constant 0 : index
    %c0_2 = arith.constant 0 : index
    %1 = vector.load %arg2[%c0_1, %c0_2] : memref<128x128xbf16, #tpu.memory_space<vmem>>, vector<128x128xbf16>
    %cst = arith.constant dense<0.000000e+00> : vector<128x128xf32>
    %2 = tpu.matmul %0, %1, %cst {dimension_numbers = #tpu.dot_dimension_numbers<[1], [0], [0], [1], [0, 0, 1, 1], [], []>} : vector<128x128xbf16>, vector<128x128xbf16>, vector<128x128xf32> -> vector<128x128xf32>
    %c0_3 = arith.constant 0 : index
    %c0_4 = arith.constant 0 : index
    %3 = vector.load %arg3[%c0_3, %c0_4] : memref<1x128xf32, #tpu.memory_space<vmem>>, vector<1x128xf32>
    %4 = vector.broadcast %3 : vector<1x128xf32> to vector<128x128xf32>
    %5 = arith.addf %2, %4 : vector<128x128xf32>
    %c0_5 = arith.constant 0 : index
    %c0_6 = arith.constant 0 : index
    %6 = vector.load %arg4[%c0_5, %c0_6] : memref<128x128xf32, #tpu.memory_space<vmem>>, vector<128x128xf32>
    tpu.vector_store %arg4[%c0_5, %c0_6], %5 {strides = array<i32>} : memref<128x128xf32, #tpu.memory_space<vmem>>, vector<128x128xf32>,
    %7 = tpu.iota {dimensions = array<i32: 0>} : vector<128x1xi32>
    %c128_i32 = arith.constant 128 : i32
    %8 = arith.muli %arg0, %c128_i32 : i32
    %9 = vector.broadcast %8 : i32 to vector<128x1xi32>
    %10 = arith.addi %7, %9 : vector<128x1xi32>
    %c128_i32_7 = arith.constant 128 : i32
    %11 = vector.broadcast %c128_i32_7 : i32 to vector<128x1xi32>
    %12 = arith.cmpi slt, %10, %11 : vector<128x1xi32>
    %cst_8 = arith.constant 0.000000e+00 : f32
    %13 = vector.shape_cast %12 : vector<128x1xi1> to vector<128x1xi1>
    %14 = vector.broadcast %13 : vector<128x1xi1> to vector<128x128xi1>
    %15 = vector.broadcast %cst_8 : f32 to vector<128x128xf32>
    %16 = arith.select %14, %5, %15 : vector<128x128xi1>, vector<128x128xf32>
    %cst_9 = arith.constant dense<0.000000e+00> : vector<128xf32>
    %17 = vector.multi_reduction <add>, %16, %cst_9 [0] : vector<128x128xf32> to vector<128xf32>
    %18 = vector.shape_cast %17 : vector<128xf32> to vector<1x128xf32>
    %19 = arith.mulf %16, %16 : vector<128x128xf32>
    %cst_10 = arith.constant dense<0.000000e+00> : vector<128xf32>
    %20 = vector.multi_reduction <add>, %19, %cst_10 [0] : vector<128x128xf32> to vector<128xf32>
    %21 = vector.shape_cast %20 : vector<128xf32> to vector<1x128xf32>
    %22 = tpu.concatenate %18, %21 in 0 : vector<1x128xf32>, vector<1x128xf32> -> vector<2x128xf32>
    %23 = vector.shape_cast %22 : vector<2x128xf32> to vector<1x2x128xf32>
    %c0_11 = arith.constant 0 : index
    %c0_12 = arith.constant 0 : index
    %c0_13 = arith.constant 0 : index
    %24 = vector.load %arg5[%c0_11, %c0_12, %c0_13] : memref<1x2x128xf32, #tpu.memory_space<vmem>>, vector<1x2x128xf32>
    tpu.vector_store %arg5[%c0_11, %c0_12, %c0_13], %23 {strides = array<i32>} : memref<1x2x128xf32, #tpu.memory_space<vmem>>, vector<1x2x128xf32>,
    return
  }
  func.func @transform_0(%arg0: i32) -> (i32, i32) {
    %c0_i32 = arith.constant 0 : i32
    %c0_i32_0 = arith.constant 0 : i32
    return %arg0, %c0_i32 : i32, i32
  }
  func.func @transform_1(%arg0: i32) -> (i32, i32) {
    %c0_i32 = arith.constant 0 : i32
    %c0_i32_0 = arith.constant 0 : i32
    %c0_i32_1 = arith.constant 0 : i32
    return %c0_i32, %c0_i32_0 : i32, i32
  }
  func.func @transform_2(%arg0: i32) -> (i32, i32) {
    %c0_i32 = arith.constant 0 : i32
    %c0_i32_0 = arith.constant 0 : i32
    %c0_i32_1 = arith.constant 0 : i32
    return %c0_i32, %c0_i32_0 : i32, i32
  }
  func.func @transform_3(%arg0: i32) -> (i32, i32) {
    %c0_i32 = arith.constant 0 : i32
    %c0_i32_0 = arith.constant 0 : i32
    return %arg0, %c0_i32 : i32, i32
  }
  func.func @transform_4(%arg0: i32) -> (i32, i32, i32) {
    %c0_i32 = arith.constant 0 : i32
    %c0_i32_0 = arith.constant 0 : i32
    %c0_i32_1 = arith.constant 0 : i32
    return %arg0, %c0_i32, %c0_i32_0 : i32, i32, i32
  }
}

module attributes {stable_mosaic.version = 11 : i64} {
  func.func @_bn_act_kernel(%arg0: i32, %arg1: memref<128x128xf32, #tpu.memory_space<vmem>>, %arg2: memref<1x128xf32, #tpu.memory_space<vmem>>, %arg3: memref<1x128xf32, #tpu.memory_space<vmem>>, %arg4: memref<128x128xf32, #tpu.memory_space<vmem>>) attributes {dimension_semantics = [#tpu.dimension_semantics<parallel>], iteration_bounds = array<i64: 1>, scalar_prefetch = 0 : i64, scratch_operands = 0 : i64, tpu.core_type = #tpu.core_type<tc>, window_params = [{transform_indices = @transform_0, window_bounds = array<i64: 128, 128>}, {pipeline_mode = #tpu.pipeline_mode<synchronous>, transform_indices = @transform_1, window_bounds = array<i64: 1, 128>}, {pipeline_mode = #tpu.pipeline_mode<synchronous>, transform_indices = @transform_2, window_bounds = array<i64: 1, 128>}, {transform_indices = @transform_3, window_bounds = array<i64: 128, 128>}]} {
    %c0 = arith.constant 0 : index
    %c0_0 = arith.constant 0 : index
    %0 = vector.load %arg1[%c0, %c0_0] : memref<128x128xf32, #tpu.memory_space<vmem>>, vector<128x128xf32>
    %c0_1 = arith.constant 0 : index
    %c0_2 = arith.constant 0 : index
    %1 = vector.load %arg2[%c0_1, %c0_2] : memref<1x128xf32, #tpu.memory_space<vmem>>, vector<1x128xf32>
    %2 = vector.broadcast %1 : vector<1x128xf32> to vector<128x128xf32>
    %3 = arith.mulf %0, %2 : vector<128x128xf32>
    %c0_3 = arith.constant 0 : index
    %c0_4 = arith.constant 0 : index
    %4 = vector.load %arg3[%c0_3, %c0_4] : memref<1x128xf32, #tpu.memory_space<vmem>>, vector<1x128xf32>
    %5 = vector.broadcast %4 : vector<1x128xf32> to vector<128x128xf32>
    %6 = arith.addf %3, %5 : vector<128x128xf32>
    %cst = arith.constant 2.000000e-01 : f32
    %7 = vector.broadcast %cst : f32 to vector<128x128xf32>
    %8 = arith.mulf %7, %6 : vector<128x128xf32>
    %9 = arith.maximumf %6, %8 : vector<128x128xf32>
    %c0_5 = arith.constant 0 : index
    %c0_6 = arith.constant 0 : index
    %10 = vector.load %arg4[%c0_5, %c0_6] : memref<128x128xf32, #tpu.memory_space<vmem>>, vector<128x128xf32>
    tpu.vector_store %arg4[%c0_5, %c0_6], %9 {strides = array<i32>} : memref<128x128xf32, #tpu.memory_space<vmem>>, vector<128x128xf32>,
    return
  }
  func.func @transform_0(%arg0: i32) -> (i32, i32) {
    %c0_i32 = arith.constant 0 : i32
    %c0_i32_0 = arith.constant 0 : i32
    return %arg0, %c0_i32 : i32, i32
  }
  func.func @transform_1(%arg0: i32) -> (i32, i32) {
    %c0_i32 = arith.constant 0 : i32
    %c0_i32_0 = arith.constant 0 : i32
    %c0_i32_1 = arith.constant 0 : i32
    return %c0_i32, %c0_i32_0 : i32, i32
  }
  func.func @transform_2(%arg0: i32) -> (i32, i32) {
    %c0_i32 = arith.constant 0 : i32
    %c0_i32_0 = arith.constant 0 : i32
    %c0_i32_1 = arith.constant 0 : i32
    return %c0_i32, %c0_i32_0 : i32, i32
  }
  func.func @transform_3(%arg0: i32) -> (i32, i32) {
    %c0_i32 = arith.constant 0 : i32
    %c0_i32_0 = arith.constant 0 : i32
    return %arg0, %c0_i32 : i32, i32
  }
}

module attributes {stable_mosaic.version = 11 : i64} {
  func.func @_conv_bias_stats_kernel(%arg0: i32, %arg1: memref<32x128xbf16, #tpu.memory_space<vmem>>, %arg2: memref<128x128xbf16, #tpu.memory_space<vmem>>, %arg3: memref<1x128xf32, #tpu.memory_space<vmem>>, %arg4: memref<32x128xf32, #tpu.memory_space<vmem>>, %arg5: memref<1x2x128xf32, #tpu.memory_space<vmem>>) attributes {dimension_semantics = [#tpu.dimension_semantics<parallel>], iteration_bounds = array<i64: 1>, scalar_prefetch = 0 : i64, scratch_operands = 0 : i64, tpu.core_type = #tpu.core_type<tc>, window_params = [{transform_indices = @transform_0, window_bounds = array<i64: 32, 128>}, {pipeline_mode = #tpu.pipeline_mode<synchronous>, transform_indices = @transform_1, window_bounds = array<i64: 128, 128>}, {pipeline_mode = #tpu.pipeline_mode<synchronous>, transform_indices = @transform_2, window_bounds = array<i64: 1, 128>}, {transform_indices = @transform_3, window_bounds = array<i64: 32, 128>}, {transform_indices = @transform_4, window_bounds = array<i64: 1, 2, 128>}]} {
    %c0 = arith.constant 0 : index
    %c0_0 = arith.constant 0 : index
    %0 = vector.load %arg1[%c0, %c0_0] : memref<32x128xbf16, #tpu.memory_space<vmem>>, vector<32x128xbf16>
    %c0_1 = arith.constant 0 : index
    %c0_2 = arith.constant 0 : index
    %1 = vector.load %arg2[%c0_1, %c0_2] : memref<128x128xbf16, #tpu.memory_space<vmem>>, vector<128x128xbf16>
    %cst = arith.constant dense<0.000000e+00> : vector<32x128xf32>
    %2 = tpu.matmul %0, %1, %cst {dimension_numbers = #tpu.dot_dimension_numbers<[1], [0], [0], [1], [0, 0, 1, 1], [], []>} : vector<32x128xbf16>, vector<128x128xbf16>, vector<32x128xf32> -> vector<32x128xf32>
    %c0_3 = arith.constant 0 : index
    %c0_4 = arith.constant 0 : index
    %3 = vector.load %arg3[%c0_3, %c0_4] : memref<1x128xf32, #tpu.memory_space<vmem>>, vector<1x128xf32>
    %4 = vector.broadcast %3 : vector<1x128xf32> to vector<32x128xf32>
    %5 = arith.addf %2, %4 : vector<32x128xf32>
    %c0_5 = arith.constant 0 : index
    %c0_6 = arith.constant 0 : index
    %6 = vector.load %arg4[%c0_5, %c0_6] : memref<32x128xf32, #tpu.memory_space<vmem>>, vector<32x128xf32>
    tpu.vector_store %arg4[%c0_5, %c0_6], %5 {strides = array<i32>} : memref<32x128xf32, #tpu.memory_space<vmem>>, vector<32x128xf32>,
    %7 = tpu.iota {dimensions = array<i32: 0>} : vector<32x1xi32>
    %c32_i32 = arith.constant 32 : i32
    %8 = arith.muli %arg0, %c32_i32 : i32
    %9 = vector.broadcast %8 : i32 to vector<32x1xi32>
    %10 = arith.addi %7, %9 : vector<32x1xi32>
    %c32_i32_7 = arith.constant 32 : i32
    %11 = vector.broadcast %c32_i32_7 : i32 to vector<32x1xi32>
    %12 = arith.cmpi slt, %10, %11 : vector<32x1xi32>
    %cst_8 = arith.constant 0.000000e+00 : f32
    %13 = vector.shape_cast %12 : vector<32x1xi1> to vector<32x1xi1>
    %14 = vector.broadcast %13 : vector<32x1xi1> to vector<32x128xi1>
    %15 = vector.broadcast %cst_8 : f32 to vector<32x128xf32>
    %16 = arith.select %14, %5, %15 : vector<32x128xi1>, vector<32x128xf32>
    %cst_9 = arith.constant dense<0.000000e+00> : vector<128xf32>
    %17 = vector.multi_reduction <add>, %16, %cst_9 [0] : vector<32x128xf32> to vector<128xf32>
    %18 = vector.shape_cast %17 : vector<128xf32> to vector<1x128xf32>
    %19 = arith.mulf %16, %16 : vector<32x128xf32>
    %cst_10 = arith.constant dense<0.000000e+00> : vector<128xf32>
    %20 = vector.multi_reduction <add>, %19, %cst_10 [0] : vector<32x128xf32> to vector<128xf32>
    %21 = vector.shape_cast %20 : vector<128xf32> to vector<1x128xf32>
    %22 = tpu.concatenate %18, %21 in 0 : vector<1x128xf32>, vector<1x128xf32> -> vector<2x128xf32>
    %23 = vector.shape_cast %22 : vector<2x128xf32> to vector<1x2x128xf32>
    %c0_11 = arith.constant 0 : index
    %c0_12 = arith.constant 0 : index
    %c0_13 = arith.constant 0 : index
    %24 = vector.load %arg5[%c0_11, %c0_12, %c0_13] : memref<1x2x128xf32, #tpu.memory_space<vmem>>, vector<1x2x128xf32>
    tpu.vector_store %arg5[%c0_11, %c0_12, %c0_13], %23 {strides = array<i32>} : memref<1x2x128xf32, #tpu.memory_space<vmem>>, vector<1x2x128xf32>,
    return
  }
  func.func @transform_0(%arg0: i32) -> (i32, i32) {
    %c0_i32 = arith.constant 0 : i32
    %c0_i32_0 = arith.constant 0 : i32
    return %arg0, %c0_i32 : i32, i32
  }
  func.func @transform_1(%arg0: i32) -> (i32, i32) {
    %c0_i32 = arith.constant 0 : i32
    %c0_i32_0 = arith.constant 0 : i32
    %c0_i32_1 = arith.constant 0 : i32
    return %c0_i32, %c0_i32_0 : i32, i32
  }
  func.func @transform_2(%arg0: i32) -> (i32, i32) {
    %c0_i32 = arith.constant 0 : i32
    %c0_i32_0 = arith.constant 0 : i32
    %c0_i32_1 = arith.constant 0 : i32
    return %c0_i32, %c0_i32_0 : i32, i32
  }
  func.func @transform_3(%arg0: i32) -> (i32, i32) {
    %c0_i32 = arith.constant 0 : i32
    %c0_i32_0 = arith.constant 0 : i32
    return %arg0, %c0_i32 : i32, i32
  }
  func.func @transform_4(%arg0: i32) -> (i32, i32, i32) {
    %c0_i32 = arith.constant 0 : i32
    %c0_i32_0 = arith.constant 0 : i32
    %c0_i32_1 = arith.constant 0 : i32
    return %arg0, %c0_i32, %c0_i32_0 : i32, i32, i32
  }
}

module attributes {stable_mosaic.version = 11 : i64} {
  func.func @_bn_act_kernel(%arg0: i32, %arg1: memref<32x128xf32, #tpu.memory_space<vmem>>, %arg2: memref<1x128xf32, #tpu.memory_space<vmem>>, %arg3: memref<1x128xf32, #tpu.memory_space<vmem>>, %arg4: memref<32x128xf32, #tpu.memory_space<vmem>>) attributes {dimension_semantics = [#tpu.dimension_semantics<parallel>], iteration_bounds = array<i64: 1>, scalar_prefetch = 0 : i64, scratch_operands = 0 : i64, tpu.core_type = #tpu.core_type<tc>, window_params = [{transform_indices = @transform_0, window_bounds = array<i64: 32, 128>}, {pipeline_mode = #tpu.pipeline_mode<synchronous>, transform_indices = @transform_1, window_bounds = array<i64: 1, 128>}, {pipeline_mode = #tpu.pipeline_mode<synchronous>, transform_indices = @transform_2, window_bounds = array<i64: 1, 128>}, {transform_indices = @transform_3, window_bounds = array<i64: 32, 128>}]} {
    %c0 = arith.constant 0 : index
    %c0_0 = arith.constant 0 : index
    %0 = vector.load %arg1[%c0, %c0_0] : memref<32x128xf32, #tpu.memory_space<vmem>>, vector<32x128xf32>
    %c0_1 = arith.constant 0 : index
    %c0_2 = arith.constant 0 : index
    %1 = vector.load %arg2[%c0_1, %c0_2] : memref<1x128xf32, #tpu.memory_space<vmem>>, vector<1x128xf32>
    %2 = vector.broadcast %1 : vector<1x128xf32> to vector<32x128xf32>
    %3 = arith.mulf %0, %2 : vector<32x128xf32>
    %c0_3 = arith.constant 0 : index
    %c0_4 = arith.constant 0 : index
    %4 = vector.load %arg3[%c0_3, %c0_4] : memref<1x128xf32, #tpu.memory_space<vmem>>, vector<1x128xf32>
    %5 = vector.broadcast %4 : vector<1x128xf32> to vector<32x128xf32>
    %6 = arith.addf %3, %5 : vector<32x128xf32>
    %cst = arith.constant 2.000000e-01 : f32
    %7 = vector.broadcast %cst : f32 to vector<32x128xf32>
    %8 = arith.mulf %7, %6 : vector<32x128xf32>
    %9 = arith.maximumf %6, %8 : vector<32x128xf32>
    %c0_5 = arith.constant 0 : index
    %c0_6 = arith.constant 0 : index
    %10 = vector.load %arg4[%c0_5, %c0_6] : memref<32x128xf32, #tpu.memory_space<vmem>>, vector<32x128xf32>
    tpu.vector_store %arg4[%c0_5, %c0_6], %9 {strides = array<i32>} : memref<32x128xf32, #tpu.memory_space<vmem>>, vector<32x128xf32>,
    return
  }
  func.func @transform_0(%arg0: i32) -> (i32, i32) {
    %c0_i32 = arith.constant 0 : i32
    %c0_i32_0 = arith.constant 0 : i32
    return %arg0, %c0_i32 : i32, i32
  }
  func.func @transform_1(%arg0: i32) -> (i32, i32) {
    %c0_i32 = arith.constant 0 : i32
    %c0_i32_0 = arith.constant 0 : i32
    %c0_i32_1 = arith.constant 0 : i32
    return %c0_i32, %c0_i32_0 : i32, i32
  }
  func.func @transform_2(%arg0: i32) -> (i32, i32) {
    %c0_i32 = arith.constant 0 : i32
    %c0_i32_0 = arith.constant 0 : i32
    %c0_i32_1 = arith.constant 0 : i32
    return %c0_i32, %c0_i32_0 : i32, i32
  }
  func.func @transform_3(%arg0: i32) -> (i32, i32) {
    %c0_i32 = arith.constant 0 : i32
    %c0_i32_0 = arith.constant 0 : i32
    return %arg0, %c0_i32 : i32, i32
  }
}

module attributes {stable_mosaic.version = 11 : i64} {
  func.func @_conv_bias_stats_kernel(%arg0: i32, %arg1: memref<24x256xbf16, #tpu.memory_space<vmem>>, %arg2: memref<256x128xbf16, #tpu.memory_space<vmem>>, %arg3: memref<1x128xf32, #tpu.memory_space<vmem>>, %arg4: memref<24x128xf32, #tpu.memory_space<vmem>>, %arg5: memref<1x2x128xf32, #tpu.memory_space<vmem>>) attributes {dimension_semantics = [#tpu.dimension_semantics<parallel>], iteration_bounds = array<i64: 1>, scalar_prefetch = 0 : i64, scratch_operands = 0 : i64, tpu.core_type = #tpu.core_type<tc>, window_params = [{transform_indices = @transform_0, window_bounds = array<i64: 24, 256>}, {pipeline_mode = #tpu.pipeline_mode<synchronous>, transform_indices = @transform_1, window_bounds = array<i64: 256, 128>}, {pipeline_mode = #tpu.pipeline_mode<synchronous>, transform_indices = @transform_2, window_bounds = array<i64: 1, 128>}, {transform_indices = @transform_3, window_bounds = array<i64: 24, 128>}, {transform_indices = @transform_4, window_bounds = array<i64: 1, 2, 128>}]} {
    %c0 = arith.constant 0 : index
    %c0_0 = arith.constant 0 : index
    %0 = vector.load %arg1[%c0, %c0_0] : memref<24x256xbf16, #tpu.memory_space<vmem>>, vector<24x256xbf16>
    %c0_1 = arith.constant 0 : index
    %c0_2 = arith.constant 0 : index
    %1 = vector.load %arg2[%c0_1, %c0_2] : memref<256x128xbf16, #tpu.memory_space<vmem>>, vector<256x128xbf16>
    %cst = arith.constant dense<0.000000e+00> : vector<24x128xf32>
    %2 = tpu.matmul %0, %1, %cst {dimension_numbers = #tpu.dot_dimension_numbers<[1], [0], [0], [1], [0, 0, 1, 1], [], []>} : vector<24x256xbf16>, vector<256x128xbf16>, vector<24x128xf32> -> vector<24x128xf32>
    %c0_3 = arith.constant 0 : index
    %c0_4 = arith.constant 0 : index
    %3 = vector.load %arg3[%c0_3, %c0_4] : memref<1x128xf32, #tpu.memory_space<vmem>>, vector<1x128xf32>
    %4 = vector.broadcast %3 : vector<1x128xf32> to vector<24x128xf32>
    %5 = arith.addf %2, %4 : vector<24x128xf32>
    %c0_5 = arith.constant 0 : index
    %c0_6 = arith.constant 0 : index
    %6 = vector.load %arg4[%c0_5, %c0_6] : memref<24x128xf32, #tpu.memory_space<vmem>>, vector<24x128xf32>
    tpu.vector_store %arg4[%c0_5, %c0_6], %5 {strides = array<i32>} : memref<24x128xf32, #tpu.memory_space<vmem>>, vector<24x128xf32>,
    %7 = tpu.iota {dimensions = array<i32: 0>} : vector<24x1xi32>
    %c24_i32 = arith.constant 24 : i32
    %8 = arith.muli %arg0, %c24_i32 : i32
    %9 = vector.broadcast %8 : i32 to vector<24x1xi32>
    %10 = arith.addi %7, %9 : vector<24x1xi32>
    %c18_i32 = arith.constant 18 : i32
    %11 = vector.broadcast %c18_i32 : i32 to vector<24x1xi32>
    %12 = arith.cmpi slt, %10, %11 : vector<24x1xi32>
    %cst_7 = arith.constant 0.000000e+00 : f32
    %13 = vector.shape_cast %12 : vector<24x1xi1> to vector<24x1xi1>
    %14 = vector.broadcast %13 : vector<24x1xi1> to vector<24x128xi1>
    %15 = vector.broadcast %cst_7 : f32 to vector<24x128xf32>
    %16 = arith.select %14, %5, %15 : vector<24x128xi1>, vector<24x128xf32>
    %cst_8 = arith.constant dense<0.000000e+00> : vector<128xf32>
    %17 = vector.multi_reduction <add>, %16, %cst_8 [0] : vector<24x128xf32> to vector<128xf32>
    %18 = vector.shape_cast %17 : vector<128xf32> to vector<1x128xf32>
    %19 = arith.mulf %16, %16 : vector<24x128xf32>
    %cst_9 = arith.constant dense<0.000000e+00> : vector<128xf32>
    %20 = vector.multi_reduction <add>, %19, %cst_9 [0] : vector<24x128xf32> to vector<128xf32>
    %21 = vector.shape_cast %20 : vector<128xf32> to vector<1x128xf32>
    %22 = tpu.concatenate %18, %21 in 0 : vector<1x128xf32>, vector<1x128xf32> -> vector<2x128xf32>
    %23 = vector.shape_cast %22 : vector<2x128xf32> to vector<1x2x128xf32>
    %c0_10 = arith.constant 0 : index
    %c0_11 = arith.constant 0 : index
    %c0_12 = arith.constant 0 : index
    %24 = vector.load %arg5[%c0_10, %c0_11, %c0_12] : memref<1x2x128xf32, #tpu.memory_space<vmem>>, vector<1x2x128xf32>
    tpu.vector_store %arg5[%c0_10, %c0_11, %c0_12], %23 {strides = array<i32>} : memref<1x2x128xf32, #tpu.memory_space<vmem>>, vector<1x2x128xf32>,
    return
  }
  func.func @transform_0(%arg0: i32) -> (i32, i32) {
    %c0_i32 = arith.constant 0 : i32
    %c0_i32_0 = arith.constant 0 : i32
    return %arg0, %c0_i32 : i32, i32
  }
  func.func @transform_1(%arg0: i32) -> (i32, i32) {
    %c0_i32 = arith.constant 0 : i32
    %c0_i32_0 = arith.constant 0 : i32
    %c0_i32_1 = arith.constant 0 : i32
    return %c0_i32, %c0_i32_0 : i32, i32
  }
  func.func @transform_2(%arg0: i32) -> (i32, i32) {
    %c0_i32 = arith.constant 0 : i32
    %c0_i32_0 = arith.constant 0 : i32
    %c0_i32_1 = arith.constant 0 : i32
    return %c0_i32, %c0_i32_0 : i32, i32
  }
  func.func @transform_3(%arg0: i32) -> (i32, i32) {
    %c0_i32 = arith.constant 0 : i32
    %c0_i32_0 = arith.constant 0 : i32
    return %arg0, %c0_i32 : i32, i32
  }
  func.func @transform_4(%arg0: i32) -> (i32, i32, i32) {
    %c0_i32 = arith.constant 0 : i32
    %c0_i32_0 = arith.constant 0 : i32
    %c0_i32_1 = arith.constant 0 : i32
    return %arg0, %c0_i32, %c0_i32_0 : i32, i32, i32
  }
}

module attributes {stable_mosaic.version = 11 : i64} {
  func.func @_bn_act_kernel(%arg0: i32, %arg1: memref<24x128xf32, #tpu.memory_space<vmem>>, %arg2: memref<1x128xf32, #tpu.memory_space<vmem>>, %arg3: memref<1x128xf32, #tpu.memory_space<vmem>>, %arg4: memref<24x128xf32, #tpu.memory_space<vmem>>) attributes {dimension_semantics = [#tpu.dimension_semantics<parallel>], iteration_bounds = array<i64: 1>, scalar_prefetch = 0 : i64, scratch_operands = 0 : i64, tpu.core_type = #tpu.core_type<tc>, window_params = [{transform_indices = @transform_0, window_bounds = array<i64: 24, 128>}, {pipeline_mode = #tpu.pipeline_mode<synchronous>, transform_indices = @transform_1, window_bounds = array<i64: 1, 128>}, {pipeline_mode = #tpu.pipeline_mode<synchronous>, transform_indices = @transform_2, window_bounds = array<i64: 1, 128>}, {transform_indices = @transform_3, window_bounds = array<i64: 24, 128>}]} {
    %c0 = arith.constant 0 : index
    %c0_0 = arith.constant 0 : index
    %0 = vector.load %arg1[%c0, %c0_0] : memref<24x128xf32, #tpu.memory_space<vmem>>, vector<24x128xf32>
    %c0_1 = arith.constant 0 : index
    %c0_2 = arith.constant 0 : index
    %1 = vector.load %arg2[%c0_1, %c0_2] : memref<1x128xf32, #tpu.memory_space<vmem>>, vector<1x128xf32>
    %2 = vector.broadcast %1 : vector<1x128xf32> to vector<24x128xf32>
    %3 = arith.mulf %0, %2 : vector<24x128xf32>
    %c0_3 = arith.constant 0 : index
    %c0_4 = arith.constant 0 : index
    %4 = vector.load %arg3[%c0_3, %c0_4] : memref<1x128xf32, #tpu.memory_space<vmem>>, vector<1x128xf32>
    %5 = vector.broadcast %4 : vector<1x128xf32> to vector<24x128xf32>
    %6 = arith.addf %3, %5 : vector<24x128xf32>
    %cst = arith.constant 2.000000e-01 : f32
    %7 = vector.broadcast %cst : f32 to vector<24x128xf32>
    %8 = arith.mulf %7, %6 : vector<24x128xf32>
    %9 = arith.maximumf %6, %8 : vector<24x128xf32>
    %c0_5 = arith.constant 0 : index
    %c0_6 = arith.constant 0 : index
    %10 = vector.load %arg4[%c0_5, %c0_6] : memref<24x128xf32, #tpu.memory_space<vmem>>, vector<24x128xf32>
    tpu.vector_store %arg4[%c0_5, %c0_6], %9 {strides = array<i32>} : memref<24x128xf32, #tpu.memory_space<vmem>>, vector<24x128xf32>,
    return
  }
  func.func @transform_0(%arg0: i32) -> (i32, i32) {
    %c0_i32 = arith.constant 0 : i32
    %c0_i32_0 = arith.constant 0 : i32
    return %arg0, %c0_i32 : i32, i32
  }
  func.func @transform_1(%arg0: i32) -> (i32, i32) {
    %c0_i32 = arith.constant 0 : i32
    %c0_i32_0 = arith.constant 0 : i32
    %c0_i32_1 = arith.constant 0 : i32
    return %c0_i32, %c0_i32_0 : i32, i32
  }
  func.func @transform_2(%arg0: i32) -> (i32, i32) {
    %c0_i32 = arith.constant 0 : i32
    %c0_i32_0 = arith.constant 0 : i32
    %c0_i32_1 = arith.constant 0 : i32
    return %c0_i32, %c0_i32_0 : i32, i32
  }
  func.func @transform_3(%arg0: i32) -> (i32, i32) {
    %c0_i32 = arith.constant 0 : i32
    %c0_i32_0 = arith.constant 0 : i32
    return %arg0, %c0_i32 : i32, i32
  }
}

module attributes {stable_mosaic.version = 11 : i64} {
  func.func @_conv_bias_act_kernel(%arg0: i32, %arg1: memref<8x512xbf16, #tpu.memory_space<vmem>>, %arg2: memref<512x128xbf16, #tpu.memory_space<vmem>>, %arg3: memref<1x128xf32, #tpu.memory_space<vmem>>, %arg4: memref<8x128xf32, #tpu.memory_space<vmem>>) attributes {dimension_semantics = [#tpu.dimension_semantics<parallel>], iteration_bounds = array<i64: 1>, scalar_prefetch = 0 : i64, scratch_operands = 0 : i64, tpu.core_type = #tpu.core_type<tc>, window_params = [{transform_indices = @transform_0, window_bounds = array<i64: 8, 512>}, {pipeline_mode = #tpu.pipeline_mode<synchronous>, transform_indices = @transform_1, window_bounds = array<i64: 512, 128>}, {pipeline_mode = #tpu.pipeline_mode<synchronous>, transform_indices = @transform_2, window_bounds = array<i64: 1, 128>}, {transform_indices = @transform_3, window_bounds = array<i64: 8, 128>}]} {
    %c0 = arith.constant 0 : index
    %c0_0 = arith.constant 0 : index
    %0 = vector.load %arg1[%c0, %c0_0] : memref<8x512xbf16, #tpu.memory_space<vmem>>, vector<8x512xbf16>
    %c0_1 = arith.constant 0 : index
    %c0_2 = arith.constant 0 : index
    %1 = vector.load %arg2[%c0_1, %c0_2] : memref<512x128xbf16, #tpu.memory_space<vmem>>, vector<512x128xbf16>
    %cst = arith.constant dense<0.000000e+00> : vector<8x128xf32>
    %2 = tpu.matmul %0, %1, %cst {dimension_numbers = #tpu.dot_dimension_numbers<[1], [0], [0], [1], [0, 0, 1, 1], [], []>} : vector<8x512xbf16>, vector<512x128xbf16>, vector<8x128xf32> -> vector<8x128xf32>
    %c0_3 = arith.constant 0 : index
    %c0_4 = arith.constant 0 : index
    %3 = vector.load %arg3[%c0_3, %c0_4] : memref<1x128xf32, #tpu.memory_space<vmem>>, vector<1x128xf32>
    %4 = vector.broadcast %3 : vector<1x128xf32> to vector<8x128xf32>
    %5 = arith.addf %2, %4 : vector<8x128xf32>
    %c0_5 = arith.constant 0 : index
    %c0_6 = arith.constant 0 : index
    %6 = vector.load %arg4[%c0_5, %c0_6] : memref<8x128xf32, #tpu.memory_space<vmem>>, vector<8x128xf32>
    tpu.vector_store %arg4[%c0_5, %c0_6], %5 {strides = array<i32>} : memref<8x128xf32, #tpu.memory_space<vmem>>, vector<8x128xf32>,
    return
  }
  func.func @transform_0(%arg0: i32) -> (i32, i32) {
    %c0_i32 = arith.constant 0 : i32
    %c0_i32_0 = arith.constant 0 : i32
    return %arg0, %c0_i32 : i32, i32
  }
  func.func @transform_1(%arg0: i32) -> (i32, i32) {
    %c0_i32 = arith.constant 0 : i32
    %c0_i32_0 = arith.constant 0 : i32
    %c0_i32_1 = arith.constant 0 : i32
    return %c0_i32, %c0_i32_0 : i32, i32
  }
  func.func @transform_2(%arg0: i32) -> (i32, i32) {
    %c0_i32 = arith.constant 0 : i32
    %c0_i32_0 = arith.constant 0 : i32
    %c0_i32_1 = arith.constant 0 : i32
    return %c0_i32, %c0_i32_0 : i32, i32
  }
  func.func @transform_3(%arg0: i32) -> (i32, i32) {
    %c0_i32 = arith.constant 0 : i32
    %c0_i32_0 = arith.constant 0 : i32
    return %arg0, %c0_i32 : i32, i32
  }
}

module attributes {stable_mosaic.version = 11 : i64} {
  func.func @_conv_bias_act_kernel(%arg0: i32, %arg1: memref<512x128xbf16, #tpu.memory_space<vmem>>, %arg2: memref<128x128xbf16, #tpu.memory_space<vmem>>, %arg3: memref<1x128xf32, #tpu.memory_space<vmem>>, %arg4: memref<512x128xf32, #tpu.memory_space<vmem>>) attributes {dimension_semantics = [#tpu.dimension_semantics<parallel>], iteration_bounds = array<i64: 4>, scalar_prefetch = 0 : i64, scratch_operands = 0 : i64, tpu.core_type = #tpu.core_type<tc>, window_params = [{transform_indices = @transform_0, window_bounds = array<i64: 512, 128>}, {pipeline_mode = #tpu.pipeline_mode<synchronous>, transform_indices = @transform_1, window_bounds = array<i64: 128, 128>}, {pipeline_mode = #tpu.pipeline_mode<synchronous>, transform_indices = @transform_2, window_bounds = array<i64: 1, 128>}, {transform_indices = @transform_3, window_bounds = array<i64: 512, 128>}]} {
    %c0 = arith.constant 0 : index
    %c0_0 = arith.constant 0 : index
    %0 = vector.load %arg1[%c0, %c0_0] : memref<512x128xbf16, #tpu.memory_space<vmem>>, vector<512x128xbf16>
    %c0_1 = arith.constant 0 : index
    %c0_2 = arith.constant 0 : index
    %1 = vector.load %arg2[%c0_1, %c0_2] : memref<128x128xbf16, #tpu.memory_space<vmem>>, vector<128x128xbf16>
    %cst = arith.constant dense<0.000000e+00> : vector<512x128xf32>
    %2 = tpu.matmul %0, %1, %cst {dimension_numbers = #tpu.dot_dimension_numbers<[1], [0], [0], [1], [0, 0, 1, 1], [], []>} : vector<512x128xbf16>, vector<128x128xbf16>, vector<512x128xf32> -> vector<512x128xf32>
    %c0_3 = arith.constant 0 : index
    %c0_4 = arith.constant 0 : index
    %3 = vector.load %arg3[%c0_3, %c0_4] : memref<1x128xf32, #tpu.memory_space<vmem>>, vector<1x128xf32>
    %4 = vector.broadcast %3 : vector<1x128xf32> to vector<512x128xf32>
    %5 = arith.addf %2, %4 : vector<512x128xf32>
    %cst_5 = arith.constant 2.000000e-01 : f32
    %6 = vector.broadcast %cst_5 : f32 to vector<512x128xf32>
    %7 = arith.mulf %6, %5 : vector<512x128xf32>
    %8 = arith.maximumf %5, %7 : vector<512x128xf32>
    %c0_6 = arith.constant 0 : index
    %c0_7 = arith.constant 0 : index
    %9 = vector.load %arg4[%c0_6, %c0_7] : memref<512x128xf32, #tpu.memory_space<vmem>>, vector<512x128xf32>
    tpu.vector_store %arg4[%c0_6, %c0_7], %8 {strides = array<i32>} : memref<512x128xf32, #tpu.memory_space<vmem>>, vector<512x128xf32>,
    return
  }
  func.func @transform_0(%arg0: i32) -> (i32, i32) {
    %c0_i32 = arith.constant 0 : i32
    %c0_i32_0 = arith.constant 0 : i32
    return %arg0, %c0_i32 : i32, i32
  }
  func.func @transform_1(%arg0: i32) -> (i32, i32) {
    %c0_i32 = arith.constant 0 : i32
    %c0_i32_0 = arith.constant 0 : i32
    %c0_i32_1 = arith.constant 0 : i32
    return %c0_i32, %c0_i32_0 : i32, i32
  }
  func.func @transform_2(%arg0: i32) -> (i32, i32) {
    %c0_i32 = arith.constant 0 : i32
    %c0_i32_0 = arith.constant 0 : i32
    %c0_i32_1 = arith.constant 0 : i32
    return %c0_i32, %c0_i32_0 : i32, i32
  }
  func.func @transform_3(%arg0: i32) -> (i32, i32) {
    %c0_i32 = arith.constant 0 : i32
    %c0_i32_0 = arith.constant 0 : i32
    return %arg0, %c0_i32 : i32, i32
  }
}

module attributes {stable_mosaic.version = 11 : i64} {
  func.func @_conv_bias_stats_kernel(%arg0: i32, %arg1: memref<512x128xbf16, #tpu.memory_space<vmem>>, %arg2: memref<128x128xbf16, #tpu.memory_space<vmem>>, %arg3: memref<1x128xf32, #tpu.memory_space<vmem>>, %arg4: memref<512x128xf32, #tpu.memory_space<vmem>>, %arg5: memref<1x2x128xf32, #tpu.memory_space<vmem>>) attributes {dimension_semantics = [#tpu.dimension_semantics<parallel>], iteration_bounds = array<i64: 1>, scalar_prefetch = 0 : i64, scratch_operands = 0 : i64, tpu.core_type = #tpu.core_type<tc>, window_params = [{transform_indices = @transform_0, window_bounds = array<i64: 512, 128>}, {pipeline_mode = #tpu.pipeline_mode<synchronous>, transform_indices = @transform_1, window_bounds = array<i64: 128, 128>}, {pipeline_mode = #tpu.pipeline_mode<synchronous>, transform_indices = @transform_2, window_bounds = array<i64: 1, 128>}, {transform_indices = @transform_3, window_bounds = array<i64: 512, 128>}, {transform_indices = @transform_4, window_bounds = array<i64: 1, 2, 128>}]} {
    %c0 = arith.constant 0 : index
    %c0_0 = arith.constant 0 : index
    %0 = vector.load %arg1[%c0, %c0_0] : memref<512x128xbf16, #tpu.memory_space<vmem>>, vector<512x128xbf16>
    %c0_1 = arith.constant 0 : index
    %c0_2 = arith.constant 0 : index
    %1 = vector.load %arg2[%c0_1, %c0_2] : memref<128x128xbf16, #tpu.memory_space<vmem>>, vector<128x128xbf16>
    %cst = arith.constant dense<0.000000e+00> : vector<512x128xf32>
    %2 = tpu.matmul %0, %1, %cst {dimension_numbers = #tpu.dot_dimension_numbers<[1], [0], [0], [1], [0, 0, 1, 1], [], []>} : vector<512x128xbf16>, vector<128x128xbf16>, vector<512x128xf32> -> vector<512x128xf32>
    %c0_3 = arith.constant 0 : index
    %c0_4 = arith.constant 0 : index
    %3 = vector.load %arg3[%c0_3, %c0_4] : memref<1x128xf32, #tpu.memory_space<vmem>>, vector<1x128xf32>
    %4 = vector.broadcast %3 : vector<1x128xf32> to vector<512x128xf32>
    %5 = arith.addf %2, %4 : vector<512x128xf32>
    %c0_5 = arith.constant 0 : index
    %c0_6 = arith.constant 0 : index
    %6 = vector.load %arg4[%c0_5, %c0_6] : memref<512x128xf32, #tpu.memory_space<vmem>>, vector<512x128xf32>
    tpu.vector_store %arg4[%c0_5, %c0_6], %5 {strides = array<i32>} : memref<512x128xf32, #tpu.memory_space<vmem>>, vector<512x128xf32>,
    %7 = tpu.iota {dimensions = array<i32: 0>} : vector<512x1xi32>
    %c512_i32 = arith.constant 512 : i32
    %8 = arith.muli %arg0, %c512_i32 : i32
    %9 = vector.broadcast %8 : i32 to vector<512x1xi32>
    %10 = arith.addi %7, %9 : vector<512x1xi32>
    %c512_i32_7 = arith.constant 512 : i32
    %11 = vector.broadcast %c512_i32_7 : i32 to vector<512x1xi32>
    %12 = arith.cmpi slt, %10, %11 : vector<512x1xi32>
    %cst_8 = arith.constant 0.000000e+00 : f32
    %13 = vector.shape_cast %12 : vector<512x1xi1> to vector<512x1xi1>
    %14 = vector.broadcast %13 : vector<512x1xi1> to vector<512x128xi1>
    %15 = vector.broadcast %cst_8 : f32 to vector<512x128xf32>
    %16 = arith.select %14, %5, %15 : vector<512x128xi1>, vector<512x128xf32>
    %cst_9 = arith.constant dense<0.000000e+00> : vector<128xf32>
    %17 = vector.multi_reduction <add>, %16, %cst_9 [0] : vector<512x128xf32> to vector<128xf32>
    %18 = vector.shape_cast %17 : vector<128xf32> to vector<1x128xf32>
    %19 = arith.mulf %16, %16 : vector<512x128xf32>
    %cst_10 = arith.constant dense<0.000000e+00> : vector<128xf32>
    %20 = vector.multi_reduction <add>, %19, %cst_10 [0] : vector<512x128xf32> to vector<128xf32>
    %21 = vector.shape_cast %20 : vector<128xf32> to vector<1x128xf32>
    %22 = tpu.concatenate %18, %21 in 0 : vector<1x128xf32>, vector<1x128xf32> -> vector<2x128xf32>
    %23 = vector.shape_cast %22 : vector<2x128xf32> to vector<1x2x128xf32>
    %c0_11 = arith.constant 0 : index
    %c0_12 = arith.constant 0 : index
    %c0_13 = arith.constant 0 : index
    %24 = vector.load %arg5[%c0_11, %c0_12, %c0_13] : memref<1x2x128xf32, #tpu.memory_space<vmem>>, vector<1x2x128xf32>
    tpu.vector_store %arg5[%c0_11, %c0_12, %c0_13], %23 {strides = array<i32>} : memref<1x2x128xf32, #tpu.memory_space<vmem>>, vector<1x2x128xf32>,
    return
  }
  func.func @transform_0(%arg0: i32) -> (i32, i32) {
    %c0_i32 = arith.constant 0 : i32
    %c0_i32_0 = arith.constant 0 : i32
    return %arg0, %c0_i32 : i32, i32
  }
  func.func @transform_1(%arg0: i32) -> (i32, i32) {
    %c0_i32 = arith.constant 0 : i32
    %c0_i32_0 = arith.constant 0 : i32
    %c0_i32_1 = arith.constant 0 : i32
    return %c0_i32, %c0_i32_0 : i32, i32
  }
  func.func @transform_2(%arg0: i32) -> (i32, i32) {
    %c0_i32 = arith.constant 0 : i32
    %c0_i32_0 = arith.constant 0 : i32
    %c0_i32_1 = arith.constant 0 : i32
    return %c0_i32, %c0_i32_0 : i32, i32
  }
  func.func @transform_3(%arg0: i32) -> (i32, i32) {
    %c0_i32 = arith.constant 0 : i32
    %c0_i32_0 = arith.constant 0 : i32
    return %arg0, %c0_i32 : i32, i32
  }
  func.func @transform_4(%arg0: i32) -> (i32, i32, i32) {
    %c0_i32 = arith.constant 0 : i32
    %c0_i32_0 = arith.constant 0 : i32
    %c0_i32_1 = arith.constant 0 : i32
    return %arg0, %c0_i32, %c0_i32_0 : i32, i32, i32
  }
}

module attributes {stable_mosaic.version = 11 : i64} {
  func.func @_bn_act_kernel(%arg0: i32, %arg1: memref<512x128xf32, #tpu.memory_space<vmem>>, %arg2: memref<1x128xf32, #tpu.memory_space<vmem>>, %arg3: memref<1x128xf32, #tpu.memory_space<vmem>>, %arg4: memref<512x128xf32, #tpu.memory_space<vmem>>) attributes {dimension_semantics = [#tpu.dimension_semantics<parallel>], iteration_bounds = array<i64: 1>, scalar_prefetch = 0 : i64, scratch_operands = 0 : i64, tpu.core_type = #tpu.core_type<tc>, window_params = [{transform_indices = @transform_0, window_bounds = array<i64: 512, 128>}, {pipeline_mode = #tpu.pipeline_mode<synchronous>, transform_indices = @transform_1, window_bounds = array<i64: 1, 128>}, {pipeline_mode = #tpu.pipeline_mode<synchronous>, transform_indices = @transform_2, window_bounds = array<i64: 1, 128>}, {transform_indices = @transform_3, window_bounds = array<i64: 512, 128>}]} {
    %c0 = arith.constant 0 : index
    %c0_0 = arith.constant 0 : index
    %0 = vector.load %arg1[%c0, %c0_0] : memref<512x128xf32, #tpu.memory_space<vmem>>, vector<512x128xf32>
    %c0_1 = arith.constant 0 : index
    %c0_2 = arith.constant 0 : index
    %1 = vector.load %arg2[%c0_1, %c0_2] : memref<1x128xf32, #tpu.memory_space<vmem>>, vector<1x128xf32>
    %2 = vector.broadcast %1 : vector<1x128xf32> to vector<512x128xf32>
    %3 = arith.mulf %0, %2 : vector<512x128xf32>
    %c0_3 = arith.constant 0 : index
    %c0_4 = arith.constant 0 : index
    %4 = vector.load %arg3[%c0_3, %c0_4] : memref<1x128xf32, #tpu.memory_space<vmem>>, vector<1x128xf32>
    %5 = vector.broadcast %4 : vector<1x128xf32> to vector<512x128xf32>
    %6 = arith.addf %3, %5 : vector<512x128xf32>
    %cst = arith.constant 2.000000e-01 : f32
    %7 = vector.broadcast %cst : f32 to vector<512x128xf32>
    %8 = arith.mulf %7, %6 : vector<512x128xf32>
    %9 = arith.maximumf %6, %8 : vector<512x128xf32>
    %c0_5 = arith.constant 0 : index
    %c0_6 = arith.constant 0 : index
    %10 = vector.load %arg4[%c0_5, %c0_6] : memref<512x128xf32, #tpu.memory_space<vmem>>, vector<512x128xf32>
    tpu.vector_store %arg4[%c0_5, %c0_6], %9 {strides = array<i32>} : memref<512x128xf32, #tpu.memory_space<vmem>>, vector<512x128xf32>,
    return
  }
  func.func @transform_0(%arg0: i32) -> (i32, i32) {
    %c0_i32 = arith.constant 0 : i32
    %c0_i32_0 = arith.constant 0 : i32
    return %arg0, %c0_i32 : i32, i32
  }
  func.func @transform_1(%arg0: i32) -> (i32, i32) {
    %c0_i32 = arith.constant 0 : i32
    %c0_i32_0 = arith.constant 0 : i32
    %c0_i32_1 = arith.constant 0 : i32
    return %c0_i32, %c0_i32_0 : i32, i32
  }
  func.func @transform_2(%arg0: i32) -> (i32, i32) {
    %c0_i32 = arith.constant 0 : i32
    %c0_i32_0 = arith.constant 0 : i32
    %c0_i32_1 = arith.constant 0 : i32
    return %c0_i32, %c0_i32_0 : i32, i32
  }
  func.func @transform_3(%arg0: i32) -> (i32, i32) {
    %c0_i32 = arith.constant 0 : i32
    %c0_i32_0 = arith.constant 0 : i32
    return %arg0, %c0_i32 : i32, i32
  }
}

module attributes {stable_mosaic.version = 11 : i64} {
  func.func @_conv_bias_stats_kernel(%arg0: i32, %arg1: memref<128x256xbf16, #tpu.memory_space<vmem>>, %arg2: memref<256x128xbf16, #tpu.memory_space<vmem>>, %arg3: memref<1x128xf32, #tpu.memory_space<vmem>>, %arg4: memref<128x128xf32, #tpu.memory_space<vmem>>, %arg5: memref<1x2x128xf32, #tpu.memory_space<vmem>>) attributes {dimension_semantics = [#tpu.dimension_semantics<parallel>], iteration_bounds = array<i64: 1>, scalar_prefetch = 0 : i64, scratch_operands = 0 : i64, tpu.core_type = #tpu.core_type<tc>, window_params = [{transform_indices = @transform_0, window_bounds = array<i64: 128, 256>}, {pipeline_mode = #tpu.pipeline_mode<synchronous>, transform_indices = @transform_1, window_bounds = array<i64: 256, 128>}, {pipeline_mode = #tpu.pipeline_mode<synchronous>, transform_indices = @transform_2, window_bounds = array<i64: 1, 128>}, {transform_indices = @transform_3, window_bounds = array<i64: 128, 128>}, {transform_indices = @transform_4, window_bounds = array<i64: 1, 2, 128>}]} {
    %c0 = arith.constant 0 : index
    %c0_0 = arith.constant 0 : index
    %0 = vector.load %arg1[%c0, %c0_0] : memref<128x256xbf16, #tpu.memory_space<vmem>>, vector<128x256xbf16>
    %c0_1 = arith.constant 0 : index
    %c0_2 = arith.constant 0 : index
    %1 = vector.load %arg2[%c0_1, %c0_2] : memref<256x128xbf16, #tpu.memory_space<vmem>>, vector<256x128xbf16>
    %cst = arith.constant dense<0.000000e+00> : vector<128x128xf32>
    %2 = tpu.matmul %0, %1, %cst {dimension_numbers = #tpu.dot_dimension_numbers<[1], [0], [0], [1], [0, 0, 1, 1], [], []>} : vector<128x256xbf16>, vector<256x128xbf16>, vector<128x128xf32> -> vector<128x128xf32>
    %c0_3 = arith.constant 0 : index
    %c0_4 = arith.constant 0 : index
    %3 = vector.load %arg3[%c0_3, %c0_4] : memref<1x128xf32, #tpu.memory_space<vmem>>, vector<1x128xf32>
    %4 = vector.broadcast %3 : vector<1x128xf32> to vector<128x128xf32>
    %5 = arith.addf %2, %4 : vector<128x128xf32>
    %c0_5 = arith.constant 0 : index
    %c0_6 = arith.constant 0 : index
    %6 = vector.load %arg4[%c0_5, %c0_6] : memref<128x128xf32, #tpu.memory_space<vmem>>, vector<128x128xf32>
    tpu.vector_store %arg4[%c0_5, %c0_6], %5 {strides = array<i32>} : memref<128x128xf32, #tpu.memory_space<vmem>>, vector<128x128xf32>,
    %7 = tpu.iota {dimensions = array<i32: 0>} : vector<128x1xi32>
    %c128_i32 = arith.constant 128 : i32
    %8 = arith.muli %arg0, %c128_i32 : i32
    %9 = vector.broadcast %8 : i32 to vector<128x1xi32>
    %10 = arith.addi %7, %9 : vector<128x1xi32>
    %c128_i32_7 = arith.constant 128 : i32
    %11 = vector.broadcast %c128_i32_7 : i32 to vector<128x1xi32>
    %12 = arith.cmpi slt, %10, %11 : vector<128x1xi32>
    %cst_8 = arith.constant 0.000000e+00 : f32
    %13 = vector.shape_cast %12 : vector<128x1xi1> to vector<128x1xi1>
    %14 = vector.broadcast %13 : vector<128x1xi1> to vector<128x128xi1>
    %15 = vector.broadcast %cst_8 : f32 to vector<128x128xf32>
    %16 = arith.select %14, %5, %15 : vector<128x128xi1>, vector<128x128xf32>
    %cst_9 = arith.constant dense<0.000000e+00> : vector<128xf32>
    %17 = vector.multi_reduction <add>, %16, %cst_9 [0] : vector<128x128xf32> to vector<128xf32>
    %18 = vector.shape_cast %17 : vector<128xf32> to vector<1x128xf32>
    %19 = arith.mulf %16, %16 : vector<128x128xf32>
    %cst_10 = arith.constant dense<0.000000e+00> : vector<128xf32>
    %20 = vector.multi_reduction <add>, %19, %cst_10 [0] : vector<128x128xf32> to vector<128xf32>
    %21 = vector.shape_cast %20 : vector<128xf32> to vector<1x128xf32>
    %22 = tpu.concatenate %18, %21 in 0 : vector<1x128xf32>, vector<1x128xf32> -> vector<2x128xf32>
    %23 = vector.shape_cast %22 : vector<2x128xf32> to vector<1x2x128xf32>
    %c0_11 = arith.constant 0 : index
    %c0_12 = arith.constant 0 : index
    %c0_13 = arith.constant 0 : index
    %24 = vector.load %arg5[%c0_11, %c0_12, %c0_13] : memref<1x2x128xf32, #tpu.memory_space<vmem>>, vector<1x2x128xf32>
    tpu.vector_store %arg5[%c0_11, %c0_12, %c0_13], %23 {strides = array<i32>} : memref<1x2x128xf32, #tpu.memory_space<vmem>>, vector<1x2x128xf32>,
    return
  }
  func.func @transform_0(%arg0: i32) -> (i32, i32) {
    %c0_i32 = arith.constant 0 : i32
    %c0_i32_0 = arith.constant 0 : i32
    return %arg0, %c0_i32 : i32, i32
  }
  func.func @transform_1(%arg0: i32) -> (i32, i32) {
    %c0_i32 = arith.constant 0 : i32
    %c0_i32_0 = arith.constant 0 : i32
    %c0_i32_1 = arith.constant 0 : i32
    return %c0_i32, %c0_i32_0 : i32, i32
  }
  func.func @transform_2(%arg0: i32) -> (i32, i32) {
    %c0_i32 = arith.constant 0 : i32
    %c0_i32_0 = arith.constant 0 : i32
    %c0_i32_1 = arith.constant 0 : i32
    return %c0_i32, %c0_i32_0 : i32, i32
  }
  func.func @transform_3(%arg0: i32) -> (i32, i32) {
    %c0_i32 = arith.constant 0 : i32
    %c0_i32_0 = arith.constant 0 : i32
    return %arg0, %c0_i32 : i32, i32
  }
  func.func @transform_4(%arg0: i32) -> (i32, i32, i32) {
    %c0_i32 = arith.constant 0 : i32
    %c0_i32_0 = arith.constant 0 : i32
    %c0_i32_1 = arith.constant 0 : i32
    return %arg0, %c0_i32, %c0_i32_0 : i32, i32, i32
  }
}

module attributes {stable_mosaic.version = 11 : i64} {
  func.func @_conv_bias_stats_kernel(%arg0: i32, %arg1: memref<104x512xbf16, #tpu.memory_space<vmem>>, %arg2: memref<512x128xbf16, #tpu.memory_space<vmem>>, %arg3: memref<1x128xf32, #tpu.memory_space<vmem>>, %arg4: memref<104x128xf32, #tpu.memory_space<vmem>>, %arg5: memref<1x2x128xf32, #tpu.memory_space<vmem>>) attributes {dimension_semantics = [#tpu.dimension_semantics<parallel>], iteration_bounds = array<i64: 1>, scalar_prefetch = 0 : i64, scratch_operands = 0 : i64, tpu.core_type = #tpu.core_type<tc>, window_params = [{transform_indices = @transform_0, window_bounds = array<i64: 104, 512>}, {pipeline_mode = #tpu.pipeline_mode<synchronous>, transform_indices = @transform_1, window_bounds = array<i64: 512, 128>}, {pipeline_mode = #tpu.pipeline_mode<synchronous>, transform_indices = @transform_2, window_bounds = array<i64: 1, 128>}, {transform_indices = @transform_3, window_bounds = array<i64: 104, 128>}, {transform_indices = @transform_4, window_bounds = array<i64: 1, 2, 128>}]} {
    %c0 = arith.constant 0 : index
    %c0_0 = arith.constant 0 : index
    %0 = vector.load %arg1[%c0, %c0_0] : memref<104x512xbf16, #tpu.memory_space<vmem>>, vector<104x512xbf16>
    %c0_1 = arith.constant 0 : index
    %c0_2 = arith.constant 0 : index
    %1 = vector.load %arg2[%c0_1, %c0_2] : memref<512x128xbf16, #tpu.memory_space<vmem>>, vector<512x128xbf16>
    %cst = arith.constant dense<0.000000e+00> : vector<104x128xf32>
    %2 = tpu.matmul %0, %1, %cst {dimension_numbers = #tpu.dot_dimension_numbers<[1], [0], [0], [1], [0, 0, 1, 1], [], []>} : vector<104x512xbf16>, vector<512x128xbf16>, vector<104x128xf32> -> vector<104x128xf32>
    %c0_3 = arith.constant 0 : index
    %c0_4 = arith.constant 0 : index
    %3 = vector.load %arg3[%c0_3, %c0_4] : memref<1x128xf32, #tpu.memory_space<vmem>>, vector<1x128xf32>
    %4 = vector.broadcast %3 : vector<1x128xf32> to vector<104x128xf32>
    %5 = arith.addf %2, %4 : vector<104x128xf32>
    %c0_5 = arith.constant 0 : index
    %c0_6 = arith.constant 0 : index
    %6 = vector.load %arg4[%c0_5, %c0_6] : memref<104x128xf32, #tpu.memory_space<vmem>>, vector<104x128xf32>
    tpu.vector_store %arg4[%c0_5, %c0_6], %5 {strides = array<i32>} : memref<104x128xf32, #tpu.memory_space<vmem>>, vector<104x128xf32>,
    %7 = tpu.iota {dimensions = array<i32: 0>} : vector<104x1xi32>
    %c104_i32 = arith.constant 104 : i32
    %8 = arith.muli %arg0, %c104_i32 : i32
    %9 = vector.broadcast %8 : i32 to vector<104x1xi32>
    %10 = arith.addi %7, %9 : vector<104x1xi32>
    %c98_i32 = arith.constant 98 : i32
    %11 = vector.broadcast %c98_i32 : i32 to vector<104x1xi32>
    %12 = arith.cmpi slt, %10, %11 : vector<104x1xi32>
    %cst_7 = arith.constant 0.000000e+00 : f32
    %13 = vector.shape_cast %12 : vector<104x1xi1> to vector<104x1xi1>
    %14 = vector.broadcast %13 : vector<104x1xi1> to vector<104x128xi1>
    %15 = vector.broadcast %cst_7 : f32 to vector<104x128xf32>
    %16 = arith.select %14, %5, %15 : vector<104x128xi1>, vector<104x128xf32>
    %cst_8 = arith.constant dense<0.000000e+00> : vector<128xf32>
    %17 = vector.multi_reduction <add>, %16, %cst_8 [0] : vector<104x128xf32> to vector<128xf32>
    %18 = vector.shape_cast %17 : vector<128xf32> to vector<1x128xf32>
    %19 = arith.mulf %16, %16 : vector<104x128xf32>
    %cst_9 = arith.constant dense<0.000000e+00> : vector<128xf32>
    %20 = vector.multi_reduction <add>, %19, %cst_9 [0] : vector<104x128xf32> to vector<128xf32>
    %21 = vector.shape_cast %20 : vector<128xf32> to vector<1x128xf32>
    %22 = tpu.concatenate %18, %21 in 0 : vector<1x128xf32>, vector<1x128xf32> -> vector<2x128xf32>
    %23 = vector.shape_cast %22 : vector<2x128xf32> to vector<1x2x128xf32>
    %c0_10 = arith.constant 0 : index
    %c0_11 = arith.constant 0 : index
    %c0_12 = arith.constant 0 : index
    %24 = vector.load %arg5[%c0_10, %c0_11, %c0_12] : memref<1x2x128xf32, #tpu.memory_space<vmem>>, vector<1x2x128xf32>
    tpu.vector_store %arg5[%c0_10, %c0_11, %c0_12], %23 {strides = array<i32>} : memref<1x2x128xf32, #tpu.memory_space<vmem>>, vector<1x2x128xf32>,
    return
  }
  func.func @transform_0(%arg0: i32) -> (i32, i32) {
    %c0_i32 = arith.constant 0 : i32
    %c0_i32_0 = arith.constant 0 : i32
    return %arg0, %c0_i32 : i32, i32
  }
  func.func @transform_1(%arg0: i32) -> (i32, i32) {
    %c0_i32 = arith.constant 0 : i32
    %c0_i32_0 = arith.constant 0 : i32
    %c0_i32_1 = arith.constant 0 : i32
    return %c0_i32, %c0_i32_0 : i32, i32
  }
  func.func @transform_2(%arg0: i32) -> (i32, i32) {
    %c0_i32 = arith.constant 0 : i32
    %c0_i32_0 = arith.constant 0 : i32
    %c0_i32_1 = arith.constant 0 : i32
    return %c0_i32, %c0_i32_0 : i32, i32
  }
  func.func @transform_3(%arg0: i32) -> (i32, i32) {
    %c0_i32 = arith.constant 0 : i32
    %c0_i32_0 = arith.constant 0 : i32
    return %arg0, %c0_i32 : i32, i32
  }
  func.func @transform_4(%arg0: i32) -> (i32, i32, i32) {
    %c0_i32 = arith.constant 0 : i32
    %c0_i32_0 = arith.constant 0 : i32
    %c0_i32_1 = arith.constant 0 : i32
    return %arg0, %c0_i32, %c0_i32_0 : i32, i32, i32
  }
}

module attributes {stable_mosaic.version = 11 : i64} {
  func.func @_bn_act_kernel(%arg0: i32, %arg1: memref<104x128xf32, #tpu.memory_space<vmem>>, %arg2: memref<1x128xf32, #tpu.memory_space<vmem>>, %arg3: memref<1x128xf32, #tpu.memory_space<vmem>>, %arg4: memref<104x128xf32, #tpu.memory_space<vmem>>) attributes {dimension_semantics = [#tpu.dimension_semantics<parallel>], iteration_bounds = array<i64: 1>, scalar_prefetch = 0 : i64, scratch_operands = 0 : i64, tpu.core_type = #tpu.core_type<tc>, window_params = [{transform_indices = @transform_0, window_bounds = array<i64: 104, 128>}, {pipeline_mode = #tpu.pipeline_mode<synchronous>, transform_indices = @transform_1, window_bounds = array<i64: 1, 128>}, {pipeline_mode = #tpu.pipeline_mode<synchronous>, transform_indices = @transform_2, window_bounds = array<i64: 1, 128>}, {transform_indices = @transform_3, window_bounds = array<i64: 104, 128>}]} {
    %c0 = arith.constant 0 : index
    %c0_0 = arith.constant 0 : index
    %0 = vector.load %arg1[%c0, %c0_0] : memref<104x128xf32, #tpu.memory_space<vmem>>, vector<104x128xf32>
    %c0_1 = arith.constant 0 : index
    %c0_2 = arith.constant 0 : index
    %1 = vector.load %arg2[%c0_1, %c0_2] : memref<1x128xf32, #tpu.memory_space<vmem>>, vector<1x128xf32>
    %2 = vector.broadcast %1 : vector<1x128xf32> to vector<104x128xf32>
    %3 = arith.mulf %0, %2 : vector<104x128xf32>
    %c0_3 = arith.constant 0 : index
    %c0_4 = arith.constant 0 : index
    %4 = vector.load %arg3[%c0_3, %c0_4] : memref<1x128xf32, #tpu.memory_space<vmem>>, vector<1x128xf32>
    %5 = vector.broadcast %4 : vector<1x128xf32> to vector<104x128xf32>
    %6 = arith.addf %3, %5 : vector<104x128xf32>
    %cst = arith.constant 2.000000e-01 : f32
    %7 = vector.broadcast %cst : f32 to vector<104x128xf32>
    %8 = arith.mulf %7, %6 : vector<104x128xf32>
    %9 = arith.maximumf %6, %8 : vector<104x128xf32>
    %c0_5 = arith.constant 0 : index
    %c0_6 = arith.constant 0 : index
    %10 = vector.load %arg4[%c0_5, %c0_6] : memref<104x128xf32, #tpu.memory_space<vmem>>, vector<104x128xf32>
    tpu.vector_store %arg4[%c0_5, %c0_6], %9 {strides = array<i32>} : memref<104x128xf32, #tpu.memory_space<vmem>>, vector<104x128xf32>,
    return
  }
  func.func @transform_0(%arg0: i32) -> (i32, i32) {
    %c0_i32 = arith.constant 0 : i32
    %c0_i32_0 = arith.constant 0 : i32
    return %arg0, %c0_i32 : i32, i32
  }
  func.func @transform_1(%arg0: i32) -> (i32, i32) {
    %c0_i32 = arith.constant 0 : i32
    %c0_i32_0 = arith.constant 0 : i32
    %c0_i32_1 = arith.constant 0 : i32
    return %c0_i32, %c0_i32_0 : i32, i32
  }
  func.func @transform_2(%arg0: i32) -> (i32, i32) {
    %c0_i32 = arith.constant 0 : i32
    %c0_i32_0 = arith.constant 0 : i32
    %c0_i32_1 = arith.constant 0 : i32
    return %c0_i32, %c0_i32_0 : i32, i32
  }
  func.func @transform_3(%arg0: i32) -> (i32, i32) {
    %c0_i32 = arith.constant 0 : i32
    %c0_i32_0 = arith.constant 0 : i32
    return %arg0, %c0_i32 : i32, i32
  }
}

module attributes {stable_mosaic.version = 11 : i64} {
  func.func @_conv_bias_act_kernel(%arg0: i32, %arg1: memref<72x1024xbf16, #tpu.memory_space<vmem>>, %arg2: memref<1024x128xbf16, #tpu.memory_space<vmem>>, %arg3: memref<1x128xf32, #tpu.memory_space<vmem>>, %arg4: memref<72x128xf32, #tpu.memory_space<vmem>>) attributes {dimension_semantics = [#tpu.dimension_semantics<parallel>], iteration_bounds = array<i64: 1>, scalar_prefetch = 0 : i64, scratch_operands = 0 : i64, tpu.core_type = #tpu.core_type<tc>, window_params = [{transform_indices = @transform_0, window_bounds = array<i64: 72, 1024>}, {pipeline_mode = #tpu.pipeline_mode<synchronous>, transform_indices = @transform_1, window_bounds = array<i64: 1024, 128>}, {pipeline_mode = #tpu.pipeline_mode<synchronous>, transform_indices = @transform_2, window_bounds = array<i64: 1, 128>}, {transform_indices = @transform_3, window_bounds = array<i64: 72, 128>}]} {
    %c0 = arith.constant 0 : index
    %c0_0 = arith.constant 0 : index
    %0 = vector.load %arg1[%c0, %c0_0] : memref<72x1024xbf16, #tpu.memory_space<vmem>>, vector<72x1024xbf16>
    %c0_1 = arith.constant 0 : index
    %c0_2 = arith.constant 0 : index
    %1 = vector.load %arg2[%c0_1, %c0_2] : memref<1024x128xbf16, #tpu.memory_space<vmem>>, vector<1024x128xbf16>
    %cst = arith.constant dense<0.000000e+00> : vector<72x128xf32>
    %2 = tpu.matmul %0, %1, %cst {dimension_numbers = #tpu.dot_dimension_numbers<[1], [0], [0], [1], [0, 0, 1, 1], [], []>} : vector<72x1024xbf16>, vector<1024x128xbf16>, vector<72x128xf32> -> vector<72x128xf32>
    %c0_3 = arith.constant 0 : index
    %c0_4 = arith.constant 0 : index
    %3 = vector.load %arg3[%c0_3, %c0_4] : memref<1x128xf32, #tpu.memory_space<vmem>>, vector<1x128xf32>
    %4 = vector.broadcast %3 : vector<1x128xf32> to vector<72x128xf32>
    %5 = arith.addf %2, %4 : vector<72x128xf32>
    %c0_5 = arith.constant 0 : index
    %c0_6 = arith.constant 0 : index
    %6 = vector.load %arg4[%c0_5, %c0_6] : memref<72x128xf32, #tpu.memory_space<vmem>>, vector<72x128xf32>
    tpu.vector_store %arg4[%c0_5, %c0_6], %5 {strides = array<i32>} : memref<72x128xf32, #tpu.memory_space<vmem>>, vector<72x128xf32>,
    return
  }
  func.func @transform_0(%arg0: i32) -> (i32, i32) {
    %c0_i32 = arith.constant 0 : i32
    %c0_i32_0 = arith.constant 0 : i32
    return %arg0, %c0_i32 : i32, i32
  }
  func.func @transform_1(%arg0: i32) -> (i32, i32) {
    %c0_i32 = arith.constant 0 : i32
    %c0_i32_0 = arith.constant 0 : i32
    %c0_i32_1 = arith.constant 0 : i32
    return %c0_i32, %c0_i32_0 : i32, i32
  }
  func.func @transform_2(%arg0: i32) -> (i32, i32) {
    %c0_i32 = arith.constant 0 : i32
    %c0_i32_0 = arith.constant 0 : i32
    %c0_i32_1 = arith.constant 0 : i32
    return %c0_i32, %c0_i32_0 : i32, i32
  }
  func.func @transform_3(%arg0: i32) -> (i32, i32) {
    %c0_i32 = arith.constant 0 : i32
    %c0_i32_0 = arith.constant 0 : i32
    return %arg0, %c0_i32 : i32, i32
  }
}

</mosaic_0001>

<bundles_post_ra>
// kernel: tile.9
= control target key start
LH: loop header
LB: loop body
LE: loop exit
PB: predicated region body
PF: predicated region fallthrough
CT: control target
= control target key end

     0   :  { %vm6_vm0 = vcmask 1043458   ;;  %s11_s6 = smov 3  ;;  %s14_s7 = smov 12  ;;  %vm8_vm1 = vcmask 31744   ;;  %vm20_vm2 = vcmask 294144   ;;  %vm32_vm3 = vcmask 261344   ;;  %s220_s0 = inlined_call_operand.vmem [shape: f32[9,4,4], index: 0, kind: input, shape index: {}]   ;;  %s221_s1 = inlined_call_operand.vmem [shape: f32[36,4], index: 1, kind: output, shape index: {}]  }
   0x1   :  { %v112_v0 = vld [vmem:[%s220_s0 + $0x8] ss:$16 sm:%s11_s6]   ;;  %s35_s12 = smov 3  ;;  %s38_s15 = smov 12  ;;  %vm44_vm4 = vcmask 228544   ;;  %vm56_vm5 = vcmask 195744  }
   0x2   :  { %v113_v1 = vld [vmem:[%s220_s0 + $0x8] ss:$16 sm:%s14_s7]   ;;  %v116_v3 = vld [vmem:[%s220_s0 + $0x6] ss:$16 sm:%s35_s12]   ;;  %s136_s16 = smov 32   ;;  %s23_s19 = smov 3 }
   0x3   :  { %v17_v2 = vsel %vm6_vm0, %v113_v1, %v112_v0  ;;  %v117_v4 = vld [vmem:[%s220_s0 + $0x6] ss:$16 sm:%s38_s15]   ;;  %s26_s20 = smov 12  ;;  %v114_v6 = vld [vmem:[%s220_s0 + $0x7] ss:$16 sm:%s23_s19]   ;;  %s47_s25 = smov 3 }
   0x4   :  { %18 = vrot.lane.b32.xlu0 %v17_v2, %s136_s16  ;;  %v41_v5 = vsel %vm6_vm0, %v117_v4, %v116_v3  ;;  %v115_v7 = vld [vmem:[%s220_s0 + $0x7] ss:$16 sm:%s26_s20]   ;;  %s137_s26 = smov 24   ;;  %s50_s29 = smov 12  ;;  %vm68_vm6 = vcmask 162944   ;;  %vm80_vm7 = vcmask 130144  }
   0x5   :  { %42 = vrot.lane.b32.xlu1 %v41_v5, %s137_s26  ;;  %v29_v8 = vsel %vm6_vm0, %v115_v7, %v114_v6  ;;  %v118_v9 = vld [vmem:[%s220_s0 + $0x5] ss:$16 sm:%s47_s25]   ;;  %s59_s3 = smov 3  ;;  %s62_s4 = smov 12  ;;  %vm92_vm8 = vcmask 97344   ;;  %vm104_vm9 = vcmask 64544  }
   0x6   :  { %v119_v10 = vld [vmem:[%s220_s0 + $0x5] ss:$16 sm:%s50_s29]   ;;  %s138_s5 = smov 28   ;;  %v120_v12 = vld [vmem:[%s220_s0 + $0x4] ss:$16 sm:%s59_s3]   ;;  %s71_s8 = smov 3 }
   0x7   :  { %v53_v11 = vsel %vm6_vm0, %v119_v10, %v118_v9  ;;  %v121_v13 = vld [vmem:[%s220_s0 + $0x4] ss:$16 sm:%s62_s4]   ;;  %v122_v14 = vld [vmem:[%s220_s0 + $0x3] ss:$16 sm:%s71_s8]   ;;  %s74_s13 = smov 12  ;;  %s139_s14 = smov 20  }
   0x8   :  { %30 = vrot.lane.b32.xlu0 %v29_v8, %s138_s5  ;;  %v65_v15 = vsel %vm6_vm0, %v121_v13, %v120_v12  ;;  %v123_v16 = vld [vmem:[%s220_s0 + $0x3] ss:$16 sm:%s74_s13]   ;;  %s83_s17 = smov 3  ;;  %s86_s18 = smov 12 }
   0x9   :  { %54 = vrot.lane.b32.xlu1 %v53_v11, %s139_s14  ;;  %v77_v17 = vsel %vm6_vm0, %v123_v16, %v122_v14  ;;  %v124_v18 = vld [vmem:[%s220_s0 + $0x2] ss:$16 sm:%s83_s17]   ;;  %s95_s23 = smov 3  ;;  %s140_s24 = smov 16  }
   0xa   :  { %v125_v19 = vld [vmem:[%s220_s0 + $0x2] ss:$16 sm:%s86_s18]   ;;  %v126_v20 = vld [vmem:[%s220_s0 + $0x1] ss:$16 sm:%s95_s23]   ;;  %s98_s27 = smov 12  ;;  %s2_s30 = smov 3 }
   0xb   :  { %v89_v21 = vsel %vm6_vm0, %v125_v19, %v124_v18  ;;  %v127_v22 = vld [vmem:[%s220_s0 + $0x1] ss:$16 sm:%s98_s27]   ;;  %s4_s2 = smov 12  ;;  %s141_s3 = smov 12   ;;  %v3_v23 = vld [vmem:[%s220_s0] ss:$16 sm:%s2_s30]  }
   0xc   :  { %66 = vrot.lane.b32.xlu0 %v65_v15, %s140_s24  ;;  %v101_v24 = vsel %vm6_vm0, %v127_v22, %v126_v20  ;;  %v5_v25 = vld [vmem:[%s220_s0] ss:$16 sm:%s4_s2]   ;;  %s142_s0 = smov 8   ;;  %s143_s8 = smov 4  }
   0xd   :  { %78 = vrot.lane.b32.xlu1 %v77_v17, %s141_s3  ;;  %v7_v26 = vsel %vm6_vm0, %v5_v25, %v3_v23 }
   0xe   :  { %9 = vst.msk [vmem:[#allocation0] sm:$0xf] %vm8_vm1, %v7_v26  }
  0x10   :  { %90 = vrot.lane.b32.xlu0 %v89_v21, %s142_s0 }
  0x11   :  { %102 = vrot.lane.b32.xlu1 %v101_v24, %s143_s8 }
  0x76   :  { %v19_v27 = vpop.permute.xlu0 %18  }
  0x77   :  { %21 = vst.msk [vmem:[#allocation0] sm:$0xf] %vm20_vm2, %v19_v27   ;;  %v43_v28 = vpop.permute.xlu1 %42  }
  0x7a   :  { %v31_v29 = vpop.permute.xlu0 %30  }
  0x7b   :  { %33 = vst.msk [vmem:[#allocation0] sm:$0xf] %vm32_vm3, %v31_v29   ;;  %v55_v30 = vpop.permute.xlu1 %54  }
  0x7c   :  { %45 = vst.msk [vmem:[#allocation0] sm:$0xf] %vm44_vm4, %v43_v28  }
  0x7d   :  { %57 = vst.msk [vmem:[#allocation0] sm:$0xf] %vm56_vm5, %v55_v30  }
  0x7e   :  { %v67_v31 = vpop.permute.xlu0 %66  }
  0x7f   :  { %69 = vst.msk [vmem:[#allocation0] sm:$0xf] %vm68_vm6, %v67_v31   ;;  %v79_v32 = vpop.permute.xlu1 %78  }
  0x80   :  { %81 = vst.msk [vmem:[#allocation0] sm:$0xf] %vm80_vm7, %v79_v32  }
  0x82   :  { %v91_v33 = vpop.permute.xlu0 %90  }
  0x83   :  { %93 = vst.msk [vmem:[#allocation0] sm:$0xf] %vm92_vm8, %v91_v33   ;;  %v103_v34 = vpop.permute.xlu1 %102  }
  0x84   :  { %105 = vst.msk [vmem:[#allocation0] sm:$0xf] %vm104_vm9, %v103_v34  }
  0x8b   :  { %v109_v35 = vld [vmem:[#allocation0] sm:$0xf] }
  0x8c   :  { %111 = vst [vmem:[%s221_s1] sm:$0xf] %v109_v35 }

// kernel: _lambda_.25
= control target key start
LH: loop header
LB: loop body
LE: loop exit
PB: predicated region body
PF: predicated region fallthrough
CT: control target
= control target key end

     0   :  { %s1070_s12 = smov 0   ;;  %s1343_s0 = inlined_call_operand.vmem [shape: f32[2048,128], index: 0, kind: input, shape index: {}]   ;;  %s1344_s1 = inlined_call_operand.vmem [shape: f32[128,128], index: 1, kind: input, shape index: {}]   ;;  %s1345_s2 = inlined_call_operand.vmem [shape: f32[1,128], index: 2, kind: input, shape index: {}]   ;;  %s1346_s3 = inlined_call_operand.vmem [shape: f32[2048,128], index: 3, kind: output, shape index: {}]  }
   0x1 LB: > { %s766_s13 = sadd.s32 4294967295, %s1048_s12   ;;  %p770_p0 = scmp.ge.s32.totalorder %s1048_s12, 1  ;;  %s1048_s12 = sphi %s1070_s12, %s13_s12  }
   0x2   : > { %p138_p1 = scmp.lt.s32.totalorder %s1048_s12, 5 }
   0x4   : > { %p139_p2 = pnand %p770_p0, %p138_p1 }
   0x5   : > { %v238_v0 = vld [vmem:[%s1344_s1] sm:$0xff] (!%p139_p2)  ;;  %v239_v1 = vld [vmem:[%s1344_s1 + $0x8] sm:$0xff] (!%p139_p2)  ;;  %v240_v2 = vld [vmem:[%s1344_s1 + $0x10] sm:$0xff] (!%p139_p2)  ;;  %s771_s20 = sshll.u32 (!%p139_p2), %s766_s13, 6 }
   0x6   : > { %142 = sbr.rel (%p139_p2) target bundleno = 317 (0x13d), region = 32  ;;  %v986_v3 = vpack.c.bf16 (!%p139_p2), %v239_v1, %v238_v0  ;;  %v241_v4 = vld [vmem:[%s1344_s1 + $0x18] sm:$0xff] (!%p139_p2)  ;;  %p163_p3 = scmp.lt.s32.totalorder (!%p139_p2), %s771_s20, 255  ;;  %v242_v6 = vld [vmem:[%s1344_s1 + $0x20] sm:$0xff] (!%p139_p2)  ;;  %v243_v7 = vld [vmem:[%s1344_s1 + $0x28] sm:$0xff] (!%p139_p2) }
   0x7   : > { %v990_v5 = vpack.c.bf16 (!%p139_p2), %v241_v4, %v240_v2  ;;  %v994_v8 = vpack.c.bf16 (!%p139_p2), %v243_v7, %v242_v6  ;;  %v244_v9 = vld [vmem:[%s1344_s1 + $0x30] sm:$0xff] (!%p139_p2)  ;;  %v245_v10 = vld [vmem:[%s1344_s1 + $0x38] sm:$0xff] (!%p139_p2)  ;;  %v246_v14 = vld [vmem:[%s1344_s1 + $0x40] sm:$0xff] (!%p139_p2) }
   0x8   : > { %987 = vmatprep.subr.bf16.mxu0 (!%p139_p2), %v986_v3  ;;  %1018 = vmatprep.subr.bf16.mxu1 (!%p139_p2), %v986_v3  ;;  %v998_v13 = vpack.c.bf16 (!%p139_p2), %v245_v10, %v244_v9  ;;  %v247_v15 = vld [vmem:[%s1344_s1 + $0x48] sm:$0xff] (!%p139_p2)  ;;  %v248_v17 = vld [vmem:[%s1344_s1 + $0x50] sm:$0xff] (!%p139_p2)  ;;  %v249_v18 = vld [vmem:[%s1344_s1 + $0x58] sm:$0xff] (!%p139_p2) }
   0x9   : > { %989 = vmatpush3.bf16.msra.mxu0 (!%p139_p2), %v986_v3  ;;  %1026 = vmatpush3.bf16.msra.mxu1 (!%p139_p2), %v986_v3  ;;  %v1002_v16 = vpack.c.bf16 (!%p139_p2), %v247_v15, %v246_v14  ;;  %v1006_v19 = vpack.c.bf16 (!%p139_p2), %v249_v18, %v248_v17  ;;  %v250_v20 = vld [vmem:[%s1344_s1 + $0x60] sm:$0xff] (!%p139_p2)  ;;  %v251_v21 = vld [vmem:[%s1344_s1 + $0x68] sm:$0xff] (!%p139_p2)  ;;  %v252_v23 = vld [vmem:[%s1344_s1 + $0x70] sm:$0xff] (!%p139_p2) }
   0xa   : > { %991 = vmatprep.subr.bf16.mxu0 (!%p139_p2), %v990_v5  ;;  %1019 = vmatprep.subr.bf16.mxu1 (!%p139_p2), %v990_v5  ;;  %v1010_v22 = vpack.c.bf16 (!%p139_p2), %v251_v21, %v250_v20  ;;  %v253_v24 = vld [vmem:[%s1344_s1 + $0x78] sm:$0xff] (!%p139_p2) }
   0xb   : > { %v1014_v25 = vpack.c.bf16 (!%p139_p2), %v253_v24, %v252_v23  ;;  %v1203_v24 = vld [vmem:[%s1345_s2] ss:$0 sm:$0xff] (!%p139_p2) }
   0xd   : > { %s1348_s20 = smov (!%p163_p3, %s771_s20), 255  ;;  %993 = vmatpush3.bf16.msra.mxu0 %v990_v5  ;;  %1027 = vmatpush3.bf16.msra.mxu1 %v990_v5 }
   0xe   : > { %s772_s27 = sshll.u32 %s1348_s20, 3  ;;  %995 = vmatprep.subr.bf16.mxu0 %v994_v8  ;;  %1020 = vmatprep.subr.bf16.mxu1 %v994_v8 }
   0xf   : > { %s1110_s7 = scalar_lea.vmem %s1343_s0, %s772_s27  ;;  %s1210_s4 = scalar_lea.vmem %s1346_s3, %s772_s27 }
  0x10   : > { %v174_v11 = vld [vmem:[%s1110_s7] sm:$0xff]  ;;  %v175_v26 = vld [vmem:[%s1110_s7 + $0x8] sm:$0xff]  ;;  %v176_v28 = vld [vmem:[%s1110_s7 + $0x10] sm:$0xff] }
  0x11   : > { %v206_v12 = vld [vmem:[%s1110_s7 + $0x100] sm:$0xff]  ;;  %890 = vmatprep.mubr.f32.mxu0 %v174_v11  ;;  %997 = vmatpush3.bf16.msra.mxu0 %v994_v8  ;;  %v207_v27 = vld [vmem:[%s1110_s7 + $0x108] sm:$0xff]  ;;  %v208_v29 = vld [vmem:[%s1110_s7 + $0x110] sm:$0xff] }
  0x12   : > { %938 = vmatprep.mubr.f32.mxu1 %v206_v12  ;;  %1028 = vmatpush3.bf16.msra.mxu1 %v994_v8  ;;  %v177_v30 = vld [vmem:[%s1110_s7 + $0x18] sm:$0xff]  ;;  %v178_v32 = vld [vmem:[%s1110_s7 + $0x20] sm:$0xff]  ;;  %v179_v34 = vld [vmem:[%s1110_s7 + $0x28] sm:$0xff] }
  0x13   : > { %999 = vmatprep.subr.bf16.mxu0 %v998_v13  ;;  %1021 = vmatprep.subr.bf16.mxu1 %v998_v13  ;;  %v209_v31 = vld [vmem:[%s1110_s7 + $0x118] sm:$0xff]  ;;  %v210_v33 = vld [vmem:[%s1110_s7 + $0x120] sm:$0xff]  ;;  %v211_v35 = vld [vmem:[%s1110_s7 + $0x128] sm:$0xff] }
  0x14   : > { %v180_v36 = vld [vmem:[%s1110_s7 + $0x30] sm:$0xff]  ;;  %v181_v38 = vld [vmem:[%s1110_s7 + $0x38] sm:$0xff]  ;;  %v182_v40 = vld [vmem:[%s1110_s7 + $0x40] sm:$0xff] }
  0x15   : > { %1001 = vmatpush3.bf16.msra.mxu0 %v998_v13  ;;  %v212_v37 = vld [vmem:[%s1110_s7 + $0x130] sm:$0xff]  ;;  %v213_v39 = vld [vmem:[%s1110_s7 + $0x138] sm:$0xff]  ;;  %v214_v41 = vld [vmem:[%s1110_s7 + $0x140] sm:$0xff] }
  0x16   : > { %1029 = vmatpush3.bf16.msra.mxu1 %v998_v13  ;;  %1003 = vmatprep.subr.bf16.mxu0 %v1002_v16  ;;  %v183_v42 = vld [vmem:[%s1110_s7 + $0x48] sm:$0xff]  ;;  %v184_v44 = vld [vmem:[%s1110_s7 + $0x50] sm:$0xff]  ;;  %v185_v46 = vld [vmem:[%s1110_s7 + $0x58] sm:$0xff] }
  0x17   : > { %1022 = vmatprep.subr.bf16.mxu1 %v1002_v16  ;;  %v215_v43 = vld [vmem:[%s1110_s7 + $0x148] sm:$0xff]  ;;  %v216_v45 = vld [vmem:[%s1110_s7 + $0x150] sm:$0xff]  ;;  %v217_v47 = vld [vmem:[%s1110_s7 + $0x158] sm:$0xff] }
  0x18   : > { %v186_v48 = vld [vmem:[%s1110_s7 + $0x60] sm:$0xff]  ;;  %v187_v50 = vld [vmem:[%s1110_s7 + $0x68] sm:$0xff]  ;;  %v188_v52 = vld [vmem:[%s1110_s7 + $0x70] sm:$0xff] }
  0x19   : > { %1005 = vmatpush3.bf16.msra.mxu0 %v1002_v16  ;;  %v218_v49 = vld [vmem:[%s1110_s7 + $0x160] sm:$0xff]  ;;  %v219_v51 = vld [vmem:[%s1110_s7 + $0x168] sm:$0xff]  ;;  %v220_v53 = vld [vmem:[%s1110_s7 + $0x170] sm:$0xff] }
  0x1a   : > { %1030 = vmatpush3.bf16.msra.mxu1 %v1002_v16  ;;  %1007 = vmatprep.subr.bf16.mxu0 %v1006_v19  ;;  %v189_v54 = vld [vmem:[%s1110_s7 + $0x78] sm:$0xff]  ;;  %v190_v56 = vld [vmem:[%s1110_s7 + $0x80] sm:$0xff]  ;;  %v191_v58 = vld [vmem:[%s1110_s7 + $0x88] sm:$0xff] }
  0x1b   : > { %1023 = vmatprep.subr.bf16.mxu1 %v1006_v19  ;;  %v221_v55 = vld [vmem:[%s1110_s7 + $0x178] sm:$0xff]  ;;  %v222_v57 = vld [vmem:[%s1110_s7 + $0x180] sm:$0xff]  ;;  %v223_v59 = vld [vmem:[%s1110_s7 + $0x188] sm:$0xff] }
  0x1c   : > { %v192_v60 = vld [vmem:[%s1110_s7 + $0x90] sm:$0xff]  ;;  %v193_v62 = vld [vmem:[%s1110_s7 + $0x98] sm:$0xff]  ;;  %v194_v0 = vld [vmem:[%s1110_s7 + $0xa0] sm:$0xff] }
  0x1d   : > { %1009 = vmatpush3.bf16.msra.mxu0 %v1006_v19  ;;  %v224_v61 = vld [vmem:[%s1110_s7 + $0x190] sm:$0xff]  ;;  %v225_v63 = vld [vmem:[%s1110_s7 + $0x198] sm:$0xff]  ;;  %v226_v1 = vld [vmem:[%s1110_s7 + $0x1a0] sm:$0xff] }
  0x1e   : > { %1031 = vmatpush3.bf16.msra.mxu1 %v1006_v19  ;;  %1011 = vmatprep.subr.bf16.mxu0 %v1010_v22  ;;  %v195_v2 = vld [vmem:[%s1110_s7 + $0xa8] sm:$0xff]  ;;  %v196_v4 = vld [vmem:[%s1110_s7 + $0xb0] sm:$0xff]  ;;  %v197_v6 = vld [vmem:[%s1110_s7 + $0xb8] sm:$0xff] }
  0x1f   : > { %1024 = vmatprep.subr.bf16.mxu1 %v1010_v22  ;;  %v227_v3 = vld [vmem:[%s1110_s7 + $0x1a8] sm:$0xff]  ;;  %v228_v5 = vld [vmem:[%s1110_s7 + $0x1b0] sm:$0xff]  ;;  %v229_v7 = vld [vmem:[%s1110_s7 + $0x1b8] sm:$0xff] }
  0x20   : > { %v198_v8 = vld [vmem:[%s1110_s7 + $0xc0] sm:$0xff]  ;;  %v199_v10 = vld [vmem:[%s1110_s7 + $0xc8] sm:$0xff]  ;;  %v200_v12 = vld [vmem:[%s1110_s7 + $0xd0] sm:$0xff] }
  0x21   : > { %1013 = vmatpush3.bf16.msra.mxu0 %v1010_v22  ;;  %v230_v9 = vld [vmem:[%s1110_s7 + $0x1c0] sm:$0xff]  ;;  %v231_v11 = vld [vmem:[%s1110_s7 + $0x1c8] sm:$0xff]  ;;  %v232_v13 = vld [vmem:[%s1110_s7 + $0x1d0] sm:$0xff] }
  0x22   : > { %1032 = vmatpush3.bf16.msra.mxu1 %v1010_v22  ;;  %1015 = vmatprep.subr.bf16.mxu0 %v1014_v25  ;;  %v201_v14 = vld [vmem:[%s1110_s7 + $0xd8] sm:$0xff]  ;;  %v202_v16 = vld [vmem:[%s1110_s7 + $0xe0] sm:$0xff]  ;;  %v203_v18 = vld [vmem:[%s1110_s7 + $0xe8] sm:$0xff] }
  0x23   : > { %1025 = vmatprep.subr.bf16.mxu1 %v1014_v25  ;;  %v233_v15 = vld [vmem:[%s1110_s7 + $0x1d8] sm:$0xff]  ;;  %v234_v17 = vld [vmem:[%s1110_s7 + $0x1e0] sm:$0xff]  ;;  %v235_v19 = vld [vmem:[%s1110_s7 + $0x1e8] sm:$0xff] }
  0x24   : > { %v204_v20 = vld [vmem:[%s1110_s7 + $0xf0] sm:$0xff]  ;;  %v205_v22 = vld [vmem:[%s1110_s7 + $0xf8] sm:$0xff] }
  0x25   : > { %1017 = vmatpush3.bf16.msra.mxu0 %v1014_v25  ;;  %v236_v21 = vld [vmem:[%s1110_s7 + $0x1f0] sm:$0xff]  ;;  %v237_v23 = vld [vmem:[%s1110_s7 + $0x1f8] sm:$0xff] }
  0x26   : > { %1033 = vmatpush3.bf16.msra.mxu1 %v1014_v25 }
  0x28   : > { %891 = vmatmul.mubr.f32.vlgmr.msra.gmra.mrb[0].mxu0 %v175_v26 }
  0x29   : > { %939 = vmatmul.mubr.f32.vlgmr.msra.gmra.mrb[0].mxu1 %v207_v27  ;;  %893 = vmatprep.mubr.f32.mxu0 %v176_v28 }
  0x2a   : > { %941 = vmatprep.mubr.f32.mxu1 %v208_v29 }
  0x2c   : > { %894 = vmatmul.mubr.f32.gmra.mrb[2].mxu0 %v177_v30 }
  0x2d   : > { %942 = vmatmul.mubr.f32.gmra.mrb[2].mxu1 %v209_v31  ;;  %896 = vmatprep.mubr.f32.mxu0 %v178_v32 }
  0x2e   : > { %944 = vmatprep.mubr.f32.mxu1 %v210_v33 }
  0x30   : > { %897 = vmatmul.mubr.f32.gmra.mrb[4].mxu0 %v179_v34 }
  0x31   : > { %945 = vmatmul.mubr.f32.gmra.mrb[4].mxu1 %v211_v35  ;;  %899 = vmatprep.mubr.f32.mxu0 %v180_v36 }
  0x32   : > { %947 = vmatprep.mubr.f32.mxu1 %v212_v37 }
  0x34   : > { %900 = vmatmul.mubr.f32.gmra.mrb[6].mxu0 %v181_v38 }
  0x35   : > { %948 = vmatmul.mubr.f32.gmra.mrb[6].mxu1 %v213_v39  ;;  %902 = vmatprep.mubr.f32.mxu0 %v182_v40 }
  0x36   : > { %950 = vmatprep.mubr.f32.mxu1 %v214_v41 }
  0x38   : > { %903 = vmatmul.mubr.f32.gmra.mrb[8].mxu0 %v183_v42 }
  0x39   : > { %951 = vmatmul.mubr.f32.gmra.mrb[8].mxu1 %v215_v43  ;;  %905 = vmatprep.mubr.f32.mxu0 %v184_v44 }
  0x3a   : > { %953 = vmatprep.mubr.f32.mxu1 %v216_v45 }
  0x3c   : > { %906 = vmatmul.mubr.f32.gmra.mrb[10].mxu0 %v185_v46 }
  0x3d   : > { %954 = vmatmul.mubr.f32.gmra.mrb[10].mxu1 %v217_v47  ;;  %908 = vmatprep.mubr.f32.mxu0 %v186_v48 }
  0x3e   : > { %956 = vmatprep.mubr.f32.mxu1 %v218_v49 }
  0x40   : > { %909 = vmatmul.mubr.f32.gmra.mrb[12].mxu0 %v187_v50 }
  0x41   : > { %957 = vmatmul.mubr.f32.gmra.mrb[12].mxu1 %v219_v51  ;;  %911 = vmatprep.mubr.f32.mxu0 %v188_v52 }
  0x42   : > { %959 = vmatprep.mubr.f32.mxu1 %v220_v53 }
  0x44   : > { %912 = vmatmul.mubr.f32.gmra.mrb[14].mxu0 %v189_v54 }
  0x45   : > { %960 = vmatmul.mubr.f32.gmra.mrb[14].mxu1 %v221_v55  ;;  %914 = vmatprep.mubr.f32.mxu0 %v190_v56 }
  0x46   : > { %962 = vmatprep.mubr.f32.mxu1 %v222_v57 }
  0x48   : > { %915 = vmatmul.mubr.f32.gmra.mrb[16].mxu0 %v191_v58 }
  0x49   : > { %963 = vmatmul.mubr.f32.gmra.mrb[16].mxu1 %v223_v59  ;;  %917 = vmatprep.mubr.f32.mxu0 %v192_v60 }
  0x4a   : > { %965 = vmatprep.mubr.f32.mxu1 %v224_v61 }
  0x4c   : > { %918 = vmatmul.mubr.f32.gmra.mrb[18].mxu0 %v193_v62 }
  0x4d   : > { %966 = vmatmul.mubr.f32.gmra.mrb[18].mxu1 %v225_v63  ;;  %920 = vmatprep.mubr.f32.mxu0 %v194_v0 }
  0x4e   : > { %968 = vmatprep.mubr.f32.mxu1 %v226_v1 }
  0x50   : > { %921 = vmatmul.mubr.f32.gmra.mrb[20].mxu0 %v195_v2 }
  0x51   : > { %969 = vmatmul.mubr.f32.gmra.mrb[20].mxu1 %v227_v3  ;;  %923 = vmatprep.mubr.f32.mxu0 %v196_v4 }
  0x52   : > { %971 = vmatprep.mubr.f32.mxu1 %v228_v5 }
  0x54   : > { %924 = vmatmul.mubr.f32.gmra.mrb[22].mxu0 %v197_v6 }
  0x55   : > { %972 = vmatmul.mubr.f32.gmra.mrb[22].mxu1 %v229_v7  ;;  %926 = vmatprep.mubr.f32.mxu0 %v198_v8 }
  0x56   : > { %974 = vmatprep.mubr.f32.mxu1 %v230_v9 }
  0x58   : > { %927 = vmatmul.mubr.f32.gmra.mrb[24].mxu0 %v199_v10 }
  0x59   : > { %975 = vmatmul.mubr.f32.gmra.mrb[24].mxu1 %v231_v11  ;;  %929 = vmatprep.mubr.f32.mxu0 %v200_v12 }
  0x5a   : > { %977 = vmatprep.mubr.f32.mxu1 %v232_v13 }
  0x5c   : > { %930 = vmatmul.mubr.f32.gmra.mrb[26].mxu0 %v201_v14 }
  0x5d   : > { %978 = vmatmul.mubr.f32.gmra.mrb[26].mxu1 %v233_v15  ;;  %932 = vmatprep.mubr.f32.mxu0 %v202_v16 }
  0x5e   : > { %980 = vmatprep.mubr.f32.mxu1 %v234_v17 }
  0x60   : > { %933 = vmatmul.mubr.f32.gmra.mrb[28].mxu0 %v203_v18 }
  0x61   : > { %981 = vmatmul.mubr.f32.gmra.mrb[28].mxu1 %v235_v19  ;;  %935 = vmatprep.mubr.f32.mxu0 %v204_v20 }
  0x62   : > { %983 = vmatprep.mubr.f32.mxu1 %v236_v21 }
  0x64   : > { %936 = vmatmul.mubr.f32.gmra.mrb[30].mxu0 %v205_v22 }
  0x65   : > { %984 = vmatmul.mubr.f32.gmra.mrb[30].mxu1 %v237_v23 }
  0xfb   : > { %v892_v25 = vpop.f32.mrb[0].mxu0 }
  0xfc   : > { %v940_v26 = vpop.f32.mrb[0].mxu1  ;;  %v333_v27 = vadd.f32 %v892_v25, %v1203_v24  ;;  %v327_v29 = vpop.f32.mrb[1].mxu0 }
  0xfd   : > { %v493_v28 = vadd.f32 %v940_v26, %v1203_v24  ;;  %v487_v30 = vpop.f32.mrb[1].mxu1  ;;  %v328_v31 = vadd.f32 %v1203_v24, %v327_v29 }
  0xfe   : > { %v488_v32 = vadd.f32 %v1203_v24, %v487_v30  ;;  %647 = vst [vmem:[%s1210_s4 + $0x8] sm:$0xff] %v333_v27 }
  0xff   : > { %679 = vst [vmem:[%s1210_s4 + $0x108] sm:$0xff] %v493_v28  ;;  %646 = vst [vmem:[%s1210_s4] sm:$0xff] %v328_v31  ;;  %v895_v33 = vpop.f32.mrb[2].mxu0 }
 0x100   : > { %678 = vst [vmem:[%s1210_s4 + $0x100] sm:$0xff] %v488_v32  ;;  %v943_v34 = vpop.f32.mrb[2].mxu1  ;;  %v343_v35 = vadd.f32 %v895_v33, %v1203_v24  ;;  %v337_v37 = vpop.f32.mrb[3].mxu0 }
 0x101   : > { %v503_v36 = vadd.f32 %v943_v34, %v1203_v24  ;;  %v497_v38 = vpop.f32.mrb[3].mxu1  ;;  %v338_v39 = vadd.f32 %v1203_v24, %v337_v37 }
 0x102   : > { %v498_v40 = vadd.f32 %v1203_v24, %v497_v38  ;;  %649 = vst [vmem:[%s1210_s4 + $0x18] sm:$0xff] %v343_v35 }
 0x103   : > { %681 = vst [vmem:[%s1210_s4 + $0x118] sm:$0xff] %v503_v36  ;;  %648 = vst [vmem:[%s1210_s4 + $0x10] sm:$0xff] %v338_v39  ;;  %v898_v41 = vpop.f32.mrb[4].mxu0 }
 0x104   : > { %680 = vst [vmem:[%s1210_s4 + $0x110] sm:$0xff] %v498_v40  ;;  %v946_v42 = vpop.f32.mrb[4].mxu1  ;;  %v353_v43 = vadd.f32 %v898_v41, %v1203_v24  ;;  %v347_v45 = vpop.f32.mrb[5].mxu0 }
 0x105   : > { %v513_v44 = vadd.f32 %v946_v42, %v1203_v24  ;;  %v507_v46 = vpop.f32.mrb[5].mxu1  ;;  %v348_v47 = vadd.f32 %v1203_v24, %v347_v45 }
 0x106   : > { %v508_v48 = vadd.f32 %v1203_v24, %v507_v46  ;;  %651 = vst [vmem:[%s1210_s4 + $0x28] sm:$0xff] %v353_v43 }
 0x107   : > { %683 = vst [vmem:[%s1210_s4 + $0x128] sm:$0xff] %v513_v44  ;;  %650 = vst [vmem:[%s1210_s4 + $0x20] sm:$0xff] %v348_v47  ;;  %v901_v49 = vpop.f32.mrb[6].mxu0 }
 0x108   : > { %682 = vst [vmem:[%s1210_s4 + $0x120] sm:$0xff] %v508_v48  ;;  %v949_v50 = vpop.f32.mrb[6].mxu1  ;;  %v363_v51 = vadd.f32 %v901_v49, %v1203_v24  ;;  %v357_v53 = vpop.f32.mrb[7].mxu0 }
 0x109   : > { %v523_v52 = vadd.f32 %v949_v50, %v1203_v24  ;;  %v517_v54 = vpop.f32.mrb[7].mxu1  ;;  %v358_v55 = vadd.f32 %v1203_v24, %v357_v53 }
 0x10a   : > { %v518_v56 = vadd.f32 %v1203_v24, %v517_v54  ;;  %653 = vst [vmem:[%s1210_s4 + $0x38] sm:$0xff] %v363_v51 }
 0x10b   : > { %685 = vst [vmem:[%s1210_s4 + $0x138] sm:$0xff] %v523_v52  ;;  %652 = vst [vmem:[%s1210_s4 + $0x30] sm:$0xff] %v358_v55  ;;  %v904_v57 = vpop.f32.mrb[8].mxu0 }
 0x10c   : > { %684 = vst [vmem:[%s1210_s4 + $0x130] sm:$0xff] %v518_v56  ;;  %v952_v58 = vpop.f32.mrb[8].mxu1  ;;  %v373_v59 = vadd.f32 %v904_v57, %v1203_v24  ;;  %v367_v61 = vpop.f32.mrb[9].mxu0 }
 0x10d   : > { %v533_v60 = vadd.f32 %v952_v58, %v1203_v24  ;;  %v527_v62 = vpop.f32.mrb[9].mxu1  ;;  %v368_v63 = vadd.f32 %v1203_v24, %v367_v61 }
 0x10e   : > { %v528_v0 = vadd.f32 %v1203_v24, %v527_v62  ;;  %655 = vst [vmem:[%s1210_s4 + $0x48] sm:$0xff] %v373_v59 }
 0x10f   : > { %687 = vst [vmem:[%s1210_s4 + $0x148] sm:$0xff] %v533_v60  ;;  %654 = vst [vmem:[%s1210_s4 + $0x40] sm:$0xff] %v368_v63  ;;  %v907_v1 = vpop.f32.mrb[10].mxu0 }
 0x110   : > { %686 = vst [vmem:[%s1210_s4 + $0x140] sm:$0xff] %v528_v0  ;;  %v955_v2 = vpop.f32.mrb[10].mxu1  ;;  %v383_v3 = vadd.f32 %v907_v1, %v1203_v24  ;;  %v377_v5 = vpop.f32.mrb[11].mxu0 }
 0x111   : > { %v543_v4 = vadd.f32 %v955_v2, %v1203_v24  ;;  %v537_v6 = vpop.f32.mrb[11].mxu1  ;;  %v378_v7 = vadd.f32 %v1203_v24, %v377_v5 }
 0x112   : > { %v538_v8 = vadd.f32 %v1203_v24, %v537_v6  ;;  %657 = vst [vmem:[%s1210_s4 + $0x58] sm:$0xff] %v383_v3 }
 0x113   : > { %689 = vst [vmem:[%s1210_s4 + $0x158] sm:$0xff] %v543_v4  ;;  %656 = vst [vmem:[%s1210_s4 + $0x50] sm:$0xff] %v378_v7  ;;  %v910_v9 = vpop.f32.mrb[12].mxu0 }
 0x114   : > { %688 = vst [vmem:[%s1210_s4 + $0x150] sm:$0xff] %v538_v8  ;;  %v958_v10 = vpop.f32.mrb[12].mxu1  ;;  %v393_v11 = vadd.f32 %v910_v9, %v1203_v24  ;;  %v387_v13 = vpop.f32.mrb[13].mxu0 }
 0x115   : > { %v553_v12 = vadd.f32 %v958_v10, %v1203_v24  ;;  %v547_v14 = vpop.f32.mrb[13].mxu1  ;;  %v388_v15 = vadd.f32 %v1203_v24, %v387_v13 }
 0x116   : > { %v548_v16 = vadd.f32 %v1203_v24, %v547_v14  ;;  %659 = vst [vmem:[%s1210_s4 + $0x68] sm:$0xff] %v393_v11 }
 0x117   : > { %691 = vst [vmem:[%s1210_s4 + $0x168] sm:$0xff] %v553_v12  ;;  %658 = vst [vmem:[%s1210_s4 + $0x60] sm:$0xff] %v388_v15  ;;  %v913_v17 = vpop.f32.mrb[14].mxu0 }
 0x118   : > { %690 = vst [vmem:[%s1210_s4 + $0x160] sm:$0xff] %v548_v16  ;;  %v961_v18 = vpop.f32.mrb[14].mxu1  ;;  %v403_v19 = vadd.f32 %v913_v17, %v1203_v24  ;;  %v397_v21 = vpop.f32.mrb[15].mxu0 }
 0x119   : > { %v563_v20 = vadd.f32 %v961_v18, %v1203_v24  ;;  %v557_v22 = vpop.f32.mrb[15].mxu1  ;;  %v398_v23 = vadd.f32 %v1203_v24, %v397_v21 }
 0x11a   : > { %v558_v25 = vadd.f32 %v1203_v24, %v557_v22  ;;  %661 = vst [vmem:[%s1210_s4 + $0x78] sm:$0xff] %v403_v19 }
 0x11b   : > { %693 = vst [vmem:[%s1210_s4 + $0x178] sm:$0xff] %v563_v20  ;;  %660 = vst [vmem:[%s1210_s4 + $0x70] sm:$0xff] %v398_v23  ;;  %v916_v26 = vpop.f32.mrb[16].mxu0 }
 0x11c   : > { %692 = vst [vmem:[%s1210_s4 + $0x170] sm:$0xff] %v558_v25  ;;  %v964_v27 = vpop.f32.mrb[16].mxu1  ;;  %v413_v28 = vadd.f32 %v916_v26, %v1203_v24  ;;  %v407_v30 = vpop.f32.mrb[17].mxu0 }
 0x11d   : > { %v573_v29 = vadd.f32 %v964_v27, %v1203_v24  ;;  %v567_v31 = vpop.f32.mrb[17].mxu1  ;;  %v408_v32 = vadd.f32 %v1203_v24, %v407_v30 }
 0x11e   : > { %v568_v33 = vadd.f32 %v1203_v24, %v567_v31  ;;  %663 = vst [vmem:[%s1210_s4 + $0x88] sm:$0xff] %v413_v28 }
 0x11f   : > { %695 = vst [vmem:[%s1210_s4 + $0x188] sm:$0xff] %v573_v29  ;;  %662 = vst [vmem:[%s1210_s4 + $0x80] sm:$0xff] %v408_v32  ;;  %v919_v34 = vpop.f32.mrb[18].mxu0 }
 0x120   : > { %694 = vst [vmem:[%s1210_s4 + $0x180] sm:$0xff] %v568_v33  ;;  %v967_v35 = vpop.f32.mrb[18].mxu1  ;;  %v423_v36 = vadd.f32 %v919_v34, %v1203_v24  ;;  %v417_v38 = vpop.f32.mrb[19].mxu0 }
 0x121   : > { %v583_v37 = vadd.f32 %v967_v35, %v1203_v24  ;;  %v577_v39 = vpop.f32.mrb[19].mxu1  ;;  %v418_v40 = vadd.f32 %v1203_v24, %v417_v38 }
 0x122   : > { %v578_v41 = vadd.f32 %v1203_v24, %v577_v39  ;;  %665 = vst [vmem:[%s1210_s4 + $0x98] sm:$0xff] %v423_v36 }
 0x123   : > { %697 = vst [vmem:[%s1210_s4 + $0x198] sm:$0xff] %v583_v37  ;;  %664 = vst [vmem:[%s1210_s4 + $0x90] sm:$0xff] %v418_v40  ;;  %v922_v42 = vpop.f32.mrb[20].mxu0 }
 0x124   : > { %696 = vst [vmem:[%s1210_s4 + $0x190] sm:$0xff] %v578_v41  ;;  %v970_v43 = vpop.f32.mrb[20].mxu1  ;;  %v433_v44 = vadd.f32 %v922_v42, %v1203_v24  ;;  %v427_v46 = vpop.f32.mrb[21].mxu0 }
 0x125   : > { %v593_v45 = vadd.f32 %v970_v43, %v1203_v24  ;;  %v587_v47 = vpop.f32.mrb[21].mxu1  ;;  %v428_v48 = vadd.f32 %v1203_v24, %v427_v46 }
 0x126   : > { %v588_v49 = vadd.f32 %v1203_v24, %v587_v47  ;;  %667 = vst [vmem:[%s1210_s4 + $0xa8] sm:$0xff] %v433_v44 }
 0x127   : > { %699 = vst [vmem:[%s1210_s4 + $0x1a8] sm:$0xff] %v593_v45  ;;  %666 = vst [vmem:[%s1210_s4 + $0xa0] sm:$0xff] %v428_v48  ;;  %v925_v50 = vpop.f32.mrb[22].mxu0 }
 0x128   : > { %698 = vst [vmem:[%s1210_s4 + $0x1a0] sm:$0xff] %v588_v49  ;;  %v973_v51 = vpop.f32.mrb[22].mxu1  ;;  %v443_v52 = vadd.f32 %v925_v50, %v1203_v24  ;;  %v437_v54 = vpop.f32.mrb[23].mxu0 }
 0x129   : > { %v603_v53 = vadd.f32 %v973_v51, %v1203_v24  ;;  %v597_v55 = vpop.f32.mrb[23].mxu1  ;;  %v438_v56 = vadd.f32 %v1203_v24, %v437_v54 }
 0x12a   : > { %v598_v57 = vadd.f32 %v1203_v24, %v597_v55  ;;  %669 = vst [vmem:[%s1210_s4 + $0xb8] sm:$0xff] %v443_v52 }
 0x12b   : > { %701 = vst [vmem:[%s1210_s4 + $0x1b8] sm:$0xff] %v603_v53  ;;  %668 = vst [vmem:[%s1210_s4 + $0xb0] sm:$0xff] %v438_v56  ;;  %v928_v58 = vpop.f32.mrb[24].mxu0 }
 0x12c   : > { %700 = vst [vmem:[%s1210_s4 + $0x1b0] sm:$0xff] %v598_v57  ;;  %v976_v59 = vpop.f32.mrb[24].mxu1  ;;  %v453_v60 = vadd.f32 %v928_v58, %v1203_v24  ;;  %v447_v62 = vpop.f32.mrb[25].mxu0 }
 0x12d   : > { %v613_v61 = vadd.f32 %v976_v59, %v1203_v24  ;;  %v607_v63 = vpop.f32.mrb[25].mxu1  ;;  %v448_v0 = vadd.f32 %v1203_v24, %v447_v62 }
 0x12e   : > { %v608_v1 = vadd.f32 %v1203_v24, %v607_v63  ;;  %671 = vst [vmem:[%s1210_s4 + $0xc8] sm:$0xff] %v453_v60 }
 0x12f   : > { %703 = vst [vmem:[%s1210_s4 + $0x1c8] sm:$0xff] %v613_v61  ;;  %670 = vst [vmem:[%s1210_s4 + $0xc0] sm:$0xff] %v448_v0  ;;  %v931_v2 = vpop.f32.mrb[26].mxu0 }
 0x130   : > { %702 = vst [vmem:[%s1210_s4 + $0x1c0] sm:$0xff] %v608_v1  ;;  %v979_v3 = vpop.f32.mrb[26].mxu1  ;;  %v463_v4 = vadd.f32 %v931_v2, %v1203_v24  ;;  %v457_v6 = vpop.f32.mrb[27].mxu0 }
 0x131   : > { %v623_v5 = vadd.f32 %v979_v3, %v1203_v24  ;;  %v617_v7 = vpop.f32.mrb[27].mxu1  ;;  %v458_v8 = vadd.f32 %v1203_v24, %v457_v6 }
 0x132   : > { %v618_v9 = vadd.f32 %v1203_v24, %v617_v7  ;;  %673 = vst [vmem:[%s1210_s4 + $0xd8] sm:$0xff] %v463_v4 }
 0x133   : > { %705 = vst [vmem:[%s1210_s4 + $0x1d8] sm:$0xff] %v623_v5  ;;  %672 = vst [vmem:[%s1210_s4 + $0xd0] sm:$0xff] %v458_v8  ;;  %v934_v10 = vpop.f32.mrb[28].mxu0 }
 0x134   : > { %704 = vst [vmem:[%s1210_s4 + $0x1d0] sm:$0xff] %v618_v9  ;;  %v982_v11 = vpop.f32.mrb[28].mxu1  ;;  %v473_v12 = vadd.f32 %v934_v10, %v1203_v24  ;;  %v467_v14 = vpop.f32.mrb[29].mxu0 }
 0x135   : > { %v633_v13 = vadd.f32 %v982_v11, %v1203_v24  ;;  %v627_v15 = vpop.f32.mrb[29].mxu1  ;;  %v468_v16 = vadd.f32 %v1203_v24, %v467_v14 }
 0x136   : > { %v628_v17 = vadd.f32 %v1203_v24, %v627_v15  ;;  %675 = vst [vmem:[%s1210_s4 + $0xe8] sm:$0xff] %v473_v12 }
 0x137   : > { %707 = vst [vmem:[%s1210_s4 + $0x1e8] sm:$0xff] %v633_v13  ;;  %674 = vst [vmem:[%s1210_s4 + $0xe0] sm:$0xff] %v468_v16  ;;  %v937_v18 = vpop.f32.mrb[30].mxu0 }
 0x138   : > { %706 = vst [vmem:[%s1210_s4 + $0x1e0] sm:$0xff] %v628_v17  ;;  %v985_v19 = vpop.f32.mrb[30].mxu1  ;;  %v483_v20 = vadd.f32 %v937_v18, %v1203_v24  ;;  %v477_v22 = vpop.f32.mrb[31].mxu0 }
 0x139   : > { %v643_v21 = vadd.f32 %v985_v19, %v1203_v24  ;;  %v637_v23 = vpop.f32.mrb[31].mxu1  ;;  %v478_v25 = vadd.f32 %v1203_v24, %v477_v22 }
 0x13a   : > { %v638_v26 = vadd.f32 %v1203_v24, %v637_v23  ;;  %677 = vst [vmem:[%s1210_s4 + $0xf8] sm:$0xff] %v483_v20 }
 0x13b   : > { %709 = vst [vmem:[%s1210_s4 + $0x1f8] sm:$0xff] %v643_v21  ;;  %676 = vst [vmem:[%s1210_s4 + $0xf0] sm:$0xff] %v478_v25 }
 0x13c   : > { %708 = vst [vmem:[%s1210_s4 + $0x1f0] sm:$0xff] %v638_v26 }
 0x13d PF: > { %s13_s12 = sadd.s32 1, %s1048_s12  }
 0x13e   : > { %p10_p4 = scmp.ge.s32.totalorder %s13_s12, 6  }
 0x140   :  { %12 = sbr.rel (!%p10_p4) target bundleno = 1 (0x1), region = 62 }

// kernel: _lambda_.26
= control target key start
LH: loop header
LB: loop body
LE: loop exit
PB: predicated region body
PF: predicated region fallthrough
CT: control target
= control target key end

     0   :  { %s1445_s1 = inlined_call_operand.vmem [shape: bf16[128,128], index: 1, kind: input, shape index: {}]   ;;  %s1446_s0 = inlined_call_operand.vmem [shape: bf16[512,128], index: 0, kind: input, shape index: {}]   ;;  %s1447_s2 = inlined_call_operand.vmem [shape: f32[1,128], index: 2, kind: input, shape index: {}]   ;;  %s1448_s3 = inlined_call_operand.vmem [shape: f32[512,128], index: 3, kind: output, shape index: {}]  }
   0x1   :  { %v1004_v0 = vld [vmem:[%s1445_s1] sm:$0xff]   ;;  %v1005_v1 = vld [vmem:[%s1445_s1 + $0x8] sm:$0xff]   ;;  %v1006_v2 = vld [vmem:[%s1445_s1 + $0x10] sm:$0xff]  }
   0x2   :  { %908 = vmatprep.subr.bf16.mxu0 %v1004_v0  ;;  %988 = vmatprep.subr.bf16.mxu1 %v1004_v0  ;;  %v1007_v3 = vld [vmem:[%s1445_s1 + $0x18] sm:$0xff]   ;;  %v1012_v4 = vld [vmem:[%s1446_s0] sm:$0xff]   ;;  %v1009_v7 = vld [vmem:[%s1445_s1 + $0x28] sm:$0xff]  }
   0x3   :  { %909 = vmatpush3.bf16.msra.mxu0 %v1004_v0  ;;  %996 = vmatpush3.bf16.msra.mxu1 %v1004_v0  ;;  %v1013_v5 = vld [vmem:[%s1446_s0 + $0x80] sm:$0xff]   ;;  %v1010_v8 = vld [vmem:[%s1445_s1 + $0x30] sm:$0xff]   ;;  %v1011_v9 = vld [vmem:[%s1445_s1 + $0x38] sm:$0xff]  }
   0x4   :  { %910 = vmatprep.subr.bf16.mxu0 %v1005_v1  ;;  %989 = vmatprep.subr.bf16.mxu1 %v1005_v1  ;;  %v1008_v6 = vld [vmem:[%s1445_s1 + $0x20] sm:$0xff]   ;;  %v1014_v10 = vld [vmem:[%s1446_s0 + $0x8] sm:$0xff]   ;;  %v1016_v12 = vld [vmem:[%s1446_s0 + $0x10] sm:$0xff]  }
   0x5   :  { %924 = vmatprep.mubr.bf16.mxu0 %v1012_v4  ;;  %956 = vmatprep.mubr.bf16.mxu1 %v1013_v5  ;;  %v1015_v11 = vld [vmem:[%s1446_s0 + $0x88] sm:$0xff]   ;;  %v1017_v13 = vld [vmem:[%s1446_s0 + $0x90] sm:$0xff]   ;;  %v1018_v14 = vld [vmem:[%s1446_s0 + $0x18] sm:$0xff]  }
   0x6   :  { %v1019_v15 = vld [vmem:[%s1446_s0 + $0x98] sm:$0xff]   ;;  %v1020_v16 = vld [vmem:[%s1446_s0 + $0x20] sm:$0xff]   ;;  %v1022_v18 = vld [vmem:[%s1446_s0 + $0x28] sm:$0xff]  }
   0x7   :  { %911 = vmatpush3.bf16.msra.mxu0 %v1005_v1  ;;  %997 = vmatpush3.bf16.msra.mxu1 %v1005_v1  ;;  %v1021_v17 = vld [vmem:[%s1446_s0 + $0xa0] sm:$0xff]   ;;  %v1023_v19 = vld [vmem:[%s1446_s0 + $0xa8] sm:$0xff]   ;;  %v1024_v20 = vld [vmem:[%s1446_s0 + $0x30] sm:$0xff]  }
   0x8   :  { %912 = vmatprep.subr.bf16.mxu0 %v1006_v2  ;;  %990 = vmatprep.subr.bf16.mxu1 %v1006_v2  ;;  %v1025_v21 = vld [vmem:[%s1446_s0 + $0xb0] sm:$0xff]   ;;  %v1026_v22 = vld [vmem:[%s1446_s0 + $0x38] sm:$0xff]   ;;  %v1028_v24 = vld [vmem:[%s1446_s0 + $0x40] sm:$0xff]  }
   0x9   :  { %v1027_v23 = vld [vmem:[%s1446_s0 + $0xb8] sm:$0xff]   ;;  %v1029_v25 = vld [vmem:[%s1446_s0 + $0xc0] sm:$0xff]   ;;  %v1030_v26 = vld [vmem:[%s1446_s0 + $0x48] sm:$0xff]  }
   0xa   :  { %v1031_v27 = vld [vmem:[%s1446_s0 + $0xc8] sm:$0xff]   ;;  %v1032_v28 = vld [vmem:[%s1446_s0 + $0x50] sm:$0xff]   ;;  %v1034_v30 = vld [vmem:[%s1446_s0 + $0x58] sm:$0xff]  }
   0xb   :  { %913 = vmatpush3.bf16.msra.mxu0 %v1006_v2  ;;  %998 = vmatpush3.bf16.msra.mxu1 %v1006_v2  ;;  %v1033_v29 = vld [vmem:[%s1446_s0 + $0xd0] sm:$0xff]   ;;  %v1035_v31 = vld [vmem:[%s1446_s0 + $0xd8] sm:$0xff]   ;;  %v1036_v32 = vld [vmem:[%s1446_s0 + $0x60] sm:$0xff]  }
   0xc   :  { %914 = vmatprep.subr.bf16.mxu0 %v1007_v3  ;;  %991 = vmatprep.subr.bf16.mxu1 %v1007_v3  ;;  %v1037_v33 = vld [vmem:[%s1446_s0 + $0xe0] sm:$0xff]   ;;  %v1038_v34 = vld [vmem:[%s1446_s0 + $0x68] sm:$0xff]   ;;  %v1040_v36 = vld [vmem:[%s1446_s0 + $0x70] sm:$0xff]  }
   0xd   :  { %v1039_v35 = vld [vmem:[%s1446_s0 + $0xe8] sm:$0xff]   ;;  %v1041_v37 = vld [vmem:[%s1446_s0 + $0xf0] sm:$0xff]   ;;  %v1042_v38 = vld [vmem:[%s1446_s0 + $0x78] sm:$0xff]  }
   0xe   :  { %v1043_v39 = vld [vmem:[%s1446_s0 + $0xf8] sm:$0xff]   ;;  %v1187_v40 = vld [vmem:[%s1447_s2] ss:$0 sm:$0xff] }
   0xf   :  { %915 = vmatpush3.bf16.msra.mxu0 %v1007_v3  ;;  %999 = vmatpush3.bf16.msra.mxu1 %v1007_v3 }
  0x10   :  { %916 = vmatprep.subr.bf16.mxu0 %v1008_v6  ;;  %992 = vmatprep.subr.bf16.mxu1 %v1008_v6 }
  0x13   :  { %917 = vmatpush3.bf16.msra.mxu0 %v1008_v6  ;;  %1000 = vmatpush3.bf16.msra.mxu1 %v1008_v6 }
  0x14   :  { %918 = vmatprep.subr.bf16.mxu0 %v1009_v7  ;;  %993 = vmatprep.subr.bf16.mxu1 %v1009_v7 }
  0x17   :  { %919 = vmatpush3.bf16.msra.mxu0 %v1009_v7  ;;  %1001 = vmatpush3.bf16.msra.mxu1 %v1009_v7 }
  0x18   :  { %920 = vmatprep.subr.bf16.mxu0 %v1010_v8  ;;  %994 = vmatprep.subr.bf16.mxu1 %v1010_v8 }
  0x1b   :  { %921 = vmatpush3.bf16.msra.mxu0 %v1010_v8  ;;  %1002 = vmatpush3.bf16.msra.mxu1 %v1010_v8 }
  0x1c   :  { %922 = vmatprep.subr.bf16.mxu0 %v1011_v9  ;;  %995 = vmatprep.subr.bf16.mxu1 %v1011_v9 }
  0x1f   :  { %923 = vmatpush3.bf16.msra.mxu0 %v1011_v9  ;;  %1003 = vmatpush3.bf16.msra.mxu1 %v1011_v9 }
  0x22   :  { %925 = vmatmul.mubr.bf16.vlgmr.msra.gmra.mrb[0].mxu0 %v1014_v10  ;;  %957 = vmatmul.mubr.bf16.vlgmr.msra.gmra.mrb[0].mxu1 %v1015_v11 }
  0x23   :  { %928 = vmatprep.mubr.bf16.mxu0 %v1016_v12  ;;  %960 = vmatprep.mubr.bf16.mxu1 %v1017_v13 }
  0x2a   :  { %929 = vmatmul.mubr.bf16.gmra.mrb[4].mxu0 %v1018_v14  ;;  %961 = vmatmul.mubr.bf16.gmra.mrb[4].mxu1 %v1019_v15 }
  0x2b   :  { %932 = vmatprep.mubr.bf16.mxu0 %v1020_v16  ;;  %964 = vmatprep.mubr.bf16.mxu1 %v1021_v17 }
  0x32   :  { %933 = vmatmul.mubr.bf16.gmra.mrb[8].mxu0 %v1022_v18  ;;  %965 = vmatmul.mubr.bf16.gmra.mrb[8].mxu1 %v1023_v19 }
  0x33   :  { %936 = vmatprep.mubr.bf16.mxu0 %v1024_v20  ;;  %968 = vmatprep.mubr.bf16.mxu1 %v1025_v21 }
  0x3a   :  { %937 = vmatmul.mubr.bf16.gmra.mrb[12].mxu0 %v1026_v22  ;;  %969 = vmatmul.mubr.bf16.gmra.mrb[12].mxu1 %v1027_v23 }
  0x3b   :  { %940 = vmatprep.mubr.bf16.mxu0 %v1028_v24  ;;  %972 = vmatprep.mubr.bf16.mxu1 %v1029_v25 }
  0x42   :  { %941 = vmatmul.mubr.bf16.gmra.mrb[16].mxu0 %v1030_v26  ;;  %973 = vmatmul.mubr.bf16.gmra.mrb[16].mxu1 %v1031_v27 }
  0x43   :  { %944 = vmatprep.mubr.bf16.mxu0 %v1032_v28  ;;  %976 = vmatprep.mubr.bf16.mxu1 %v1033_v29 }
  0x4a   :  { %945 = vmatmul.mubr.bf16.gmra.mrb[20].mxu0 %v1034_v30  ;;  %977 = vmatmul.mubr.bf16.gmra.mrb[20].mxu1 %v1035_v31 }
  0x4b   :  { %948 = vmatprep.mubr.bf16.mxu0 %v1036_v32  ;;  %980 = vmatprep.mubr.bf16.mxu1 %v1037_v33 }
  0x52   :  { %949 = vmatmul.mubr.bf16.gmra.mrb[24].mxu0 %v1038_v34  ;;  %981 = vmatmul.mubr.bf16.gmra.mrb[24].mxu1 %v1039_v35 }
  0x53   :  { %952 = vmatprep.mubr.bf16.mxu0 %v1040_v36  ;;  %984 = vmatprep.mubr.bf16.mxu1 %v1041_v37 }
  0x5a   :  { %953 = vmatmul.mubr.bf16.gmra.mrb[28].mxu0 %v1042_v38  ;;  %985 = vmatmul.mubr.bf16.gmra.mrb[28].mxu1 %v1043_v39 }
  0xf5   :  { %v926_v41 = vpop.f32.mrb[0].mxu0  ;;  %v958_v42 = vpop.f32.mrb[0].mxu1 }
  0xf6   :  { %v385_v43 = vadd.f32 %v926_v41, %v1187_v40  ;;  %v513_v44 = vadd.f32 %v958_v42, %v1187_v40  ;;  %v376_v45 = vpop.f32.mrb[1].mxu0  ;;  %v504_v46 = vpop.f32.mrb[1].mxu1 }
  0xf7   :  { %v377_v47 = vadd.f32 %v1187_v40, %v376_v45  ;;  %v505_v48 = vadd.f32 %v1187_v40, %v504_v46  ;;  %v927_v49 = vpop.f32.mrb[2].mxu0  ;;  %v959_v50 = vpop.f32.mrb[2].mxu1 }
  0xf8   :  { %v633_v51 = vmul.f32 0.2, %v385_v43  ;;  %v665_v52 = vmul.f32 0.2, %v513_v44  ;;  %v388_v53 = vadd.f32 %v927_v49, %v1187_v40  ;;  %v516_v54 = vadd.f32 %v959_v50, %v1187_v40  ;;  %v379_v55 = vpop.f32.mrb[3].mxu0  ;;  %v507_v56 = vpop.f32.mrb[3].mxu1 }
  0xf9   :  { %v631_v57 = vmul.f32 0.2, %v377_v47  ;;  %v663_v58 = vmul.f32 0.2, %v505_v48  ;;  %v380_v59 = vadd.f32 %v1187_v40, %v379_v55  ;;  %v508_v60 = vadd.f32 %v1187_v40, %v507_v56 }
  0xfa   :  { %v697_v61 = vmax.f32 %v385_v43, %v633_v51  ;;  %v729_v62 = vmax.f32 %v513_v44, %v665_v52  ;;  %v634_v63 = vmul.f32 0.2, %v388_v53  ;;  %v666_v0 = vmul.f32 0.2, %v516_v54 }
  0xfb   :  { %v695_v1 = vmax.f32 %v377_v47, %v631_v57  ;;  %v727_v2 = vmax.f32 %v505_v48, %v663_v58  ;;  %v632_v3 = vmul.f32 0.2, %v380_v59  ;;  %v664_v4 = vmul.f32 0.2, %v508_v60 }
  0xfc   :  { %761 = vst [vmem:[%s1448_s3 + $0x10] sm:$0xff] %v697_v61  ;;  %793 = vst [vmem:[%s1448_s3 + $0x110] sm:$0xff] %v729_v62  ;;  %v698_v5 = vmax.f32 %v388_v53, %v634_v63  ;;  %v730_v6 = vmax.f32 %v516_v54, %v666_v0 }
  0xfd   :  { %759 = vst [vmem:[%s1448_s3] sm:$0xff] %v695_v1  ;;  %791 = vst [vmem:[%s1448_s3 + $0x100] sm:$0xff] %v727_v2  ;;  %v696_v7 = vmax.f32 %v380_v59, %v632_v3  ;;  %v728_v8 = vmax.f32 %v508_v60, %v664_v4  ;;  %v930_v9 = vpop.f32.mrb[4].mxu0  ;;  %v962_v10 = vpop.f32.mrb[4].mxu1 }
  0xfe   :  { %762 = vst [vmem:[%s1448_s3 + $0x18] sm:$0xff] %v698_v5  ;;  %794 = vst [vmem:[%s1448_s3 + $0x118] sm:$0xff] %v730_v6  ;;  %v401_v11 = vadd.f32 %v930_v9, %v1187_v40  ;;  %v529_v12 = vadd.f32 %v962_v10, %v1187_v40  ;;  %v392_v13 = vpop.f32.mrb[5].mxu0  ;;  %v520_v14 = vpop.f32.mrb[5].mxu1 }
  0xff   :  { %760 = vst [vmem:[%s1448_s3 + $0x8] sm:$0xff] %v696_v7  ;;  %792 = vst [vmem:[%s1448_s3 + $0x108] sm:$0xff] %v728_v8  ;;  %v393_v15 = vadd.f32 %v1187_v40, %v392_v13  ;;  %v521_v16 = vadd.f32 %v1187_v40, %v520_v14  ;;  %v931_v17 = vpop.f32.mrb[6].mxu0  ;;  %v963_v18 = vpop.f32.mrb[6].mxu1 }
 0x100   :  { %v637_v19 = vmul.f32 0.2, %v401_v11  ;;  %v669_v20 = vmul.f32 0.2, %v529_v12  ;;  %v404_v21 = vadd.f32 %v931_v17, %v1187_v40  ;;  %v532_v22 = vadd.f32 %v963_v18, %v1187_v40  ;;  %v395_v23 = vpop.f32.mrb[7].mxu0  ;;  %v523_v24 = vpop.f32.mrb[7].mxu1 }
 0x101   :  { %v635_v25 = vmul.f32 0.2, %v393_v15  ;;  %v667_v26 = vmul.f32 0.2, %v521_v16  ;;  %v396_v27 = vadd.f32 %v1187_v40, %v395_v23  ;;  %v524_v28 = vadd.f32 %v1187_v40, %v523_v24 }
 0x102   :  { %v701_v29 = vmax.f32 %v401_v11, %v637_v19  ;;  %v733_v30 = vmax.f32 %v529_v12, %v669_v20  ;;  %v638_v31 = vmul.f32 0.2, %v404_v21  ;;  %v670_v32 = vmul.f32 0.2, %v532_v22 }
 0x103   :  { %v699_v33 = vmax.f32 %v393_v15, %v635_v25  ;;  %v731_v34 = vmax.f32 %v521_v16, %v667_v26  ;;  %v636_v35 = vmul.f32 0.2, %v396_v27  ;;  %v668_v36 = vmul.f32 0.2, %v524_v28 }
 0x104   :  { %765 = vst [vmem:[%s1448_s3 + $0x30] sm:$0xff] %v701_v29  ;;  %797 = vst [vmem:[%s1448_s3 + $0x130] sm:$0xff] %v733_v30  ;;  %v702_v37 = vmax.f32 %v404_v21, %v638_v31  ;;  %v734_v38 = vmax.f32 %v532_v22, %v670_v32 }
 0x105   :  { %763 = vst [vmem:[%s1448_s3 + $0x20] sm:$0xff] %v699_v33  ;;  %795 = vst [vmem:[%s1448_s3 + $0x120] sm:$0xff] %v731_v34  ;;  %v700_v39 = vmax.f32 %v396_v27, %v636_v35  ;;  %v732_v41 = vmax.f32 %v524_v28, %v668_v36  ;;  %v934_v42 = vpop.f32.mrb[8].mxu0  ;;  %v966_v43 = vpop.f32.mrb[8].mxu1 }
 0x106   :  { %766 = vst [vmem:[%s1448_s3 + $0x38] sm:$0xff] %v702_v37  ;;  %798 = vst [vmem:[%s1448_s3 + $0x138] sm:$0xff] %v734_v38  ;;  %v417_v44 = vadd.f32 %v934_v42, %v1187_v40  ;;  %v545_v45 = vadd.f32 %v966_v43, %v1187_v40  ;;  %v408_v46 = vpop.f32.mrb[9].mxu0  ;;  %v536_v47 = vpop.f32.mrb[9].mxu1 }
 0x107   :  { %764 = vst [vmem:[%s1448_s3 + $0x28] sm:$0xff] %v700_v39  ;;  %796 = vst [vmem:[%s1448_s3 + $0x128] sm:$0xff] %v732_v41  ;;  %v409_v48 = vadd.f32 %v1187_v40, %v408_v46  ;;  %v537_v49 = vadd.f32 %v1187_v40, %v536_v47  ;;  %v935_v50 = vpop.f32.mrb[10].mxu0  ;;  %v967_v51 = vpop.f32.mrb[10].mxu1 }
 0x108   :  { %v641_v52 = vmul.f32 0.2, %v417_v44  ;;  %v673_v53 = vmul.f32 0.2, %v545_v45  ;;  %v420_v54 = vadd.f32 %v935_v50, %v1187_v40  ;;  %v548_v55 = vadd.f32 %v967_v51, %v1187_v40  ;;  %v411_v56 = vpop.f32.mrb[11].mxu0  ;;  %v539_v57 = vpop.f32.mrb[11].mxu1 }
 0x109   :  { %v639_v58 = vmul.f32 0.2, %v409_v48  ;;  %v671_v59 = vmul.f32 0.2, %v537_v49  ;;  %v412_v60 = vadd.f32 %v1187_v40, %v411_v56  ;;  %v540_v61 = vadd.f32 %v1187_v40, %v539_v57 }
 0x10a   :  { %v705_v62 = vmax.f32 %v417_v44, %v641_v52  ;;  %v737_v63 = vmax.f32 %v545_v45, %v673_v53  ;;  %v642_v0 = vmul.f32 0.2, %v420_v54  ;;  %v674_v1 = vmul.f32 0.2, %v548_v55 }
 0x10b   :  { %v703_v2 = vmax.f32 %v409_v48, %v639_v58  ;;  %v735_v3 = vmax.f32 %v537_v49, %v671_v59  ;;  %v640_v4 = vmul.f32 0.2, %v412_v60  ;;  %v672_v5 = vmul.f32 0.2, %v540_v61 }
 0x10c   :  { %769 = vst [vmem:[%s1448_s3 + $0x50] sm:$0xff] %v705_v62  ;;  %801 = vst [vmem:[%s1448_s3 + $0x150] sm:$0xff] %v737_v63  ;;  %v706_v6 = vmax.f32 %v420_v54, %v642_v0  ;;  %v738_v7 = vmax.f32 %v548_v55, %v674_v1 }
 0x10d   :  { %767 = vst [vmem:[%s1448_s3 + $0x40] sm:$0xff] %v703_v2  ;;  %799 = vst [vmem:[%s1448_s3 + $0x140] sm:$0xff] %v735_v3  ;;  %v704_v8 = vmax.f32 %v412_v60, %v640_v4  ;;  %v736_v9 = vmax.f32 %v540_v61, %v672_v5  ;;  %v938_v10 = vpop.f32.mrb[12].mxu0  ;;  %v970_v11 = vpop.f32.mrb[12].mxu1 }
 0x10e   :  { %770 = vst [vmem:[%s1448_s3 + $0x58] sm:$0xff] %v706_v6  ;;  %802 = vst [vmem:[%s1448_s3 + $0x158] sm:$0xff] %v738_v7  ;;  %v433_v12 = vadd.f32 %v938_v10, %v1187_v40  ;;  %v561_v13 = vadd.f32 %v970_v11, %v1187_v40  ;;  %v424_v14 = vpop.f32.mrb[13].mxu0  ;;  %v552_v15 = vpop.f32.mrb[13].mxu1 }
 0x10f   :  { %768 = vst [vmem:[%s1448_s3 + $0x48] sm:$0xff] %v704_v8  ;;  %800 = vst [vmem:[%s1448_s3 + $0x148] sm:$0xff] %v736_v9  ;;  %v425_v16 = vadd.f32 %v1187_v40, %v424_v14  ;;  %v553_v17 = vadd.f32 %v1187_v40, %v552_v15  ;;  %v939_v18 = vpop.f32.mrb[14].mxu0  ;;  %v971_v19 = vpop.f32.mrb[14].mxu1 }
 0x110   :  { %v645_v20 = vmul.f32 0.2, %v433_v12  ;;  %v677_v21 = vmul.f32 0.2, %v561_v13  ;;  %v436_v22 = vadd.f32 %v939_v18, %v1187_v40  ;;  %v564_v23 = vadd.f32 %v971_v19, %v1187_v40  ;;  %v427_v24 = vpop.f32.mrb[15].mxu0  ;;  %v555_v25 = vpop.f32.mrb[15].mxu1 }
 0x111   :  { %v643_v26 = vmul.f32 0.2, %v425_v16  ;;  %v675_v27 = vmul.f32 0.2, %v553_v17  ;;  %v428_v28 = vadd.f32 %v1187_v40, %v427_v24  ;;  %v556_v29 = vadd.f32 %v1187_v40, %v555_v25 }
 0x112   :  { %v709_v30 = vmax.f32 %v433_v12, %v645_v20  ;;  %v741_v31 = vmax.f32 %v561_v13, %v677_v21  ;;  %v646_v32 = vmul.f32 0.2, %v436_v22  ;;  %v678_v33 = vmul.f32 0.2, %v564_v23 }
 0x113   :  { %v707_v34 = vmax.f32 %v425_v16, %v643_v26  ;;  %v739_v35 = vmax.f32 %v553_v17, %v675_v27  ;;  %v644_v36 = vmul.f32 0.2, %v428_v28  ;;  %v676_v37 = vmul.f32 0.2, %v556_v29 }
 0x114   :  { %773 = vst [vmem:[%s1448_s3 + $0x70] sm:$0xff] %v709_v30  ;;  %805 = vst [vmem:[%s1448_s3 + $0x170] sm:$0xff] %v741_v31  ;;  %v710_v38 = vmax.f32 %v436_v22, %v646_v32  ;;  %v742_v39 = vmax.f32 %v564_v23, %v678_v33 }
 0x115   :  { %771 = vst [vmem:[%s1448_s3 + $0x60] sm:$0xff] %v707_v34  ;;  %803 = vst [vmem:[%s1448_s3 + $0x160] sm:$0xff] %v739_v35  ;;  %v708_v41 = vmax.f32 %v428_v28, %v644_v36  ;;  %v740_v42 = vmax.f32 %v556_v29, %v676_v37  ;;  %v942_v43 = vpop.f32.mrb[16].mxu0  ;;  %v974_v44 = vpop.f32.mrb[16].mxu1 }
 0x116   :  { %774 = vst [vmem:[%s1448_s3 + $0x78] sm:$0xff] %v710_v38  ;;  %806 = vst [vmem:[%s1448_s3 + $0x178] sm:$0xff] %v742_v39  ;;  %v449_v45 = vadd.f32 %v942_v43, %v1187_v40  ;;  %v577_v46 = vadd.f32 %v974_v44, %v1187_v40  ;;  %v440_v47 = vpop.f32.mrb[17].mxu0  ;;  %v568_v48 = vpop.f32.mrb[17].mxu1 }
 0x117   :  { %772 = vst [vmem:[%s1448_s3 + $0x68] sm:$0xff] %v708_v41  ;;  %804 = vst [vmem:[%s1448_s3 + $0x168] sm:$0xff] %v740_v42  ;;  %v441_v49 = vadd.f32 %v1187_v40, %v440_v47  ;;  %v569_v50 = vadd.f32 %v1187_v40, %v568_v48  ;;  %v943_v51 = vpop.f32.mrb[18].mxu0  ;;  %v975_v52 = vpop.f32.mrb[18].mxu1 }
 0x118   :  { %v649_v53 = vmul.f32 0.2, %v449_v45  ;;  %v681_v54 = vmul.f32 0.2, %v577_v46  ;;  %v452_v55 = vadd.f32 %v943_v51, %v1187_v40  ;;  %v580_v56 = vadd.f32 %v975_v52, %v1187_v40  ;;  %v443_v57 = vpop.f32.mrb[19].mxu0  ;;  %v571_v58 = vpop.f32.mrb[19].mxu1 }
 0x119   :  { %v647_v59 = vmul.f32 0.2, %v441_v49  ;;  %v679_v60 = vmul.f32 0.2, %v569_v50  ;;  %v444_v61 = vadd.f32 %v1187_v40, %v443_v57  ;;  %v572_v62 = vadd.f32 %v1187_v40, %v571_v58 }
 0x11a   :  { %v713_v63 = vmax.f32 %v449_v45, %v649_v53  ;;  %v745_v0 = vmax.f32 %v577_v46, %v681_v54  ;;  %v650_v1 = vmul.f32 0.2, %v452_v55  ;;  %v682_v2 = vmul.f32 0.2, %v580_v56 }
 0x11b   :  { %v711_v3 = vmax.f32 %v441_v49, %v647_v59  ;;  %v743_v4 = vmax.f32 %v569_v50, %v679_v60  ;;  %v648_v5 = vmul.f32 0.2, %v444_v61  ;;  %v680_v6 = vmul.f32 0.2, %v572_v62 }
 0x11c   :  { %777 = vst [vmem:[%s1448_s3 + $0x90] sm:$0xff] %v713_v63  ;;  %809 = vst [vmem:[%s1448_s3 + $0x190] sm:$0xff] %v745_v0  ;;  %v714_v7 = vmax.f32 %v452_v55, %v650_v1  ;;  %v746_v8 = vmax.f32 %v580_v56, %v682_v2 }
 0x11d   :  { %775 = vst [vmem:[%s1448_s3 + $0x80] sm:$0xff] %v711_v3  ;;  %807 = vst [vmem:[%s1448_s3 + $0x180] sm:$0xff] %v743_v4  ;;  %v712_v9 = vmax.f32 %v444_v61, %v648_v5  ;;  %v744_v10 = vmax.f32 %v572_v62, %v680_v6  ;;  %v946_v11 = vpop.f32.mrb[20].mxu0  ;;  %v978_v12 = vpop.f32.mrb[20].mxu1 }
 0x11e   :  { %778 = vst [vmem:[%s1448_s3 + $0x98] sm:$0xff] %v714_v7  ;;  %810 = vst [vmem:[%s1448_s3 + $0x198] sm:$0xff] %v746_v8  ;;  %v465_v13 = vadd.f32 %v946_v11, %v1187_v40  ;;  %v593_v14 = vadd.f32 %v978_v12, %v1187_v40  ;;  %v456_v15 = vpop.f32.mrb[21].mxu0  ;;  %v584_v16 = vpop.f32.mrb[21].mxu1 }
 0x11f   :  { %776 = vst [vmem:[%s1448_s3 + $0x88] sm:$0xff] %v712_v9  ;;  %808 = vst [vmem:[%s1448_s3 + $0x188] sm:$0xff] %v744_v10  ;;  %v457_v17 = vadd.f32 %v1187_v40, %v456_v15  ;;  %v585_v18 = vadd.f32 %v1187_v40, %v584_v16  ;;  %v947_v19 = vpop.f32.mrb[22].mxu0  ;;  %v979_v20 = vpop.f32.mrb[22].mxu1 }
 0x120   :  { %v653_v21 = vmul.f32 0.2, %v465_v13  ;;  %v685_v22 = vmul.f32 0.2, %v593_v14  ;;  %v468_v23 = vadd.f32 %v947_v19, %v1187_v40  ;;  %v596_v24 = vadd.f32 %v979_v20, %v1187_v40  ;;  %v459_v25 = vpop.f32.mrb[23].mxu0  ;;  %v587_v26 = vpop.f32.mrb[23].mxu1 }
 0x121   :  { %v651_v27 = vmul.f32 0.2, %v457_v17  ;;  %v683_v28 = vmul.f32 0.2, %v585_v18  ;;  %v460_v29 = vadd.f32 %v1187_v40, %v459_v25  ;;  %v588_v30 = vadd.f32 %v1187_v40, %v587_v26 }
 0x122   :  { %v717_v31 = vmax.f32 %v465_v13, %v653_v21  ;;  %v749_v32 = vmax.f32 %v593_v14, %v685_v22  ;;  %v654_v33 = vmul.f32 0.2, %v468_v23  ;;  %v686_v34 = vmul.f32 0.2, %v596_v24 }
 0x123   :  { %v715_v35 = vmax.f32 %v457_v17, %v651_v27  ;;  %v747_v36 = vmax.f32 %v585_v18, %v683_v28  ;;  %v652_v37 = vmul.f32 0.2, %v460_v29  ;;  %v684_v38 = vmul.f32 0.2, %v588_v30 }
 0x124   :  { %781 = vst [vmem:[%s1448_s3 + $0xb0] sm:$0xff] %v717_v31  ;;  %813 = vst [vmem:[%s1448_s3 + $0x1b0] sm:$0xff] %v749_v32  ;;  %v718_v39 = vmax.f32 %v468_v23, %v654_v33  ;;  %v750_v41 = vmax.f32 %v596_v24, %v686_v34 }
 0x125   :  { %779 = vst [vmem:[%s1448_s3 + $0xa0] sm:$0xff] %v715_v35  ;;  %811 = vst [vmem:[%s1448_s3 + $0x1a0] sm:$0xff] %v747_v36  ;;  %v716_v42 = vmax.f32 %v460_v29, %v652_v37  ;;  %v748_v43 = vmax.f32 %v588_v30, %v684_v38  ;;  %v950_v44 = vpop.f32.mrb[24].mxu0  ;;  %v982_v45 = vpop.f32.mrb[24].mxu1 }
 0x126   :  { %782 = vst [vmem:[%s1448_s3 + $0xb8] sm:$0xff] %v718_v39  ;;  %814 = vst [vmem:[%s1448_s3 + $0x1b8] sm:$0xff] %v750_v41  ;;  %v481_v46 = vadd.f32 %v950_v44, %v1187_v40  ;;  %v609_v47 = vadd.f32 %v982_v45, %v1187_v40  ;;  %v472_v48 = vpop.f32.mrb[25].mxu0  ;;  %v600_v49 = vpop.f32.mrb[25].mxu1 }
 0x127   :  { %780 = vst [vmem:[%s1448_s3 + $0xa8] sm:$0xff] %v716_v42  ;;  %812 = vst [vmem:[%s1448_s3 + $0x1a8] sm:$0xff] %v748_v43  ;;  %v473_v50 = vadd.f32 %v1187_v40, %v472_v48  ;;  %v601_v51 = vadd.f32 %v1187_v40, %v600_v49  ;;  %v951_v52 = vpop.f32.mrb[26].mxu0  ;;  %v983_v53 = vpop.f32.mrb[26].mxu1 }
 0x128   :  { %v657_v54 = vmul.f32 0.2, %v481_v46  ;;  %v689_v55 = vmul.f32 0.2, %v609_v47  ;;  %v484_v56 = vadd.f32 %v951_v52, %v1187_v40  ;;  %v612_v57 = vadd.f32 %v983_v53, %v1187_v40  ;;  %v475_v58 = vpop.f32.mrb[27].mxu0  ;;  %v603_v59 = vpop.f32.mrb[27].mxu1 }
 0x129   :  { %v655_v60 = vmul.f32 0.2, %v473_v50  ;;  %v687_v61 = vmul.f32 0.2, %v601_v51  ;;  %v476_v62 = vadd.f32 %v1187_v40, %v475_v58  ;;  %v604_v63 = vadd.f32 %v1187_v40, %v603_v59 }
 0x12a   :  { %v721_v0 = vmax.f32 %v481_v46, %v657_v54  ;;  %v753_v1 = vmax.f32 %v609_v47, %v689_v55  ;;  %v658_v2 = vmul.f32 0.2, %v484_v56  ;;  %v690_v3 = vmul.f32 0.2, %v612_v57 }
 0x12b   :  { %v719_v4 = vmax.f32 %v473_v50, %v655_v60  ;;  %v751_v5 = vmax.f32 %v601_v51, %v687_v61  ;;  %v656_v6 = vmul.f32 0.2, %v476_v62  ;;  %v688_v7 = vmul.f32 0.2, %v604_v63 }
 0x12c   :  { %785 = vst [vmem:[%s1448_s3 + $0xd0] sm:$0xff] %v721_v0  ;;  %817 = vst [vmem:[%s1448_s3 + $0x1d0] sm:$0xff] %v753_v1  ;;  %v722_v8 = vmax.f32 %v484_v56, %v658_v2  ;;  %v754_v9 = vmax.f32 %v612_v57, %v690_v3 }
 0x12d   :  { %783 = vst [vmem:[%s1448_s3 + $0xc0] sm:$0xff] %v719_v4  ;;  %815 = vst [vmem:[%s1448_s3 + $0x1c0] sm:$0xff] %v751_v5  ;;  %v720_v10 = vmax.f32 %v476_v62, %v656_v6  ;;  %v752_v11 = vmax.f32 %v604_v63, %v688_v7  ;;  %v954_v12 = vpop.f32.mrb[28].mxu0  ;;  %v986_v13 = vpop.f32.mrb[28].mxu1 }
 0x12e   :  { %786 = vst [vmem:[%s1448_s3 + $0xd8] sm:$0xff] %v722_v8  ;;  %818 = vst [vmem:[%s1448_s3 + $0x1d8] sm:$0xff] %v754_v9  ;;  %v497_v14 = vadd.f32 %v954_v12, %v1187_v40  ;;  %v625_v15 = vadd.f32 %v986_v13, %v1187_v40  ;;  %v488_v16 = vpop.f32.mrb[29].mxu0  ;;  %v616_v17 = vpop.f32.mrb[29].mxu1 }
 0x12f   :  { %784 = vst [vmem:[%s1448_s3 + $0xc8] sm:$0xff] %v720_v10  ;;  %816 = vst [vmem:[%s1448_s3 + $0x1c8] sm:$0xff] %v752_v11  ;;  %v489_v18 = vadd.f32 %v1187_v40, %v488_v16  ;;  %v617_v19 = vadd.f32 %v1187_v40, %v616_v17  ;;  %v955_v20 = vpop.f32.mrb[30].mxu0  ;;  %v987_v21 = vpop.f32.mrb[30].mxu1 }
 0x130   :  { %v661_v22 = vmul.f32 0.2, %v497_v14  ;;  %v693_v23 = vmul.f32 0.2, %v625_v15  ;;  %v500_v24 = vadd.f32 %v955_v20, %v1187_v40  ;;  %v628_v25 = vadd.f32 %v987_v21, %v1187_v40  ;;  %v491_v26 = vpop.f32.mrb[31].mxu0  ;;  %v619_v27 = vpop.f32.mrb[31].mxu1 }
 0x131   :  { %v659_v28 = vmul.f32 0.2, %v489_v18  ;;  %v691_v29 = vmul.f32 0.2, %v617_v19  ;;  %v492_v30 = vadd.f32 %v1187_v40, %v491_v26  ;;  %v620_v31 = vadd.f32 %v1187_v40, %v619_v27 }
 0x132   :  { %v725_v32 = vmax.f32 %v497_v14, %v661_v22  ;;  %v757_v33 = vmax.f32 %v625_v15, %v693_v23  ;;  %v662_v34 = vmul.f32 0.2, %v500_v24  ;;  %v694_v35 = vmul.f32 0.2, %v628_v25 }
 0x133   :  { %v723_v36 = vmax.f32 %v489_v18, %v659_v28  ;;  %v755_v37 = vmax.f32 %v617_v19, %v691_v29  ;;  %v660_v38 = vmul.f32 0.2, %v492_v30  ;;  %v692_v39 = vmul.f32 0.2, %v620_v31 }
 0x134   :  { %789 = vst [vmem:[%s1448_s3 + $0xf0] sm:$0xff] %v725_v32  ;;  %821 = vst [vmem:[%s1448_s3 + $0x1f0] sm:$0xff] %v757_v33  ;;  %v726_v41 = vmax.f32 %v500_v24, %v662_v34  ;;  %v758_v42 = vmax.f32 %v628_v25, %v694_v35 }
 0x135   :  { %787 = vst [vmem:[%s1448_s3 + $0xe0] sm:$0xff] %v723_v36  ;;  %819 = vst [vmem:[%s1448_s3 + $0x1e0] sm:$0xff] %v755_v37  ;;  %v724_v40 = vmax.f32 %v492_v30, %v660_v38  ;;  %v756_v43 = vmax.f32 %v620_v31, %v692_v39 }
 0x136   :  { %790 = vst [vmem:[%s1448_s3 + $0xf8] sm:$0xff] %v726_v41  ;;  %822 = vst [vmem:[%s1448_s3 + $0x1f8] sm:$0xff] %v758_v42 }
 0x137   :  { %788 = vst [vmem:[%s1448_s3 + $0xe8] sm:$0xff] %v724_v40  ;;  %820 = vst [vmem:[%s1448_s3 + $0x1e8] sm:$0xff] %v756_v43 }

// kernel: _lambda_.28
= control target key start
LH: loop header
LB: loop body
LE: loop exit
PB: predicated region body
PF: predicated region fallthrough
CT: control target
= control target key end

     0   :  { %s288_s0 = inlined_call_operand.vmem [shape: f32[128,128], index: 0, kind: input, shape index: {}]   ;;  %s289_s1 = inlined_call_operand.vmem [shape: f32[1,128], index: 1, kind: input, shape index: {}]   ;;  %s290_s2 = inlined_call_operand.vmem [shape: f32[1,128], index: 2, kind: input, shape index: {}]   ;;  %s291_s3 = inlined_call_operand.vmem [shape: f32[128,128], index: 3, kind: output, shape index: {}]  }
   0x1   :  { %v14_v0 = vld [vmem:[%s288_s0] sm:$0xff]  ;;  %v15_v4 = vld [vmem:[%s288_s0 + $0x8] sm:$0xff]  ;;  %v16_v5 = vld [vmem:[%s288_s0 + $0x10] sm:$0xff] }
   0x2   :  { %v156_v1 = vld [vmem:[%s289_s1] ss:$0 sm:$0xff]  ;;  %v17_v6 = vld [vmem:[%s288_s0 + $0x18] sm:$0xff]  ;;  %v19_v11 = vld [vmem:[%s288_s0 + $0x28] sm:$0xff] }
   0x3   :  { %v161_v2 = vld [vmem:[%s290_s2] ss:$0 sm:$0xff]  ;;  %v37_v3 = vmul.f32 %v156_v1, %v14_v0  ;;  %v38_v7 = vmul.f32 %v156_v1, %v15_v4  ;;  %v39_v8 = vmul.f32 %v156_v1, %v16_v5  ;;  %v40_v9 = vmul.f32 %v156_v1, %v17_v6  ;;  %v20_v12 = vld [vmem:[%s288_s0 + $0x30] sm:$0xff]  ;;  %v21_v17 = vld [vmem:[%s288_s0 + $0x38] sm:$0xff] }
   0x4   :  { %v18_v10 = vld [vmem:[%s288_s0 + $0x20] sm:$0xff]  ;;  %v42_v15 = vmul.f32 %v156_v1, %v19_v11  ;;  %v43_v16 = vmul.f32 %v156_v1, %v20_v12  ;;  %v44_v21 = vmul.f32 %v156_v1, %v21_v17  ;;  %v23_v27 = vld [vmem:[%s288_s0 + $0x48] sm:$0xff]  ;;  %v24_v28 = vld [vmem:[%s288_s0 + $0x50] sm:$0xff] }
   0x5   :  { %v60_v13 = vadd.f32 %v161_v2, %v37_v3  ;;  %v41_v14 = vmul.f32 %v156_v1, %v18_v10  ;;  %v61_v18 = vadd.f32 %v161_v2, %v38_v7  ;;  %v62_v19 = vadd.f32 %v161_v2, %v39_v8  ;;  %v22_v22 = vld [vmem:[%s288_s0 + $0x40] sm:$0xff]  ;;  %v25_v29 = vld [vmem:[%s288_s0 + $0x58] sm:$0xff]  ;;  %v27_v43 = vld [vmem:[%s288_s0 + $0x68] sm:$0xff] }
   0x6   :  { %v63_v20 = vadd.f32 %v161_v2, %v40_v9  ;;  %v65_v25 = vadd.f32 %v161_v2, %v42_v15  ;;  %v66_v26 = vadd.f32 %v161_v2, %v43_v16  ;;  %v67_v33 = vadd.f32 %v161_v2, %v44_v21  ;;  %v26_v42 = vld [vmem:[%s288_s0 + $0x60] sm:$0xff]  ;;  %v28_v44 = vld [vmem:[%s288_s0 + $0x70] sm:$0xff]  ;;  %v29_v49 = vld [vmem:[%s288_s0 + $0x78] sm:$0xff] }
   0x7   :  { %v76_v23 = vmul.f32 0.2, %v60_v13  ;;  %v64_v24 = vadd.f32 %v161_v2, %v41_v14  ;;  %v77_v30 = vmul.f32 0.2, %v61_v18  ;;  %v78_v31 = vmul.f32 0.2, %v62_v19 }
   0x8   :  { %v79_v32 = vmul.f32 0.2, %v63_v20  ;;  %v81_v36 = vmul.f32 0.2, %v65_v25  ;;  %v82_v37 = vmul.f32 0.2, %v66_v26  ;;  %v45_v48 = vmul.f32 %v156_v1, %v22_v22 }
   0x9   :  { %v92_v34 = vmax.f32 %v60_v13, %v76_v23  ;;  %v80_v35 = vmul.f32 0.2, %v64_v24  ;;  %v93_v38 = vmax.f32 %v61_v18, %v77_v30  ;;  %v94_v39 = vmax.f32 %v62_v19, %v78_v31 }
   0xa   :  { %v95_v40 = vmax.f32 %v63_v20, %v79_v32  ;;  %v83_v41 = vmul.f32 0.2, %v67_v33  ;;  %v97_v46 = vmax.f32 %v65_v25, %v81_v36  ;;  %v98_v47 = vmax.f32 %v66_v26, %v82_v37 }
   0xb   :  { %108 = vst [vmem:[%s291_s3] sm:$0xff] %v92_v34  ;;  %v96_v45 = vmax.f32 %v64_v24, %v80_v35  ;;  %109 = vst [vmem:[%s291_s3 + $0x8] sm:$0xff] %v93_v38  ;;  %v46_v51 = vmul.f32 %v156_v1, %v23_v27  ;;  %v47_v52 = vmul.f32 %v156_v1, %v24_v28 }
   0xc   :  { %110 = vst [vmem:[%s291_s3 + $0x10] sm:$0xff] %v94_v39  ;;  %111 = vst [vmem:[%s291_s3 + $0x18] sm:$0xff] %v95_v40  ;;  %v99_v50 = vmax.f32 %v67_v33, %v83_v41  ;;  %v48_v53 = vmul.f32 %v156_v1, %v25_v29  ;;  %v68_v54 = vadd.f32 %v161_v2, %v45_v48 }
   0xd   :  { %112 = vst [vmem:[%s291_s3 + $0x20] sm:$0xff] %v96_v45  ;;  %113 = vst [vmem:[%s291_s3 + $0x28] sm:$0xff] %v97_v46  ;;  %v49_v55 = vmul.f32 %v156_v1, %v26_v42  ;;  %v50_v56 = vmul.f32 %v156_v1, %v27_v43  ;;  %v51_v57 = vmul.f32 %v156_v1, %v28_v44 }
   0xe   :  { %114 = vst [vmem:[%s291_s3 + $0x30] sm:$0xff] %v98_v47  ;;  %115 = vst [vmem:[%s291_s3 + $0x38] sm:$0xff] %v99_v50  ;;  %v69_v58 = vadd.f32 %v161_v2, %v46_v51  ;;  %v70_v59 = vadd.f32 %v161_v2, %v47_v52  ;;  %v71_v60 = vadd.f32 %v161_v2, %v48_v53  ;;  %v84_v62 = vmul.f32 0.2, %v68_v54 }
   0xf   :  { %v52_v61 = vmul.f32 %v156_v1, %v29_v49  ;;  %v72_v63 = vadd.f32 %v161_v2, %v49_v55  ;;  %v73_v0 = vadd.f32 %v161_v2, %v50_v56  ;;  %v74_v3 = vadd.f32 %v161_v2, %v51_v57 }
  0x10   :  { %v85_v4 = vmul.f32 0.2, %v69_v58  ;;  %v86_v5 = vmul.f32 0.2, %v70_v59  ;;  %v87_v6 = vmul.f32 0.2, %v71_v60  ;;  %v100_v8 = vmax.f32 %v68_v54, %v84_v62 }
  0x11   :  { %v75_v7 = vadd.f32 %v161_v2, %v52_v61  ;;  %v88_v9 = vmul.f32 0.2, %v72_v63  ;;  %v89_v10 = vmul.f32 0.2, %v73_v0  ;;  %v90_v11 = vmul.f32 0.2, %v74_v3 }
  0x12   :  { %v101_v12 = vmax.f32 %v69_v58, %v85_v4  ;;  %v102_v13 = vmax.f32 %v70_v59, %v86_v5  ;;  %v103_v14 = vmax.f32 %v71_v60, %v87_v6  ;;  %116 = vst [vmem:[%s291_s3 + $0x40] sm:$0xff] %v100_v8 }
  0x13   :  { %v91_v1 = vmul.f32 0.2, %v75_v7  ;;  %v104_v15 = vmax.f32 %v72_v63, %v88_v9  ;;  %v105_v16 = vmax.f32 %v73_v0, %v89_v10  ;;  %v106_v17 = vmax.f32 %v74_v3, %v90_v11 }
  0x14   :  { %117 = vst [vmem:[%s291_s3 + $0x48] sm:$0xff] %v101_v12  ;;  %118 = vst [vmem:[%s291_s3 + $0x50] sm:$0xff] %v102_v13 }
  0x15   :  { %119 = vst [vmem:[%s291_s3 + $0x58] sm:$0xff] %v103_v14  ;;  %v107_v2 = vmax.f32 %v75_v7, %v91_v1  ;;  %120 = vst [vmem:[%s291_s3 + $0x60] sm:$0xff] %v104_v15 }
  0x16   :  { %121 = vst [vmem:[%s291_s3 + $0x68] sm:$0xff] %v105_v16  ;;  %122 = vst [vmem:[%s291_s3 + $0x70] sm:$0xff] %v106_v17 }
  0x17   :  { %123 = vst [vmem:[%s291_s3 + $0x78] sm:$0xff] %v107_v2 }

// kernel: _lambda_.27
= control target key start
LH: loop header
LB: loop body
LE: loop exit
PB: predicated region body
PF: predicated region fallthrough
CT: control target
= control target key end

     0   :  { %vm422_vm0 = vcmask 1040384   ;;  %s669_s1 = inlined_call_operand.vmem [shape: bf16[128,128], index: 1, kind: input, shape index: {}]   ;;  %s670_s0 = inlined_call_operand.vmem [shape: bf16[128,128], index: 0, kind: input, shape index: {}]   ;;  %s671_s2 = inlined_call_operand.vmem [shape: f32[1,128], index: 2, kind: input, shape index: {}]   ;;  %s672_s3 = inlined_call_operand.vmem [shape: f32[128,128], index: 3, kind: output, shape index: {0}]   ;;  %s673_s4 = inlined_call_operand.vmem [shape: f32[1,2,128], index: 4, kind: output, shape index: {1}]  }
   0x1   :  { %v514_v0 = vld [vmem:[%s669_s1] sm:$0xff]   ;;  %v515_v1 = vld [vmem:[%s669_s1 + $0x8] sm:$0xff]   ;;  %v516_v2 = vld [vmem:[%s669_s1 + $0x10] sm:$0xff]  }
   0x2   :  { %466 = vmatprep.subr.bf16.mxu0 %v514_v0  ;;  %498 = vmatprep.subr.bf16.mxu1 %v514_v0  ;;  %v517_v3 = vld [vmem:[%s669_s1 + $0x18] sm:$0xff]   ;;  %v522_v4 = vld [vmem:[%s670_s0] sm:$0xff]   ;;  %v519_v7 = vld [vmem:[%s669_s1 + $0x28] sm:$0xff]  }
   0x3   :  { %467 = vmatpush3.bf16.msra.mxu0 %v514_v0  ;;  %506 = vmatpush3.bf16.msra.mxu1 %v514_v0  ;;  %v518_v5 = vld [vmem:[%s669_s1 + $0x20] sm:$0xff]   ;;  %v520_v8 = vld [vmem:[%s669_s1 + $0x30] sm:$0xff]   ;;  %v521_v9 = vld [vmem:[%s669_s1 + $0x38] sm:$0xff]  }
   0x4   :  { %468 = vmatprep.subr.bf16.mxu0 %v515_v1  ;;  %499 = vmatprep.subr.bf16.mxu1 %v515_v1  ;;  %v526_v6 = vld [vmem:[%s670_s0 + $0x20] sm:$0xff]   ;;  %v523_v10 = vld [vmem:[%s670_s0 + $0x8] sm:$0xff]   ;;  %v524_v12 = vld [vmem:[%s670_s0 + $0x10] sm:$0xff]  }
   0x5   :  { %482 = vmatprep.mubr.bf16.mxu0 %v522_v4  ;;  %490 = vmatprep.mubr.bf16.mxu1 %v526_v6  ;;  %v527_v11 = vld [vmem:[%s670_s0 + $0x28] sm:$0xff]   ;;  %v528_v13 = vld [vmem:[%s670_s0 + $0x30] sm:$0xff]   ;;  %v525_v14 = vld [vmem:[%s670_s0 + $0x18] sm:$0xff]  }
   0x6   :  { %v529_v15 = vld [vmem:[%s670_s0 + $0x38] sm:$0xff]   ;;  %v433_v16 = vld [vmem:[%s671_s2] ss:$0 sm:$0xff] }
   0x7   :  { %469 = vmatpush3.bf16.msra.mxu0 %v515_v1  ;;  %507 = vmatpush3.bf16.msra.mxu1 %v515_v1 }
   0x8   :  { %470 = vmatprep.subr.bf16.mxu0 %v516_v2  ;;  %500 = vmatprep.subr.bf16.mxu1 %v516_v2 }
   0xb   :  { %471 = vmatpush3.bf16.msra.mxu0 %v516_v2  ;;  %508 = vmatpush3.bf16.msra.mxu1 %v516_v2 }
   0xc   :  { %472 = vmatprep.subr.bf16.mxu0 %v517_v3  ;;  %501 = vmatprep.subr.bf16.mxu1 %v517_v3 }
   0xf   :  { %473 = vmatpush3.bf16.msra.mxu0 %v517_v3  ;;  %509 = vmatpush3.bf16.msra.mxu1 %v517_v3 }
  0x10   :  { %474 = vmatprep.subr.bf16.mxu0 %v518_v5  ;;  %502 = vmatprep.subr.bf16.mxu1 %v518_v5 }
  0x13   :  { %475 = vmatpush3.bf16.msra.mxu0 %v518_v5  ;;  %510 = vmatpush3.bf16.msra.mxu1 %v518_v5 }
  0x14   :  { %476 = vmatprep.subr.bf16.mxu0 %v519_v7  ;;  %503 = vmatprep.subr.bf16.mxu1 %v519_v7 }
  0x17   :  { %477 = vmatpush3.bf16.msra.mxu0 %v519_v7  ;;  %511 = vmatpush3.bf16.msra.mxu1 %v519_v7 }
  0x18   :  { %478 = vmatprep.subr.bf16.mxu0 %v520_v8  ;;  %504 = vmatprep.subr.bf16.mxu1 %v520_v8 }
  0x1b   :  { %479 = vmatpush3.bf16.msra.mxu0 %v520_v8  ;;  %512 = vmatpush3.bf16.msra.mxu1 %v520_v8 }
  0x1c   :  { %480 = vmatprep.subr.bf16.mxu0 %v521_v9  ;;  %505 = vmatprep.subr.bf16.mxu1 %v521_v9 }
  0x1f   :  { %481 = vmatpush3.bf16.msra.mxu0 %v521_v9  ;;  %513 = vmatpush3.bf16.msra.mxu1 %v521_v9 }
  0x22   :  { %483 = vmatmul.mubr.bf16.vlgmr.msra.gmra.mrb[0].mxu0 %v523_v10  ;;  %491 = vmatmul.mubr.bf16.vlgmr.msra.gmra.mrb[0].mxu1 %v527_v11 }
  0x23   :  { %486 = vmatprep.mubr.bf16.mxu0 %v524_v12  ;;  %494 = vmatprep.mubr.bf16.mxu1 %v528_v13 }
  0x2a   :  { %487 = vmatmul.mubr.bf16.gmra.mrb[4].mxu0 %v525_v14  ;;  %495 = vmatmul.mubr.bf16.gmra.mrb[4].mxu1 %v529_v15 }
  0xf5   :  { %v484_v17 = vpop.f32.mrb[0].mxu0  ;;  %v492_v18 = vpop.f32.mrb[0].mxu1 }
  0xf6   :  { %v195_v19 = vadd.f32 %v484_v17, %v433_v16  ;;  %v186_v20 = vpop.f32.mrb[1].mxu0  ;;  %v606_v21 = vadd.f32 %v492_v18, %v433_v16  ;;  %v218_v22 = vpop.f32.mrb[1].mxu1 }
  0xf7   :  { %v187_v23 = vadd.f32 %v433_v16, %v186_v20  ;;  %v485_v24 = vpop.f32.mrb[2].mxu0  ;;  %v219_v25 = vadd.f32 %v433_v16, %v218_v22  ;;  %v493_v26 = vpop.f32.mrb[2].mxu1 }
  0xf8   :  { %251 = vst [vmem:[%s672_s3 + $0x10] sm:$0xff] %v195_v19  ;;  %v198_v27 = vadd.f32 %v485_v24, %v433_v16  ;;  %v189_v28 = vpop.f32.mrb[3].mxu0  ;;  %259 = vst [vmem:[%s672_s3 + $0x50] sm:$0xff] %v606_v21  ;;  %v615_v29 = vadd.f32 %v493_v26, %v433_v16  ;;  %v221_v30 = vpop.f32.mrb[3].mxu1  ;;  %v387_v36 = vmul.f32 %v195_v19, %v195_v19 }
  0xf9   :  { %249 = vst [vmem:[%s672_s3] sm:$0xff] %v187_v23  ;;  %v190_v31 = vadd.f32 %v433_v16, %v189_v28  ;;  %257 = vst [vmem:[%s672_s3 + $0x40] sm:$0xff] %v219_v25  ;;  %v222_v32 = vadd.f32 %v433_v16, %v221_v30  ;;  %v385_v33 = vmul.f32 %v187_v23, %v187_v23 }
  0xfa   :  { %252 = vst [vmem:[%s672_s3 + $0x18] sm:$0xff] %v198_v27  ;;  %260 = vst [vmem:[%s672_s3 + $0x58] sm:$0xff] %v615_v29  ;;  %v388_v41 = vmul.f32 %v198_v27, %v198_v27  ;;  %v393_v6 = vmul.f32 %v219_v25, %v219_v25  ;;  %v395_v12 = vmul.f32 %v606_v21, %v606_v21 }
  0xfb   :  { %250 = vst [vmem:[%s672_s3 + $0x8] sm:$0xff] %v190_v31  ;;  %v364_v34 = vadd.f32 %v190_v31, %v187_v23  ;;  %v386_v35 = vmul.f32 %v190_v31, %v190_v31  ;;  %258 = vst [vmem:[%s672_s3 + $0x48] sm:$0xff] %v222_v32  ;;  %v394_v11 = vmul.f32 %v222_v32, %v222_v32 }
  0xfc   :  { %v396_v15 = vmul.f32 %v615_v29, %v615_v29 }
  0xfd   :  { %v365_v37 = vadd.f32 %v364_v34, %v195_v19  ;;  %v401_v38 = vadd.f32 %v386_v35, %v385_v33  ;;  %v488_v39 = vpop.f32.mrb[4].mxu0  ;;  %v496_v40 = vpop.f32.mrb[4].mxu1 }
  0xfe   :  { %v211_v42 = vadd.f32 %v488_v39, %v433_v16  ;;  %v202_v43 = vpop.f32.mrb[5].mxu0  ;;  %v243_v44 = vadd.f32 %v496_v40, %v433_v16  ;;  %v234_v45 = vpop.f32.mrb[5].mxu1 }
  0xff   :  { %v402_v46 = vadd.f32 %v401_v38, %v387_v36  ;;  %v203_v47 = vadd.f32 %v433_v16, %v202_v43  ;;  %v366_v48 = vadd.f32 %v365_v37, %v198_v27  ;;  %v489_v49 = vpop.f32.mrb[6].mxu0  ;;  %v235_v50 = vadd.f32 %v433_v16, %v234_v45  ;;  %v497_v51 = vpop.f32.mrb[6].mxu1 }
 0x100   :  { %255 = vst [vmem:[%s672_s3 + $0x30] sm:$0xff] %v211_v42  ;;  %v214_v52 = vadd.f32 %v489_v49, %v433_v16  ;;  %v205_v53 = vpop.f32.mrb[7].mxu0  ;;  %263 = vst [vmem:[%s672_s3 + $0x70] sm:$0xff] %v243_v44  ;;  %v246_v54 = vadd.f32 %v497_v51, %v433_v16  ;;  %v237_v55 = vpop.f32.mrb[7].mxu1  ;;  %v391_v0 = vmul.f32 %v211_v42, %v211_v42 }
 0x101   :  { %253 = vst [vmem:[%s672_s3 + $0x20] sm:$0xff] %v203_v47  ;;  %v367_v56 = vadd.f32 %v366_v48, %v203_v47  ;;  %v389_v57 = vmul.f32 %v203_v47, %v203_v47  ;;  %v403_v58 = vadd.f32 %v402_v46, %v388_v41  ;;  %v206_v59 = vadd.f32 %v433_v16, %v205_v53 }
 0x102   :  { %261 = vst [vmem:[%s672_s3 + $0x60] sm:$0xff] %v235_v50  ;;  %256 = vst [vmem:[%s672_s3 + $0x38] sm:$0xff] %v214_v52  ;;  %v238_v60 = vadd.f32 %v433_v16, %v237_v55  ;;  %v392_v3 = vmul.f32 %v214_v52, %v214_v52  ;;  %v397_v18 = vmul.f32 %v235_v50, %v235_v50 }
 0x103   :  { %264 = vst [vmem:[%s672_s3 + $0x78] sm:$0xff] %v246_v54  ;;  %v404_v61 = vadd.f32 %v403_v58, %v389_v57  ;;  %254 = vst [vmem:[%s672_s3 + $0x28] sm:$0xff] %v206_v59  ;;  %v368_v62 = vadd.f32 %v367_v56, %v206_v59  ;;  %v390_v63 = vmul.f32 %v206_v59, %v206_v59 }
 0x104   :  { %262 = vst [vmem:[%s672_s3 + $0x68] sm:$0xff] %v238_v60  ;;  %v398_v24 = vmul.f32 %v238_v60, %v238_v60  ;;  %v400_v28 = vmul.f32 %v246_v54, %v246_v54 }
 0x105   :  { %v369_v1 = vadd.f32 %v368_v62, %v211_v42  ;;  %v405_v2 = vadd.f32 %v404_v61, %v390_v63 }
 0x107   :  { %v406_v4 = vadd.f32 %v405_v2, %v391_v0  ;;  %v370_v5 = vadd.f32 %v369_v1, %v214_v52 }
 0x109   :  { %v371_v7 = vadd.f32 %v370_v5, %v219_v25  ;;  %v407_v8 = vadd.f32 %v406_v4, %v392_v3  ;;  %v399_v25 = vmul.f32 %v243_v44, %v243_v44 }
 0x10b   :  { %v408_v9 = vadd.f32 %v407_v8, %v393_v6  ;;  %v372_v10 = vadd.f32 %v371_v7, %v222_v32 }
 0x10d   :  { %v373_v13 = vadd.f32 %v372_v10, %v606_v21  ;;  %v409_v14 = vadd.f32 %v408_v9, %v394_v11 }
 0x10f   :  { %v410_v16 = vadd.f32 %v409_v14, %v395_v12  ;;  %v374_v17 = vadd.f32 %v373_v13, %v615_v29 }
 0x111   :  { %v375_v19 = vadd.f32 %v374_v17, %v235_v50  ;;  %v411_v20 = vadd.f32 %v410_v16, %v396_v15 }
 0x113   :  { %v412_v22 = vadd.f32 %v411_v20, %v397_v18  ;;  %v376_v23 = vadd.f32 %v375_v19, %v238_v60 }
 0x115   :  { %v377_v26 = vadd.f32 %v376_v23, %v243_v44  ;;  %v413_v27 = vadd.f32 %v412_v22, %v398_v24 }
 0x117   :  { %v378_v30 = vadd.f32 %v377_v26, %v246_v54  ;;  %v414_v31 = vadd.f32 %v413_v27, %v399_v25 }
 0x119   :  { %v379_v21 = vrot.slane %v378_v30, 4  ;;  %v415_v32 = vadd.f32 %v414_v31, %v400_v28 }
 0x11b   :  { %v380_v33 = vadd.f32 %v379_v21, %v378_v30  ;;  %v416_v34 = vrot.slane %v415_v32, 4 }
 0x11d   :  { %v381_v35 = vrot.slane %v380_v33, 2  ;;  %v417_v36 = vadd.f32 %v416_v34, %v415_v32 }
 0x11f   :  { %v382_v37 = vadd.f32 %v381_v35, %v380_v33  ;;  %v418_v29 = vrot.slane %v417_v36, 2 }
 0x121   :  { %v383_v38 = vrot.slane %v382_v37, 1  ;;  %v419_v39 = vadd.f32 %v418_v29, %v417_v36 }
 0x123   :  { %v420_v40 = vrot.slane %v419_v39, 1  ;;  %v384_v41 = vadd.f32 %v383_v38, %v382_v37 }
 0x125   :  { %v421_v42 = vadd.f32 %v420_v40, %v419_v39 }
 0x127   :  { %v423_v43 = vsel %vm422_vm0, %v384_v41, %v421_v42 }
 0x128   :  { %424 = vst [vmem:[%s673_s4] sm:$0x3] %v423_v43 }

// kernel: _lambda_.30
= control target key start
LH: loop header
LB: loop body
LE: loop exit
PB: predicated region body
PF: predicated region fallthrough
CT: control target
= control target key end

     0   :  { %s108_s0 = inlined_call_operand.vmem [shape: f32[32,128], index: 0, kind: input, shape index: {}]   ;;  %s109_s1 = inlined_call_operand.vmem [shape: f32[1,128], index: 1, kind: input, shape index: {}]   ;;  %s110_s2 = inlined_call_operand.vmem [shape: f32[1,128], index: 2, kind: input, shape index: {}]   ;;  %s111_s3 = inlined_call_operand.vmem [shape: f32[32,128], index: 3, kind: output, shape index: {}]  }
   0x1   :  { %v14_v0 = vld [vmem:[%s108_s0] sm:$0xff]  ;;  %v15_v4 = vld [vmem:[%s108_s0 + $0x8] sm:$0xff]  ;;  %v16_v5 = vld [vmem:[%s108_s0 + $0x10] sm:$0xff] }
   0x2   :  { %v56_v1 = vld [vmem:[%s109_s1] ss:$0 sm:$0xff]  ;;  %v17_v6 = vld [vmem:[%s108_s0 + $0x18] sm:$0xff] }
   0x3   :  { %v57_v2 = vld [vmem:[%s110_s2] ss:$0 sm:$0xff]  ;;  %v25_v3 = vmul.f32 %v56_v1, %v14_v0  ;;  %v26_v7 = vmul.f32 %v56_v1, %v15_v4  ;;  %v27_v8 = vmul.f32 %v56_v1, %v16_v5  ;;  %v28_v9 = vmul.f32 %v56_v1, %v17_v6 }
   0x5   :  { %v36_v10 = vadd.f32 %v57_v2, %v25_v3  ;;  %v37_v11 = vadd.f32 %v57_v2, %v26_v7  ;;  %v38_v12 = vadd.f32 %v57_v2, %v27_v8  ;;  %v39_v13 = vadd.f32 %v57_v2, %v28_v9 }
   0x7   :  { %v40_v14 = vmul.f32 0.2, %v36_v10  ;;  %v41_v15 = vmul.f32 0.2, %v37_v11  ;;  %v42_v16 = vmul.f32 0.2, %v38_v12 }
   0x8   :  { %v43_v17 = vmul.f32 0.2, %v39_v13 }
   0x9   :  { %v44_v18 = vmax.f32 %v36_v10, %v40_v14  ;;  %v45_v19 = vmax.f32 %v37_v11, %v41_v15  ;;  %v46_v20 = vmax.f32 %v38_v12, %v42_v16 }
   0xa   :  { %v47_v21 = vmax.f32 %v39_v13, %v43_v17 }
   0xb   :  { %48 = vst [vmem:[%s111_s3] sm:$0xff] %v44_v18  ;;  %49 = vst [vmem:[%s111_s3 + $0x8] sm:$0xff] %v45_v19 }
   0xc   :  { %50 = vst [vmem:[%s111_s3 + $0x10] sm:$0xff] %v46_v20  ;;  %51 = vst [vmem:[%s111_s3 + $0x18] sm:$0xff] %v47_v21 }

// kernel: _lambda_.29
= control target key start
LH: loop header
LB: loop body
LE: loop exit
PB: predicated region body
PF: predicated region fallthrough
CT: control target
= control target key end

     0   :  { %vm206_vm0 = vcmask 1040384   ;;  %s341_s1 = inlined_call_operand.vmem [shape: bf16[128,128], index: 1, kind: input, shape index: {}]   ;;  %s342_s0 = inlined_call_operand.vmem [shape: bf16[32,128], index: 0, kind: input, shape index: {}]   ;;  %s343_s2 = inlined_call_operand.vmem [shape: f32[1,128], index: 2, kind: input, shape index: {}]   ;;  %s344_s3 = inlined_call_operand.vmem [shape: f32[32,128], index: 3, kind: output, shape index: {0}]   ;;  %s345_s4 = inlined_call_operand.vmem [shape: f32[1,2,128], index: 4, kind: output, shape index: {1}]  }
   0x1   :  { %v258_v0 = vld [vmem:[%s341_s1] sm:$0xff]   ;;  %v259_v1 = vld [vmem:[%s341_s1 + $0x8] sm:$0xff]   ;;  %v260_v2 = vld [vmem:[%s341_s1 + $0x10] sm:$0xff]  }
   0x2   :  { %238 = vmatprep.subr.bf16.mxu0 %v258_v0  ;;  %v261_v3 = vld [vmem:[%s341_s1 + $0x18] sm:$0xff]   ;;  %v266_v4 = vld [vmem:[%s342_s0] sm:$0xff]   ;;  %v263_v6 = vld [vmem:[%s341_s1 + $0x28] sm:$0xff]  }
   0x3   :  { %239 = vmatpush3.bf16.msra.mxu0 %v258_v0  ;;  %254 = vmatprep.mubr.bf16.mxu0 %v266_v4  ;;  %v262_v5 = vld [vmem:[%s341_s1 + $0x20] sm:$0xff]   ;;  %v264_v7 = vld [vmem:[%s341_s1 + $0x30] sm:$0xff]   ;;  %v265_v8 = vld [vmem:[%s341_s1 + $0x38] sm:$0xff]  }
   0x4   :  { %240 = vmatprep.subr.bf16.mxu0 %v259_v1  ;;  %v267_v9 = vld [vmem:[%s342_s0 + $0x8] sm:$0xff]   ;;  %v217_v10 = vld [vmem:[%s343_s2] ss:$0 sm:$0xff] }
   0x7   :  { %241 = vmatpush3.bf16.msra.mxu0 %v259_v1 }
   0x8   :  { %242 = vmatprep.subr.bf16.mxu0 %v260_v2 }
   0xb   :  { %243 = vmatpush3.bf16.msra.mxu0 %v260_v2 }
   0xc   :  { %244 = vmatprep.subr.bf16.mxu0 %v261_v3 }
   0xf   :  { %245 = vmatpush3.bf16.msra.mxu0 %v261_v3 }
  0x10   :  { %246 = vmatprep.subr.bf16.mxu0 %v262_v5 }
  0x13   :  { %247 = vmatpush3.bf16.msra.mxu0 %v262_v5 }
  0x14   :  { %248 = vmatprep.subr.bf16.mxu0 %v263_v6 }
  0x17   :  { %249 = vmatpush3.bf16.msra.mxu0 %v263_v6 }
  0x18   :  { %250 = vmatprep.subr.bf16.mxu0 %v264_v7 }
  0x1b   :  { %251 = vmatpush3.bf16.msra.mxu0 %v264_v7 }
  0x1c   :  { %252 = vmatprep.subr.bf16.mxu0 %v265_v8 }
  0x1f   :  { %253 = vmatpush3.bf16.msra.mxu0 %v265_v8 }
  0x22   :  { %255 = vmatmul.mubr.bf16.vlgmr.msra.gmra.mrb[0].mxu0 %v267_v9 }
  0xf5   :  { %v256_v11 = vpop.f32.mrb[0].mxu0 }
  0xf6   :  { %v147_v12 = vadd.f32 %v256_v11, %v217_v10  ;;  %v138_v13 = vpop.f32.mrb[1].mxu0 }
  0xf7   :  { %v139_v14 = vadd.f32 %v217_v10, %v138_v13  ;;  %v257_v15 = vpop.f32.mrb[2].mxu0 }
  0xf8   :  { %155 = vst [vmem:[%s344_s3 + $0x10] sm:$0xff] %v147_v12  ;;  %v150_v16 = vadd.f32 %v257_v15, %v217_v10  ;;  %v141_v17 = vpop.f32.mrb[3].mxu0  ;;  %v195_v22 = vmul.f32 %v147_v12, %v147_v12 }
  0xf9   :  { %153 = vst [vmem:[%s344_s3] sm:$0xff] %v139_v14  ;;  %v142_v18 = vadd.f32 %v217_v10, %v141_v17  ;;  %v193_v19 = vmul.f32 %v139_v14, %v139_v14 }
  0xfa   :  { %156 = vst [vmem:[%s344_s3 + $0x18] sm:$0xff] %v150_v16  ;;  %v196_v25 = vmul.f32 %v150_v16, %v150_v16 }
  0xfb   :  { %154 = vst [vmem:[%s344_s3 + $0x8] sm:$0xff] %v142_v18  ;;  %v184_v20 = vadd.f32 %v142_v18, %v139_v14  ;;  %v194_v21 = vmul.f32 %v142_v18, %v142_v18 }
  0xfd   :  { %v185_v23 = vadd.f32 %v184_v20, %v147_v12  ;;  %v197_v24 = vadd.f32 %v194_v21, %v193_v19 }
  0xff   :  { %v186_v26 = vadd.f32 %v185_v23, %v150_v16  ;;  %v198_v27 = vadd.f32 %v197_v24, %v195_v22 }
 0x101   :  { %v187_v28 = vrot.slane %v186_v26, 4  ;;  %v199_v29 = vadd.f32 %v198_v27, %v196_v25 }
 0x103   :  { %v188_v30 = vadd.f32 %v187_v28, %v186_v26  ;;  %v200_v31 = vrot.slane %v199_v29, 4 }
 0x105   :  { %v189_v32 = vrot.slane %v188_v30, 2  ;;  %v201_v33 = vadd.f32 %v200_v31, %v199_v29 }
 0x107   :  { %v190_v34 = vadd.f32 %v189_v32, %v188_v30  ;;  %v202_v35 = vrot.slane %v201_v33, 2 }
 0x109   :  { %v191_v36 = vrot.slane %v190_v34, 1  ;;  %v203_v37 = vadd.f32 %v202_v35, %v201_v33 }
 0x10b   :  { %v204_v38 = vrot.slane %v203_v37, 1  ;;  %v192_v39 = vadd.f32 %v191_v36, %v190_v34 }
 0x10d   :  { %v205_v40 = vadd.f32 %v204_v38, %v203_v37 }
 0x10f   :  { %v207_v41 = vsel %vm206_vm0, %v192_v39, %v205_v40 }
 0x110   :  { %208 = vst [vmem:[%s345_s4] sm:$0x3] %v207_v41 }

// kernel: _lambda_.32
= control target key start
LH: loop header
LB: loop body
LE: loop exit
PB: predicated region body
PF: predicated region fallthrough
CT: control target
= control target key end

     0   :  { %s96_s0 = inlined_call_operand.vmem [shape: f32[24,128], index: 0, kind: input, shape index: {}]   ;;  %s97_s1 = inlined_call_operand.vmem [shape: f32[1,128], index: 1, kind: input, shape index: {}]   ;;  %s98_s2 = inlined_call_operand.vmem [shape: f32[1,128], index: 2, kind: input, shape index: {}]   ;;  %s99_s3 = inlined_call_operand.vmem [shape: f32[24,128], index: 3, kind: output, shape index: {}]  }
   0x1   :  { %v14_v0 = vld [vmem:[%s96_s0] sm:$0xff]  ;;  %v15_v4 = vld [vmem:[%s96_s0 + $0x8] sm:$0xff]  ;;  %v16_v5 = vld [vmem:[%s96_s0 + $0x10] sm:$0xff] }
   0x2   :  { %v50_v1 = vld [vmem:[%s97_s1] ss:$0 sm:$0xff] }
   0x3   :  { %v51_v2 = vld [vmem:[%s98_s2] ss:$0 sm:$0xff]  ;;  %v24_v3 = vmul.f32 %v50_v1, %v14_v0  ;;  %v25_v6 = vmul.f32 %v50_v1, %v15_v4  ;;  %v26_v7 = vmul.f32 %v50_v1, %v16_v5 }
   0x5   :  { %v34_v8 = vadd.f32 %v51_v2, %v24_v3  ;;  %v35_v9 = vadd.f32 %v51_v2, %v25_v6  ;;  %v36_v10 = vadd.f32 %v51_v2, %v26_v7 }
   0x7   :  { %v37_v11 = vmul.f32 0.2, %v34_v8  ;;  %v38_v12 = vmul.f32 0.2, %v35_v9  ;;  %v39_v13 = vmul.f32 0.2, %v36_v10 }
   0x9   :  { %v40_v14 = vmax.f32 %v34_v8, %v37_v11  ;;  %v41_v15 = vmax.f32 %v35_v9, %v38_v12  ;;  %v42_v16 = vmax.f32 %v36_v10, %v39_v13 }
   0xb   :  { %43 = vst [vmem:[%s99_s3] sm:$0xff] %v40_v14  ;;  %44 = vst [vmem:[%s99_s3 + $0x8] sm:$0xff] %v41_v15 }
   0xc   :  { %45 = vst [vmem:[%s99_s3 + $0x10] sm:$0xff] %v42_v16 }

// kernel: _lambda_.31
= control target key start
LH: loop header
LB: loop body
LE: loop exit
PB: predicated region body
PF: predicated region fallthrough
CT: control target
= control target key end

     0   :  { %v223_v21 = vlaneseq  ;;  %vm263_vm1 = vcmask 1040384   ;;  %s457_s1 = inlined_call_operand.vmem [shape: bf16[256,128], index: 1, kind: input, shape index: {}]   ;;  %s458_s0 = inlined_call_operand.vmem [shape: bf16[24,256], index: 0, kind: input, shape index: {}]   ;;  %s459_s2 = inlined_call_operand.vmem [shape: f32[1,128], index: 2, kind: input, shape index: {}]   ;;  %s460_s3 = inlined_call_operand.vmem [shape: f32[24,128], index: 3, kind: output, shape index: {0}]   ;;  %s461_s4 = inlined_call_operand.vmem [shape: f32[1,2,128], index: 4, kind: output, shape index: {1}]  }
   0x1   :  { %v339_v0 = vld [vmem:[%s457_s1 + $0x40] sm:$0xff]   ;;  %v341_v2 = vld [vmem:[%s457_s1 + $0x48] sm:$0xff]   ;;  %v343_v4 = vld [vmem:[%s457_s1 + $0x50] sm:$0xff]  }
   0x2   :  { %v340_v1 = vld [vmem:[%s457_s1] sm:$0xff]   ;;  %295 = vmatprep.subr.bf16.mxu0 %v339_v0  ;;  %323 = vmatprep.subr.bf16.mxu1 %v339_v0  ;;  %v342_v3 = vld [vmem:[%s457_s1 + $0x8] sm:$0xff]   ;;  %v344_v5 = vld [vmem:[%s457_s1 + $0x10] sm:$0xff]   ;;  %v224_v22 = vshrl.u32 %v223_v21, 7 }
   0x3   :  { %296 = vmatpush3.bf16.msra.mxu0 %v340_v1  ;;  %331 = vmatpush3.bf16.msra.mxu1 %v340_v1  ;;  %v345_v6 = vld [vmem:[%s457_s1 + $0x58] sm:$0xff]   ;;  %v347_v8 = vld [vmem:[%s457_s1 + $0x60] sm:$0xff]   ;;  %v349_v10 = vld [vmem:[%s457_s1 + $0x68] sm:$0xff]  }
   0x4   :  { %297 = vmatprep.subr.bf16.mxu0 %v341_v2  ;;  %324 = vmatprep.subr.bf16.mxu1 %v341_v2  ;;  %v346_v7 = vld [vmem:[%s457_s1 + $0x18] sm:$0xff]   ;;  %v348_v9 = vld [vmem:[%s457_s1 + $0x20] sm:$0xff]   ;;  %v19_v12 = vld [vmem:[%s458_s0 + $0x10] sm:$0xff]  ;;  %v226_v23 = vadd.s32 16, %v224_v22 }
   0x5   :  { %v357_v11 = vld [vmem:[%s458_s0 + $0x4] ss:$8 sps:$4 sm:$0xff]   ;;  %v278_v13 = vcombine.high %v19_v12, %v19_v12  ;;  %v351_v15 = vld [vmem:[%s457_s1 + $0x70] sm:$0xff]   ;;  %v353_v17 = vld [vmem:[%s457_s1 + $0x78] sm:$0xff]   ;;  %v277_v20 = vcombine.low %v19_v12, %v19_v12 }
   0x6   :  { %v350_v14 = vld [vmem:[%s457_s1 + $0x28] sm:$0xff]   ;;  %204 = vmatprep.mubr.bf16.mxu0 %v357_v11  ;;  %v352_v16 = vld [vmem:[%s457_s1 + $0x30] sm:$0xff]   ;;  %v354_v18 = vld [vmem:[%s457_s1 + $0x38] sm:$0xff]   ;;  %vm234_vm0 = vcmp.lt.s32.totalorder %v226_v23, 18 }
   0x7   :  { %298 = vmatpush3.bf16.msra.mxu0 %v342_v3  ;;  %332 = vmatpush3.bf16.msra.mxu1 %v342_v3  ;;  %v355_v19 = vld [vmem:[%s458_s0] ss:$8 sps:$4 sm:$0xff]  }
   0x8   :  { %299 = vmatprep.subr.bf16.mxu0 %v343_v4  ;;  %325 = vmatprep.subr.bf16.mxu1 %v343_v4  ;;  %v274_v26 = vld [vmem:[%s459_s2] ss:$0 sm:$0xff] }
   0x9   :  { %212 = vmatprep.mubr.bf16.mxu1 %v278_v13 }
   0xb   :  { %300 = vmatpush3.bf16.msra.mxu0 %v344_v5  ;;  %333 = vmatpush3.bf16.msra.mxu1 %v344_v5 }
   0xc   :  { %301 = vmatprep.subr.bf16.mxu0 %v345_v6  ;;  %326 = vmatprep.subr.bf16.mxu1 %v345_v6 }
   0xf   :  { %302 = vmatpush3.bf16.msra.mxu0 %v346_v7  ;;  %334 = vmatpush3.bf16.msra.mxu1 %v346_v7 }
  0x10   :  { %303 = vmatprep.subr.bf16.mxu0 %v347_v8  ;;  %327 = vmatprep.subr.bf16.mxu1 %v347_v8 }
  0x13   :  { %304 = vmatpush3.bf16.msra.mxu0 %v348_v9  ;;  %335 = vmatpush3.bf16.msra.mxu1 %v348_v9 }
  0x14   :  { %305 = vmatprep.subr.bf16.mxu0 %v349_v10  ;;  %328 = vmatprep.subr.bf16.mxu1 %v349_v10 }
  0x17   :  { %306 = vmatpush3.bf16.msra.mxu0 %v350_v14  ;;  %336 = vmatpush3.bf16.msra.mxu1 %v350_v14 }
  0x18   :  { %307 = vmatprep.subr.bf16.mxu0 %v351_v15  ;;  %329 = vmatprep.subr.bf16.mxu1 %v351_v15 }
  0x1b   :  { %308 = vmatpush3.bf16.msra.mxu0 %v352_v16  ;;  %337 = vmatpush3.bf16.msra.mxu1 %v352_v16 }
  0x1c   :  { %309 = vmatprep.subr.bf16.mxu0 %v353_v17  ;;  %330 = vmatprep.subr.bf16.mxu1 %v353_v17 }
  0x1f   :  { %310 = vmatpush3.bf16.msra.mxu0 %v354_v18  ;;  %338 = vmatpush3.bf16.msra.mxu1 %v354_v18 }
  0x22   :  { %205 = vmatmul.mubr.bf16.vlgmr.msra.gmra.mrb[0].mxu0 %v355_v19  ;;  %213 = vmatmul.mubr.bf16.vlgmr.msra.gmra.mrb[0].mxu1 %v277_v20 }
  0xf5   :  { %v311_v24 = vpop.f32.mrb[0].mxu0  ;;  %v317_v25 = vpop.f32.mrb[0].mxu1 }
  0xf6   :  { %v312_v27 = vpop.f32.mrb[1].mxu0  ;;  %v318_v28 = vpop.f32.mrb[1].mxu1 }
  0xf7   :  { %v313_v29 = vadd.f32 %v312_v27, %v311_v24  ;;  %v319_v30 = vadd.f32 %v318_v28, %v317_v25  ;;  %v314_v31 = vpop.f32.mrb[2].mxu0  ;;  %v320_v32 = vpop.f32.mrb[2].mxu1 }
  0xf8   :  { %v315_v33 = vpop.f32.mrb[3].mxu0  ;;  %v321_v34 = vpop.f32.mrb[3].mxu1 }
  0xf9   :  { %v207_v35 = vadd.f32 %v313_v29, %v274_v26  ;;  %v215_v36 = vadd.f32 %v319_v30, %v274_v26  ;;  %v316_v37 = vadd.f32 %v315_v33, %v314_v31 }
  0xfb   :  { %220 = vst [vmem:[%s460_s3] sm:$0xff] %v207_v35  ;;  %222 = vst [vmem:[%s460_s3 + $0x10] sm:$0xff] %v215_v36  ;;  %v243_v38 = vsel %vm234_vm0, %v215_v36, 0.0  ;;  %v210_v39 = vadd.f32 %v316_v37, %v274_v26  ;;  %v252_v40 = vmul.f32 %v207_v35, %v207_v35 }
  0xfc   :  { %v254_v41 = vmul.f32 %v243_v38, %v243_v38 }
  0xfd   :  { %221 = vst [vmem:[%s460_s3 + $0x8] sm:$0xff] %v210_v39  ;;  %v244_v42 = vadd.f32 %v210_v39, %v207_v35  ;;  %v253_v43 = vmul.f32 %v210_v39, %v210_v39 }
  0xff   :  { %v245_v44 = vadd.f32 %v244_v42, %v243_v38  ;;  %v255_v45 = vadd.f32 %v253_v43, %v252_v40 }
 0x101   :  { %v246_v46 = vrot.slane %v245_v44, 4  ;;  %v256_v47 = vadd.f32 %v255_v45, %v254_v41 }
 0x103   :  { %v247_v48 = vadd.f32 %v246_v46, %v245_v44  ;;  %v257_v49 = vrot.slane %v256_v47, 4 }
 0x105   :  { %v248_v50 = vrot.slane %v247_v48, 2  ;;  %v258_v51 = vadd.f32 %v257_v49, %v256_v47 }
 0x107   :  { %v249_v52 = vadd.f32 %v248_v50, %v247_v48  ;;  %v259_v53 = vrot.slane %v258_v51, 2 }
 0x109   :  { %v250_v54 = vrot.slane %v249_v52, 1  ;;  %v260_v55 = vadd.f32 %v259_v53, %v258_v51 }
 0x10b   :  { %v261_v56 = vrot.slane %v260_v55, 1  ;;  %v251_v57 = vadd.f32 %v250_v54, %v249_v52 }
 0x10d   :  { %v262_v58 = vadd.f32 %v261_v56, %v260_v55 }
 0x10f   :  { %v264_v59 = vsel %vm263_vm1, %v251_v57, %v262_v58 }
 0x110   :  { %265 = vst [vmem:[%s461_s4] sm:$0x3] %v264_v59 }

// kernel: _lambda_.33
= control target key start
LH: loop header
LB: loop body
LE: loop exit
PB: predicated region body
PF: predicated region fallthrough
CT: control target
= control target key end

     0   :  { %s624_s1 = inlined_call_operand.vmem [shape: bf16[512,128], index: 1, kind: input, shape index: {}]   ;;  %s625_s0 = inlined_call_operand.vmem [shape: bf16[8,512], index: 0, kind: input, shape index: {}]   ;;  %s626_s2 = inlined_call_operand.vmem [shape: f32[1,128], index: 2, kind: input, shape index: {}]   ;;  %s627_s3 = inlined_call_operand.vmem [shape: f32[8,128], index: 3, kind: output, shape index: {}]  }
   0x1   :  { %v460_v0 = vld [vmem:[%s624_s1 + $0x40] sm:$0xff]   ;;  %v464_v4 = vld [vmem:[%s624_s1 + $0x48] sm:$0xff]   ;;  %v468_v8 = vld [vmem:[%s624_s1 + $0x50] sm:$0xff]  }
   0x2   :  { %v461_v1 = vld [vmem:[%s624_s1 + $0xc0] sm:$0xff]   ;;  %416 = vmatprep.subr.bf16.mxu0 %v460_v0  ;;  %v465_v5 = vld [vmem:[%s624_s1 + $0xc8] sm:$0xff]   ;;  %v469_v9 = vld [vmem:[%s624_s1 + $0xd0] sm:$0xff]  }
   0x3   :  { %v462_v2 = vld [vmem:[%s624_s1] sm:$0xff]   ;;  %438 = vmatprep.subr.bf16.mxu1 %v461_v1  ;;  %v466_v6 = vld [vmem:[%s624_s1 + $0x8] sm:$0xff]   ;;  %v470_v10 = vld [vmem:[%s624_s1 + $0x10] sm:$0xff]  }
   0x4   :  { %v463_v3 = vld [vmem:[%s624_s1 + $0x80] sm:$0xff]   ;;  %417 = vmatpush3.bf16.msra.mxu0 %v462_v2  ;;  %v467_v7 = vld [vmem:[%s624_s1 + $0x88] sm:$0xff]   ;;  %v471_v11 = vld [vmem:[%s624_s1 + $0x90] sm:$0xff]  }
   0x5   :  { %439 = vmatpush3.bf16.msra.mxu1 %v463_v3  ;;  %418 = vmatprep.subr.bf16.mxu0 %v464_v4  ;;  %v472_v12 = vld [vmem:[%s624_s1 + $0x58] sm:$0xff]   ;;  %v476_v16 = vld [vmem:[%s624_s1 + $0x60] sm:$0xff]   ;;  %v480_v20 = vld [vmem:[%s624_s1 + $0x68] sm:$0xff]  }
   0x6   :  { %440 = vmatprep.subr.bf16.mxu1 %v465_v5  ;;  %v473_v13 = vld [vmem:[%s624_s1 + $0xd8] sm:$0xff]   ;;  %v477_v17 = vld [vmem:[%s624_s1 + $0xe0] sm:$0xff]   ;;  %v481_v21 = vld [vmem:[%s624_s1 + $0xe8] sm:$0xff]  }
   0x7   :  { %v474_v14 = vld [vmem:[%s624_s1 + $0x18] sm:$0xff]   ;;  %v478_v18 = vld [vmem:[%s624_s1 + $0x20] sm:$0xff]   ;;  %v482_v22 = vld [vmem:[%s624_s1 + $0x28] sm:$0xff]  }
   0x8   :  { %419 = vmatpush3.bf16.msra.mxu0 %v466_v6  ;;  %v475_v15 = vld [vmem:[%s624_s1 + $0x98] sm:$0xff]   ;;  %v479_v19 = vld [vmem:[%s624_s1 + $0xa0] sm:$0xff]   ;;  %v483_v23 = vld [vmem:[%s624_s1 + $0xa8] sm:$0xff]  }
   0x9   :  { %441 = vmatpush3.bf16.msra.mxu1 %v467_v7  ;;  %420 = vmatprep.subr.bf16.mxu0 %v468_v8  ;;  %v484_v24 = vld [vmem:[%s624_s1 + $0x70] sm:$0xff]   ;;  %v488_v28 = vld [vmem:[%s624_s1 + $0x78] sm:$0xff]   ;;  %v15_v32 = vld [vmem:[%s625_s0] sm:$0xff] }
   0xa   :  { %442 = vmatprep.subr.bf16.mxu1 %v469_v9  ;;  %v485_v25 = vld [vmem:[%s624_s1 + $0xf0] sm:$0xff]   ;;  %v489_v29 = vld [vmem:[%s624_s1 + $0xf8] sm:$0xff]   ;;  %v16_v33 = vld [vmem:[%s625_s0 + $0x8] sm:$0xff]  ;;  %v380_v34 = vcombine.low %v15_v32, %v15_v32  ;;  %v381_v35 = vcombine.high %v15_v32, %v15_v32 }
   0xb   :  { %v486_v26 = vld [vmem:[%s624_s1 + $0x30] sm:$0xff]   ;;  %v490_v30 = vld [vmem:[%s624_s1 + $0x38] sm:$0xff]   ;;  %v382_v36 = vcombine.low %v16_v33, %v16_v33  ;;  %v383_v37 = vcombine.high %v16_v33, %v16_v33  ;;  %v379_v40 = vld [vmem:[%s626_s2] ss:$0 sm:$0xff] }
   0xc   :  { %421 = vmatpush3.bf16.msra.mxu0 %v470_v10  ;;  %v487_v27 = vld [vmem:[%s624_s1 + $0xb0] sm:$0xff]   ;;  %v491_v31 = vld [vmem:[%s624_s1 + $0xb8] sm:$0xff]   ;;  %326 = vmatprep.mubr.bf16.mxu0 %v381_v35 }
   0xd   :  { %443 = vmatpush3.bf16.msra.mxu1 %v471_v11  ;;  %422 = vmatprep.subr.bf16.mxu0 %v472_v12 }
   0xe   :  { %444 = vmatprep.subr.bf16.mxu1 %v473_v13  ;;  %366 = vmatprep.mubr.bf16.mxu1 %v383_v37 }
  0x10   :  { %423 = vmatpush3.bf16.msra.mxu0 %v474_v14 }
  0x11   :  { %445 = vmatpush3.bf16.msra.mxu1 %v475_v15  ;;  %424 = vmatprep.subr.bf16.mxu0 %v476_v16 }
  0x12   :  { %446 = vmatprep.subr.bf16.mxu1 %v477_v17 }
  0x14   :  { %425 = vmatpush3.bf16.msra.mxu0 %v478_v18 }
  0x15   :  { %447 = vmatpush3.bf16.msra.mxu1 %v479_v19  ;;  %426 = vmatprep.subr.bf16.mxu0 %v480_v20 }
  0x16   :  { %448 = vmatprep.subr.bf16.mxu1 %v481_v21 }
  0x18   :  { %427 = vmatpush3.bf16.msra.mxu0 %v482_v22 }
  0x19   :  { %449 = vmatpush3.bf16.msra.mxu1 %v483_v23  ;;  %428 = vmatprep.subr.bf16.mxu0 %v484_v24 }
  0x1a   :  { %450 = vmatprep.subr.bf16.mxu1 %v485_v25 }
  0x1c   :  { %429 = vmatpush3.bf16.msra.mxu0 %v486_v26 }
  0x1d   :  { %451 = vmatpush3.bf16.msra.mxu1 %v487_v27  ;;  %430 = vmatprep.subr.bf16.mxu0 %v488_v28 }
  0x1e   :  { %452 = vmatprep.subr.bf16.mxu1 %v489_v29 }
  0x20   :  { %431 = vmatpush3.bf16.msra.mxu0 %v490_v30 }
  0x21   :  { %453 = vmatpush3.bf16.msra.mxu1 %v491_v31 }
  0x23   :  { %327 = vmatmul.mubr.bf16.vlgmr.msra.gmra.mrb[0].mxu0 %v380_v34 }
  0x24   :  { %367 = vmatmul.mubr.bf16.vlgmr.msra.gmra.mrb[0].mxu1 %v382_v36 }
  0xf6   :  { %v432_v38 = vpop.f32.mrb[0].mxu0 }
  0xf7   :  { %v454_v39 = vpop.f32.mrb[0].mxu1  ;;  %v433_v41 = vpop.f32.mrb[1].mxu0 }
  0xf8   :  { %v455_v42 = vpop.f32.mrb[1].mxu1  ;;  %v434_v43 = vadd.f32 %v433_v41, %v432_v38  ;;  %v435_v45 = vpop.f32.mrb[2].mxu0 }
  0xf9   :  { %v456_v44 = vadd.f32 %v455_v42, %v454_v39  ;;  %v457_v46 = vpop.f32.mrb[2].mxu1  ;;  %v436_v47 = vpop.f32.mrb[3].mxu0 }
  0xfa   :  { %v458_v48 = vpop.f32.mrb[3].mxu1  ;;  %v329_v49 = vadd.f32 %v434_v43, %v379_v40 }
  0xfc   :  { %v369_v50 = vadd.f32 %v456_v44, %v329_v49 }
  0xfe   :  { %374 = vst [vmem:[%s627_s3] sm:$0xff] %v369_v50 }

// kernel: _lambda_.17
= control target key start
LH: loop header
LB: loop body
LE: loop exit
PB: predicated region body
PF: predicated region fallthrough
CT: control target
= control target key end

     0   :  { %s1303_s12 = smov 0   ;;  %s1517_s0 = inlined_call_operand.vmem [shape: bf16[2048,128], index: 0, kind: input, shape index: {}]   ;;  %s1518_s1 = inlined_call_operand.vmem [shape: bf16[128,128], index: 1, kind: input, shape index: {}]   ;;  %s1519_s2 = inlined_call_operand.vmem [shape: f32[1,128], index: 2, kind: input, shape index: {}]   ;;  %s1520_s3 = inlined_call_operand.vmem [shape: f32[2048,128], index: 3, kind: output, shape index: {}]  }
   0x1 LB: > { %s1039_s13 = sadd.s32 4294967295, %s1281_s12   ;;  %p1043_p0 = scmp.ge.s32.totalorder %s1281_s12, 1  ;;  %s1281_s12 = sphi %s1303_s12, %s13_s12  }
   0x2   : > { %p138_p1 = scmp.lt.s32.totalorder %s1281_s12, 5 }
   0x4   : > { %p139_p2 = pnand %p1043_p0, %p138_p1 }
   0x5   : > { %v1235_v0 = vld [vmem:[%s1518_s1] sm:$0xff] (!%p139_p2)   ;;  %s1044_s16 = sshll.u32 (!%p139_p2), %s1039_s13, 6  ;;  %v1236_v1 = vld [vmem:[%s1518_s1 + $0x8] sm:$0xff] (!%p139_p2)   ;;  %v1237_v2 = vld [vmem:[%s1518_s1 + $0x10] sm:$0xff] (!%p139_p2)  }
   0x6   : > { %142 = sbr.rel (%p139_p2) target bundleno = 316 (0x13c), region = 32  ;;  %p163_p3 = scmp.lt.s32.totalorder (!%p139_p2), %s1044_s16, 255  ;;  %1131 = vmatprep.subr.bf16.mxu0 (!%p139_p2), %v1235_v0  ;;  %1211 = vmatprep.subr.bf16.mxu1 (!%p139_p2), %v1235_v0  ;;  %v1238_v3 = vld [vmem:[%s1518_s1 + $0x18] sm:$0xff] (!%p139_p2)   ;;  %v1239_v6 = vld [vmem:[%s1518_s1 + $0x20] sm:$0xff] (!%p139_p2)   ;;  %v1240_v7 = vld [vmem:[%s1518_s1 + $0x28] sm:$0xff] (!%p139_p2)  }
   0x7   : > { %1132 = vmatpush3.bf16.msra.mxu0 (!%p139_p2), %v1235_v0  ;;  %1219 = vmatpush3.bf16.msra.mxu1 (!%p139_p2), %v1235_v0  ;;  %v1241_v8 = vld [vmem:[%s1518_s1 + $0x30] sm:$0xff] (!%p139_p2)   ;;  %v1242_v9 = vld [vmem:[%s1518_s1 + $0x38] sm:$0xff] (!%p139_p2)   ;;  %v1378_v40 = vld [vmem:[%s1519_s2] ss:$0 sm:$0xff] (!%p139_p2) }
   0x8   : > { %1133 = vmatprep.subr.bf16.mxu0 (!%p139_p2), %v1236_v1  ;;  %1212 = vmatprep.subr.bf16.mxu1 (!%p139_p2), %v1236_v1 }
   0xb   : > { %1134 = vmatpush3.bf16.msra.mxu0 (!%p139_p2), %v1236_v1  ;;  %1220 = vmatpush3.bf16.msra.mxu1 (!%p139_p2), %v1236_v1 }
   0xc   : > { %1135 = vmatprep.subr.bf16.mxu0 (!%p139_p2), %v1237_v2  ;;  %1213 = vmatprep.subr.bf16.mxu1 (!%p139_p2), %v1237_v2 }
   0xd   : > { %s1522_s16 = smov (!%p163_p3, %s1044_s16), 255 }
   0xe   : > { %s1045_s21 = sshll.u32 %s1522_s16, 2  ;;  %s1047_s10 = sshll.u32 %s1522_s16, 3 }
   0xf   : > { %s1326_s24 = scalar_lea.vmem %s1517_s0, %s1045_s21  ;;  %1136 = vmatpush3.bf16.msra.mxu0 %v1237_v2  ;;  %1221 = vmatpush3.bf16.msra.mxu1 %v1237_v2  ;;  %s1390_s14 = scalar_lea.vmem %s1520_s3, %s1047_s10 }
  0x10   : > { %v1243_v4 = vld [vmem:[%s1326_s24] sm:$0xff]   ;;  %1137 = vmatprep.subr.bf16.mxu0 %v1238_v3  ;;  %1214 = vmatprep.subr.bf16.mxu1 %v1238_v3  ;;  %v1245_v10 = vld [vmem:[%s1326_s24 + $0x8] sm:$0xff]   ;;  %v1247_v12 = vld [vmem:[%s1326_s24 + $0x10] sm:$0xff]  }
  0x11   : > { %v1244_v5 = vld [vmem:[%s1326_s24 + $0x80] sm:$0xff]   ;;  %1147 = vmatprep.mubr.bf16.mxu0 %v1243_v4  ;;  %v1246_v11 = vld [vmem:[%s1326_s24 + $0x88] sm:$0xff]   ;;  %v1248_v13 = vld [vmem:[%s1326_s24 + $0x90] sm:$0xff]  }
  0x12   : > { %1179 = vmatprep.mubr.bf16.mxu1 %v1244_v5  ;;  %v1249_v14 = vld [vmem:[%s1326_s24 + $0x18] sm:$0xff]   ;;  %v1251_v16 = vld [vmem:[%s1326_s24 + $0x20] sm:$0xff]   ;;  %v1253_v18 = vld [vmem:[%s1326_s24 + $0x28] sm:$0xff]  }
  0x13   : > { %1138 = vmatpush3.bf16.msra.mxu0 %v1238_v3  ;;  %1222 = vmatpush3.bf16.msra.mxu1 %v1238_v3  ;;  %v1250_v15 = vld [vmem:[%s1326_s24 + $0x98] sm:$0xff]   ;;  %v1252_v17 = vld [vmem:[%s1326_s24 + $0xa0] sm:$0xff]   ;;  %v1254_v19 = vld [vmem:[%s1326_s24 + $0xa8] sm:$0xff]  }
  0x14   : > { %1139 = vmatprep.subr.bf16.mxu0 %v1239_v6  ;;  %1215 = vmatprep.subr.bf16.mxu1 %v1239_v6  ;;  %v1255_v20 = vld [vmem:[%s1326_s24 + $0x30] sm:$0xff]   ;;  %v1257_v22 = vld [vmem:[%s1326_s24 + $0x38] sm:$0xff]   ;;  %v1259_v24 = vld [vmem:[%s1326_s24 + $0x40] sm:$0xff]  }
  0x15   : > { %v1256_v21 = vld [vmem:[%s1326_s24 + $0xb0] sm:$0xff]   ;;  %v1258_v23 = vld [vmem:[%s1326_s24 + $0xb8] sm:$0xff]   ;;  %v1260_v25 = vld [vmem:[%s1326_s24 + $0xc0] sm:$0xff]  }
  0x16   : > { %v1261_v26 = vld [vmem:[%s1326_s24 + $0x48] sm:$0xff]   ;;  %v1263_v28 = vld [vmem:[%s1326_s24 + $0x50] sm:$0xff]   ;;  %v1265_v30 = vld [vmem:[%s1326_s24 + $0x58] sm:$0xff]  }
  0x17   : > { %1140 = vmatpush3.bf16.msra.mxu0 %v1239_v6  ;;  %1223 = vmatpush3.bf16.msra.mxu1 %v1239_v6  ;;  %v1262_v27 = vld [vmem:[%s1326_s24 + $0xc8] sm:$0xff]   ;;  %v1264_v29 = vld [vmem:[%s1326_s24 + $0xd0] sm:$0xff]   ;;  %v1266_v31 = vld [vmem:[%s1326_s24 + $0xd8] sm:$0xff]  }
  0x18   : > { %1141 = vmatprep.subr.bf16.mxu0 %v1240_v7  ;;  %1216 = vmatprep.subr.bf16.mxu1 %v1240_v7  ;;  %v1267_v32 = vld [vmem:[%s1326_s24 + $0x60] sm:$0xff]   ;;  %v1269_v34 = vld [vmem:[%s1326_s24 + $0x68] sm:$0xff]   ;;  %v1271_v36 = vld [vmem:[%s1326_s24 + $0x70] sm:$0xff]  }
  0x19   : > { %v1268_v33 = vld [vmem:[%s1326_s24 + $0xe0] sm:$0xff]   ;;  %v1270_v35 = vld [vmem:[%s1326_s24 + $0xe8] sm:$0xff]   ;;  %v1272_v37 = vld [vmem:[%s1326_s24 + $0xf0] sm:$0xff]  }
  0x1a   : > { %v1273_v38 = vld [vmem:[%s1326_s24 + $0x78] sm:$0xff]  }
  0x1b   : > { %1142 = vmatpush3.bf16.msra.mxu0 %v1240_v7  ;;  %1224 = vmatpush3.bf16.msra.mxu1 %v1240_v7  ;;  %v1274_v39 = vld [vmem:[%s1326_s24 + $0xf8] sm:$0xff]  }
  0x1c   : > { %1143 = vmatprep.subr.bf16.mxu0 %v1241_v8  ;;  %1217 = vmatprep.subr.bf16.mxu1 %v1241_v8 }
  0x1f   : > { %1144 = vmatpush3.bf16.msra.mxu0 %v1241_v8  ;;  %1225 = vmatpush3.bf16.msra.mxu1 %v1241_v8 }
  0x20   : > { %1145 = vmatprep.subr.bf16.mxu0 %v1242_v9  ;;  %1218 = vmatprep.subr.bf16.mxu1 %v1242_v9 }
  0x23   : > { %1146 = vmatpush3.bf16.msra.mxu0 %v1242_v9  ;;  %1226 = vmatpush3.bf16.msra.mxu1 %v1242_v9 }
  0x26   : > { %1148 = vmatmul.mubr.bf16.vlgmr.msra.gmra.mrb[0].mxu0 %v1245_v10  ;;  %1180 = vmatmul.mubr.bf16.vlgmr.msra.gmra.mrb[0].mxu1 %v1246_v11 }
  0x27   : > { %1151 = vmatprep.mubr.bf16.mxu0 %v1247_v12  ;;  %1183 = vmatprep.mubr.bf16.mxu1 %v1248_v13 }
  0x2e   : > { %1152 = vmatmul.mubr.bf16.gmra.mrb[4].mxu0 %v1249_v14  ;;  %1184 = vmatmul.mubr.bf16.gmra.mrb[4].mxu1 %v1250_v15 }
  0x2f   : > { %1155 = vmatprep.mubr.bf16.mxu0 %v1251_v16  ;;  %1187 = vmatprep.mubr.bf16.mxu1 %v1252_v17 }
  0x36   : > { %1156 = vmatmul.mubr.bf16.gmra.mrb[8].mxu0 %v1253_v18  ;;  %1188 = vmatmul.mubr.bf16.gmra.mrb[8].mxu1 %v1254_v19 }
  0x37   : > { %1159 = vmatprep.mubr.bf16.mxu0 %v1255_v20  ;;  %1191 = vmatprep.mubr.bf16.mxu1 %v1256_v21 }
  0x3e   : > { %1160 = vmatmul.mubr.bf16.gmra.mrb[12].mxu0 %v1257_v22  ;;  %1192 = vmatmul.mubr.bf16.gmra.mrb[12].mxu1 %v1258_v23 }
  0x3f   : > { %1163 = vmatprep.mubr.bf16.mxu0 %v1259_v24  ;;  %1195 = vmatprep.mubr.bf16.mxu1 %v1260_v25 }
  0x46   : > { %1164 = vmatmul.mubr.bf16.gmra.mrb[16].mxu0 %v1261_v26  ;;  %1196 = vmatmul.mubr.bf16.gmra.mrb[16].mxu1 %v1262_v27 }
  0x47   : > { %1167 = vmatprep.mubr.bf16.mxu0 %v1263_v28  ;;  %1199 = vmatprep.mubr.bf16.mxu1 %v1264_v29 }
  0x4e   : > { %1168 = vmatmul.mubr.bf16.gmra.mrb[20].mxu0 %v1265_v30  ;;  %1200 = vmatmul.mubr.bf16.gmra.mrb[20].mxu1 %v1266_v31 }
  0x4f   : > { %1171 = vmatprep.mubr.bf16.mxu0 %v1267_v32  ;;  %1203 = vmatprep.mubr.bf16.mxu1 %v1268_v33 }
  0x56   : > { %1172 = vmatmul.mubr.bf16.gmra.mrb[24].mxu0 %v1269_v34  ;;  %1204 = vmatmul.mubr.bf16.gmra.mrb[24].mxu1 %v1270_v35 }
  0x57   : > { %1175 = vmatprep.mubr.bf16.mxu0 %v1271_v36  ;;  %1207 = vmatprep.mubr.bf16.mxu1 %v1272_v37 }
  0x5e   : > { %1176 = vmatmul.mubr.bf16.gmra.mrb[28].mxu0 %v1273_v38  ;;  %1208 = vmatmul.mubr.bf16.gmra.mrb[28].mxu1 %v1274_v39 }
  0xf9   : > { %v1149_v41 = vpop.f32.mrb[0].mxu0  ;;  %v1181_v42 = vpop.f32.mrb[0].mxu1 }
  0xfa   : > { %v545_v43 = vadd.f32 %v1149_v41, %v1378_v40  ;;  %v673_v44 = vadd.f32 %v1181_v42, %v1378_v40  ;;  %v536_v45 = vpop.f32.mrb[1].mxu0  ;;  %v664_v46 = vpop.f32.mrb[1].mxu1 }
  0xfb   : > { %v537_v47 = vadd.f32 %v1378_v40, %v536_v45  ;;  %v665_v48 = vadd.f32 %v1378_v40, %v664_v46  ;;  %v1150_v49 = vpop.f32.mrb[2].mxu0  ;;  %v1182_v50 = vpop.f32.mrb[2].mxu1 }
  0xfc   : > { %v793_v51 = vmul.f32 0.2, %v545_v43  ;;  %v825_v52 = vmul.f32 0.2, %v673_v44  ;;  %v548_v53 = vadd.f32 %v1150_v49, %v1378_v40  ;;  %v676_v54 = vadd.f32 %v1182_v50, %v1378_v40  ;;  %v539_v55 = vpop.f32.mrb[3].mxu0  ;;  %v667_v56 = vpop.f32.mrb[3].mxu1 }
  0xfd   : > { %v791_v57 = vmul.f32 0.2, %v537_v47  ;;  %v823_v58 = vmul.f32 0.2, %v665_v48  ;;  %v540_v59 = vadd.f32 %v1378_v40, %v539_v55  ;;  %v668_v60 = vadd.f32 %v1378_v40, %v667_v56 }
  0xfe   : > { %v857_v61 = vmax.f32 %v545_v43, %v793_v51  ;;  %v889_v62 = vmax.f32 %v673_v44, %v825_v52  ;;  %v794_v63 = vmul.f32 0.2, %v548_v53  ;;  %v826_v0 = vmul.f32 0.2, %v676_v54 }
  0xff   : > { %v855_v1 = vmax.f32 %v537_v47, %v791_v57  ;;  %v887_v2 = vmax.f32 %v665_v48, %v823_v58  ;;  %v792_v3 = vmul.f32 0.2, %v540_v59  ;;  %v824_v4 = vmul.f32 0.2, %v668_v60 }
 0x100   : > { %921 = vst [vmem:[%s1390_s14 + $0x10] sm:$0xff] %v857_v61  ;;  %953 = vst [vmem:[%s1390_s14 + $0x110] sm:$0xff] %v889_v62  ;;  %v858_v5 = vmax.f32 %v548_v53, %v794_v63  ;;  %v890_v6 = vmax.f32 %v676_v54, %v826_v0 }
 0x101   : > { %919 = vst [vmem:[%s1390_s14] sm:$0xff] %v855_v1  ;;  %951 = vst [vmem:[%s1390_s14 + $0x100] sm:$0xff] %v887_v2  ;;  %v856_v7 = vmax.f32 %v540_v59, %v792_v3  ;;  %v888_v8 = vmax.f32 %v668_v60, %v824_v4  ;;  %v1153_v9 = vpop.f32.mrb[4].mxu0  ;;  %v1185_v10 = vpop.f32.mrb[4].mxu1 }
 0x102   : > { %922 = vst [vmem:[%s1390_s14 + $0x18] sm:$0xff] %v858_v5  ;;  %954 = vst [vmem:[%s1390_s14 + $0x118] sm:$0xff] %v890_v6  ;;  %v561_v11 = vadd.f32 %v1153_v9, %v1378_v40  ;;  %v689_v12 = vadd.f32 %v1185_v10, %v1378_v40  ;;  %v552_v13 = vpop.f32.mrb[5].mxu0  ;;  %v680_v14 = vpop.f32.mrb[5].mxu1 }
 0x103   : > { %920 = vst [vmem:[%s1390_s14 + $0x8] sm:$0xff] %v856_v7  ;;  %952 = vst [vmem:[%s1390_s14 + $0x108] sm:$0xff] %v888_v8  ;;  %v553_v15 = vadd.f32 %v1378_v40, %v552_v13  ;;  %v681_v16 = vadd.f32 %v1378_v40, %v680_v14  ;;  %v1154_v17 = vpop.f32.mrb[6].mxu0  ;;  %v1186_v18 = vpop.f32.mrb[6].mxu1 }
 0x104   : > { %v797_v19 = vmul.f32 0.2, %v561_v11  ;;  %v829_v20 = vmul.f32 0.2, %v689_v12  ;;  %v564_v21 = vadd.f32 %v1154_v17, %v1378_v40  ;;  %v692_v22 = vadd.f32 %v1186_v18, %v1378_v40  ;;  %v555_v23 = vpop.f32.mrb[7].mxu0  ;;  %v683_v24 = vpop.f32.mrb[7].mxu1 }
 0x105   : > { %v795_v25 = vmul.f32 0.2, %v553_v15  ;;  %v827_v26 = vmul.f32 0.2, %v681_v16  ;;  %v556_v27 = vadd.f32 %v1378_v40, %v555_v23  ;;  %v684_v28 = vadd.f32 %v1378_v40, %v683_v24 }
 0x106   : > { %v861_v29 = vmax.f32 %v561_v11, %v797_v19  ;;  %v893_v30 = vmax.f32 %v689_v12, %v829_v20  ;;  %v798_v31 = vmul.f32 0.2, %v564_v21  ;;  %v830_v32 = vmul.f32 0.2, %v692_v22 }
 0x107   : > { %v859_v33 = vmax.f32 %v553_v15, %v795_v25  ;;  %v891_v34 = vmax.f32 %v681_v16, %v827_v26  ;;  %v796_v35 = vmul.f32 0.2, %v556_v27  ;;  %v828_v36 = vmul.f32 0.2, %v684_v28 }
 0x108   : > { %925 = vst [vmem:[%s1390_s14 + $0x30] sm:$0xff] %v861_v29  ;;  %957 = vst [vmem:[%s1390_s14 + $0x130] sm:$0xff] %v893_v30  ;;  %v862_v37 = vmax.f32 %v564_v21, %v798_v31  ;;  %v894_v38 = vmax.f32 %v692_v22, %v830_v32 }
 0x109   : > { %923 = vst [vmem:[%s1390_s14 + $0x20] sm:$0xff] %v859_v33  ;;  %955 = vst [vmem:[%s1390_s14 + $0x120] sm:$0xff] %v891_v34  ;;  %v860_v39 = vmax.f32 %v556_v27, %v796_v35  ;;  %v892_v41 = vmax.f32 %v684_v28, %v828_v36  ;;  %v1157_v42 = vpop.f32.mrb[8].mxu0  ;;  %v1189_v43 = vpop.f32.mrb[8].mxu1 }
 0x10a   : > { %926 = vst [vmem:[%s1390_s14 + $0x38] sm:$0xff] %v862_v37  ;;  %958 = vst [vmem:[%s1390_s14 + $0x138] sm:$0xff] %v894_v38  ;;  %v577_v44 = vadd.f32 %v1157_v42, %v1378_v40  ;;  %v705_v45 = vadd.f32 %v1189_v43, %v1378_v40  ;;  %v568_v46 = vpop.f32.mrb[9].mxu0  ;;  %v696_v47 = vpop.f32.mrb[9].mxu1 }
 0x10b   : > { %924 = vst [vmem:[%s1390_s14 + $0x28] sm:$0xff] %v860_v39  ;;  %956 = vst [vmem:[%s1390_s14 + $0x128] sm:$0xff] %v892_v41  ;;  %v569_v48 = vadd.f32 %v1378_v40, %v568_v46  ;;  %v697_v49 = vadd.f32 %v1378_v40, %v696_v47  ;;  %v1158_v50 = vpop.f32.mrb[10].mxu0  ;;  %v1190_v51 = vpop.f32.mrb[10].mxu1 }
 0x10c   : > { %v801_v52 = vmul.f32 0.2, %v577_v44  ;;  %v833_v53 = vmul.f32 0.2, %v705_v45  ;;  %v580_v54 = vadd.f32 %v1158_v50, %v1378_v40  ;;  %v708_v55 = vadd.f32 %v1190_v51, %v1378_v40  ;;  %v571_v56 = vpop.f32.mrb[11].mxu0  ;;  %v699_v57 = vpop.f32.mrb[11].mxu1 }
 0x10d   : > { %v799_v58 = vmul.f32 0.2, %v569_v48  ;;  %v831_v59 = vmul.f32 0.2, %v697_v49  ;;  %v572_v60 = vadd.f32 %v1378_v40, %v571_v56  ;;  %v700_v61 = vadd.f32 %v1378_v40, %v699_v57 }
 0x10e   : > { %v865_v62 = vmax.f32 %v577_v44, %v801_v52  ;;  %v897_v63 = vmax.f32 %v705_v45, %v833_v53  ;;  %v802_v0 = vmul.f32 0.2, %v580_v54  ;;  %v834_v1 = vmul.f32 0.2, %v708_v55 }
 0x10f   : > { %v863_v2 = vmax.f32 %v569_v48, %v799_v58  ;;  %v895_v3 = vmax.f32 %v697_v49, %v831_v59  ;;  %v800_v4 = vmul.f32 0.2, %v572_v60  ;;  %v832_v5 = vmul.f32 0.2, %v700_v61 }
 0x110   : > { %929 = vst [vmem:[%s1390_s14 + $0x50] sm:$0xff] %v865_v62  ;;  %961 = vst [vmem:[%s1390_s14 + $0x150] sm:$0xff] %v897_v63  ;;  %v866_v6 = vmax.f32 %v580_v54, %v802_v0  ;;  %v898_v7 = vmax.f32 %v708_v55, %v834_v1 }
 0x111   : > { %927 = vst [vmem:[%s1390_s14 + $0x40] sm:$0xff] %v863_v2  ;;  %959 = vst [vmem:[%s1390_s14 + $0x140] sm:$0xff] %v895_v3  ;;  %v864_v8 = vmax.f32 %v572_v60, %v800_v4  ;;  %v896_v9 = vmax.f32 %v700_v61, %v832_v5  ;;  %v1161_v10 = vpop.f32.mrb[12].mxu0  ;;  %v1193_v11 = vpop.f32.mrb[12].mxu1 }
 0x112   : > { %930 = vst [vmem:[%s1390_s14 + $0x58] sm:$0xff] %v866_v6  ;;  %962 = vst [vmem:[%s1390_s14 + $0x158] sm:$0xff] %v898_v7  ;;  %v593_v12 = vadd.f32 %v1161_v10, %v1378_v40  ;;  %v721_v13 = vadd.f32 %v1193_v11, %v1378_v40  ;;  %v584_v14 = vpop.f32.mrb[13].mxu0  ;;  %v712_v15 = vpop.f32.mrb[13].mxu1 }
 0x113   : > { %928 = vst [vmem:[%s1390_s14 + $0x48] sm:$0xff] %v864_v8  ;;  %960 = vst [vmem:[%s1390_s14 + $0x148] sm:$0xff] %v896_v9  ;;  %v585_v16 = vadd.f32 %v1378_v40, %v584_v14  ;;  %v713_v17 = vadd.f32 %v1378_v40, %v712_v15  ;;  %v1162_v18 = vpop.f32.mrb[14].mxu0  ;;  %v1194_v19 = vpop.f32.mrb[14].mxu1 }
 0x114   : > { %v805_v20 = vmul.f32 0.2, %v593_v12  ;;  %v837_v21 = vmul.f32 0.2, %v721_v13  ;;  %v596_v22 = vadd.f32 %v1162_v18, %v1378_v40  ;;  %v724_v23 = vadd.f32 %v1194_v19, %v1378_v40  ;;  %v587_v24 = vpop.f32.mrb[15].mxu0  ;;  %v715_v25 = vpop.f32.mrb[15].mxu1 }
 0x115   : > { %v803_v26 = vmul.f32 0.2, %v585_v16  ;;  %v835_v27 = vmul.f32 0.2, %v713_v17  ;;  %v588_v28 = vadd.f32 %v1378_v40, %v587_v24  ;;  %v716_v29 = vadd.f32 %v1378_v40, %v715_v25 }
 0x116   : > { %v869_v30 = vmax.f32 %v593_v12, %v805_v20  ;;  %v901_v31 = vmax.f32 %v721_v13, %v837_v21  ;;  %v806_v32 = vmul.f32 0.2, %v596_v22  ;;  %v838_v33 = vmul.f32 0.2, %v724_v23 }
 0x117   : > { %v867_v34 = vmax.f32 %v585_v16, %v803_v26  ;;  %v899_v35 = vmax.f32 %v713_v17, %v835_v27  ;;  %v804_v36 = vmul.f32 0.2, %v588_v28  ;;  %v836_v37 = vmul.f32 0.2, %v716_v29 }
 0x118   : > { %933 = vst [vmem:[%s1390_s14 + $0x70] sm:$0xff] %v869_v30  ;;  %965 = vst [vmem:[%s1390_s14 + $0x170] sm:$0xff] %v901_v31  ;;  %v870_v38 = vmax.f32 %v596_v22, %v806_v32  ;;  %v902_v39 = vmax.f32 %v724_v23, %v838_v33 }
 0x119   : > { %931 = vst [vmem:[%s1390_s14 + $0x60] sm:$0xff] %v867_v34  ;;  %963 = vst [vmem:[%s1390_s14 + $0x160] sm:$0xff] %v899_v35  ;;  %v868_v41 = vmax.f32 %v588_v28, %v804_v36  ;;  %v900_v42 = vmax.f32 %v716_v29, %v836_v37  ;;  %v1165_v43 = vpop.f32.mrb[16].mxu0  ;;  %v1197_v44 = vpop.f32.mrb[16].mxu1 }
 0x11a   : > { %934 = vst [vmem:[%s1390_s14 + $0x78] sm:$0xff] %v870_v38  ;;  %966 = vst [vmem:[%s1390_s14 + $0x178] sm:$0xff] %v902_v39  ;;  %v609_v45 = vadd.f32 %v1165_v43, %v1378_v40  ;;  %v737_v46 = vadd.f32 %v1197_v44, %v1378_v40  ;;  %v600_v47 = vpop.f32.mrb[17].mxu0  ;;  %v728_v48 = vpop.f32.mrb[17].mxu1 }
 0x11b   : > { %932 = vst [vmem:[%s1390_s14 + $0x68] sm:$0xff] %v868_v41  ;;  %964 = vst [vmem:[%s1390_s14 + $0x168] sm:$0xff] %v900_v42  ;;  %v601_v49 = vadd.f32 %v1378_v40, %v600_v47  ;;  %v729_v50 = vadd.f32 %v1378_v40, %v728_v48  ;;  %v1166_v51 = vpop.f32.mrb[18].mxu0  ;;  %v1198_v52 = vpop.f32.mrb[18].mxu1 }
 0x11c   : > { %v809_v53 = vmul.f32 0.2, %v609_v45  ;;  %v841_v54 = vmul.f32 0.2, %v737_v46  ;;  %v612_v55 = vadd.f32 %v1166_v51, %v1378_v40  ;;  %v740_v56 = vadd.f32 %v1198_v52, %v1378_v40  ;;  %v603_v57 = vpop.f32.mrb[19].mxu0  ;;  %v731_v58 = vpop.f32.mrb[19].mxu1 }
 0x11d   : > { %v807_v59 = vmul.f32 0.2, %v601_v49  ;;  %v839_v60 = vmul.f32 0.2, %v729_v50  ;;  %v604_v61 = vadd.f32 %v1378_v40, %v603_v57  ;;  %v732_v62 = vadd.f32 %v1378_v40, %v731_v58 }
 0x11e   : > { %v873_v63 = vmax.f32 %v609_v45, %v809_v53  ;;  %v905_v0 = vmax.f32 %v737_v46, %v841_v54  ;;  %v810_v1 = vmul.f32 0.2, %v612_v55  ;;  %v842_v2 = vmul.f32 0.2, %v740_v56 }
 0x11f   : > { %v871_v3 = vmax.f32 %v601_v49, %v807_v59  ;;  %v903_v4 = vmax.f32 %v729_v50, %v839_v60  ;;  %v808_v5 = vmul.f32 0.2, %v604_v61  ;;  %v840_v6 = vmul.f32 0.2, %v732_v62 }
 0x120   : > { %937 = vst [vmem:[%s1390_s14 + $0x90] sm:$0xff] %v873_v63  ;;  %969 = vst [vmem:[%s1390_s14 + $0x190] sm:$0xff] %v905_v0  ;;  %v874_v7 = vmax.f32 %v612_v55, %v810_v1  ;;  %v906_v8 = vmax.f32 %v740_v56, %v842_v2 }
 0x121   : > { %935 = vst [vmem:[%s1390_s14 + $0x80] sm:$0xff] %v871_v3  ;;  %967 = vst [vmem:[%s1390_s14 + $0x180] sm:$0xff] %v903_v4  ;;  %v872_v9 = vmax.f32 %v604_v61, %v808_v5  ;;  %v904_v10 = vmax.f32 %v732_v62, %v840_v6  ;;  %v1169_v11 = vpop.f32.mrb[20].mxu0  ;;  %v1201_v12 = vpop.f32.mrb[20].mxu1 }
 0x122   : > { %938 = vst [vmem:[%s1390_s14 + $0x98] sm:$0xff] %v874_v7  ;;  %970 = vst [vmem:[%s1390_s14 + $0x198] sm:$0xff] %v906_v8  ;;  %v625_v13 = vadd.f32 %v1169_v11, %v1378_v40  ;;  %v753_v14 = vadd.f32 %v1201_v12, %v1378_v40  ;;  %v616_v15 = vpop.f32.mrb[21].mxu0  ;;  %v744_v16 = vpop.f32.mrb[21].mxu1 }
 0x123   : > { %936 = vst [vmem:[%s1390_s14 + $0x88] sm:$0xff] %v872_v9  ;;  %968 = vst [vmem:[%s1390_s14 + $0x188] sm:$0xff] %v904_v10  ;;  %v617_v17 = vadd.f32 %v1378_v40, %v616_v15  ;;  %v745_v18 = vadd.f32 %v1378_v40, %v744_v16  ;;  %v1170_v19 = vpop.f32.mrb[22].mxu0  ;;  %v1202_v20 = vpop.f32.mrb[22].mxu1 }
 0x124   : > { %v813_v21 = vmul.f32 0.2, %v625_v13  ;;  %v845_v22 = vmul.f32 0.2, %v753_v14  ;;  %v628_v23 = vadd.f32 %v1170_v19, %v1378_v40  ;;  %v756_v24 = vadd.f32 %v1202_v20, %v1378_v40  ;;  %v619_v25 = vpop.f32.mrb[23].mxu0  ;;  %v747_v26 = vpop.f32.mrb[23].mxu1 }
 0x125   : > { %v811_v27 = vmul.f32 0.2, %v617_v17  ;;  %v843_v28 = vmul.f32 0.2, %v745_v18  ;;  %v620_v29 = vadd.f32 %v1378_v40, %v619_v25  ;;  %v748_v30 = vadd.f32 %v1378_v40, %v747_v26 }
 0x126   : > { %v877_v31 = vmax.f32 %v625_v13, %v813_v21  ;;  %v909_v32 = vmax.f32 %v753_v14, %v845_v22  ;;  %v814_v33 = vmul.f32 0.2, %v628_v23  ;;  %v846_v34 = vmul.f32 0.2, %v756_v24 }
 0x127   : > { %v875_v35 = vmax.f32 %v617_v17, %v811_v27  ;;  %v907_v36 = vmax.f32 %v745_v18, %v843_v28  ;;  %v812_v37 = vmul.f32 0.2, %v620_v29  ;;  %v844_v38 = vmul.f32 0.2, %v748_v30 }
 0x128   : > { %941 = vst [vmem:[%s1390_s14 + $0xb0] sm:$0xff] %v877_v31  ;;  %973 = vst [vmem:[%s1390_s14 + $0x1b0] sm:$0xff] %v909_v32  ;;  %v878_v39 = vmax.f32 %v628_v23, %v814_v33  ;;  %v910_v41 = vmax.f32 %v756_v24, %v846_v34 }
 0x129   : > { %939 = vst [vmem:[%s1390_s14 + $0xa0] sm:$0xff] %v875_v35  ;;  %971 = vst [vmem:[%s1390_s14 + $0x1a0] sm:$0xff] %v907_v36  ;;  %v876_v42 = vmax.f32 %v620_v29, %v812_v37  ;;  %v908_v43 = vmax.f32 %v748_v30, %v844_v38  ;;  %v1173_v44 = vpop.f32.mrb[24].mxu0  ;;  %v1205_v45 = vpop.f32.mrb[24].mxu1 }
 0x12a   : > { %942 = vst [vmem:[%s1390_s14 + $0xb8] sm:$0xff] %v878_v39  ;;  %974 = vst [vmem:[%s1390_s14 + $0x1b8] sm:$0xff] %v910_v41  ;;  %v641_v46 = vadd.f32 %v1173_v44, %v1378_v40  ;;  %v769_v47 = vadd.f32 %v1205_v45, %v1378_v40  ;;  %v632_v48 = vpop.f32.mrb[25].mxu0  ;;  %v760_v49 = vpop.f32.mrb[25].mxu1 }
 0x12b   : > { %940 = vst [vmem:[%s1390_s14 + $0xa8] sm:$0xff] %v876_v42  ;;  %972 = vst [vmem:[%s1390_s14 + $0x1a8] sm:$0xff] %v908_v43  ;;  %v633_v50 = vadd.f32 %v1378_v40, %v632_v48  ;;  %v761_v51 = vadd.f32 %v1378_v40, %v760_v49  ;;  %v1174_v52 = vpop.f32.mrb[26].mxu0  ;;  %v1206_v53 = vpop.f32.mrb[26].mxu1 }
 0x12c   : > { %v817_v54 = vmul.f32 0.2, %v641_v46  ;;  %v849_v55 = vmul.f32 0.2, %v769_v47  ;;  %v644_v56 = vadd.f32 %v1174_v52, %v1378_v40  ;;  %v772_v57 = vadd.f32 %v1206_v53, %v1378_v40  ;;  %v635_v58 = vpop.f32.mrb[27].mxu0  ;;  %v763_v59 = vpop.f32.mrb[27].mxu1 }
 0x12d   : > { %v815_v60 = vmul.f32 0.2, %v633_v50  ;;  %v847_v61 = vmul.f32 0.2, %v761_v51  ;;  %v636_v62 = vadd.f32 %v1378_v40, %v635_v58  ;;  %v764_v63 = vadd.f32 %v1378_v40, %v763_v59 }
 0x12e   : > { %v881_v0 = vmax.f32 %v641_v46, %v817_v54  ;;  %v913_v1 = vmax.f32 %v769_v47, %v849_v55  ;;  %v818_v2 = vmul.f32 0.2, %v644_v56  ;;  %v850_v3 = vmul.f32 0.2, %v772_v57 }
 0x12f   : > { %v879_v4 = vmax.f32 %v633_v50, %v815_v60  ;;  %v911_v5 = vmax.f32 %v761_v51, %v847_v61  ;;  %v816_v6 = vmul.f32 0.2, %v636_v62  ;;  %v848_v7 = vmul.f32 0.2, %v764_v63 }
 0x130   : > { %945 = vst [vmem:[%s1390_s14 + $0xd0] sm:$0xff] %v881_v0  ;;  %977 = vst [vmem:[%s1390_s14 + $0x1d0] sm:$0xff] %v913_v1  ;;  %v882_v8 = vmax.f32 %v644_v56, %v818_v2  ;;  %v914_v9 = vmax.f32 %v772_v57, %v850_v3 }
 0x131   : > { %943 = vst [vmem:[%s1390_s14 + $0xc0] sm:$0xff] %v879_v4  ;;  %975 = vst [vmem:[%s1390_s14 + $0x1c0] sm:$0xff] %v911_v5  ;;  %v880_v10 = vmax.f32 %v636_v62, %v816_v6  ;;  %v912_v11 = vmax.f32 %v764_v63, %v848_v7  ;;  %v1177_v12 = vpop.f32.mrb[28].mxu0  ;;  %v1209_v13 = vpop.f32.mrb[28].mxu1 }
 0x132   : > { %946 = vst [vmem:[%s1390_s14 + $0xd8] sm:$0xff] %v882_v8  ;;  %978 = vst [vmem:[%s1390_s14 + $0x1d8] sm:$0xff] %v914_v9  ;;  %v657_v14 = vadd.f32 %v1177_v12, %v1378_v40  ;;  %v785_v15 = vadd.f32 %v1209_v13, %v1378_v40  ;;  %v648_v16 = vpop.f32.mrb[29].mxu0  ;;  %v776_v17 = vpop.f32.mrb[29].mxu1 }
 0x133   : > { %944 = vst [vmem:[%s1390_s14 + $0xc8] sm:$0xff] %v880_v10  ;;  %976 = vst [vmem:[%s1390_s14 + $0x1c8] sm:$0xff] %v912_v11  ;;  %v649_v18 = vadd.f32 %v1378_v40, %v648_v16  ;;  %v777_v19 = vadd.f32 %v1378_v40, %v776_v17  ;;  %v1178_v20 = vpop.f32.mrb[30].mxu0  ;;  %v1210_v21 = vpop.f32.mrb[30].mxu1 }
 0x134   : > { %v821_v22 = vmul.f32 0.2, %v657_v14  ;;  %v853_v23 = vmul.f32 0.2, %v785_v15  ;;  %v660_v24 = vadd.f32 %v1178_v20, %v1378_v40  ;;  %v788_v25 = vadd.f32 %v1210_v21, %v1378_v40  ;;  %v651_v26 = vpop.f32.mrb[31].mxu0  ;;  %v779_v27 = vpop.f32.mrb[31].mxu1 }
 0x135   : > { %v819_v28 = vmul.f32 0.2, %v649_v18  ;;  %v851_v29 = vmul.f32 0.2, %v777_v19  ;;  %v652_v30 = vadd.f32 %v1378_v40, %v651_v26  ;;  %v780_v31 = vadd.f32 %v1378_v40, %v779_v27 }
 0x136   : > { %v885_v32 = vmax.f32 %v657_v14, %v821_v22  ;;  %v917_v33 = vmax.f32 %v785_v15, %v853_v23  ;;  %v822_v34 = vmul.f32 0.2, %v660_v24  ;;  %v854_v35 = vmul.f32 0.2, %v788_v25 }
 0x137   : > { %v883_v36 = vmax.f32 %v649_v18, %v819_v28  ;;  %v915_v37 = vmax.f32 %v777_v19, %v851_v29  ;;  %v820_v38 = vmul.f32 0.2, %v652_v30  ;;  %v852_v39 = vmul.f32 0.2, %v780_v31 }
 0x138   : > { %949 = vst [vmem:[%s1390_s14 + $0xf0] sm:$0xff] %v885_v32  ;;  %981 = vst [vmem:[%s1390_s14 + $0x1f0] sm:$0xff] %v917_v33  ;;  %v886_v41 = vmax.f32 %v660_v24, %v822_v34  ;;  %v918_v42 = vmax.f32 %v788_v25, %v854_v35 }
 0x139   : > { %947 = vst [vmem:[%s1390_s14 + $0xe0] sm:$0xff] %v883_v36  ;;  %979 = vst [vmem:[%s1390_s14 + $0x1e0] sm:$0xff] %v915_v37  ;;  %v884_v43 = vmax.f32 %v652_v30, %v820_v38  ;;  %v916_v40 = vmax.f32 %v780_v31, %v852_v39 }
 0x13a   : > { %950 = vst [vmem:[%s1390_s14 + $0xf8] sm:$0xff] %v886_v41  ;;  %982 = vst [vmem:[%s1390_s14 + $0x1f8] sm:$0xff] %v918_v42 }
 0x13b   : > { %948 = vst [vmem:[%s1390_s14 + $0xe8] sm:$0xff] %v884_v43  ;;  %980 = vst [vmem:[%s1390_s14 + $0x1e8] sm:$0xff] %v916_v40 }
 0x13c PF: > { %s13_s12 = sadd.s32 1, %s1281_s12  }
 0x13d   : > { %p10_p4 = scmp.ge.s32.totalorder %s13_s12, 6  }
 0x13f   :  { %12 = sbr.rel (!%p10_p4) target bundleno = 1 (0x1), region = 62 }

// kernel: _lambda_.19
= control target key start
LH: loop header
LB: loop body
LE: loop exit
PB: predicated region body
PF: predicated region fallthrough
CT: control target
= control target key end

     0   :  { %s960_s0 = inlined_call_operand.vmem [shape: f32[512,128], index: 0, kind: input, shape index: {}]   ;;  %s961_s1 = inlined_call_operand.vmem [shape: f32[1,128], index: 1, kind: input, shape index: {}]   ;;  %s962_s2 = inlined_call_operand.vmem [shape: f32[1,128], index: 2, kind: input, shape index: {}]   ;;  %s963_s3 = inlined_call_operand.vmem [shape: f32[512,128], index: 3, kind: output, shape index: {}]  }
   0x1   :  { %v14_v0 = vld [vmem:[%s960_s0] sm:$0xff]  ;;  %v15_v4 = vld [vmem:[%s960_s0 + $0x8] sm:$0xff]  ;;  %v16_v5 = vld [vmem:[%s960_s0 + $0x10] sm:$0xff] }
   0x2   :  { %v444_v1 = vld [vmem:[%s961_s1] ss:$0 sm:$0xff]  ;;  %v17_v6 = vld [vmem:[%s960_s0 + $0x18] sm:$0xff]  ;;  %v19_v11 = vld [vmem:[%s960_s0 + $0x28] sm:$0xff] }
   0x3   :  { %v449_v2 = vld [vmem:[%s962_s2] ss:$0 sm:$0xff]  ;;  %v85_v3 = vmul.f32 %v444_v1, %v14_v0  ;;  %v86_v7 = vmul.f32 %v444_v1, %v15_v4  ;;  %v87_v8 = vmul.f32 %v444_v1, %v16_v5  ;;  %v88_v9 = vmul.f32 %v444_v1, %v17_v6  ;;  %v20_v12 = vld [vmem:[%s960_s0 + $0x30] sm:$0xff]  ;;  %v21_v17 = vld [vmem:[%s960_s0 + $0x38] sm:$0xff] }
   0x4   :  { %v18_v10 = vld [vmem:[%s960_s0 + $0x20] sm:$0xff]  ;;  %v90_v15 = vmul.f32 %v444_v1, %v19_v11  ;;  %v91_v16 = vmul.f32 %v444_v1, %v20_v12  ;;  %v92_v21 = vmul.f32 %v444_v1, %v21_v17  ;;  %v23_v27 = vld [vmem:[%s960_s0 + $0x48] sm:$0xff]  ;;  %v24_v28 = vld [vmem:[%s960_s0 + $0x50] sm:$0xff] }
   0x5   :  { %v156_v13 = vadd.f32 %v449_v2, %v85_v3  ;;  %v89_v14 = vmul.f32 %v444_v1, %v18_v10  ;;  %v157_v18 = vadd.f32 %v449_v2, %v86_v7  ;;  %v158_v19 = vadd.f32 %v449_v2, %v87_v8  ;;  %v22_v22 = vld [vmem:[%s960_s0 + $0x40] sm:$0xff]  ;;  %v25_v29 = vld [vmem:[%s960_s0 + $0x58] sm:$0xff]  ;;  %v27_v43 = vld [vmem:[%s960_s0 + $0x68] sm:$0xff] }
   0x6   :  { %v159_v20 = vadd.f32 %v449_v2, %v88_v9  ;;  %v161_v25 = vadd.f32 %v449_v2, %v90_v15  ;;  %v162_v26 = vadd.f32 %v449_v2, %v91_v16  ;;  %v163_v33 = vadd.f32 %v449_v2, %v92_v21  ;;  %v26_v42 = vld [vmem:[%s960_s0 + $0x60] sm:$0xff]  ;;  %v28_v44 = vld [vmem:[%s960_s0 + $0x70] sm:$0xff]  ;;  %v29_v49 = vld [vmem:[%s960_s0 + $0x78] sm:$0xff] }
   0x7   :  { %v220_v23 = vmul.f32 0.2, %v156_v13  ;;  %v160_v24 = vadd.f32 %v449_v2, %v89_v14  ;;  %v221_v30 = vmul.f32 0.2, %v157_v18  ;;  %v222_v31 = vmul.f32 0.2, %v158_v19 }
   0x8   :  { %v223_v32 = vmul.f32 0.2, %v159_v20  ;;  %v225_v36 = vmul.f32 0.2, %v161_v25  ;;  %v226_v37 = vmul.f32 0.2, %v162_v26  ;;  %v93_v48 = vmul.f32 %v444_v1, %v22_v22 }
   0x9   :  { %v284_v34 = vmax.f32 %v156_v13, %v220_v23  ;;  %v224_v35 = vmul.f32 0.2, %v160_v24  ;;  %v285_v38 = vmax.f32 %v157_v18, %v221_v30  ;;  %v286_v39 = vmax.f32 %v158_v19, %v222_v31  ;;  %v30_v62 = vld [vmem:[%s960_s0 + $0x80] sm:$0xff]  ;;  %v31_v5 = vld [vmem:[%s960_s0 + $0x88] sm:$0xff]  ;;  %v32_v6 = vld [vmem:[%s960_s0 + $0x90] sm:$0xff] }
   0xa   :  { %v287_v40 = vmax.f32 %v159_v20, %v223_v32  ;;  %v227_v41 = vmul.f32 0.2, %v163_v33  ;;  %v289_v46 = vmax.f32 %v161_v25, %v225_v36  ;;  %v290_v47 = vmax.f32 %v162_v26, %v226_v37  ;;  %v33_v7 = vld [vmem:[%s960_s0 + $0x98] sm:$0xff]  ;;  %v34_v20 = vld [vmem:[%s960_s0 + $0xa0] sm:$0xff]  ;;  %v35_v21 = vld [vmem:[%s960_s0 + $0xa8] sm:$0xff] }
   0xb   :  { %348 = vst [vmem:[%s963_s3] sm:$0xff] %v284_v34  ;;  %v288_v45 = vmax.f32 %v160_v24, %v224_v35  ;;  %349 = vst [vmem:[%s963_s3 + $0x8] sm:$0xff] %v285_v38  ;;  %v94_v51 = vmul.f32 %v444_v1, %v23_v27  ;;  %v95_v52 = vmul.f32 %v444_v1, %v24_v28  ;;  %v36_v22 = vld [vmem:[%s960_s0 + $0xb0] sm:$0xff]  ;;  %v37_v27 = vld [vmem:[%s960_s0 + $0xb8] sm:$0xff] }
   0xc   :  { %350 = vst [vmem:[%s963_s3 + $0x10] sm:$0xff] %v286_v39  ;;  %351 = vst [vmem:[%s963_s3 + $0x18] sm:$0xff] %v287_v40  ;;  %v291_v50 = vmax.f32 %v163_v33, %v227_v41  ;;  %v96_v53 = vmul.f32 %v444_v1, %v25_v29  ;;  %v164_v54 = vadd.f32 %v449_v2, %v93_v48  ;;  %v38_v40 = vld [vmem:[%s960_s0 + $0xc0] sm:$0xff] }
   0xd   :  { %352 = vst [vmem:[%s963_s3 + $0x20] sm:$0xff] %v288_v45  ;;  %353 = vst [vmem:[%s963_s3 + $0x28] sm:$0xff] %v289_v46  ;;  %v97_v55 = vmul.f32 %v444_v1, %v26_v42  ;;  %v98_v56 = vmul.f32 %v444_v1, %v27_v43  ;;  %v99_v57 = vmul.f32 %v444_v1, %v28_v44  ;;  %v39_v45 = vld [vmem:[%s960_s0 + $0xc8] sm:$0xff]  ;;  %v40_v46 = vld [vmem:[%s960_s0 + $0xd0] sm:$0xff] }
   0xe   :  { %354 = vst [vmem:[%s963_s3 + $0x30] sm:$0xff] %v290_v47  ;;  %355 = vst [vmem:[%s963_s3 + $0x38] sm:$0xff] %v291_v50  ;;  %v165_v58 = vadd.f32 %v449_v2, %v94_v51  ;;  %v166_v59 = vadd.f32 %v449_v2, %v95_v52  ;;  %v167_v60 = vadd.f32 %v449_v2, %v96_v53  ;;  %v228_v63 = vmul.f32 0.2, %v164_v54  ;;  %v41_v47 = vld [vmem:[%s960_s0 + $0xd8] sm:$0xff] }
   0xf   :  { %v100_v61 = vmul.f32 %v444_v1, %v29_v49  ;;  %v168_v0 = vadd.f32 %v449_v2, %v97_v55  ;;  %v169_v3 = vadd.f32 %v449_v2, %v98_v56  ;;  %v170_v4 = vadd.f32 %v449_v2, %v99_v57 }
  0x10   :  { %v229_v8 = vmul.f32 0.2, %v165_v58  ;;  %v230_v9 = vmul.f32 0.2, %v166_v59  ;;  %v231_v10 = vmul.f32 0.2, %v167_v60  ;;  %v292_v12 = vmax.f32 %v164_v54, %v228_v63 }
  0x11   :  { %v171_v11 = vadd.f32 %v449_v2, %v100_v61  ;;  %v232_v13 = vmul.f32 0.2, %v168_v0  ;;  %v233_v14 = vmul.f32 0.2, %v169_v3  ;;  %v234_v15 = vmul.f32 0.2, %v170_v4 }
  0x12   :  { %v293_v16 = vmax.f32 %v165_v58, %v229_v8  ;;  %v294_v17 = vmax.f32 %v166_v59, %v230_v9  ;;  %v295_v18 = vmax.f32 %v167_v60, %v231_v10  ;;  %356 = vst [vmem:[%s963_s3 + $0x40] sm:$0xff] %v292_v12  ;;  %v101_v26 = vmul.f32 %v444_v1, %v30_v62  ;;  %v42_v60 = vld [vmem:[%s960_s0 + $0xe0] sm:$0xff]  ;;  %v43_v61 = vld [vmem:[%s960_s0 + $0xe8] sm:$0xff]  ;;  %v44_v62 = vld [vmem:[%s960_s0 + $0xf0] sm:$0xff] }
  0x13   :  { %v235_v19 = vmul.f32 0.2, %v171_v11  ;;  %v296_v23 = vmax.f32 %v168_v0, %v232_v13  ;;  %v297_v24 = vmax.f32 %v169_v3, %v233_v14  ;;  %v298_v25 = vmax.f32 %v170_v4, %v234_v15 }
  0x14   :  { %357 = vst [vmem:[%s963_s3 + $0x48] sm:$0xff] %v293_v16  ;;  %358 = vst [vmem:[%s963_s3 + $0x50] sm:$0xff] %v294_v17  ;;  %v102_v29 = vmul.f32 %v444_v1, %v31_v5  ;;  %v103_v30 = vmul.f32 %v444_v1, %v32_v6  ;;  %v104_v31 = vmul.f32 %v444_v1, %v33_v7  ;;  %v45_v5 = vld [vmem:[%s960_s0 + $0xf8] sm:$0xff] }
  0x15   :  { %359 = vst [vmem:[%s963_s3 + $0x58] sm:$0xff] %v295_v18  ;;  %v299_v28 = vmax.f32 %v171_v11, %v235_v19  ;;  %360 = vst [vmem:[%s963_s3 + $0x60] sm:$0xff] %v296_v23  ;;  %v172_v32 = vadd.f32 %v449_v2, %v101_v26  ;;  %v105_v33 = vmul.f32 %v444_v1, %v34_v20  ;;  %v46_v18 = vld [vmem:[%s960_s0 + $0x100] sm:$0xff]  ;;  %v47_v23 = vld [vmem:[%s960_s0 + $0x108] sm:$0xff] }
  0x16   :  { %361 = vst [vmem:[%s963_s3 + $0x68] sm:$0xff] %v297_v24  ;;  %362 = vst [vmem:[%s963_s3 + $0x70] sm:$0xff] %v298_v25  ;;  %v106_v34 = vmul.f32 %v444_v1, %v35_v21  ;;  %v107_v35 = vmul.f32 %v444_v1, %v36_v22  ;;  %v173_v36 = vadd.f32 %v449_v2, %v102_v29  ;;  %v48_v24 = vld [vmem:[%s960_s0 + $0x110] sm:$0xff]  ;;  %v49_v25 = vld [vmem:[%s960_s0 + $0x118] sm:$0xff] }
  0x17   :  { %363 = vst [vmem:[%s963_s3 + $0x78] sm:$0xff] %v299_v28  ;;  %v174_v37 = vadd.f32 %v449_v2, %v103_v30  ;;  %v175_v38 = vadd.f32 %v449_v2, %v104_v31  ;;  %v108_v39 = vmul.f32 %v444_v1, %v37_v27  ;;  %v236_v41 = vmul.f32 0.2, %v172_v32 }
  0x18   :  { %v176_v42 = vadd.f32 %v449_v2, %v105_v33  ;;  %v177_v43 = vadd.f32 %v449_v2, %v106_v34  ;;  %v178_v44 = vadd.f32 %v449_v2, %v107_v35  ;;  %v237_v48 = vmul.f32 0.2, %v173_v36 }
  0x19   :  { %v238_v49 = vmul.f32 0.2, %v174_v37  ;;  %v239_v50 = vmul.f32 0.2, %v175_v38  ;;  %v179_v51 = vadd.f32 %v449_v2, %v108_v39  ;;  %v300_v52 = vmax.f32 %v172_v32, %v236_v41  ;;  %v51_v39 = vld [vmem:[%s960_s0 + $0x128] sm:$0xff] }
  0x1a   :  { %v240_v53 = vmul.f32 0.2, %v176_v42  ;;  %v241_v54 = vmul.f32 0.2, %v177_v43  ;;  %v242_v55 = vmul.f32 0.2, %v178_v44  ;;  %v301_v56 = vmax.f32 %v173_v36, %v237_v48 }
  0x1b   :  { %v302_v57 = vmax.f32 %v174_v37, %v238_v49  ;;  %v303_v58 = vmax.f32 %v175_v38, %v239_v50  ;;  %v243_v59 = vmul.f32 0.2, %v179_v51  ;;  %364 = vst [vmem:[%s963_s3 + $0x80] sm:$0xff] %v300_v52  ;;  %v109_v4 = vmul.f32 %v444_v1, %v38_v40  ;;  %v50_v38 = vld [vmem:[%s960_s0 + $0x120] sm:$0xff]  ;;  %v52_v40 = vld [vmem:[%s960_s0 + $0x130] sm:$0xff] }
  0x1c   :  { %v304_v63 = vmax.f32 %v176_v42, %v240_v53  ;;  %v305_v0 = vmax.f32 %v177_v43, %v241_v54  ;;  %v306_v3 = vmax.f32 %v178_v44, %v242_v55  ;;  %365 = vst [vmem:[%s963_s3 + $0x88] sm:$0xff] %v301_v56  ;;  %v110_v7 = vmul.f32 %v444_v1, %v39_v45  ;;  %v53_v45 = vld [vmem:[%s960_s0 + $0x138] sm:$0xff] }
  0x1d   :  { %366 = vst [vmem:[%s963_s3 + $0x90] sm:$0xff] %v302_v57  ;;  %367 = vst [vmem:[%s963_s3 + $0x98] sm:$0xff] %v303_v58  ;;  %v307_v6 = vmax.f32 %v179_v51, %v243_v59  ;;  %v111_v8 = vmul.f32 %v444_v1, %v40_v46  ;;  %v112_v9 = vmul.f32 %v444_v1, %v41_v47  ;;  %v54_v58 = vld [vmem:[%s960_s0 + $0x140] sm:$0xff] }
  0x1e   :  { %368 = vst [vmem:[%s963_s3 + $0xa0] sm:$0xff] %v304_v63  ;;  %369 = vst [vmem:[%s963_s3 + $0xa8] sm:$0xff] %v305_v0  ;;  %v180_v10 = vadd.f32 %v449_v2, %v109_v4  ;;  %v113_v11 = vmul.f32 %v444_v1, %v42_v60  ;;  %v114_v12 = vmul.f32 %v444_v1, %v43_v61  ;;  %v55_v63 = vld [vmem:[%s960_s0 + $0x148] sm:$0xff]  ;;  %v56_v0 = vld [vmem:[%s960_s0 + $0x150] sm:$0xff] }
  0x1f   :  { %370 = vst [vmem:[%s963_s3 + $0xb0] sm:$0xff] %v306_v3  ;;  %v115_v13 = vmul.f32 %v444_v1, %v44_v62  ;;  %371 = vst [vmem:[%s963_s3 + $0xb8] sm:$0xff] %v307_v6  ;;  %v181_v14 = vadd.f32 %v449_v2, %v110_v7  ;;  %v182_v15 = vadd.f32 %v449_v2, %v111_v8  ;;  %v57_v3 = vld [vmem:[%s960_s0 + $0x158] sm:$0xff] }
  0x20   :  { %v183_v16 = vadd.f32 %v449_v2, %v112_v9  ;;  %v116_v17 = vmul.f32 %v444_v1, %v45_v5  ;;  %v244_v19 = vmul.f32 0.2, %v180_v10  ;;  %v184_v20 = vadd.f32 %v449_v2, %v113_v11 }
  0x21   :  { %v185_v21 = vadd.f32 %v449_v2, %v114_v12  ;;  %v186_v22 = vadd.f32 %v449_v2, %v115_v13  ;;  %v245_v26 = vmul.f32 0.2, %v181_v14  ;;  %v246_v27 = vmul.f32 0.2, %v182_v15 }
  0x22   :  { %v247_v28 = vmul.f32 0.2, %v183_v16  ;;  %v187_v29 = vadd.f32 %v449_v2, %v116_v17  ;;  %v308_v30 = vmax.f32 %v180_v10, %v244_v19  ;;  %v248_v31 = vmul.f32 0.2, %v184_v20  ;;  %v59_v17 = vld [vmem:[%s960_s0 + $0x168] sm:$0xff] }
  0x23   :  { %v249_v32 = vmul.f32 0.2, %v185_v21  ;;  %v250_v33 = vmul.f32 0.2, %v186_v22  ;;  %v309_v34 = vmax.f32 %v181_v14, %v245_v26  ;;  %v310_v35 = vmax.f32 %v182_v15, %v246_v27 }
  0x24   :  { %v311_v36 = vmax.f32 %v183_v16, %v247_v28  ;;  %v251_v37 = vmul.f32 0.2, %v187_v29  ;;  %372 = vst [vmem:[%s963_s3 + $0xc0] sm:$0xff] %v308_v30  ;;  %v312_v41 = vmax.f32 %v184_v20, %v248_v31  ;;  %v117_v44 = vmul.f32 %v444_v1, %v46_v18  ;;  %v58_v16 = vld [vmem:[%s960_s0 + $0x160] sm:$0xff]  ;;  %v60_v18 = vld [vmem:[%s960_s0 + $0x170] sm:$0xff] }
  0x25   :  { %v313_v42 = vmax.f32 %v185_v21, %v249_v32  ;;  %v314_v43 = vmax.f32 %v186_v22, %v250_v33  ;;  %373 = vst [vmem:[%s963_s3 + $0xc8] sm:$0xff] %v309_v34  ;;  %374 = vst [vmem:[%s963_s3 + $0xd0] sm:$0xff] %v310_v35  ;;  %v118_v47 = vmul.f32 %v444_v1, %v47_v23  ;;  %v61_v23 = vld [vmem:[%s960_s0 + $0x178] sm:$0xff] }
  0x26   :  { %375 = vst [vmem:[%s963_s3 + $0xd8] sm:$0xff] %v311_v36  ;;  %v315_v46 = vmax.f32 %v187_v29, %v251_v37  ;;  %v119_v48 = vmul.f32 %v444_v1, %v48_v24  ;;  %v120_v49 = vmul.f32 %v444_v1, %v49_v25  ;;  %376 = vst [vmem:[%s963_s3 + $0xe0] sm:$0xff] %v312_v41  ;;  %v62_v36 = vld [vmem:[%s960_s0 + $0x180] sm:$0xff]  ;;  %v63_v41 = vld [vmem:[%s960_s0 + $0x188] sm:$0xff] }
  0x27   :  { %377 = vst [vmem:[%s963_s3 + $0xe8] sm:$0xff] %v313_v42  ;;  %378 = vst [vmem:[%s963_s3 + $0xf0] sm:$0xff] %v314_v43  ;;  %v188_v50 = vadd.f32 %v449_v2, %v117_v44  ;;  %v121_v51 = vmul.f32 %v444_v1, %v50_v38  ;;  %v122_v52 = vmul.f32 %v444_v1, %v51_v39  ;;  %v64_v42 = vld [vmem:[%s960_s0 + $0x190] sm:$0xff]  ;;  %v65_v43 = vld [vmem:[%s960_s0 + $0x198] sm:$0xff] }
  0x28   :  { %v123_v53 = vmul.f32 %v444_v1, %v52_v40  ;;  %379 = vst [vmem:[%s963_s3 + $0xf8] sm:$0xff] %v315_v46  ;;  %v189_v54 = vadd.f32 %v449_v2, %v118_v47  ;;  %v190_v55 = vadd.f32 %v449_v2, %v119_v48  ;;  %v191_v56 = vadd.f32 %v449_v2, %v120_v49 }
  0x29   :  { %v124_v57 = vmul.f32 %v444_v1, %v53_v45  ;;  %v252_v59 = vmul.f32 0.2, %v188_v50  ;;  %v192_v60 = vadd.f32 %v449_v2, %v121_v51  ;;  %v193_v61 = vadd.f32 %v449_v2, %v122_v52 }
  0x2a   :  { %v194_v62 = vadd.f32 %v449_v2, %v123_v53  ;;  %v253_v4 = vmul.f32 0.2, %v189_v54  ;;  %v254_v5 = vmul.f32 0.2, %v190_v55  ;;  %v255_v6 = vmul.f32 0.2, %v191_v56 }
  0x2b   :  { %v195_v7 = vadd.f32 %v449_v2, %v124_v57  ;;  %v316_v8 = vmax.f32 %v188_v50, %v252_v59  ;;  %v256_v9 = vmul.f32 0.2, %v192_v60  ;;  %v257_v10 = vmul.f32 0.2, %v193_v61  ;;  %v67_v57 = vld [vmem:[%s960_s0 + $0x1a8] sm:$0xff] }
  0x2c   :  { %v258_v11 = vmul.f32 0.2, %v194_v62  ;;  %v317_v12 = vmax.f32 %v189_v54, %v253_v4  ;;  %v318_v13 = vmax.f32 %v190_v55, %v254_v5  ;;  %v319_v14 = vmax.f32 %v191_v56, %v255_v6  ;;  %v66_v56 = vld [vmem:[%s960_s0 + $0x1a0] sm:$0xff] }
  0x2d   :  { %v259_v15 = vmul.f32 0.2, %v195_v7  ;;  %380 = vst [vmem:[%s963_s3 + $0x100] sm:$0xff] %v316_v8  ;;  %v320_v19 = vmax.f32 %v192_v60, %v256_v9  ;;  %v321_v20 = vmax.f32 %v193_v61, %v257_v10  ;;  %v125_v22 = vmul.f32 %v444_v1, %v54_v58  ;;  %v68_v58 = vld [vmem:[%s960_s0 + $0x1b0] sm:$0xff] }
  0x2e   :  { %v322_v21 = vmax.f32 %v194_v62, %v258_v11  ;;  %381 = vst [vmem:[%s963_s3 + $0x108] sm:$0xff] %v317_v12  ;;  %382 = vst [vmem:[%s963_s3 + $0x110] sm:$0xff] %v318_v13  ;;  %v126_v25 = vmul.f32 %v444_v1, %v55_v63  ;;  %v127_v26 = vmul.f32 %v444_v1, %v56_v0  ;;  %v69_v63 = vld [vmem:[%s960_s0 + $0x1b8] sm:$0xff] }
  0x2f   :  { %383 = vst [vmem:[%s963_s3 + $0x118] sm:$0xff] %v319_v14  ;;  %v323_v24 = vmax.f32 %v195_v7, %v259_v15  ;;  %v128_v27 = vmul.f32 %v444_v1, %v57_v3  ;;  %384 = vst [vmem:[%s963_s3 + $0x120] sm:$0xff] %v320_v19  ;;  %v196_v28 = vadd.f32 %v449_v2, %v125_v22  ;;  %v70_v14 = vld [vmem:[%s960_s0 + $0x1c0] sm:$0xff]  ;;  %v71_v19 = vld [vmem:[%s960_s0 + $0x1c8] sm:$0xff] }
  0x30   :  { %385 = vst [vmem:[%s963_s3 + $0x128] sm:$0xff] %v321_v20  ;;  %386 = vst [vmem:[%s963_s3 + $0x130] sm:$0xff] %v322_v21  ;;  %v129_v29 = vmul.f32 %v444_v1, %v58_v16  ;;  %v130_v30 = vmul.f32 %v444_v1, %v59_v17  ;;  %v131_v31 = vmul.f32 %v444_v1, %v60_v18  ;;  %v72_v20 = vld [vmem:[%s960_s0 + $0x1d0] sm:$0xff]  ;;  %v73_v21 = vld [vmem:[%s960_s0 + $0x1d8] sm:$0xff] }
  0x31   :  { %387 = vst [vmem:[%s963_s3 + $0x138] sm:$0xff] %v323_v24  ;;  %v197_v32 = vadd.f32 %v449_v2, %v126_v25  ;;  %v198_v33 = vadd.f32 %v449_v2, %v127_v26  ;;  %v199_v34 = vadd.f32 %v449_v2, %v128_v27  ;;  %v132_v35 = vmul.f32 %v444_v1, %v61_v23 }
  0x32   :  { %v260_v37 = vmul.f32 0.2, %v196_v28  ;;  %v200_v38 = vadd.f32 %v449_v2, %v129_v29  ;;  %v201_v39 = vadd.f32 %v449_v2, %v130_v30  ;;  %v202_v40 = vadd.f32 %v449_v2, %v131_v31 }
  0x33   :  { %v261_v44 = vmul.f32 0.2, %v197_v32  ;;  %v262_v45 = vmul.f32 0.2, %v198_v33  ;;  %v263_v46 = vmul.f32 0.2, %v199_v34  ;;  %v203_v47 = vadd.f32 %v449_v2, %v132_v35 }
  0x34   :  { %v324_v48 = vmax.f32 %v196_v28, %v260_v37  ;;  %v264_v49 = vmul.f32 0.2, %v200_v38  ;;  %v265_v50 = vmul.f32 0.2, %v201_v39  ;;  %v266_v51 = vmul.f32 0.2, %v202_v40 }
  0x35   :  { %v325_v52 = vmax.f32 %v197_v32, %v261_v44  ;;  %v326_v53 = vmax.f32 %v198_v33, %v262_v45  ;;  %v327_v54 = vmax.f32 %v199_v34, %v263_v46  ;;  %v267_v55 = vmul.f32 0.2, %v203_v47  ;;  %v74_v34 = vld [vmem:[%s960_s0 + $0x1e0] sm:$0xff]  ;;  %v75_v35 = vld [vmem:[%s960_s0 + $0x1e8] sm:$0xff] }
  0x36   :  { %388 = vst [vmem:[%s963_s3 + $0x140] sm:$0xff] %v324_v48  ;;  %v328_v59 = vmax.f32 %v200_v38, %v264_v49  ;;  %v329_v60 = vmax.f32 %v201_v39, %v265_v50  ;;  %v330_v61 = vmax.f32 %v202_v40, %v266_v51  ;;  %v133_v62 = vmul.f32 %v444_v1, %v62_v36  ;;  %v76_v36 = vld [vmem:[%s960_s0 + $0x1f0] sm:$0xff] }
  0x37   :  { %389 = vst [vmem:[%s963_s3 + $0x148] sm:$0xff] %v325_v52  ;;  %390 = vst [vmem:[%s963_s3 + $0x150] sm:$0xff] %v326_v53  ;;  %v331_v0 = vmax.f32 %v203_v47, %v267_v55  ;;  %v134_v3 = vmul.f32 %v444_v1, %v63_v41  ;;  %v135_v4 = vmul.f32 %v444_v1, %v64_v42  ;;  %v77_v41 = vld [vmem:[%s960_s0 + $0x1f8] sm:$0xff] }
  0x38   :  { %391 = vst [vmem:[%s963_s3 + $0x158] sm:$0xff] %v327_v54  ;;  %v136_v5 = vmul.f32 %v444_v1, %v65_v43  ;;  %392 = vst [vmem:[%s963_s3 + $0x160] sm:$0xff] %v328_v59  ;;  %v204_v6 = vadd.f32 %v449_v2, %v133_v62  ;;  %v137_v7 = vmul.f32 %v444_v1, %v66_v56 }
  0x39   :  { %393 = vst [vmem:[%s963_s3 + $0x168] sm:$0xff] %v329_v60  ;;  %394 = vst [vmem:[%s963_s3 + $0x170] sm:$0xff] %v330_v61  ;;  %v138_v8 = vmul.f32 %v444_v1, %v67_v57  ;;  %v139_v9 = vmul.f32 %v444_v1, %v68_v58  ;;  %v205_v10 = vadd.f32 %v449_v2, %v134_v3 }
  0x3a   :  { %395 = vst [vmem:[%s963_s3 + $0x178] sm:$0xff] %v331_v0  ;;  %v206_v11 = vadd.f32 %v449_v2, %v135_v4  ;;  %v207_v12 = vadd.f32 %v449_v2, %v136_v5  ;;  %v140_v13 = vmul.f32 %v444_v1, %v69_v63  ;;  %v268_v15 = vmul.f32 0.2, %v204_v6 }
  0x3b   :  { %v208_v16 = vadd.f32 %v449_v2, %v137_v7  ;;  %v209_v17 = vadd.f32 %v449_v2, %v138_v8  ;;  %v210_v18 = vadd.f32 %v449_v2, %v139_v9  ;;  %v269_v22 = vmul.f32 0.2, %v205_v10 }
  0x3c   :  { %v270_v23 = vmul.f32 0.2, %v206_v11  ;;  %v271_v24 = vmul.f32 0.2, %v207_v12  ;;  %v211_v25 = vadd.f32 %v449_v2, %v140_v13  ;;  %v332_v26 = vmax.f32 %v204_v6, %v268_v15 }
  0x3d   :  { %v272_v27 = vmul.f32 0.2, %v208_v16  ;;  %v273_v28 = vmul.f32 0.2, %v209_v17  ;;  %v274_v29 = vmul.f32 0.2, %v210_v18  ;;  %v333_v30 = vmax.f32 %v205_v10, %v269_v22 }
  0x3e   :  { %v334_v31 = vmax.f32 %v206_v11, %v270_v23  ;;  %v335_v32 = vmax.f32 %v207_v12, %v271_v24  ;;  %v275_v33 = vmul.f32 0.2, %v211_v25  ;;  %396 = vst [vmem:[%s963_s3 + $0x180] sm:$0xff] %v332_v26  ;;  %v141_v40 = vmul.f32 %v444_v1, %v70_v14 }
  0x3f   :  { %v336_v37 = vmax.f32 %v208_v16, %v272_v27  ;;  %v337_v38 = vmax.f32 %v209_v17, %v273_v28  ;;  %v338_v39 = vmax.f32 %v210_v18, %v274_v29  ;;  %397 = vst [vmem:[%s963_s3 + $0x188] sm:$0xff] %v333_v30  ;;  %v142_v43 = vmul.f32 %v444_v1, %v71_v19 }
  0x40   :  { %398 = vst [vmem:[%s963_s3 + $0x190] sm:$0xff] %v334_v31  ;;  %399 = vst [vmem:[%s963_s3 + $0x198] sm:$0xff] %v335_v32  ;;  %v339_v42 = vmax.f32 %v211_v25, %v275_v33  ;;  %v143_v44 = vmul.f32 %v444_v1, %v72_v20  ;;  %v144_v45 = vmul.f32 %v444_v1, %v73_v21 }
  0x41   :  { %400 = vst [vmem:[%s963_s3 + $0x1a0] sm:$0xff] %v336_v37  ;;  %401 = vst [vmem:[%s963_s3 + $0x1a8] sm:$0xff] %v337_v38  ;;  %v212_v46 = vadd.f32 %v449_v2, %v141_v40  ;;  %v145_v47 = vmul.f32 %v444_v1, %v74_v34  ;;  %v146_v48 = vmul.f32 %v444_v1, %v75_v35 }
  0x42   :  { %402 = vst [vmem:[%s963_s3 + $0x1b0] sm:$0xff] %v338_v39  ;;  %v147_v49 = vmul.f32 %v444_v1, %v76_v36  ;;  %403 = vst [vmem:[%s963_s3 + $0x1b8] sm:$0xff] %v339_v42  ;;  %v213_v50 = vadd.f32 %v449_v2, %v142_v43  ;;  %v214_v51 = vadd.f32 %v449_v2, %v143_v44 }
  0x43   :  { %v215_v52 = vadd.f32 %v449_v2, %v144_v45  ;;  %v148_v53 = vmul.f32 %v444_v1, %v77_v41  ;;  %v276_v54 = vmul.f32 0.2, %v212_v46  ;;  %v216_v55 = vadd.f32 %v449_v2, %v145_v47 }
  0x44   :  { %v217_v56 = vadd.f32 %v449_v2, %v146_v48  ;;  %v218_v57 = vadd.f32 %v449_v2, %v147_v49  ;;  %v277_v58 = vmul.f32 0.2, %v213_v50  ;;  %v278_v59 = vmul.f32 0.2, %v214_v51 }
  0x45   :  { %v279_v60 = vmul.f32 0.2, %v215_v52  ;;  %v219_v61 = vadd.f32 %v449_v2, %v148_v53  ;;  %v340_v62 = vmax.f32 %v212_v46, %v276_v54  ;;  %v280_v63 = vmul.f32 0.2, %v216_v55 }
  0x46   :  { %v281_v0 = vmul.f32 0.2, %v217_v56  ;;  %v282_v3 = vmul.f32 0.2, %v218_v57  ;;  %v341_v4 = vmax.f32 %v213_v50, %v277_v58  ;;  %v342_v5 = vmax.f32 %v214_v51, %v278_v59 }
  0x47   :  { %v343_v6 = vmax.f32 %v215_v52, %v279_v60  ;;  %v283_v1 = vmul.f32 0.2, %v219_v61  ;;  %404 = vst [vmem:[%s963_s3 + $0x1c0] sm:$0xff] %v340_v62  ;;  %v344_v7 = vmax.f32 %v216_v55, %v280_v63 }
  0x48   :  { %v345_v8 = vmax.f32 %v217_v56, %v281_v0  ;;  %v346_v9 = vmax.f32 %v218_v57, %v282_v3  ;;  %405 = vst [vmem:[%s963_s3 + $0x1c8] sm:$0xff] %v341_v4  ;;  %406 = vst [vmem:[%s963_s3 + $0x1d0] sm:$0xff] %v342_v5 }
  0x49   :  { %407 = vst [vmem:[%s963_s3 + $0x1d8] sm:$0xff] %v343_v6  ;;  %v347_v2 = vmax.f32 %v219_v61, %v283_v1  ;;  %408 = vst [vmem:[%s963_s3 + $0x1e0] sm:$0xff] %v344_v7 }
  0x4a   :  { %409 = vst [vmem:[%s963_s3 + $0x1e8] sm:$0xff] %v345_v8  ;;  %410 = vst [vmem:[%s963_s3 + $0x1f0] sm:$0xff] %v346_v9 }
  0x4b   :  { %411 = vst [vmem:[%s963_s3 + $0x1f8] sm:$0xff] %v347_v2 }

// kernel: _lambda_.18
= control target key start
LH: loop header
LB: loop body
LE: loop exit
PB: predicated region body
PF: predicated region fallthrough
CT: control target
= control target key end

     0   :  { %vm1286_vm0 = vcmask 1040384   ;;  %s2115_s1 = inlined_call_operand.vmem [shape: bf16[128,128], index: 1, kind: input, shape index: {}]   ;;  %s2116_s0 = inlined_call_operand.vmem [shape: bf16[512,128], index: 0, kind: input, shape index: {}]   ;;  %s2117_s2 = inlined_call_operand.vmem [shape: f32[1,128], index: 2, kind: input, shape index: {}]   ;;  %s2118_s3 = inlined_call_operand.vmem [shape: f32[512,128], index: 3, kind: output, shape index: {0}]   ;;  %s2119_s4 = inlined_call_operand.vmem [shape: f32[1,2,128], index: 4, kind: output, shape index: {1}]  }
   0x1   :  { %v1474_v0 = vld [vmem:[%s2115_s1] sm:$0xff]   ;;  %v1475_v1 = vld [vmem:[%s2115_s1 + $0x8] sm:$0xff]   ;;  %v1476_v2 = vld [vmem:[%s2115_s1 + $0x10] sm:$0xff]  }
   0x2   :  { %1378 = vmatprep.subr.bf16.mxu0 %v1474_v0  ;;  %1458 = vmatprep.subr.bf16.mxu1 %v1474_v0  ;;  %v1477_v3 = vld [vmem:[%s2115_s1 + $0x18] sm:$0xff]   ;;  %v1482_v4 = vld [vmem:[%s2116_s0] sm:$0xff]   ;;  %v1479_v6 = vld [vmem:[%s2115_s1 + $0x28] sm:$0xff]  }
   0x3   :  { %1379 = vmatpush3.bf16.msra.mxu0 %v1474_v0  ;;  %1466 = vmatpush3.bf16.msra.mxu1 %v1474_v0  ;;  %v1478_v5 = vld [vmem:[%s2115_s1 + $0x20] sm:$0xff]   ;;  %v1480_v7 = vld [vmem:[%s2115_s1 + $0x30] sm:$0xff]   ;;  %v1481_v8 = vld [vmem:[%s2115_s1 + $0x38] sm:$0xff]  }
   0x4   :  { %1380 = vmatprep.subr.bf16.mxu0 %v1475_v1  ;;  %1459 = vmatprep.subr.bf16.mxu1 %v1475_v1  ;;  %v1498_v9 = vld [vmem:[%s2116_s0 + $0x80] sm:$0xff]   ;;  %v1483_v10 = vld [vmem:[%s2116_s0 + $0x8] sm:$0xff]   ;;  %v1484_v11 = vld [vmem:[%s2116_s0 + $0x10] sm:$0xff]  }
   0x5   :  { %1394 = vmatprep.mubr.bf16.mxu0 %v1482_v4  ;;  %1426 = vmatprep.mubr.bf16.mxu1 %v1498_v9  ;;  %v1499_v12 = vld [vmem:[%s2116_s0 + $0x88] sm:$0xff]   ;;  %v1500_v13 = vld [vmem:[%s2116_s0 + $0x90] sm:$0xff]   ;;  %v1485_v14 = vld [vmem:[%s2116_s0 + $0x18] sm:$0xff]  }
   0x6   :  { %v1486_v15 = vld [vmem:[%s2116_s0 + $0x20] sm:$0xff]   ;;  %v1501_v16 = vld [vmem:[%s2116_s0 + $0x98] sm:$0xff]   ;;  %v1487_v18 = vld [vmem:[%s2116_s0 + $0x28] sm:$0xff]  }
   0x7   :  { %1381 = vmatpush3.bf16.msra.mxu0 %v1475_v1  ;;  %1467 = vmatpush3.bf16.msra.mxu1 %v1475_v1  ;;  %v1502_v17 = vld [vmem:[%s2116_s0 + $0xa0] sm:$0xff]   ;;  %v1503_v19 = vld [vmem:[%s2116_s0 + $0xa8] sm:$0xff]   ;;  %v1488_v20 = vld [vmem:[%s2116_s0 + $0x30] sm:$0xff]  }
   0x8   :  { %1382 = vmatprep.subr.bf16.mxu0 %v1476_v2  ;;  %1460 = vmatprep.subr.bf16.mxu1 %v1476_v2  ;;  %v1504_v21 = vld [vmem:[%s2116_s0 + $0xb0] sm:$0xff]   ;;  %v1489_v22 = vld [vmem:[%s2116_s0 + $0x38] sm:$0xff]   ;;  %v1490_v24 = vld [vmem:[%s2116_s0 + $0x40] sm:$0xff]  }
   0x9   :  { %v1505_v23 = vld [vmem:[%s2116_s0 + $0xb8] sm:$0xff]   ;;  %v1506_v25 = vld [vmem:[%s2116_s0 + $0xc0] sm:$0xff]   ;;  %v1491_v26 = vld [vmem:[%s2116_s0 + $0x48] sm:$0xff]  }
   0xa   :  { %v1507_v27 = vld [vmem:[%s2116_s0 + $0xc8] sm:$0xff]   ;;  %v1492_v28 = vld [vmem:[%s2116_s0 + $0x50] sm:$0xff]   ;;  %v1493_v30 = vld [vmem:[%s2116_s0 + $0x58] sm:$0xff]  }
   0xb   :  { %1383 = vmatpush3.bf16.msra.mxu0 %v1476_v2  ;;  %1468 = vmatpush3.bf16.msra.mxu1 %v1476_v2  ;;  %v1508_v29 = vld [vmem:[%s2116_s0 + $0xd0] sm:$0xff]   ;;  %v1509_v31 = vld [vmem:[%s2116_s0 + $0xd8] sm:$0xff]   ;;  %v1494_v32 = vld [vmem:[%s2116_s0 + $0x60] sm:$0xff]  }
   0xc   :  { %1384 = vmatprep.subr.bf16.mxu0 %v1477_v3  ;;  %1461 = vmatprep.subr.bf16.mxu1 %v1477_v3  ;;  %v1510_v33 = vld [vmem:[%s2116_s0 + $0xe0] sm:$0xff]   ;;  %v1495_v34 = vld [vmem:[%s2116_s0 + $0x68] sm:$0xff]   ;;  %v1496_v36 = vld [vmem:[%s2116_s0 + $0x70] sm:$0xff]  }
   0xd   :  { %v1511_v35 = vld [vmem:[%s2116_s0 + $0xe8] sm:$0xff]   ;;  %v1512_v37 = vld [vmem:[%s2116_s0 + $0xf0] sm:$0xff]   ;;  %v1497_v38 = vld [vmem:[%s2116_s0 + $0x78] sm:$0xff]  }
   0xe   :  { %v1513_v39 = vld [vmem:[%s2116_s0 + $0xf8] sm:$0xff]   ;;  %v1662_v40 = vld [vmem:[%s2117_s2] ss:$0 sm:$0xff] }
   0xf   :  { %1385 = vmatpush3.bf16.msra.mxu0 %v1477_v3  ;;  %1469 = vmatpush3.bf16.msra.mxu1 %v1477_v3 }
  0x10   :  { %1386 = vmatprep.subr.bf16.mxu0 %v1478_v5  ;;  %1462 = vmatprep.subr.bf16.mxu1 %v1478_v5 }
  0x13   :  { %1387 = vmatpush3.bf16.msra.mxu0 %v1478_v5  ;;  %1470 = vmatpush3.bf16.msra.mxu1 %v1478_v5 }
  0x14   :  { %1388 = vmatprep.subr.bf16.mxu0 %v1479_v6  ;;  %1463 = vmatprep.subr.bf16.mxu1 %v1479_v6 }
  0x17   :  { %1389 = vmatpush3.bf16.msra.mxu0 %v1479_v6  ;;  %1471 = vmatpush3.bf16.msra.mxu1 %v1479_v6 }
  0x18   :  { %1390 = vmatprep.subr.bf16.mxu0 %v1480_v7  ;;  %1464 = vmatprep.subr.bf16.mxu1 %v1480_v7 }
  0x1b   :  { %1391 = vmatpush3.bf16.msra.mxu0 %v1480_v7  ;;  %1472 = vmatpush3.bf16.msra.mxu1 %v1480_v7 }
  0x1c   :  { %1392 = vmatprep.subr.bf16.mxu0 %v1481_v8  ;;  %1465 = vmatprep.subr.bf16.mxu1 %v1481_v8 }
  0x1f   :  { %1393 = vmatpush3.bf16.msra.mxu0 %v1481_v8  ;;  %1473 = vmatpush3.bf16.msra.mxu1 %v1481_v8 }
  0x22   :  { %1395 = vmatmul.mubr.bf16.vlgmr.msra.gmra.mrb[0].mxu0 %v1483_v10  ;;  %1427 = vmatmul.mubr.bf16.vlgmr.msra.gmra.mrb[0].mxu1 %v1499_v12 }
  0x23   :  { %1398 = vmatprep.mubr.bf16.mxu0 %v1484_v11  ;;  %1430 = vmatprep.mubr.bf16.mxu1 %v1500_v13 }
  0x2a   :  { %1399 = vmatmul.mubr.bf16.gmra.mrb[4].mxu0 %v1485_v14  ;;  %1431 = vmatmul.mubr.bf16.gmra.mrb[4].mxu1 %v1501_v16 }
  0x2b   :  { %1402 = vmatprep.mubr.bf16.mxu0 %v1486_v15  ;;  %1434 = vmatprep.mubr.bf16.mxu1 %v1502_v17 }
  0x32   :  { %1403 = vmatmul.mubr.bf16.gmra.mrb[8].mxu0 %v1487_v18  ;;  %1435 = vmatmul.mubr.bf16.gmra.mrb[8].mxu1 %v1503_v19 }
  0x33   :  { %1406 = vmatprep.mubr.bf16.mxu0 %v1488_v20  ;;  %1438 = vmatprep.mubr.bf16.mxu1 %v1504_v21 }
  0x3a   :  { %1407 = vmatmul.mubr.bf16.gmra.mrb[12].mxu0 %v1489_v22  ;;  %1439 = vmatmul.mubr.bf16.gmra.mrb[12].mxu1 %v1505_v23 }
  0x3b   :  { %1410 = vmatprep.mubr.bf16.mxu0 %v1490_v24  ;;  %1442 = vmatprep.mubr.bf16.mxu1 %v1506_v25 }
  0x42   :  { %1411 = vmatmul.mubr.bf16.gmra.mrb[16].mxu0 %v1491_v26  ;;  %1443 = vmatmul.mubr.bf16.gmra.mrb[16].mxu1 %v1507_v27 }
  0x43   :  { %1414 = vmatprep.mubr.bf16.mxu0 %v1492_v28  ;;  %1446 = vmatprep.mubr.bf16.mxu1 %v1508_v29 }
  0x4a   :  { %1415 = vmatmul.mubr.bf16.gmra.mrb[20].mxu0 %v1493_v30  ;;  %1447 = vmatmul.mubr.bf16.gmra.mrb[20].mxu1 %v1509_v31 }
  0x4b   :  { %1418 = vmatprep.mubr.bf16.mxu0 %v1494_v32  ;;  %1450 = vmatprep.mubr.bf16.mxu1 %v1510_v33 }
  0x52   :  { %1419 = vmatmul.mubr.bf16.gmra.mrb[24].mxu0 %v1495_v34  ;;  %1451 = vmatmul.mubr.bf16.gmra.mrb[24].mxu1 %v1511_v35 }
  0x53   :  { %1422 = vmatprep.mubr.bf16.mxu0 %v1496_v36  ;;  %1454 = vmatprep.mubr.bf16.mxu1 %v1512_v37 }
  0x5a   :  { %1423 = vmatmul.mubr.bf16.gmra.mrb[28].mxu0 %v1497_v38  ;;  %1455 = vmatmul.mubr.bf16.gmra.mrb[28].mxu1 %v1513_v39 }
  0xf5   :  { %v1396_v41 = vpop.f32.mrb[0].mxu0  ;;  %v1428_v42 = vpop.f32.mrb[0].mxu1 }
  0xf6   :  { %v387_v43 = vadd.f32 %v1396_v41, %v1662_v40  ;;  %v378_v44 = vpop.f32.mrb[1].mxu0  ;;  %v1666_v45 = vadd.f32 %v1428_v42, %v1662_v40  ;;  %v506_v46 = vpop.f32.mrb[1].mxu1 }
  0xf7   :  { %v379_v47 = vadd.f32 %v1662_v40, %v378_v44  ;;  %v1397_v48 = vpop.f32.mrb[2].mxu0  ;;  %v1670_v49 = vadd.f32 %v1662_v40, %v506_v46  ;;  %v1429_v50 = vpop.f32.mrb[2].mxu1 }
  0xf8   :  { %635 = vst [vmem:[%s2118_s3 + $0x10] sm:$0xff] %v387_v43  ;;  %v390_v51 = vadd.f32 %v1397_v48, %v1662_v40  ;;  %v381_v52 = vpop.f32.mrb[3].mxu0  ;;  %667 = vst [vmem:[%s2118_s3 + $0x110] sm:$0xff] %v1666_v45  ;;  %v1681_v53 = vadd.f32 %v1429_v50, %v1662_v40  ;;  %v509_v54 = vpop.f32.mrb[3].mxu1  ;;  %v1155_v60 = vmul.f32 %v387_v43, %v387_v43 }
  0xf9   :  { %633 = vst [vmem:[%s2118_s3] sm:$0xff] %v379_v47  ;;  %v382_v55 = vadd.f32 %v1662_v40, %v381_v52  ;;  %665 = vst [vmem:[%s2118_s3 + $0x100] sm:$0xff] %v1670_v49  ;;  %v1692_v56 = vadd.f32 %v1662_v40, %v509_v54  ;;  %v1153_v57 = vmul.f32 %v379_v47, %v379_v47 }
  0xfa   :  { %636 = vst [vmem:[%s2118_s3 + $0x18] sm:$0xff] %v390_v51  ;;  %668 = vst [vmem:[%s2118_s3 + $0x118] sm:$0xff] %v1681_v53  ;;  %v1156_v1 = vmul.f32 %v390_v51, %v390_v51 }
  0xfb   :  { %634 = vst [vmem:[%s2118_s3 + $0x8] sm:$0xff] %v382_v55  ;;  %v1084_v58 = vadd.f32 %v382_v55, %v379_v47  ;;  %v1154_v59 = vmul.f32 %v382_v55, %v382_v55  ;;  %666 = vst [vmem:[%s2118_s3 + $0x108] sm:$0xff] %v1692_v56 }
  0xfd   :  { %v1085_v61 = vadd.f32 %v1084_v58, %v387_v43  ;;  %v1217_v62 = vadd.f32 %v1154_v59, %v1153_v57  ;;  %v1400_v63 = vpop.f32.mrb[4].mxu0  ;;  %v1432_v0 = vpop.f32.mrb[4].mxu1 }
  0xfe   :  { %v403_v2 = vadd.f32 %v1400_v63, %v1662_v40  ;;  %v394_v3 = vpop.f32.mrb[5].mxu0  ;;  %v1710_v4 = vadd.f32 %v1432_v0, %v1662_v40  ;;  %v522_v5 = vpop.f32.mrb[5].mxu1 }
  0xff   :  { %v1218_v6 = vadd.f32 %v1217_v62, %v1155_v60  ;;  %v395_v7 = vadd.f32 %v1662_v40, %v394_v3  ;;  %v1086_v8 = vadd.f32 %v1085_v61, %v390_v51  ;;  %v1401_v9 = vpop.f32.mrb[6].mxu0  ;;  %v1714_v10 = vadd.f32 %v1662_v40, %v522_v5  ;;  %v1433_v11 = vpop.f32.mrb[6].mxu1 }
 0x100   :  { %639 = vst [vmem:[%s2118_s3 + $0x30] sm:$0xff] %v403_v2  ;;  %v406_v12 = vadd.f32 %v1401_v9, %v1662_v40  ;;  %v397_v13 = vpop.f32.mrb[7].mxu0  ;;  %671 = vst [vmem:[%s2118_s3 + $0x130] sm:$0xff] %v1710_v4  ;;  %v1725_v14 = vadd.f32 %v1433_v11, %v1662_v40  ;;  %v525_v15 = vpop.f32.mrb[7].mxu1  ;;  %v1159_v24 = vmul.f32 %v403_v2, %v403_v2 }
 0x101   :  { %637 = vst [vmem:[%s2118_s3 + $0x20] sm:$0xff] %v395_v7  ;;  %v1087_v16 = vadd.f32 %v1086_v8, %v395_v7  ;;  %v1157_v17 = vmul.f32 %v395_v7, %v395_v7  ;;  %v1219_v18 = vadd.f32 %v1218_v6, %v1156_v1  ;;  %v398_v19 = vadd.f32 %v1662_v40, %v397_v13 }
 0x102   :  { %669 = vst [vmem:[%s2118_s3 + $0x120] sm:$0xff] %v1714_v10  ;;  %640 = vst [vmem:[%s2118_s3 + $0x38] sm:$0xff] %v406_v12  ;;  %v1743_v20 = vadd.f32 %v1662_v40, %v525_v15  ;;  %v1160_v29 = vmul.f32 %v406_v12, %v406_v12 }
 0x103   :  { %672 = vst [vmem:[%s2118_s3 + $0x138] sm:$0xff] %v1725_v14  ;;  %v1220_v21 = vadd.f32 %v1219_v18, %v1157_v17  ;;  %638 = vst [vmem:[%s2118_s3 + $0x28] sm:$0xff] %v398_v19  ;;  %v1088_v22 = vadd.f32 %v1087_v16, %v398_v19  ;;  %v1158_v23 = vmul.f32 %v398_v19, %v398_v19 }
 0x104   :  { %670 = vst [vmem:[%s2118_s3 + $0x128] sm:$0xff] %v1743_v20 }
 0x105   :  { %v1089_v25 = vadd.f32 %v1088_v22, %v403_v2  ;;  %v1221_v26 = vadd.f32 %v1220_v21, %v1158_v23  ;;  %v1404_v27 = vpop.f32.mrb[8].mxu0  ;;  %v1436_v28 = vpop.f32.mrb[8].mxu1 }
 0x106   :  { %v419_v30 = vadd.f32 %v1404_v27, %v1662_v40  ;;  %v410_v31 = vpop.f32.mrb[9].mxu0  ;;  %v1754_v32 = vadd.f32 %v1436_v28, %v1662_v40  ;;  %v538_v33 = vpop.f32.mrb[9].mxu1 }
 0x107   :  { %v1222_v34 = vadd.f32 %v1221_v26, %v1159_v24  ;;  %v411_v35 = vadd.f32 %v1662_v40, %v410_v31  ;;  %v1090_v36 = vadd.f32 %v1089_v25, %v406_v12  ;;  %v1405_v37 = vpop.f32.mrb[10].mxu0  ;;  %v1758_v38 = vadd.f32 %v1662_v40, %v538_v33  ;;  %v1437_v39 = vpop.f32.mrb[10].mxu1 }
 0x108   :  { %643 = vst [vmem:[%s2118_s3 + $0x50] sm:$0xff] %v419_v30  ;;  %v422_v41 = vadd.f32 %v1405_v37, %v1662_v40  ;;  %v413_v42 = vpop.f32.mrb[11].mxu0  ;;  %675 = vst [vmem:[%s2118_s3 + $0x150] sm:$0xff] %v1754_v32  ;;  %v1769_v43 = vadd.f32 %v1437_v39, %v1662_v40  ;;  %v541_v44 = vpop.f32.mrb[11].mxu1  ;;  %v1163_v57 = vmul.f32 %v419_v30, %v419_v30 }
 0x109   :  { %641 = vst [vmem:[%s2118_s3 + $0x40] sm:$0xff] %v411_v35  ;;  %v1091_v46 = vadd.f32 %v1090_v36, %v411_v35  ;;  %v1161_v47 = vmul.f32 %v411_v35, %v411_v35  ;;  %v1223_v48 = vadd.f32 %v1222_v34, %v1160_v29  ;;  %v414_v50 = vadd.f32 %v1662_v40, %v413_v42 }
 0x10a   :  { %673 = vst [vmem:[%s2118_s3 + $0x140] sm:$0xff] %v1758_v38  ;;  %644 = vst [vmem:[%s2118_s3 + $0x58] sm:$0xff] %v422_v41  ;;  %v1787_v51 = vadd.f32 %v1662_v40, %v541_v44  ;;  %v1164_v62 = vmul.f32 %v422_v41, %v422_v41 }
 0x10b   :  { %676 = vst [vmem:[%s2118_s3 + $0x158] sm:$0xff] %v1769_v43  ;;  %v1224_v52 = vadd.f32 %v1223_v48, %v1161_v47  ;;  %642 = vst [vmem:[%s2118_s3 + $0x48] sm:$0xff] %v414_v50  ;;  %v1092_v54 = vadd.f32 %v1091_v46, %v414_v50  ;;  %v1162_v55 = vmul.f32 %v414_v50, %v414_v50 }
 0x10c   :  { %674 = vst [vmem:[%s2118_s3 + $0x148] sm:$0xff] %v1787_v51 }
 0x10d   :  { %v1093_v58 = vadd.f32 %v1092_v54, %v419_v30  ;;  %v1225_v59 = vadd.f32 %v1224_v52, %v1162_v55  ;;  %v1408_v60 = vpop.f32.mrb[12].mxu0  ;;  %v1440_v61 = vpop.f32.mrb[12].mxu1 }
 0x10e   :  { %v435_v63 = vadd.f32 %v1408_v60, %v1662_v40  ;;  %v426_v0 = vpop.f32.mrb[13].mxu0  ;;  %v1798_v1 = vadd.f32 %v1440_v61, %v1662_v40  ;;  %v554_v2 = vpop.f32.mrb[13].mxu1 }
 0x10f   :  { %v1226_v3 = vadd.f32 %v1225_v59, %v1163_v57  ;;  %v427_v5 = vadd.f32 %v1662_v40, %v426_v0  ;;  %v1094_v6 = vadd.f32 %v1093_v58, %v422_v41  ;;  %v1409_v7 = vpop.f32.mrb[14].mxu0  ;;  %v1802_v8 = vadd.f32 %v1662_v40, %v554_v2  ;;  %v1441_v9 = vpop.f32.mrb[14].mxu1 }
 0x110   :  { %647 = vst [vmem:[%s2118_s3 + $0x70] sm:$0xff] %v435_v63  ;;  %v438_v11 = vadd.f32 %v1409_v7, %v1662_v40  ;;  %v429_v12 = vpop.f32.mrb[15].mxu0  ;;  %679 = vst [vmem:[%s2118_s3 + $0x170] sm:$0xff] %v1798_v1  ;;  %v1813_v13 = vadd.f32 %v1441_v9, %v1662_v40  ;;  %v557_v15 = vpop.f32.mrb[15].mxu1  ;;  %v1167_v25 = vmul.f32 %v435_v63, %v435_v63 }
 0x111   :  { %645 = vst [vmem:[%s2118_s3 + $0x60] sm:$0xff] %v427_v5  ;;  %v1095_v16 = vadd.f32 %v1094_v6, %v427_v5  ;;  %v1165_v17 = vmul.f32 %v427_v5, %v427_v5  ;;  %v1227_v18 = vadd.f32 %v1226_v3, %v1164_v62  ;;  %v430_v19 = vadd.f32 %v1662_v40, %v429_v12 }
 0x112   :  { %677 = vst [vmem:[%s2118_s3 + $0x160] sm:$0xff] %v1802_v8  ;;  %648 = vst [vmem:[%s2118_s3 + $0x78] sm:$0xff] %v438_v11  ;;  %v1831_v21 = vadd.f32 %v1662_v40, %v557_v15  ;;  %v1168_v30 = vmul.f32 %v438_v11, %v438_v11 }
 0x113   :  { %680 = vst [vmem:[%s2118_s3 + $0x178] sm:$0xff] %v1813_v13  ;;  %v1228_v22 = vadd.f32 %v1227_v18, %v1165_v17  ;;  %646 = vst [vmem:[%s2118_s3 + $0x68] sm:$0xff] %v430_v19  ;;  %v1096_v23 = vadd.f32 %v1095_v16, %v430_v19  ;;  %v1166_v24 = vmul.f32 %v430_v19, %v430_v19 }
 0x114   :  { %678 = vst [vmem:[%s2118_s3 + $0x168] sm:$0xff] %v1831_v21 }
 0x115   :  { %v1097_v26 = vadd.f32 %v1096_v23, %v435_v63  ;;  %v1229_v27 = vadd.f32 %v1228_v22, %v1166_v24  ;;  %v1412_v28 = vpop.f32.mrb[16].mxu0  ;;  %v1444_v29 = vpop.f32.mrb[16].mxu1 }
 0x116   :  { %v451_v31 = vadd.f32 %v1412_v28, %v1662_v40  ;;  %v442_v33 = vpop.f32.mrb[17].mxu0  ;;  %v1842_v34 = vadd.f32 %v1444_v29, %v1662_v40  ;;  %v570_v35 = vpop.f32.mrb[17].mxu1 }
 0x117   :  { %v1230_v36 = vadd.f32 %v1229_v27, %v1167_v25  ;;  %v443_v37 = vadd.f32 %v1662_v40, %v442_v33  ;;  %v1098_v39 = vadd.f32 %v1097_v26, %v438_v11  ;;  %v1413_v41 = vpop.f32.mrb[18].mxu0  ;;  %v1846_v42 = vadd.f32 %v1662_v40, %v570_v35  ;;  %v1445_v44 = vpop.f32.mrb[18].mxu1 }
 0x118   :  { %651 = vst [vmem:[%s2118_s3 + $0x90] sm:$0xff] %v451_v31  ;;  %v454_v46 = vadd.f32 %v1413_v41, %v1662_v40  ;;  %v445_v47 = vpop.f32.mrb[19].mxu0  ;;  %683 = vst [vmem:[%s2118_s3 + $0x190] sm:$0xff] %v1842_v34  ;;  %v1857_v48 = vadd.f32 %v1445_v44, %v1662_v40  ;;  %v573_v50 = vpop.f32.mrb[19].mxu1  ;;  %v1171_v62 = vmul.f32 %v451_v31, %v451_v31 }
 0x119   :  { %649 = vst [vmem:[%s2118_s3 + $0x80] sm:$0xff] %v443_v37  ;;  %v1099_v52 = vadd.f32 %v1098_v39, %v443_v37  ;;  %v1169_v54 = vmul.f32 %v443_v37, %v443_v37  ;;  %v1231_v55 = vadd.f32 %v1230_v36, %v1168_v30  ;;  %v446_v57 = vadd.f32 %v1662_v40, %v445_v47 }
 0x11a   :  { %681 = vst [vmem:[%s2118_s3 + $0x180] sm:$0xff] %v1846_v42  ;;  %652 = vst [vmem:[%s2118_s3 + $0x98] sm:$0xff] %v454_v46  ;;  %v1875_v58 = vadd.f32 %v1662_v40, %v573_v50  ;;  %v1172_v5 = vmul.f32 %v454_v46, %v454_v46 }
 0x11b   :  { %684 = vst [vmem:[%s2118_s3 + $0x198] sm:$0xff] %v1857_v48  ;;  %v1232_v59 = vadd.f32 %v1231_v55, %v1169_v54  ;;  %650 = vst [vmem:[%s2118_s3 + $0x88] sm:$0xff] %v446_v57  ;;  %v1100_v60 = vadd.f32 %v1099_v52, %v446_v57  ;;  %v1170_v61 = vmul.f32 %v446_v57, %v446_v57 }
 0x11c   :  { %682 = vst [vmem:[%s2118_s3 + $0x188] sm:$0xff] %v1875_v58 }
 0x11d   :  { %v1101_v63 = vadd.f32 %v1100_v60, %v451_v31  ;;  %v1233_v0 = vadd.f32 %v1232_v59, %v1170_v61  ;;  %v1416_v2 = vpop.f32.mrb[20].mxu0  ;;  %v1448_v3 = vpop.f32.mrb[20].mxu1 }
 0x11e   :  { %v467_v6 = vadd.f32 %v1416_v2, %v1662_v40  ;;  %v458_v7 = vpop.f32.mrb[21].mxu0  ;;  %v1886_v9 = vadd.f32 %v1448_v3, %v1662_v40  ;;  %v586_v11 = vpop.f32.mrb[21].mxu1 }
 0x11f   :  { %v1234_v12 = vadd.f32 %v1233_v0, %v1171_v62  ;;  %v459_v15 = vadd.f32 %v1662_v40, %v458_v7  ;;  %v1102_v16 = vadd.f32 %v1101_v63, %v454_v46  ;;  %v1417_v17 = vpop.f32.mrb[22].mxu0  ;;  %v1890_v18 = vadd.f32 %v1662_v40, %v586_v11  ;;  %v1449_v19 = vpop.f32.mrb[22].mxu1 }
 0x120   :  { %655 = vst [vmem:[%s2118_s3 + $0xb0] sm:$0xff] %v467_v6  ;;  %v470_v22 = vadd.f32 %v1417_v17, %v1662_v40  ;;  %v461_v23 = vpop.f32.mrb[23].mxu0  ;;  %687 = vst [vmem:[%s2118_s3 + $0x1b0] sm:$0xff] %v1886_v9  ;;  %v1901_v24 = vadd.f32 %v1449_v19, %v1662_v40  ;;  %v589_v25 = vpop.f32.mrb[23].mxu1  ;;  %v1175_v36 = vmul.f32 %v467_v6, %v467_v6 }
 0x121   :  { %653 = vst [vmem:[%s2118_s3 + $0xa0] sm:$0xff] %v459_v15  ;;  %v1103_v26 = vadd.f32 %v1102_v16, %v459_v15  ;;  %v1173_v27 = vmul.f32 %v459_v15, %v459_v15  ;;  %v1235_v28 = vadd.f32 %v1234_v12, %v1172_v5  ;;  %v462_v29 = vadd.f32 %v1662_v40, %v461_v23 }
 0x122   :  { %685 = vst [vmem:[%s2118_s3 + $0x1a0] sm:$0xff] %v1890_v18  ;;  %656 = vst [vmem:[%s2118_s3 + $0xb8] sm:$0xff] %v470_v22  ;;  %v1919_v30 = vadd.f32 %v1662_v40, %v589_v25  ;;  %v1176_v46 = vmul.f32 %v470_v22, %v470_v22 }
 0x123   :  { %688 = vst [vmem:[%s2118_s3 + $0x1b8] sm:$0xff] %v1901_v24  ;;  %v1236_v31 = vadd.f32 %v1235_v28, %v1173_v27  ;;  %654 = vst [vmem:[%s2118_s3 + $0xa8] sm:$0xff] %v462_v29  ;;  %v1104_v33 = vadd.f32 %v1103_v26, %v462_v29  ;;  %v1174_v35 = vmul.f32 %v462_v29, %v462_v29 }
 0x124   :  { %686 = vst [vmem:[%s2118_s3 + $0x1a8] sm:$0xff] %v1919_v30 }
 0x125   :  { %v1105_v37 = vadd.f32 %v1104_v33, %v467_v6  ;;  %v1237_v39 = vadd.f32 %v1236_v31, %v1174_v35  ;;  %v1420_v41 = vpop.f32.mrb[24].mxu0  ;;  %v1452_v44 = vpop.f32.mrb[24].mxu1 }
 0x126   :  { %v483_v47 = vadd.f32 %v1420_v41, %v1662_v40  ;;  %v474_v50 = vpop.f32.mrb[25].mxu0  ;;  %v1930_v52 = vadd.f32 %v1452_v44, %v1662_v40  ;;  %v602_v54 = vpop.f32.mrb[25].mxu1 }
 0x127   :  { %v1238_v55 = vadd.f32 %v1237_v39, %v1175_v36  ;;  %v475_v57 = vadd.f32 %v1662_v40, %v474_v50  ;;  %v1106_v59 = vadd.f32 %v1105_v37, %v470_v22  ;;  %v1421_v60 = vpop.f32.mrb[26].mxu0  ;;  %v1934_v61 = vadd.f32 %v1662_v40, %v602_v54  ;;  %v1453_v62 = vpop.f32.mrb[26].mxu1 }
 0x128   :  { %659 = vst [vmem:[%s2118_s3 + $0xd0] sm:$0xff] %v483_v47  ;;  %v486_v63 = vadd.f32 %v1421_v60, %v1662_v40  ;;  %v477_v0 = vpop.f32.mrb[27].mxu0  ;;  %691 = vst [vmem:[%s2118_s3 + $0x1d0] sm:$0xff] %v1930_v52  ;;  %v1945_v2 = vadd.f32 %v1453_v62, %v1662_v40  ;;  %v605_v3 = vpop.f32.mrb[27].mxu1  ;;  %v1179_v19 = vmul.f32 %v483_v47, %v483_v47 }
 0x129   :  { %657 = vst [vmem:[%s2118_s3 + $0xc0] sm:$0xff] %v475_v57  ;;  %v1107_v5 = vadd.f32 %v1106_v59, %v475_v57  ;;  %v1177_v6 = vmul.f32 %v475_v57, %v475_v57  ;;  %v1239_v7 = vadd.f32 %v1238_v55, %v1176_v46  ;;  %v478_v11 = vadd.f32 %v1662_v40, %v477_v0 }
 0x12a   :  { %689 = vst [vmem:[%s2118_s3 + $0x1c0] sm:$0xff] %v1934_v61  ;;  %660 = vst [vmem:[%s2118_s3 + $0xd8] sm:$0xff] %v486_v63  ;;  %v1963_v12 = vadd.f32 %v1662_v40, %v605_v3  ;;  %v1180_v27 = vmul.f32 %v486_v63, %v486_v63 }
 0x12b   :  { %692 = vst [vmem:[%s2118_s3 + $0x1d8] sm:$0xff] %v1945_v2  ;;  %v1240_v15 = vadd.f32 %v1239_v7, %v1177_v6  ;;  %658 = vst [vmem:[%s2118_s3 + $0xc8] sm:$0xff] %v478_v11  ;;  %v1108_v16 = vadd.f32 %v1107_v5, %v478_v11  ;;  %v1178_v17 = vmul.f32 %v478_v11, %v478_v11 }
 0x12c   :  { %690 = vst [vmem:[%s2118_s3 + $0x1c8] sm:$0xff] %v1963_v12 }
 0x12d   :  { %v1109_v22 = vadd.f32 %v1108_v16, %v483_v47  ;;  %v1241_v23 = vadd.f32 %v1240_v15, %v1178_v17  ;;  %v1424_v25 = vpop.f32.mrb[28].mxu0  ;;  %v1456_v26 = vpop.f32.mrb[28].mxu1 }
 0x12e   :  { %v499_v28 = vadd.f32 %v1424_v25, %v1662_v40  ;;  %v490_v29 = vpop.f32.mrb[29].mxu0  ;;  %v1974_v31 = vadd.f32 %v1456_v26, %v1662_v40  ;;  %v618_v33 = vpop.f32.mrb[29].mxu1  ;;  %v1186_v25 = vmul.f32 %v1692_v56, %v1692_v56  ;;  %v1187_v26 = vmul.f32 %v1666_v45, %v1666_v45 }
 0x12f   :  { %v1242_v35 = vadd.f32 %v1241_v23, %v1179_v19  ;;  %v491_v36 = vadd.f32 %v1662_v40, %v490_v29  ;;  %v1110_v37 = vadd.f32 %v1109_v22, %v486_v63  ;;  %v1425_v39 = vpop.f32.mrb[30].mxu0  ;;  %v1978_v41 = vadd.f32 %v1662_v40, %v618_v33  ;;  %v1457_v44 = vpop.f32.mrb[30].mxu1 }
 0x130   :  { %663 = vst [vmem:[%s2118_s3 + $0xf0] sm:$0xff] %v499_v28  ;;  %v502_v46 = vadd.f32 %v1425_v39, %v1662_v40  ;;  %v493_v47 = vpop.f32.mrb[31].mxu0  ;;  %695 = vst [vmem:[%s2118_s3 + $0x1f0] sm:$0xff] %v1974_v31  ;;  %v1989_v50 = vadd.f32 %v1457_v44, %v1662_v40  ;;  %v621_v54 = vpop.f32.mrb[31].mxu1  ;;  %v1183_v5 = vmul.f32 %v499_v28, %v499_v28 }
 0x131   :  { %661 = vst [vmem:[%s2118_s3 + $0xe0] sm:$0xff] %v491_v36  ;;  %v1111_v55 = vadd.f32 %v1110_v37, %v491_v36  ;;  %v1181_v57 = vmul.f32 %v491_v36, %v491_v36  ;;  %v1243_v59 = vadd.f32 %v1242_v35, %v1180_v27  ;;  %v494_v60 = vadd.f32 %v1662_v40, %v493_v47 }
 0x132   :  { %693 = vst [vmem:[%s2118_s3 + $0x1e0] sm:$0xff] %v1978_v41  ;;  %664 = vst [vmem:[%s2118_s3 + $0xf8] sm:$0xff] %v502_v46  ;;  %v2007_v62 = vadd.f32 %v1662_v40, %v621_v54  ;;  %v1184_v11 = vmul.f32 %v502_v46, %v502_v46  ;;  %v1185_v40 = vmul.f32 %v1670_v49, %v1670_v49 }
 0x133   :  { %696 = vst [vmem:[%s2118_s3 + $0x1f8] sm:$0xff] %v1989_v50  ;;  %v1244_v63 = vadd.f32 %v1243_v59, %v1181_v57  ;;  %662 = vst [vmem:[%s2118_s3 + $0xe8] sm:$0xff] %v494_v60  ;;  %v1112_v0 = vadd.f32 %v1111_v55, %v494_v60  ;;  %v1182_v3 = vmul.f32 %v494_v60, %v494_v60 }
 0x134   :  { %694 = vst [vmem:[%s2118_s3 + $0x1e8] sm:$0xff] %v2007_v62  ;;  %v1188_v29 = vmul.f32 %v1681_v53, %v1681_v53  ;;  %v1190_v44 = vmul.f32 %v1743_v20, %v1743_v20 }
 0x135   :  { %v1113_v6 = vadd.f32 %v1112_v0, %v499_v28  ;;  %v1245_v7 = vadd.f32 %v1244_v63, %v1182_v3  ;;  %v1194_v63 = vmul.f32 %v1787_v51, %v1787_v51 }
 0x137   :  { %v1246_v15 = vadd.f32 %v1245_v7, %v1183_v5  ;;  %v1114_v16 = vadd.f32 %v1113_v6, %v502_v46 }
 0x139   :  { %v1115_v17 = vadd.f32 %v1114_v16, %v1670_v49  ;;  %v1247_v19 = vadd.f32 %v1246_v15, %v1184_v11  ;;  %v1189_v49 = vmul.f32 %v1714_v10, %v1714_v10  ;;  %v1198_v16 = vmul.f32 %v1831_v21, %v1831_v21 }
 0x13b   :  { %v1248_v22 = vadd.f32 %v1247_v19, %v1185_v40  ;;  %v1116_v23 = vadd.f32 %v1115_v17, %v1692_v56 }
 0x13d   :  { %v1117_v27 = vadd.f32 %v1116_v23, %v1666_v45  ;;  %v1249_v28 = vadd.f32 %v1248_v22, %v1186_v25  ;;  %v1191_v45 = vmul.f32 %v1710_v4, %v1710_v4 }
 0x13f   :  { %v1250_v33 = vadd.f32 %v1249_v28, %v1187_v26  ;;  %v1118_v35 = vadd.f32 %v1117_v27, %v1681_v53  ;;  %v1192_v53 = vmul.f32 %v1725_v14, %v1725_v14  ;;  %v1202_v27 = vmul.f32 %v1875_v58, %v1875_v58 }
 0x141   :  { %v1119_v36 = vadd.f32 %v1118_v35, %v1714_v10  ;;  %v1251_v37 = vadd.f32 %v1250_v33, %v1188_v29  ;;  %v1193_v10 = vmul.f32 %v1758_v38, %v1758_v38 }
 0x143   :  { %v1252_v39 = vadd.f32 %v1251_v37, %v1189_v49  ;;  %v1120_v56 = vadd.f32 %v1119_v36, %v1743_v20 }
 0x145   :  { %v1121_v46 = vadd.f32 %v1120_v56, %v1710_v4  ;;  %v1253_v47 = vadd.f32 %v1252_v39, %v1190_v44  ;;  %v1195_v4 = vmul.f32 %v1754_v32, %v1754_v32  ;;  %v1206_v39 = vmul.f32 %v1919_v30, %v1919_v30 }
 0x147   :  { %v1254_v54 = vadd.f32 %v1253_v47, %v1191_v45  ;;  %v1122_v55 = vadd.f32 %v1121_v46, %v1725_v14  ;;  %v1196_v14 = vmul.f32 %v1769_v43, %v1769_v43 }
 0x149   :  { %v1123_v57 = vadd.f32 %v1122_v55, %v1758_v38  ;;  %v1255_v59 = vadd.f32 %v1254_v54, %v1192_v53  ;;  %v1197_v38 = vmul.f32 %v1802_v8, %v1802_v8  ;;  %v1210_v55 = vmul.f32 %v1963_v12, %v1963_v12 }
 0x14b   :  { %v1256_v60 = vadd.f32 %v1255_v59, %v1193_v10  ;;  %v1124_v20 = vadd.f32 %v1123_v57, %v1787_v51 }
 0x14d   :  { %v1125_v0 = vadd.f32 %v1124_v20, %v1754_v32  ;;  %v1257_v3 = vadd.f32 %v1256_v60, %v1194_v63  ;;  %v1199_v32 = vmul.f32 %v1798_v1, %v1798_v1 }
 0x14f   :  { %v1258_v5 = vadd.f32 %v1257_v3, %v1195_v4  ;;  %v1126_v6 = vadd.f32 %v1125_v0, %v1769_v43  ;;  %v1200_v43 = vmul.f32 %v1813_v13, %v1813_v13  ;;  %v1214_v0 = vmul.f32 %v2007_v62, %v2007_v62 }
 0x151   :  { %v1127_v7 = vadd.f32 %v1126_v6, %v1802_v8  ;;  %v1259_v11 = vadd.f32 %v1258_v5, %v1196_v14  ;;  %v1201_v8 = vmul.f32 %v1846_v42, %v1846_v42 }
 0x153   :  { %v1260_v15 = vadd.f32 %v1259_v11, %v1197_v38  ;;  %v1128_v51 = vadd.f32 %v1127_v7, %v1831_v21 }
 0x155   :  { %v1129_v40 = vadd.f32 %v1128_v51, %v1798_v1  ;;  %v1261_v17 = vadd.f32 %v1260_v15, %v1198_v16  ;;  %v1203_v1 = vmul.f32 %v1842_v34, %v1842_v34 }
 0x157   :  { %v1262_v19 = vadd.f32 %v1261_v17, %v1199_v32  ;;  %v1130_v22 = vadd.f32 %v1129_v40, %v1813_v13  ;;  %v1204_v13 = vmul.f32 %v1857_v48, %v1857_v48 }
 0x159   :  { %v1131_v23 = vadd.f32 %v1130_v22, %v1846_v42  ;;  %v1263_v25 = vadd.f32 %v1262_v19, %v1200_v43  ;;  %v1205_v42 = vmul.f32 %v1890_v18, %v1890_v18 }
 0x15b   :  { %v1264_v26 = vadd.f32 %v1263_v25, %v1201_v8  ;;  %v1132_v21 = vadd.f32 %v1131_v23, %v1875_v58 }
 0x15d   :  { %v1133_v28 = vadd.f32 %v1132_v21, %v1842_v34  ;;  %v1265_v29 = vadd.f32 %v1264_v26, %v1202_v27  ;;  %v1207_v34 = vmul.f32 %v1886_v9, %v1886_v9 }
 0x15f   :  { %v1266_v33 = vadd.f32 %v1265_v29, %v1203_v1  ;;  %v1134_v35 = vadd.f32 %v1133_v28, %v1857_v48  ;;  %v1208_v48 = vmul.f32 %v1901_v24, %v1901_v24 }
 0x161   :  { %v1135_v49 = vadd.f32 %v1134_v35, %v1890_v18  ;;  %v1267_v36 = vadd.f32 %v1266_v33, %v1204_v13  ;;  %v1209_v18 = vmul.f32 %v1934_v61, %v1934_v61 }
 0x163   :  { %v1268_v37 = vadd.f32 %v1267_v36, %v1205_v42  ;;  %v1136_v58 = vadd.f32 %v1135_v49, %v1919_v30 }
 0x165   :  { %v1137_v56 = vadd.f32 %v1136_v58, %v1886_v9  ;;  %v1269_v44 = vadd.f32 %v1268_v37, %v1206_v39  ;;  %v1211_v9 = vmul.f32 %v1930_v52, %v1930_v52 }
 0x167   :  { %v1270_v45 = vadd.f32 %v1269_v44, %v1207_v34  ;;  %v1138_v46 = vadd.f32 %v1137_v56, %v1901_v24  ;;  %v1212_v24 = vmul.f32 %v1945_v2, %v1945_v2 }
 0x169   :  { %v1139_v47 = vadd.f32 %v1138_v46, %v1934_v61  ;;  %v1271_v53 = vadd.f32 %v1270_v45, %v1208_v48  ;;  %v1213_v61 = vmul.f32 %v1978_v41, %v1978_v41 }
 0x16b   :  { %v1272_v54 = vadd.f32 %v1271_v53, %v1209_v18  ;;  %v1140_v30 = vadd.f32 %v1139_v47, %v1963_v12 }
 0x16d   :  { %v1141_v10 = vadd.f32 %v1140_v30, %v1930_v52  ;;  %v1273_v57 = vadd.f32 %v1272_v54, %v1210_v55  ;;  %v1215_v52 = vmul.f32 %v1974_v31, %v1974_v31 }
 0x16f   :  { %v1274_v59 = vadd.f32 %v1273_v57, %v1211_v9  ;;  %v1142_v60 = vadd.f32 %v1141_v10, %v1945_v2  ;;  %v1216_v2 = vmul.f32 %v1989_v50, %v1989_v50 }
 0x171   :  { %v1143_v20 = vadd.f32 %v1142_v60, %v1978_v41  ;;  %v1275_v63 = vadd.f32 %v1274_v59, %v1212_v24 }
 0x173   :  { %v1276_v4 = vadd.f32 %v1275_v63, %v1213_v61  ;;  %v1144_v12 = vadd.f32 %v1143_v20, %v2007_v62 }
 0x175   :  { %v1145_v3 = vadd.f32 %v1144_v12, %v1974_v31  ;;  %v1277_v14 = vadd.f32 %v1276_v4, %v1214_v0 }
 0x177   :  { %v1146_v5 = vadd.f32 %v1145_v3, %v1989_v50  ;;  %v1278_v6 = vadd.f32 %v1277_v14, %v1215_v52 }
 0x179   :  { %v1147_v41 = vrot.slane %v1146_v5, 4  ;;  %v1279_v38 = vadd.f32 %v1278_v6, %v1216_v2 }
 0x17b   :  { %v1148_v7 = vadd.f32 %v1147_v41, %v1146_v5  ;;  %v1280_v11 = vrot.slane %v1279_v38, 4 }
 0x17d   :  { %v1149_v15 = vrot.slane %v1148_v7, 2  ;;  %v1281_v51 = vadd.f32 %v1280_v11, %v1279_v38 }
 0x17f   :  { %v1150_v16 = vadd.f32 %v1149_v15, %v1148_v7  ;;  %v1282_v62 = vrot.slane %v1281_v51, 2 }
 0x181   :  { %v1151_v32 = vrot.slane %v1150_v16, 1  ;;  %v1283_v40 = vadd.f32 %v1282_v62, %v1281_v51 }
 0x183   :  { %v1284_v17 = vrot.slane %v1283_v40, 1  ;;  %v1152_v31 = vadd.f32 %v1151_v32, %v1150_v16 }
 0x185   :  { %v1285_v43 = vadd.f32 %v1284_v17, %v1283_v40 }
 0x187   :  { %v1287_v19 = vsel %vm1286_vm0, %v1152_v31, %v1285_v43 }
 0x188   :  { %1288 = vst [vmem:[%s2119_s4] sm:$0x3] %v1287_v19 }

// kernel: _lambda_.20
= control target key start
LH: loop header
LB: loop body
LE: loop exit
PB: predicated region body
PF: predicated region fallthrough
CT: control target
= control target key end

     0   :  { %vm518_vm0 = vcmask 1040384   ;;  %s899_s1 = inlined_call_operand.vmem [shape: bf16[256,128], index: 1, kind: input, shape index: {}]   ;;  %s900_s0 = inlined_call_operand.vmem [shape: bf16[128,256], index: 0, kind: input, shape index: {}]   ;;  %s901_s2 = inlined_call_operand.vmem [shape: f32[1,128], index: 2, kind: input, shape index: {}]   ;;  %s902_s3 = inlined_call_operand.vmem [shape: f32[128,128], index: 3, kind: output, shape index: {0}]   ;;  %s903_s4 = inlined_call_operand.vmem [shape: f32[1,2,128], index: 4, kind: output, shape index: {1}]  }
   0x1   :  { %v642_v0 = vld [vmem:[%s899_s1 + $0x40] sm:$0xff]   ;;  %v644_v2 = vld [vmem:[%s899_s1 + $0x48] sm:$0xff]   ;;  %v646_v4 = vld [vmem:[%s899_s1 + $0x50] sm:$0xff]  }
   0x2   :  { %v643_v1 = vld [vmem:[%s899_s1] sm:$0xff]   ;;  %562 = vmatprep.subr.bf16.mxu0 %v642_v0  ;;  %626 = vmatprep.subr.bf16.mxu1 %v642_v0  ;;  %v645_v3 = vld [vmem:[%s899_s1 + $0x8] sm:$0xff]   ;;  %v647_v5 = vld [vmem:[%s899_s1 + $0x10] sm:$0xff]  }
   0x3   :  { %563 = vmatpush3.bf16.msra.mxu0 %v643_v1  ;;  %634 = vmatpush3.bf16.msra.mxu1 %v643_v1  ;;  %v648_v6 = vld [vmem:[%s899_s1 + $0x58] sm:$0xff]   ;;  %v650_v8 = vld [vmem:[%s899_s1 + $0x60] sm:$0xff]   ;;  %v652_v10 = vld [vmem:[%s899_s1 + $0x68] sm:$0xff]  }
   0x4   :  { %564 = vmatprep.subr.bf16.mxu0 %v644_v2  ;;  %627 = vmatprep.subr.bf16.mxu1 %v644_v2  ;;  %v649_v7 = vld [vmem:[%s899_s1 + $0x18] sm:$0xff]   ;;  %v651_v9 = vld [vmem:[%s899_s1 + $0x20] sm:$0xff]   ;;  %v653_v12 = vld [vmem:[%s899_s1 + $0x28] sm:$0xff]  }
   0x5   :  { %v660_v11 = vld [vmem:[%s900_s0 + $0x4] ss:$8 sps:$4 sm:$0xff]   ;;  %v654_v14 = vld [vmem:[%s899_s1 + $0x70] sm:$0xff]   ;;  %v656_v16 = vld [vmem:[%s899_s1 + $0x78] sm:$0xff]  }
   0x6   :  { %v666_v13 = vld [vmem:[%s900_s0 + $0x44] ss:$8 sps:$4 sm:$0xff]   ;;  %280 = vmatprep.mubr.bf16.mxu0 %v660_v11  ;;  %v655_v15 = vld [vmem:[%s899_s1 + $0x30] sm:$0xff]   ;;  %v657_v17 = vld [vmem:[%s899_s1 + $0x38] sm:$0xff]  }
   0x7   :  { %565 = vmatpush3.bf16.msra.mxu0 %v645_v3  ;;  %635 = vmatpush3.bf16.msra.mxu1 %v645_v3  ;;  %v658_v18 = vld [vmem:[%s900_s0] ss:$8 sps:$4 sm:$0xff]   ;;  %v661_v20 = vld [vmem:[%s900_s0 + $0x14] ss:$8 sps:$4 sm:$0xff]   ;;  %v663_v22 = vld [vmem:[%s900_s0 + $0x10] ss:$8 sps:$4 sm:$0xff]  }
   0x8   :  { %566 = vmatprep.subr.bf16.mxu0 %v646_v4  ;;  %628 = vmatprep.subr.bf16.mxu1 %v646_v4  ;;  %v664_v19 = vld [vmem:[%s900_s0 + $0x40] ss:$8 sps:$4 sm:$0xff]   ;;  %v670_v21 = vld [vmem:[%s900_s0 + $0x54] ss:$8 sps:$4 sm:$0xff]   ;;  %v672_v23 = vld [vmem:[%s900_s0 + $0x50] ss:$8 sps:$4 sm:$0xff]  }
   0x9   :  { %312 = vmatprep.mubr.bf16.mxu1 %v666_v13  ;;  %v667_v24 = vld [vmem:[%s900_s0 + $0x24] ss:$8 sps:$4 sm:$0xff]   ;;  %v669_v26 = vld [vmem:[%s900_s0 + $0x20] ss:$8 sps:$4 sm:$0xff]   ;;  %v673_v28 = vld [vmem:[%s900_s0 + $0x34] ss:$8 sps:$4 sm:$0xff]  }
   0xa   :  { %v676_v25 = vld [vmem:[%s900_s0 + $0x64] ss:$8 sps:$4 sm:$0xff]   ;;  %v678_v27 = vld [vmem:[%s900_s0 + $0x60] ss:$8 sps:$4 sm:$0xff]   ;;  %v679_v29 = vld [vmem:[%s900_s0 + $0x74] ss:$8 sps:$4 sm:$0xff]  }
   0xb   :  { %567 = vmatpush3.bf16.msra.mxu0 %v647_v5  ;;  %636 = vmatpush3.bf16.msra.mxu1 %v647_v5  ;;  %v675_v30 = vld [vmem:[%s900_s0 + $0x30] ss:$8 sps:$4 sm:$0xff]   ;;  %v806_v34 = vld [vmem:[%s901_s2] ss:$0 sm:$0xff] }
   0xc   :  { %568 = vmatprep.subr.bf16.mxu0 %v648_v6  ;;  %629 = vmatprep.subr.bf16.mxu1 %v648_v6  ;;  %v681_v31 = vld [vmem:[%s900_s0 + $0x70] ss:$8 sps:$4 sm:$0xff]  }
   0xf   :  { %569 = vmatpush3.bf16.msra.mxu0 %v649_v7  ;;  %637 = vmatpush3.bf16.msra.mxu1 %v649_v7 }
  0x10   :  { %570 = vmatprep.subr.bf16.mxu0 %v650_v8  ;;  %630 = vmatprep.subr.bf16.mxu1 %v650_v8 }
  0x13   :  { %571 = vmatpush3.bf16.msra.mxu0 %v651_v9  ;;  %638 = vmatpush3.bf16.msra.mxu1 %v651_v9 }
  0x14   :  { %572 = vmatprep.subr.bf16.mxu0 %v652_v10  ;;  %631 = vmatprep.subr.bf16.mxu1 %v652_v10 }
  0x17   :  { %573 = vmatpush3.bf16.msra.mxu0 %v653_v12  ;;  %639 = vmatpush3.bf16.msra.mxu1 %v653_v12 }
  0x18   :  { %574 = vmatprep.subr.bf16.mxu0 %v654_v14  ;;  %632 = vmatprep.subr.bf16.mxu1 %v654_v14 }
  0x1b   :  { %575 = vmatpush3.bf16.msra.mxu0 %v655_v15  ;;  %640 = vmatpush3.bf16.msra.mxu1 %v655_v15 }
  0x1c   :  { %576 = vmatprep.subr.bf16.mxu0 %v656_v16  ;;  %633 = vmatprep.subr.bf16.mxu1 %v656_v16 }
  0x1f   :  { %577 = vmatpush3.bf16.msra.mxu0 %v657_v17  ;;  %641 = vmatpush3.bf16.msra.mxu1 %v657_v17 }
  0x22   :  { %281 = vmatmul.mubr.bf16.vlgmr.msra.gmra.mrb[0].mxu0 %v658_v18  ;;  %313 = vmatmul.mubr.bf16.vlgmr.msra.gmra.mrb[0].mxu1 %v664_v19 }
  0x23   :  { %288 = vmatprep.mubr.bf16.mxu0 %v661_v20  ;;  %320 = vmatprep.mubr.bf16.mxu1 %v670_v21 }
  0x2a   :  { %289 = vmatmul.mubr.bf16.gmra.mrb[4].mxu0 %v663_v22  ;;  %321 = vmatmul.mubr.bf16.gmra.mrb[4].mxu1 %v672_v23 }
  0x2b   :  { %296 = vmatprep.mubr.bf16.mxu0 %v667_v24  ;;  %328 = vmatprep.mubr.bf16.mxu1 %v676_v25 }
  0x32   :  { %297 = vmatmul.mubr.bf16.gmra.mrb[8].mxu0 %v669_v26  ;;  %329 = vmatmul.mubr.bf16.gmra.mrb[8].mxu1 %v678_v27 }
  0x33   :  { %304 = vmatprep.mubr.bf16.mxu0 %v673_v28  ;;  %336 = vmatprep.mubr.bf16.mxu1 %v679_v29 }
  0x3a   :  { %305 = vmatmul.mubr.bf16.gmra.mrb[12].mxu0 %v675_v30  ;;  %337 = vmatmul.mubr.bf16.gmra.mrb[12].mxu1 %v681_v31 }
  0xf5   :  { %v578_v32 = vpop.f32.mrb[0].mxu0  ;;  %v602_v33 = vpop.f32.mrb[0].mxu1 }
  0xf6   :  { %v579_v35 = vpop.f32.mrb[1].mxu0  ;;  %v603_v36 = vpop.f32.mrb[1].mxu1 }
  0xf7   :  { %v580_v37 = vadd.f32 %v579_v35, %v578_v32  ;;  %v581_v38 = vpop.f32.mrb[2].mxu0  ;;  %v604_v39 = vadd.f32 %v603_v36, %v602_v33  ;;  %v605_v40 = vpop.f32.mrb[2].mxu1 }
  0xf8   :  { %v582_v41 = vpop.f32.mrb[3].mxu0  ;;  %v606_v42 = vpop.f32.mrb[3].mxu1 }
  0xf9   :  { %v283_v43 = vadd.f32 %v580_v37, %v806_v34  ;;  %v583_v44 = vadd.f32 %v582_v41, %v581_v38  ;;  %v810_v45 = vadd.f32 %v604_v39, %v806_v34  ;;  %v607_v46 = vadd.f32 %v606_v42, %v605_v40 }
  0xfb   :  { %345 = vst [vmem:[%s902_s3] sm:$0xff] %v283_v43  ;;  %v286_v47 = vadd.f32 %v583_v44, %v806_v34  ;;  %353 = vst [vmem:[%s902_s3 + $0x40] sm:$0xff] %v810_v45  ;;  %v821_v48 = vadd.f32 %v607_v46, %v806_v34  ;;  %v481_v49 = vmul.f32 %v283_v43, %v283_v43 }
  0xfd   :  { %346 = vst [vmem:[%s902_s3 + $0x8] sm:$0xff] %v286_v47  ;;  %v460_v50 = vadd.f32 %v286_v47, %v283_v43  ;;  %v482_v51 = vmul.f32 %v286_v47, %v286_v47  ;;  %v584_v52 = vpop.f32.mrb[4].mxu0  ;;  %354 = vst [vmem:[%s902_s3 + $0x48] sm:$0xff] %v821_v48  ;;  %v608_v53 = vpop.f32.mrb[4].mxu1 }
  0xfe   :  { %v585_v54 = vpop.f32.mrb[5].mxu0  ;;  %v609_v55 = vpop.f32.mrb[5].mxu1 }
  0xff   :  { %v497_v56 = vadd.f32 %v482_v51, %v481_v49  ;;  %v586_v57 = vadd.f32 %v585_v54, %v584_v52  ;;  %v587_v58 = vpop.f32.mrb[6].mxu0  ;;  %v610_v59 = vadd.f32 %v609_v55, %v608_v53  ;;  %v611_v60 = vpop.f32.mrb[6].mxu1 }
 0x100   :  { %v588_v61 = vpop.f32.mrb[7].mxu0  ;;  %v612_v62 = vpop.f32.mrb[7].mxu1 }
 0x101   :  { %v291_v63 = vadd.f32 %v586_v57, %v806_v34  ;;  %v589_v0 = vadd.f32 %v588_v61, %v587_v58  ;;  %v832_v1 = vadd.f32 %v610_v59, %v806_v34  ;;  %v613_v2 = vadd.f32 %v612_v62, %v611_v60 }
 0x102   :  { %v489_v57 = vmul.f32 %v810_v45, %v810_v45 }
 0x103   :  { %347 = vst [vmem:[%s902_s3 + $0x10] sm:$0xff] %v291_v63  ;;  %v461_v3 = vadd.f32 %v460_v50, %v291_v63  ;;  %v483_v4 = vmul.f32 %v291_v63, %v291_v63  ;;  %v294_v5 = vadd.f32 %v589_v0, %v806_v34  ;;  %355 = vst [vmem:[%s902_s3 + $0x50] sm:$0xff] %v832_v1 }
 0x104   :  { %v843_v6 = vadd.f32 %v613_v2, %v806_v34  ;;  %v491_v62 = vmul.f32 %v832_v1, %v832_v1 }
 0x105   :  { %v498_v7 = vadd.f32 %v497_v56, %v483_v4  ;;  %348 = vst [vmem:[%s902_s3 + $0x18] sm:$0xff] %v294_v5  ;;  %v462_v8 = vadd.f32 %v461_v3, %v294_v5  ;;  %v484_v9 = vmul.f32 %v294_v5, %v294_v5  ;;  %v590_v10 = vpop.f32.mrb[8].mxu0  ;;  %v614_v11 = vpop.f32.mrb[8].mxu1 }
 0x106   :  { %v591_v12 = vpop.f32.mrb[9].mxu0  ;;  %356 = vst [vmem:[%s902_s3 + $0x58] sm:$0xff] %v843_v6  ;;  %v615_v13 = vpop.f32.mrb[9].mxu1  ;;  %v492_v2 = vmul.f32 %v843_v6, %v843_v6 }
 0x107   :  { %v499_v14 = vadd.f32 %v498_v7, %v484_v9  ;;  %v592_v15 = vadd.f32 %v591_v12, %v590_v10  ;;  %v593_v16 = vpop.f32.mrb[10].mxu0  ;;  %v616_v17 = vadd.f32 %v615_v13, %v614_v11  ;;  %v617_v18 = vpop.f32.mrb[10].mxu1 }
 0x108   :  { %v594_v19 = vpop.f32.mrb[11].mxu0  ;;  %v618_v20 = vpop.f32.mrb[11].mxu1 }
 0x109   :  { %v299_v21 = vadd.f32 %v592_v15, %v806_v34  ;;  %v595_v22 = vadd.f32 %v594_v19, %v593_v16  ;;  %v331_v23 = vadd.f32 %v616_v17, %v806_v34  ;;  %v619_v24 = vadd.f32 %v618_v20, %v617_v18 }
 0x10b   :  { %349 = vst [vmem:[%s902_s3 + $0x20] sm:$0xff] %v299_v21  ;;  %v463_v25 = vadd.f32 %v462_v8, %v299_v21  ;;  %v485_v26 = vmul.f32 %v299_v21, %v299_v21  ;;  %v302_v27 = vadd.f32 %v595_v22, %v806_v34  ;;  %357 = vst [vmem:[%s902_s3 + $0x60] sm:$0xff] %v331_v23 }
 0x10c   :  { %v334_v28 = vadd.f32 %v619_v24, %v806_v34  ;;  %v493_v5 = vmul.f32 %v331_v23, %v331_v23 }
 0x10d   :  { %v500_v29 = vadd.f32 %v499_v14, %v485_v26  ;;  %350 = vst [vmem:[%s902_s3 + $0x28] sm:$0xff] %v302_v27  ;;  %v464_v30 = vadd.f32 %v463_v25, %v302_v27  ;;  %v486_v31 = vmul.f32 %v302_v27, %v302_v27  ;;  %v596_v32 = vpop.f32.mrb[12].mxu0  ;;  %v620_v33 = vpop.f32.mrb[12].mxu1 }
 0x10e   :  { %v597_v35 = vpop.f32.mrb[13].mxu0  ;;  %358 = vst [vmem:[%s902_s3 + $0x68] sm:$0xff] %v334_v28  ;;  %v621_v36 = vpop.f32.mrb[13].mxu1  ;;  %v494_v10 = vmul.f32 %v334_v28, %v334_v28 }
 0x10f   :  { %v501_v37 = vadd.f32 %v500_v29, %v486_v31  ;;  %v598_v38 = vadd.f32 %v597_v35, %v596_v32  ;;  %v599_v39 = vpop.f32.mrb[14].mxu0  ;;  %v622_v40 = vadd.f32 %v621_v36, %v620_v33  ;;  %v623_v41 = vpop.f32.mrb[14].mxu1 }
 0x110   :  { %v600_v42 = vpop.f32.mrb[15].mxu0  ;;  %v624_v43 = vpop.f32.mrb[15].mxu1 }
 0x111   :  { %v307_v44 = vadd.f32 %v598_v38, %v806_v34  ;;  %v601_v46 = vadd.f32 %v600_v42, %v599_v39  ;;  %v339_v47 = vadd.f32 %v622_v40, %v806_v34  ;;  %v625_v49 = vadd.f32 %v624_v43, %v623_v41 }
 0x113   :  { %351 = vst [vmem:[%s902_s3 + $0x30] sm:$0xff] %v307_v44  ;;  %v465_v50 = vadd.f32 %v464_v30, %v307_v44  ;;  %v487_v51 = vmul.f32 %v307_v44, %v307_v44  ;;  %v310_v52 = vadd.f32 %v601_v46, %v806_v34  ;;  %359 = vst [vmem:[%s902_s3 + $0x70] sm:$0xff] %v339_v47 }
 0x114   :  { %v342_v53 = vadd.f32 %v625_v49, %v806_v34  ;;  %v490_v34 = vmul.f32 %v821_v48, %v821_v48 }
 0x115   :  { %v502_v54 = vadd.f32 %v501_v37, %v487_v51  ;;  %352 = vst [vmem:[%s902_s3 + $0x38] sm:$0xff] %v310_v52  ;;  %v466_v55 = vadd.f32 %v465_v50, %v310_v52  ;;  %v488_v56 = vmul.f32 %v310_v52, %v310_v52 }
 0x116   :  { %360 = vst [vmem:[%s902_s3 + $0x78] sm:$0xff] %v342_v53  ;;  %v496_v15 = vmul.f32 %v342_v53, %v342_v53 }
 0x117   :  { %v467_v58 = vadd.f32 %v466_v55, %v810_v45  ;;  %v503_v59 = vadd.f32 %v502_v54, %v488_v56 }
 0x119   :  { %v468_v60 = vadd.f32 %v467_v58, %v821_v48  ;;  %v504_v61 = vadd.f32 %v503_v59, %v489_v57  ;;  %v495_v48 = vmul.f32 %v339_v47, %v339_v47 }
 0x11b   :  { %v505_v63 = vadd.f32 %v504_v61, %v490_v34  ;;  %v469_v0 = vadd.f32 %v468_v60, %v832_v1 }
 0x11d   :  { %v470_v3 = vadd.f32 %v469_v0, %v843_v6  ;;  %v506_v4 = vadd.f32 %v505_v63, %v491_v62 }
 0x11f   :  { %v471_v45 = vadd.f32 %v470_v3, %v331_v23  ;;  %v507_v7 = vadd.f32 %v506_v4, %v492_v2 }
 0x121   :  { %v508_v8 = vadd.f32 %v507_v7, %v493_v5  ;;  %v472_v9 = vadd.f32 %v471_v45, %v334_v28 }
 0x123   :  { %v509_v11 = vadd.f32 %v508_v8, %v494_v10  ;;  %v473_v12 = vadd.f32 %v472_v9, %v339_v47 }
 0x125   :  { %v510_v13 = vadd.f32 %v509_v11, %v495_v48  ;;  %v474_v14 = vadd.f32 %v473_v12, %v342_v53 }
 0x127   :  { %v475_v16 = vrot.slane %v474_v14, 4  ;;  %v511_v1 = vadd.f32 %v510_v13, %v496_v15 }
 0x129   :  { %v476_v17 = vadd.f32 %v475_v16, %v474_v14  ;;  %v512_v18 = vrot.slane %v511_v1, 4 }
 0x12b   :  { %v477_v19 = vrot.slane %v476_v17, 2  ;;  %v513_v20 = vadd.f32 %v512_v18, %v511_v1 }
 0x12d   :  { %v478_v6 = vadd.f32 %v477_v19, %v476_v17  ;;  %v514_v21 = vrot.slane %v513_v20, 2 }
 0x12f   :  { %v479_v22 = vrot.slane %v478_v6, 1  ;;  %v515_v23 = vadd.f32 %v514_v21, %v513_v20 }
 0x131   :  { %v516_v24 = vrot.slane %v515_v23, 1  ;;  %v480_v25 = vadd.f32 %v479_v22, %v478_v6 }
 0x133   :  { %v517_v26 = vadd.f32 %v516_v24, %v515_v23 }
 0x135   :  { %v519_v27 = vsel %vm518_vm0, %v480_v25, %v517_v26 }
 0x136   :  { %520 = vst [vmem:[%s903_s4] sm:$0x3] %v519_v27 }

// kernel: _lambda_.23
= control target key start
LH: loop header
LB: loop body
LE: loop exit
PB: predicated region body
PF: predicated region fallthrough
CT: control target
= control target key end

     0   :  { %s231_s0 = inlined_call_operand.vmem [shape: f32[104,128], index: 0, kind: input, shape index: {}]   ;;  %s232_s1 = inlined_call_operand.vmem [shape: f32[1,128], index: 1, kind: input, shape index: {}]   ;;  %s233_s2 = inlined_call_operand.vmem [shape: f32[1,128], index: 2, kind: input, shape index: {}]   ;;  %s234_s3 = inlined_call_operand.vmem [shape: f32[104,128], index: 3, kind: output, shape index: {}]  }
   0x1   :  { %v14_v0 = vld [vmem:[%s231_s0] sm:$0xff]  ;;  %v15_v4 = vld [vmem:[%s231_s0 + $0x8] sm:$0xff]  ;;  %v16_v5 = vld [vmem:[%s231_s0 + $0x10] sm:$0xff] }
   0x2   :  { %v110_v1 = vld [vmem:[%s232_s1] ss:$0 sm:$0xff]  ;;  %v17_v6 = vld [vmem:[%s231_s0 + $0x18] sm:$0xff]  ;;  %v19_v11 = vld [vmem:[%s231_s0 + $0x28] sm:$0xff] }
   0x3   :  { %v141_v2 = vld [vmem:[%s233_s2] ss:$0 sm:$0xff]  ;;  %v34_v3 = vmul.f32 %v110_v1, %v14_v0  ;;  %v35_v7 = vmul.f32 %v110_v1, %v15_v4  ;;  %v36_v8 = vmul.f32 %v110_v1, %v16_v5  ;;  %v37_v9 = vmul.f32 %v110_v1, %v17_v6  ;;  %v20_v12 = vld [vmem:[%s231_s0 + $0x30] sm:$0xff]  ;;  %v21_v17 = vld [vmem:[%s231_s0 + $0x38] sm:$0xff] }
   0x4   :  { %v18_v10 = vld [vmem:[%s231_s0 + $0x20] sm:$0xff]  ;;  %v39_v15 = vmul.f32 %v110_v1, %v19_v11  ;;  %v40_v16 = vmul.f32 %v110_v1, %v20_v12  ;;  %v41_v21 = vmul.f32 %v110_v1, %v21_v17  ;;  %v23_v27 = vld [vmem:[%s231_s0 + $0x48] sm:$0xff]  ;;  %v24_v28 = vld [vmem:[%s231_s0 + $0x50] sm:$0xff] }
   0x5   :  { %v54_v13 = vadd.f32 %v141_v2, %v34_v3  ;;  %v38_v14 = vmul.f32 %v110_v1, %v18_v10  ;;  %v55_v18 = vadd.f32 %v141_v2, %v35_v7  ;;  %v56_v19 = vadd.f32 %v141_v2, %v36_v8  ;;  %v22_v22 = vld [vmem:[%s231_s0 + $0x40] sm:$0xff]  ;;  %v25_v29 = vld [vmem:[%s231_s0 + $0x58] sm:$0xff] }
   0x6   :  { %v57_v20 = vadd.f32 %v141_v2, %v37_v9  ;;  %v59_v25 = vadd.f32 %v141_v2, %v39_v15  ;;  %v60_v26 = vadd.f32 %v141_v2, %v40_v16  ;;  %v61_v33 = vadd.f32 %v141_v2, %v41_v21  ;;  %v26_v42 = vld [vmem:[%s231_s0 + $0x60] sm:$0xff] }
   0x7   :  { %v67_v23 = vmul.f32 0.2, %v54_v13  ;;  %v58_v24 = vadd.f32 %v141_v2, %v38_v14  ;;  %v68_v30 = vmul.f32 0.2, %v55_v18  ;;  %v69_v31 = vmul.f32 0.2, %v56_v19 }
   0x8   :  { %v70_v32 = vmul.f32 0.2, %v57_v20  ;;  %v72_v36 = vmul.f32 0.2, %v59_v25  ;;  %v73_v37 = vmul.f32 0.2, %v60_v26  ;;  %v42_v46 = vmul.f32 %v110_v1, %v22_v22 }
   0x9   :  { %v80_v34 = vmax.f32 %v54_v13, %v67_v23  ;;  %v71_v35 = vmul.f32 0.2, %v58_v24  ;;  %v81_v38 = vmax.f32 %v55_v18, %v68_v30  ;;  %v82_v39 = vmax.f32 %v56_v19, %v69_v31 }
   0xa   :  { %v83_v40 = vmax.f32 %v57_v20, %v70_v32  ;;  %v74_v41 = vmul.f32 0.2, %v61_v33  ;;  %v85_v44 = vmax.f32 %v59_v25, %v72_v36  ;;  %v86_v45 = vmax.f32 %v60_v26, %v73_v37 }
   0xb   :  { %93 = vst [vmem:[%s234_s3] sm:$0xff] %v80_v34  ;;  %v84_v43 = vmax.f32 %v58_v24, %v71_v35  ;;  %94 = vst [vmem:[%s234_s3 + $0x8] sm:$0xff] %v81_v38  ;;  %v43_v48 = vmul.f32 %v110_v1, %v23_v27  ;;  %v44_v49 = vmul.f32 %v110_v1, %v24_v28 }
   0xc   :  { %95 = vst [vmem:[%s234_s3 + $0x10] sm:$0xff] %v82_v39  ;;  %96 = vst [vmem:[%s234_s3 + $0x18] sm:$0xff] %v83_v40  ;;  %v87_v47 = vmax.f32 %v61_v33, %v74_v41  ;;  %v45_v50 = vmul.f32 %v110_v1, %v25_v29  ;;  %v62_v51 = vadd.f32 %v141_v2, %v42_v46 }
   0xd   :  { %97 = vst [vmem:[%s234_s3 + $0x20] sm:$0xff] %v84_v43  ;;  %98 = vst [vmem:[%s234_s3 + $0x28] sm:$0xff] %v85_v44  ;;  %v46_v52 = vmul.f32 %v110_v1, %v26_v42  ;;  %v63_v53 = vadd.f32 %v141_v2, %v43_v48  ;;  %v64_v54 = vadd.f32 %v141_v2, %v44_v49 }
   0xe   :  { %99 = vst [vmem:[%s234_s3 + $0x30] sm:$0xff] %v86_v45  ;;  %100 = vst [vmem:[%s234_s3 + $0x38] sm:$0xff] %v87_v47  ;;  %v65_v55 = vadd.f32 %v141_v2, %v45_v50  ;;  %v75_v56 = vmul.f32 0.2, %v62_v51 }
   0xf   :  { %v66_v57 = vadd.f32 %v141_v2, %v46_v52  ;;  %v76_v58 = vmul.f32 0.2, %v63_v53  ;;  %v77_v59 = vmul.f32 0.2, %v64_v54 }
  0x10   :  { %v78_v60 = vmul.f32 0.2, %v65_v55  ;;  %v88_v61 = vmax.f32 %v62_v51, %v75_v56 }
  0x11   :  { %v79_v62 = vmul.f32 0.2, %v66_v57  ;;  %v89_v63 = vmax.f32 %v63_v53, %v76_v58  ;;  %v90_v0 = vmax.f32 %v64_v54, %v77_v59 }
  0x12   :  { %v91_v1 = vmax.f32 %v65_v55, %v78_v60  ;;  %101 = vst [vmem:[%s234_s3 + $0x40] sm:$0xff] %v88_v61 }
  0x13   :  { %v92_v3 = vmax.f32 %v66_v57, %v79_v62  ;;  %102 = vst [vmem:[%s234_s3 + $0x48] sm:$0xff] %v89_v63  ;;  %103 = vst [vmem:[%s234_s3 + $0x50] sm:$0xff] %v90_v0 }
  0x14   :  { %104 = vst [vmem:[%s234_s3 + $0x58] sm:$0xff] %v91_v1 }
  0x15   :  { %105 = vst [vmem:[%s234_s3 + $0x60] sm:$0xff] %v92_v3 }

// kernel: _lambda_.22
= control target key start
LH: loop header
LB: loop body
LE: loop exit
PB: predicated region body
PF: predicated region fallthrough
CT: control target
= control target key end

     0   :  { %vm759_vm1 = vcmask 1040384   ;;  %s1278_s1 = inlined_call_operand.vmem [shape: bf16[512,128], index: 1, kind: input, shape index: {}]   ;;  %s1279_s0 = inlined_call_operand.vmem [shape: bf16[104,512], index: 0, kind: input, shape index: {}]   ;;  %s1280_s2 = inlined_call_operand.vmem [shape: f32[1,128], index: 2, kind: input, shape index: {}]   ;;  %s1281_s3 = inlined_call_operand.vmem [shape: f32[104,128], index: 3, kind: output, shape index: {0}]   ;;  %s1282_s4 = inlined_call_operand.vmem [shape: f32[1,2,128], index: 4, kind: output, shape index: {1}]  }
   0x1   :  { %v947_v0 = vld [vmem:[%s1278_s1 + $0x40] sm:$0xff]   ;;  %v951_v4 = vld [vmem:[%s1278_s1 + $0x48] sm:$0xff]   ;;  %v955_v8 = vld [vmem:[%s1278_s1 + $0x50] sm:$0xff]  }
   0x2   :  { %v948_v1 = vld [vmem:[%s1278_s1 + $0xc0] sm:$0xff]   ;;  %831 = vmatprep.subr.bf16.mxu0 %v947_v0  ;;  %v952_v5 = vld [vmem:[%s1278_s1 + $0xc8] sm:$0xff]   ;;  %v956_v9 = vld [vmem:[%s1278_s1 + $0xd0] sm:$0xff]  }
   0x3   :  { %v949_v2 = vld [vmem:[%s1278_s1] sm:$0xff]   ;;  %889 = vmatprep.subr.bf16.mxu1 %v948_v1  ;;  %v953_v6 = vld [vmem:[%s1278_s1 + $0x8] sm:$0xff]   ;;  %v957_v10 = vld [vmem:[%s1278_s1 + $0x10] sm:$0xff]  }
   0x4   :  { %v950_v3 = vld [vmem:[%s1278_s1 + $0x80] sm:$0xff]   ;;  %832 = vmatpush3.bf16.msra.mxu0 %v949_v2  ;;  %v954_v7 = vld [vmem:[%s1278_s1 + $0x88] sm:$0xff]   ;;  %v958_v11 = vld [vmem:[%s1278_s1 + $0x90] sm:$0xff]  }
   0x5   :  { %890 = vmatpush3.bf16.msra.mxu1 %v950_v3  ;;  %833 = vmatprep.subr.bf16.mxu0 %v951_v4  ;;  %v959_v12 = vld [vmem:[%s1278_s1 + $0x58] sm:$0xff]   ;;  %v963_v16 = vld [vmem:[%s1278_s1 + $0x60] sm:$0xff]   ;;  %v967_v20 = vld [vmem:[%s1278_s1 + $0x68] sm:$0xff]  }
   0x6   :  { %891 = vmatprep.subr.bf16.mxu1 %v952_v5  ;;  %v960_v13 = vld [vmem:[%s1278_s1 + $0xd8] sm:$0xff]   ;;  %v964_v17 = vld [vmem:[%s1278_s1 + $0xe0] sm:$0xff]   ;;  %v968_v21 = vld [vmem:[%s1278_s1 + $0xe8] sm:$0xff]  }
   0x7   :  { %v961_v14 = vld [vmem:[%s1278_s1 + $0x18] sm:$0xff]   ;;  %v965_v18 = vld [vmem:[%s1278_s1 + $0x20] sm:$0xff]   ;;  %v969_v22 = vld [vmem:[%s1278_s1 + $0x28] sm:$0xff]  }
   0x8   :  { %834 = vmatpush3.bf16.msra.mxu0 %v953_v6  ;;  %v962_v15 = vld [vmem:[%s1278_s1 + $0x98] sm:$0xff]   ;;  %v966_v19 = vld [vmem:[%s1278_s1 + $0xa0] sm:$0xff]   ;;  %v970_v23 = vld [vmem:[%s1278_s1 + $0xa8] sm:$0xff]  }
   0x9   :  { %892 = vmatpush3.bf16.msra.mxu1 %v954_v7  ;;  %835 = vmatprep.subr.bf16.mxu0 %v955_v8  ;;  %v971_v24 = vld [vmem:[%s1278_s1 + $0x70] sm:$0xff]   ;;  %v975_v28 = vld [vmem:[%s1278_s1 + $0x78] sm:$0xff]   ;;  %v41_v54 = vld [vmem:[%s1279_s0 + $0xc0] sm:$0xff] }
   0xa   :  { %893 = vmatprep.subr.bf16.mxu1 %v956_v9  ;;  %v972_v25 = vld [vmem:[%s1278_s1 + $0xf0] sm:$0xff]   ;;  %v976_v29 = vld [vmem:[%s1278_s1 + $0xf8] sm:$0xff]   ;;  %v42_v55 = vld [vmem:[%s1279_s0 + $0xc8] sm:$0xff]  ;;  %v796_v58 = vcombine.high %v41_v54, %v41_v54  ;;  %v795_v60 = vcombine.low %v41_v54, %v41_v54 }
   0xb   :  { %v973_v26 = vld [vmem:[%s1278_s1 + $0x30] sm:$0xff]   ;;  %v977_v30 = vld [vmem:[%s1278_s1 + $0x38] sm:$0xff]   ;;  %v798_v59 = vcombine.high %v42_v55, %v42_v55  ;;  %v797_v61 = vcombine.low %v42_v55, %v42_v55  ;;  %v1221_v0 = vld [vmem:[%s1280_s2] ss:$0 sm:$0xff] }
   0xc   :  { %836 = vmatpush3.bf16.msra.mxu0 %v957_v10  ;;  %v974_v27 = vld [vmem:[%s1278_s1 + $0xb0] sm:$0xff]   ;;  %v978_v31 = vld [vmem:[%s1278_s1 + $0xb8] sm:$0xff]  }
   0xd   :  { %894 = vmatpush3.bf16.msra.mxu1 %v958_v11  ;;  %837 = vmatprep.subr.bf16.mxu0 %v959_v12  ;;  %v979_v32 = vld [vmem:[%s1279_s0] ss:$16 sps:$4 sm:$0xff]   ;;  %v981_v33 = vld [vmem:[%s1279_s0 + $0x4] ss:$16 sps:$4 sm:$0xff]   ;;  %v982_v34 = vld [vmem:[%s1279_s0 + $0x8] ss:$16 sps:$4 sm:$0xff]  }
   0xe   :  { %895 = vmatprep.subr.bf16.mxu1 %v960_v13  ;;  %v984_v35 = vld [vmem:[%s1279_s0 + $0xc] ss:$16 sps:$4 sm:$0xff]   ;;  %472 = vmatprep.mubr.bf16.mxu0 %v981_v33  ;;  %v985_v36 = vld [vmem:[%s1279_s0 + $0x24] ss:$16 sps:$4 sm:$0xff]   ;;  %v989_v38 = vld [vmem:[%s1279_s0 + $0x20] ss:$16 sps:$4 sm:$0xff]  }
   0xf   :  { %560 = vmatprep.mubr.bf16.mxu1 %v984_v35  ;;  %v987_v37 = vld [vmem:[%s1279_s0 + $0x2c] ss:$16 sps:$4 sm:$0xff]   ;;  %v990_v39 = vld [vmem:[%s1279_s0 + $0x28] ss:$16 sps:$4 sm:$0xff]   ;;  %v991_v40 = vld [vmem:[%s1279_s0 + $0x44] ss:$16 sps:$4 sm:$0xff]  }
  0x10   :  { %838 = vmatpush3.bf16.msra.mxu0 %v961_v14  ;;  %v993_v41 = vld [vmem:[%s1279_s0 + $0x4c] ss:$16 sps:$4 sm:$0xff]   ;;  %v995_v42 = vld [vmem:[%s1279_s0 + $0x40] ss:$16 sps:$4 sm:$0xff]   ;;  %v996_v43 = vld [vmem:[%s1279_s0 + $0x48] ss:$16 sps:$4 sm:$0xff]  }
  0x11   :  { %896 = vmatpush3.bf16.msra.mxu1 %v962_v15  ;;  %839 = vmatprep.subr.bf16.mxu0 %v963_v16  ;;  %v997_v44 = vld [vmem:[%s1279_s0 + $0x64] ss:$16 sps:$4 sm:$0xff]   ;;  %v999_v45 = vld [vmem:[%s1279_s0 + $0x6c] ss:$16 sps:$4 sm:$0xff]   ;;  %v1001_v46 = vld [vmem:[%s1279_s0 + $0x60] ss:$16 sps:$4 sm:$0xff]  }
  0x12   :  { %897 = vmatprep.subr.bf16.mxu1 %v964_v17  ;;  %v1002_v47 = vld [vmem:[%s1279_s0 + $0x68] ss:$16 sps:$4 sm:$0xff]   ;;  %v1003_v48 = vld [vmem:[%s1279_s0 + $0x84] ss:$16 sps:$4 sm:$0xff]   ;;  %v1005_v49 = vld [vmem:[%s1279_s0 + $0x8c] ss:$16 sps:$4 sm:$0xff]  }
  0x13   :  { %v1007_v50 = vld [vmem:[%s1279_s0 + $0x80] ss:$16 sps:$4 sm:$0xff]   ;;  %v1008_v51 = vld [vmem:[%s1279_s0 + $0x88] ss:$16 sps:$4 sm:$0xff]   ;;  %v1009_v52 = vld [vmem:[%s1279_s0 + $0xa4] ss:$16 sps:$4 sm:$0xff]  }
  0x14   :  { %840 = vmatpush3.bf16.msra.mxu0 %v965_v18  ;;  %v1011_v53 = vld [vmem:[%s1279_s0 + $0xac] ss:$16 sps:$4 sm:$0xff]   ;;  %v1013_v56 = vld [vmem:[%s1279_s0 + $0xa0] ss:$16 sps:$4 sm:$0xff]   ;;  %v1014_v57 = vld [vmem:[%s1279_s0 + $0xa8] ss:$16 sps:$4 sm:$0xff]  }
  0x15   :  { %898 = vmatpush3.bf16.msra.mxu1 %v966_v19  ;;  %841 = vmatprep.subr.bf16.mxu0 %v967_v20 }
  0x16   :  { %899 = vmatprep.subr.bf16.mxu1 %v968_v21 }
  0x18   :  { %842 = vmatpush3.bf16.msra.mxu0 %v969_v22 }
  0x19   :  { %900 = vmatpush3.bf16.msra.mxu1 %v970_v23  ;;  %843 = vmatprep.subr.bf16.mxu0 %v971_v24 }
  0x1a   :  { %901 = vmatprep.subr.bf16.mxu1 %v972_v25 }
  0x1c   :  { %844 = vmatpush3.bf16.msra.mxu0 %v973_v26 }
  0x1d   :  { %902 = vmatpush3.bf16.msra.mxu1 %v974_v27  ;;  %845 = vmatprep.subr.bf16.mxu0 %v975_v28 }
  0x1e   :  { %903 = vmatprep.subr.bf16.mxu1 %v976_v29 }
  0x20   :  { %846 = vmatpush3.bf16.msra.mxu0 %v977_v30 }
  0x21   :  { %904 = vmatpush3.bf16.msra.mxu1 %v978_v31 }
  0x23   :  { %473 = vmatmul.mubr.bf16.vlgmr.msra.gmra.mrb[0].mxu0 %v979_v32 }
  0x24   :  { %561 = vmatmul.mubr.bf16.vlgmr.msra.gmra.mrb[0].mxu1 %v982_v34  ;;  %480 = vmatprep.mubr.bf16.mxu0 %v985_v36 }
  0x25   :  { %568 = vmatprep.mubr.bf16.mxu1 %v987_v37 }
  0x2b   :  { %481 = vmatmul.mubr.bf16.gmra.mrb[4].mxu0 %v989_v38 }
  0x2c   :  { %569 = vmatmul.mubr.bf16.gmra.mrb[4].mxu1 %v990_v39  ;;  %488 = vmatprep.mubr.bf16.mxu0 %v991_v40 }
  0x2d   :  { %576 = vmatprep.mubr.bf16.mxu1 %v993_v41 }
  0x33   :  { %489 = vmatmul.mubr.bf16.gmra.mrb[8].mxu0 %v995_v42 }
  0x34   :  { %577 = vmatmul.mubr.bf16.gmra.mrb[8].mxu1 %v996_v43  ;;  %496 = vmatprep.mubr.bf16.mxu0 %v997_v44 }
  0x35   :  { %584 = vmatprep.mubr.bf16.mxu1 %v999_v45 }
  0x3b   :  { %497 = vmatmul.mubr.bf16.gmra.mrb[12].mxu0 %v1001_v46 }
  0x3c   :  { %585 = vmatmul.mubr.bf16.gmra.mrb[12].mxu1 %v1002_v47  ;;  %504 = vmatprep.mubr.bf16.mxu0 %v1003_v48 }
  0x3d   :  { %592 = vmatprep.mubr.bf16.mxu1 %v1005_v49 }
  0x43   :  { %505 = vmatmul.mubr.bf16.gmra.mrb[16].mxu0 %v1007_v50 }
  0x44   :  { %593 = vmatmul.mubr.bf16.gmra.mrb[16].mxu1 %v1008_v51  ;;  %512 = vmatprep.mubr.bf16.mxu0 %v1009_v52 }
  0x45   :  { %600 = vmatprep.mubr.bf16.mxu1 %v1011_v53 }
  0x4b   :  { %513 = vmatmul.mubr.bf16.gmra.mrb[20].mxu0 %v1013_v56 }
  0x4c   :  { %601 = vmatmul.mubr.bf16.gmra.mrb[20].mxu1 %v1014_v57  ;;  %520 = vmatprep.mubr.bf16.mxu0 %v796_v58 }
  0x4d   :  { %608 = vmatprep.mubr.bf16.mxu1 %v798_v59 }
  0x53   :  { %521 = vmatmul.mubr.bf16.gmra.mrb[24].mxu0 %v795_v60 }
  0x54   :  { %609 = vmatmul.mubr.bf16.gmra.mrb[24].mxu1 %v797_v61 }
  0xf6   :  { %v847_v62 = vpop.f32.mrb[0].mxu0 }
  0xf7   :  { %v905_v63 = vpop.f32.mrb[0].mxu1  ;;  %v848_v1 = vpop.f32.mrb[1].mxu0 }
  0xf8   :  { %v849_v2 = vadd.f32 %v848_v1, %v847_v62  ;;  %v906_v3 = vpop.f32.mrb[1].mxu1  ;;  %v850_v4 = vpop.f32.mrb[2].mxu0 }
  0xf9   :  { %v907_v5 = vadd.f32 %v906_v3, %v905_v63  ;;  %v908_v6 = vpop.f32.mrb[2].mxu1  ;;  %v851_v7 = vpop.f32.mrb[3].mxu0 }
  0xfa   :  { %v475_v8 = vadd.f32 %v849_v2, %v1221_v0  ;;  %v852_v9 = vadd.f32 %v851_v7, %v850_v4  ;;  %v909_v10 = vpop.f32.mrb[3].mxu1 }
  0xfb   :  { %v910_v11 = vadd.f32 %v909_v10, %v908_v6 }
  0xfc   :  { %v563_v12 = vadd.f32 %v907_v5, %v475_v8  ;;  %v478_v13 = vadd.f32 %v852_v9, %v1221_v0 }
  0xfe   :  { %616 = vst [vmem:[%s1281_s3] sm:$0xff] %v563_v12  ;;  %v566_v14 = vadd.f32 %v910_v11, %v478_v13  ;;  %v853_v15 = vpop.f32.mrb[4].mxu0  ;;  %v728_v18 = vmul.f32 %v563_v12, %v563_v12 }
  0xff   :  { %v911_v16 = vpop.f32.mrb[4].mxu1  ;;  %v854_v17 = vpop.f32.mrb[5].mxu0 }
 0x100   :  { %617 = vst [vmem:[%s1281_s3 + $0x8] sm:$0xff] %v566_v14  ;;  %v710_v19 = vadd.f32 %v566_v14, %v563_v12  ;;  %v729_v20 = vmul.f32 %v566_v14, %v566_v14  ;;  %v855_v21 = vadd.f32 %v854_v17, %v853_v15  ;;  %v912_v22 = vpop.f32.mrb[5].mxu1  ;;  %v856_v23 = vpop.f32.mrb[6].mxu0 }
 0x101   :  { %v913_v24 = vadd.f32 %v912_v22, %v911_v16  ;;  %v914_v25 = vpop.f32.mrb[6].mxu1  ;;  %v857_v26 = vpop.f32.mrb[7].mxu0 }
 0x102   :  { %v741_v27 = vadd.f32 %v729_v20, %v728_v18  ;;  %v483_v28 = vadd.f32 %v855_v21, %v1221_v0  ;;  %v858_v29 = vadd.f32 %v857_v26, %v856_v23  ;;  %v915_v30 = vpop.f32.mrb[7].mxu1 }
 0x103   :  { %v916_v31 = vadd.f32 %v915_v30, %v914_v25 }
 0x104   :  { %v571_v32 = vadd.f32 %v913_v24, %v483_v28  ;;  %v486_v33 = vadd.f32 %v858_v29, %v1221_v0 }
 0x106   :  { %618 = vst [vmem:[%s1281_s3 + $0x10] sm:$0xff] %v571_v32  ;;  %v711_v34 = vadd.f32 %v710_v19, %v571_v32  ;;  %v730_v35 = vmul.f32 %v571_v32, %v571_v32  ;;  %v574_v36 = vadd.f32 %v916_v31, %v486_v33  ;;  %v859_v37 = vpop.f32.mrb[8].mxu0 }
 0x107   :  { %v917_v38 = vpop.f32.mrb[8].mxu1  ;;  %v860_v39 = vpop.f32.mrb[9].mxu0 }
 0x108   :  { %v742_v40 = vadd.f32 %v741_v27, %v730_v35  ;;  %619 = vst [vmem:[%s1281_s3 + $0x18] sm:$0xff] %v574_v36  ;;  %v712_v41 = vadd.f32 %v711_v34, %v574_v36  ;;  %v731_v42 = vmul.f32 %v574_v36, %v574_v36  ;;  %v861_v43 = vadd.f32 %v860_v39, %v859_v37  ;;  %v918_v44 = vpop.f32.mrb[9].mxu1  ;;  %v862_v45 = vpop.f32.mrb[10].mxu0 }
 0x109   :  { %v919_v46 = vadd.f32 %v918_v44, %v917_v38  ;;  %v920_v47 = vpop.f32.mrb[10].mxu1  ;;  %v863_v48 = vpop.f32.mrb[11].mxu0 }
 0x10a   :  { %v743_v49 = vadd.f32 %v742_v40, %v731_v42  ;;  %v491_v50 = vadd.f32 %v861_v43, %v1221_v0  ;;  %v864_v51 = vadd.f32 %v863_v48, %v862_v45  ;;  %v921_v52 = vpop.f32.mrb[11].mxu1  ;;  %v629_v43 = vlaneseq }
 0x10b   :  { %v922_v53 = vadd.f32 %v921_v52, %v920_v47 }
 0x10c   :  { %v579_v54 = vadd.f32 %v919_v46, %v491_v50  ;;  %v494_v55 = vadd.f32 %v864_v51, %v1221_v0 }
 0x10e   :  { %620 = vst [vmem:[%s1281_s3 + $0x20] sm:$0xff] %v579_v54  ;;  %v713_v56 = vadd.f32 %v712_v41, %v579_v54  ;;  %v732_v57 = vmul.f32 %v579_v54, %v579_v54  ;;  %v582_v58 = vadd.f32 %v922_v53, %v494_v55  ;;  %v865_v59 = vpop.f32.mrb[12].mxu0 }
 0x10f   :  { %v923_v60 = vpop.f32.mrb[12].mxu1  ;;  %v866_v61 = vpop.f32.mrb[13].mxu0 }
 0x110   :  { %v744_v62 = vadd.f32 %v743_v49, %v732_v57  ;;  %621 = vst [vmem:[%s1281_s3 + $0x28] sm:$0xff] %v582_v58  ;;  %v714_v63 = vadd.f32 %v713_v56, %v582_v58  ;;  %v733_v1 = vmul.f32 %v582_v58, %v582_v58  ;;  %v867_v2 = vadd.f32 %v866_v61, %v865_v59  ;;  %v924_v3 = vpop.f32.mrb[13].mxu1  ;;  %v868_v4 = vpop.f32.mrb[14].mxu0 }
 0x111   :  { %v925_v5 = vadd.f32 %v924_v3, %v923_v60  ;;  %v926_v6 = vpop.f32.mrb[14].mxu1  ;;  %v869_v7 = vpop.f32.mrb[15].mxu0  ;;  %v630_v58 = vshrl.u32 %v629_v43, 7 }
 0x112   :  { %v745_v8 = vadd.f32 %v744_v62, %v733_v1  ;;  %v499_v9 = vadd.f32 %v867_v2, %v1221_v0  ;;  %v870_v10 = vadd.f32 %v869_v7, %v868_v4  ;;  %v927_v11 = vpop.f32.mrb[15].mxu1 }
 0x113   :  { %v928_v12 = vadd.f32 %v927_v11, %v926_v6  ;;  %v642_v4 = vadd.s32 96, %v630_v58 }
 0x114   :  { %v587_v13 = vadd.f32 %v925_v5, %v499_v9  ;;  %v502_v14 = vadd.f32 %v870_v10, %v1221_v0 }
 0x115   :  { %vm670_vm0 = vcmp.lt.s32.totalorder %v642_v4, 98 }
 0x116   :  { %622 = vst [vmem:[%s1281_s3 + $0x30] sm:$0xff] %v587_v13  ;;  %v715_v15 = vadd.f32 %v714_v63, %v587_v13  ;;  %v734_v16 = vmul.f32 %v587_v13, %v587_v13  ;;  %v590_v17 = vadd.f32 %v928_v12, %v502_v14  ;;  %v871_v18 = vpop.f32.mrb[16].mxu0 }
 0x117   :  { %v929_v19 = vpop.f32.mrb[16].mxu1  ;;  %v872_v20 = vpop.f32.mrb[17].mxu0 }
 0x118   :  { %v746_v21 = vadd.f32 %v745_v8, %v734_v16  ;;  %623 = vst [vmem:[%s1281_s3 + $0x38] sm:$0xff] %v590_v17  ;;  %v716_v22 = vadd.f32 %v715_v15, %v590_v17  ;;  %v735_v23 = vmul.f32 %v590_v17, %v590_v17  ;;  %v873_v24 = vadd.f32 %v872_v20, %v871_v18  ;;  %v930_v25 = vpop.f32.mrb[17].mxu1  ;;  %v874_v26 = vpop.f32.mrb[18].mxu0 }
 0x119   :  { %v931_v27 = vadd.f32 %v930_v25, %v929_v19  ;;  %v932_v28 = vpop.f32.mrb[18].mxu1  ;;  %v875_v29 = vpop.f32.mrb[19].mxu0 }
 0x11a   :  { %v747_v30 = vadd.f32 %v746_v21, %v735_v23  ;;  %v507_v31 = vadd.f32 %v873_v24, %v1221_v0  ;;  %v876_v32 = vadd.f32 %v875_v29, %v874_v26  ;;  %v933_v33 = vpop.f32.mrb[19].mxu1 }
 0x11b   :  { %v934_v34 = vadd.f32 %v933_v33, %v932_v28 }
 0x11c   :  { %v595_v35 = vadd.f32 %v931_v27, %v507_v31  ;;  %v510_v36 = vadd.f32 %v876_v32, %v1221_v0 }
 0x11e   :  { %624 = vst [vmem:[%s1281_s3 + $0x40] sm:$0xff] %v595_v35  ;;  %v717_v37 = vadd.f32 %v716_v22, %v595_v35  ;;  %v736_v38 = vmul.f32 %v595_v35, %v595_v35  ;;  %v598_v39 = vadd.f32 %v934_v34, %v510_v36  ;;  %v877_v40 = vpop.f32.mrb[20].mxu0 }
 0x11f   :  { %v935_v41 = vpop.f32.mrb[20].mxu1  ;;  %v878_v42 = vpop.f32.mrb[21].mxu0 }
 0x120   :  { %v748_v44 = vadd.f32 %v747_v30, %v736_v38  ;;  %625 = vst [vmem:[%s1281_s3 + $0x48] sm:$0xff] %v598_v39  ;;  %v718_v45 = vadd.f32 %v717_v37, %v598_v39  ;;  %v737_v46 = vmul.f32 %v598_v39, %v598_v39  ;;  %v879_v47 = vadd.f32 %v878_v42, %v877_v40  ;;  %v936_v48 = vpop.f32.mrb[21].mxu1  ;;  %v880_v49 = vpop.f32.mrb[22].mxu0 }
 0x121   :  { %v937_v50 = vadd.f32 %v936_v48, %v935_v41  ;;  %v938_v51 = vpop.f32.mrb[22].mxu1  ;;  %v881_v52 = vpop.f32.mrb[23].mxu0 }
 0x122   :  { %v749_v53 = vadd.f32 %v748_v44, %v737_v46  ;;  %v515_v54 = vadd.f32 %v879_v47, %v1221_v0  ;;  %v882_v55 = vadd.f32 %v881_v52, %v880_v49  ;;  %v939_v56 = vpop.f32.mrb[23].mxu1 }
 0x123   :  { %v940_v57 = vadd.f32 %v939_v56, %v938_v51 }
 0x124   :  { %v603_v59 = vadd.f32 %v937_v50, %v515_v54  ;;  %v518_v60 = vadd.f32 %v882_v55, %v1221_v0 }
 0x126   :  { %626 = vst [vmem:[%s1281_s3 + $0x50] sm:$0xff] %v603_v59  ;;  %v719_v61 = vadd.f32 %v718_v45, %v603_v59  ;;  %v738_v62 = vmul.f32 %v603_v59, %v603_v59  ;;  %v606_v63 = vadd.f32 %v940_v57, %v518_v60  ;;  %v883_v1 = vpop.f32.mrb[24].mxu0 }
 0x127   :  { %v941_v2 = vpop.f32.mrb[24].mxu1  ;;  %v884_v3 = vpop.f32.mrb[25].mxu0 }
 0x128   :  { %v750_v5 = vadd.f32 %v749_v53, %v738_v62  ;;  %627 = vst [vmem:[%s1281_s3 + $0x58] sm:$0xff] %v606_v63  ;;  %v720_v6 = vadd.f32 %v719_v61, %v606_v63  ;;  %v739_v7 = vmul.f32 %v606_v63, %v606_v63  ;;  %v885_v8 = vadd.f32 %v884_v3, %v883_v1  ;;  %v942_v9 = vpop.f32.mrb[25].mxu1  ;;  %v886_v10 = vpop.f32.mrb[26].mxu0 }
 0x129   :  { %v943_v11 = vadd.f32 %v942_v9, %v941_v2  ;;  %v944_v12 = vpop.f32.mrb[26].mxu1  ;;  %v887_v13 = vpop.f32.mrb[27].mxu0 }
 0x12a   :  { %v751_v14 = vadd.f32 %v750_v5, %v739_v7  ;;  %v523_v15 = vadd.f32 %v885_v8, %v1221_v0  ;;  %v945_v16 = vpop.f32.mrb[27].mxu1 }
 0x12c   :  { %v611_v17 = vadd.f32 %v943_v11, %v523_v15 }
 0x12e   :  { %628 = vst [vmem:[%s1281_s3 + $0x60] sm:$0xff] %v611_v17  ;;  %v709_v18 = vsel %vm670_vm0, %v611_v17, 0.0 }
 0x12f   :  { %v721_v19 = vadd.f32 %v720_v6, %v709_v18  ;;  %v740_v20 = vmul.f32 %v709_v18, %v709_v18 }
 0x131   :  { %v722_v21 = vrot.slane %v721_v19, 4  ;;  %v752_v22 = vadd.f32 %v751_v14, %v740_v20 }
 0x133   :  { %v723_v23 = vadd.f32 %v722_v21, %v721_v19  ;;  %v753_v24 = vrot.slane %v752_v22, 4 }
 0x135   :  { %v724_v25 = vrot.slane %v723_v23, 2  ;;  %v754_v26 = vadd.f32 %v753_v24, %v752_v22 }
 0x137   :  { %v725_v27 = vadd.f32 %v724_v25, %v723_v23  ;;  %v755_v28 = vrot.slane %v754_v26, 2 }
 0x139   :  { %v726_v29 = vrot.slane %v725_v27, 1  ;;  %v756_v0 = vadd.f32 %v755_v28, %v754_v26 }
 0x13b   :  { %v757_v30 = vrot.slane %v756_v0, 1  ;;  %v727_v31 = vadd.f32 %v726_v29, %v725_v27 }
 0x13d   :  { %v758_v32 = vadd.f32 %v757_v30, %v756_v0 }
 0x13f   :  { %v760_v33 = vsel %vm759_vm1, %v727_v31, %v758_v32 }
 0x140   :  { %761 = vst [vmem:[%s1282_s4] sm:$0x3] %v760_v33 }

// kernel: _lambda_.24
= control target key start
LH: loop header
LB: loop body
LE: loop exit
PB: predicated region body
PF: predicated region fallthrough
CT: control target
= control target key end

     0   :  { %s1808_s1 = inlined_call_operand.vmem [shape: bf16[1024,128], index: 1, kind: input, shape index: {}]   ;;  %s1809_s0 = inlined_call_operand.vmem [shape: bf16[72,1024], index: 0, kind: input, shape index: {}]   ;;  %s1810_s2 = inlined_call_operand.vmem [shape: f32[1,128], index: 2, kind: input, shape index: {}]   ;;  %s1811_s3 = inlined_call_operand.vmem [shape: f32[72,128], index: 3, kind: output, shape index: {}]  }
   0x1   :  { %v1348_v0 = vld [vmem:[%s1808_s1 + $0x40] sm:$0xff]   ;;  %v1352_v4 = vld [vmem:[%s1808_s1 + $0x48] sm:$0xff]   ;;  %v1356_v8 = vld [vmem:[%s1808_s1 + $0x50] sm:$0xff]  }
   0x2   :  { %v1349_v1 = vld [vmem:[%s1808_s1 + $0xc0] sm:$0xff]   ;;  %1164 = vmatprep.subr.bf16.mxu0 %v1348_v0  ;;  %v1353_v5 = vld [vmem:[%s1808_s1 + $0xc8] sm:$0xff]   ;;  %v1357_v9 = vld [vmem:[%s1808_s1 + $0xd0] sm:$0xff]  }
   0x3   :  { %v1350_v2 = vld [vmem:[%s1808_s1] sm:$0xff]   ;;  %1210 = vmatprep.subr.bf16.mxu1 %v1349_v1  ;;  %v1354_v6 = vld [vmem:[%s1808_s1 + $0x8] sm:$0xff]   ;;  %v1358_v10 = vld [vmem:[%s1808_s1 + $0x10] sm:$0xff]  }
   0x4   :  { %v1351_v3 = vld [vmem:[%s1808_s1 + $0x80] sm:$0xff]   ;;  %1165 = vmatpush3.bf16.msra.mxu0 %v1350_v2  ;;  %v1355_v7 = vld [vmem:[%s1808_s1 + $0x88] sm:$0xff]   ;;  %v1359_v11 = vld [vmem:[%s1808_s1 + $0x90] sm:$0xff]  }
   0x5   :  { %1211 = vmatpush3.bf16.msra.mxu1 %v1351_v3  ;;  %1166 = vmatprep.subr.bf16.mxu0 %v1352_v4  ;;  %v1360_v12 = vld [vmem:[%s1808_s1 + $0x58] sm:$0xff]   ;;  %v1364_v16 = vld [vmem:[%s1808_s1 + $0x60] sm:$0xff]   ;;  %v1368_v20 = vld [vmem:[%s1808_s1 + $0x68] sm:$0xff]  }
   0x6   :  { %1212 = vmatprep.subr.bf16.mxu1 %v1353_v5  ;;  %v1361_v13 = vld [vmem:[%s1808_s1 + $0xd8] sm:$0xff]   ;;  %v1365_v17 = vld [vmem:[%s1808_s1 + $0xe0] sm:$0xff]   ;;  %v1369_v21 = vld [vmem:[%s1808_s1 + $0xe8] sm:$0xff]  }
   0x7   :  { %v1362_v14 = vld [vmem:[%s1808_s1 + $0x18] sm:$0xff]   ;;  %v1366_v18 = vld [vmem:[%s1808_s1 + $0x20] sm:$0xff]   ;;  %v1370_v22 = vld [vmem:[%s1808_s1 + $0x28] sm:$0xff]  }
   0x8   :  { %1167 = vmatpush3.bf16.msra.mxu0 %v1354_v6  ;;  %v1363_v15 = vld [vmem:[%s1808_s1 + $0x98] sm:$0xff]   ;;  %v1367_v19 = vld [vmem:[%s1808_s1 + $0xa0] sm:$0xff]   ;;  %v1371_v23 = vld [vmem:[%s1808_s1 + $0xa8] sm:$0xff]  }
   0x9   :  { %1213 = vmatpush3.bf16.msra.mxu1 %v1355_v7  ;;  %1168 = vmatprep.subr.bf16.mxu0 %v1356_v8  ;;  %v1372_v24 = vld [vmem:[%s1808_s1 + $0x70] sm:$0xff]   ;;  %v1376_v28 = vld [vmem:[%s1808_s1 + $0x78] sm:$0xff]   ;;  %v15_v32 = vld [vmem:[%s1809_s0] sm:$0xff] }
   0xa   :  { %1214 = vmatprep.subr.bf16.mxu1 %v1357_v9  ;;  %v1373_v25 = vld [vmem:[%s1808_s1 + $0xf0] sm:$0xff]   ;;  %v1377_v29 = vld [vmem:[%s1808_s1 + $0xf8] sm:$0xff]   ;;  %v19_v33 = vld [vmem:[%s1809_s0 + $0x20] sm:$0xff] }
   0xb   :  { %v1374_v26 = vld [vmem:[%s1808_s1 + $0x30] sm:$0xff]   ;;  %v1378_v30 = vld [vmem:[%s1808_s1 + $0x38] sm:$0xff]   ;;  %v16_v34 = vld [vmem:[%s1809_s0 + $0x8] sm:$0xff]  ;;  %v1060_v35 = vcombine.low %v15_v32, %v19_v33  ;;  %v1061_v36 = vcombine.high %v15_v32, %v19_v33 }
   0xc   :  { %1169 = vmatpush3.bf16.msra.mxu0 %v1358_v10  ;;  %v1375_v27 = vld [vmem:[%s1808_s1 + $0xb0] sm:$0xff]   ;;  %v1379_v31 = vld [vmem:[%s1808_s1 + $0xb8] sm:$0xff]   ;;  %v20_v37 = vld [vmem:[%s1809_s0 + $0x28] sm:$0xff] }
   0xd   :  { %1215 = vmatpush3.bf16.msra.mxu1 %v1359_v11  ;;  %1170 = vmatprep.subr.bf16.mxu0 %v1360_v12  ;;  %v1062_v38 = vcombine.low %v16_v34, %v20_v37  ;;  %v1063_v39 = vcombine.high %v16_v34, %v20_v37  ;;  %v1380_v40 = vld [vmem:[%s1808_s1 + $0x140] sm:$0xff]   ;;  %v1384_v44 = vld [vmem:[%s1808_s1 + $0x148] sm:$0xff]   ;;  %v1388_v56 = vld [vmem:[%s1808_s1 + $0x150] sm:$0xff]  }
   0xe   :  { %1216 = vmatprep.subr.bf16.mxu1 %v1361_v13  ;;  %790 = vmatprep.mubr.bf16.mxu0 %v1061_v36  ;;  %v1381_v41 = vld [vmem:[%s1808_s1 + $0x100] sm:$0xff]   ;;  %v1385_v45 = vld [vmem:[%s1808_s1 + $0x108] sm:$0xff]   ;;  %v1389_v57 = vld [vmem:[%s1808_s1 + $0x110] sm:$0xff]  }
   0xf   :  { %862 = vmatprep.mubr.bf16.mxu1 %v1063_v39  ;;  %v1382_v42 = vld [vmem:[%s1808_s1 + $0x1c0] sm:$0xff]   ;;  %v24_v49 = vld [vmem:[%s1809_s0 + $0x48] sm:$0xff]  ;;  %v1390_v58 = vld [vmem:[%s1808_s1 + $0x1d0] sm:$0xff]  }
  0x10   :  { %1171 = vmatpush3.bf16.msra.mxu0 %v1362_v14  ;;  %v1383_v43 = vld [vmem:[%s1808_s1 + $0x180] sm:$0xff]   ;;  %v28_v50 = vld [vmem:[%s1809_s0 + $0x68] sm:$0xff]  ;;  %v1391_v59 = vld [vmem:[%s1808_s1 + $0x190] sm:$0xff]  }
  0x11   :  { %1217 = vmatpush3.bf16.msra.mxu1 %v1363_v15  ;;  %1172 = vmatprep.subr.bf16.mxu0 %v1364_v16  ;;  %v23_v46 = vld [vmem:[%s1809_s0 + $0x40] sm:$0xff]  ;;  %v1071_v52 = vcombine.high %v24_v49, %v28_v50  ;;  %v1386_v53 = vld [vmem:[%s1808_s1 + $0x1c8] sm:$0xff]   ;;  %v1070_v54 = vcombine.low %v24_v49, %v28_v50  ;;  %v1392_v2 = vld [vmem:[%s1808_s1 + $0x158] sm:$0xff]  }
  0x12   :  { %1218 = vmatprep.subr.bf16.mxu1 %v1365_v17  ;;  %v27_v47 = vld [vmem:[%s1809_s0 + $0x60] sm:$0xff]  ;;  %v1387_v55 = vld [vmem:[%s1808_s1 + $0x188] sm:$0xff]   ;;  %v1393_v5 = vld [vmem:[%s1808_s1 + $0x118] sm:$0xff]  }
  0x13   :  { %v1069_v48 = vcombine.high %v23_v46, %v27_v47  ;;  %v1068_v51 = vcombine.low %v23_v46, %v27_v47  ;;  %v31_v60 = vld [vmem:[%s1809_s0 + $0x80] sm:$0xff]  ;;  %v32_v62 = vld [vmem:[%s1809_s0 + $0x88] sm:$0xff]  ;;  %v1394_v6 = vld [vmem:[%s1808_s1 + $0x1d8] sm:$0xff]  }
  0x14   :  { %1173 = vmatpush3.bf16.msra.mxu0 %v1366_v18  ;;  %v35_v61 = vld [vmem:[%s1809_s0 + $0xa0] sm:$0xff]  ;;  %v36_v63 = vld [vmem:[%s1809_s0 + $0xa8] sm:$0xff]  ;;  %v1395_v7 = vld [vmem:[%s1808_s1 + $0x198] sm:$0xff]  }
  0x15   :  { %1219 = vmatpush3.bf16.msra.mxu1 %v1367_v19  ;;  %1174 = vmatprep.subr.bf16.mxu0 %v1368_v20  ;;  %v1077_v0 = vcombine.high %v31_v60, %v35_v61  ;;  %v1079_v1 = vcombine.high %v32_v62, %v36_v63  ;;  %v1076_v3 = vcombine.low %v31_v60, %v35_v61  ;;  %v1396_v8 = vld [vmem:[%s1808_s1 + $0x160] sm:$0xff]   ;;  %v40_v13 = vld [vmem:[%s1809_s0 + $0xc8] sm:$0xff]  ;;  %v1411_v33 = vld [vmem:[%s1808_s1 + $0x1b0] sm:$0xff]  }
  0x16   :  { %1220 = vmatprep.subr.bf16.mxu1 %v1369_v21  ;;  %v1078_v4 = vcombine.low %v32_v62, %v36_v63  ;;  %v1397_v9 = vld [vmem:[%s1808_s1 + $0x120] sm:$0xff]   ;;  %v44_v15 = vld [vmem:[%s1809_s0 + $0xe8] sm:$0xff]  ;;  %v1412_v34 = vld [vmem:[%s1808_s1 + $0x178] sm:$0xff]  }
  0x17   :  { %v1398_v10 = vld [vmem:[%s1808_s1 + $0x1e0] sm:$0xff]   ;;  %v1087_v17 = vcombine.high %v40_v13, %v44_v15  ;;  %v1086_v19 = vcombine.low %v40_v13, %v44_v15  ;;  %v1400_v20 = vld [vmem:[%s1808_s1 + $0x168] sm:$0xff]   ;;  %v1414_v36 = vld [vmem:[%s1808_s1 + $0x1f8] sm:$0xff]  }
  0x18   :  { %1175 = vmatpush3.bf16.msra.mxu0 %v1370_v22  ;;  %v39_v11 = vld [vmem:[%s1809_s0 + $0xc0] sm:$0xff]  ;;  %v1401_v21 = vld [vmem:[%s1808_s1 + $0x128] sm:$0xff]   ;;  %v1415_v37 = vld [vmem:[%s1808_s1 + $0x1b8] sm:$0xff]  }
  0x19   :  { %1221 = vmatpush3.bf16.msra.mxu1 %v1371_v23  ;;  %1176 = vmatprep.subr.bf16.mxu0 %v1372_v24  ;;  %v43_v12 = vld [vmem:[%s1809_s0 + $0xe0] sm:$0xff]  ;;  %v1402_v22 = vld [vmem:[%s1808_s1 + $0x1e8] sm:$0xff]   ;;  %v1404_v24 = vld [vmem:[%s1808_s1 + $0x170] sm:$0xff]  }
  0x1a   :  { %1222 = vmatprep.subr.bf16.mxu1 %v1373_v25  ;;  %v1085_v14 = vcombine.high %v39_v11, %v43_v12  ;;  %v1084_v16 = vcombine.low %v39_v11, %v43_v12  ;;  %v1399_v18 = vld [vmem:[%s1808_s1 + $0x1a0] sm:$0xff]   ;;  %v1403_v23 = vld [vmem:[%s1808_s1 + $0x1a8] sm:$0xff]   ;;  %v21_v39 = vld [vmem:[%s1809_s0 + $0x30] sm:$0xff] }
  0x1b   :  { %v47_v25 = vld [vmem:[%s1809_s0 + $0x100] sm:$0xff]  ;;  %v26_v47 = vld [vmem:[%s1809_s0 + $0x58] sm:$0xff]  ;;  %v41_v60 = vld [vmem:[%s1809_s0 + $0xd0] sm:$0xff] }
  0x1c   :  { %1177 = vmatpush3.bf16.msra.mxu0 %v1374_v26  ;;  %v48_v26 = vld [vmem:[%s1809_s0 + $0x108] sm:$0xff]  ;;  %v45_v61 = vld [vmem:[%s1809_s0 + $0xf0] sm:$0xff]  ;;  %v42_v62 = vld [vmem:[%s1809_s0 + $0xd8] sm:$0xff] }
  0x1d   :  { %1223 = vmatpush3.bf16.msra.mxu1 %v1375_v27  ;;  %1178 = vmatprep.subr.bf16.mxu0 %v1376_v28  ;;  %v1093_v27 = vcombine.high %v47_v25, %v47_v25  ;;  %v1095_v28 = vcombine.high %v48_v26, %v48_v26  ;;  %v1094_v32 = vcombine.low %v48_v26, %v48_v26  ;;  %v46_v63 = vld [vmem:[%s1809_s0 + $0xf8] sm:$0xff] }
  0x1e   :  { %1224 = vmatprep.subr.bf16.mxu1 %v1377_v29  ;;  %v1407_v29 = vld [vmem:[%s1808_s1 + $0x130] sm:$0xff]  }
  0x20   :  { %1179 = vmatpush3.bf16.msra.mxu0 %v1378_v30  ;;  %v1092_v30 = vcombine.low %v47_v25, %v47_v25 }
  0x21   :  { %1225 = vmatpush3.bf16.msra.mxu1 %v1379_v31  ;;  %1256 = vmatprep.subr.bf16.mxu0 %v1380_v40  ;;  %v1410_v31 = vld [vmem:[%s1808_s1 + $0x1f0] sm:$0xff]   ;;  %v18_v40 = vld [vmem:[%s1809_s0 + $0x18] sm:$0xff] }
  0x22   :  { %1302 = vmatprep.subr.bf16.mxu1 %v1382_v42  ;;  %v22_v42 = vld [vmem:[%s1809_s0 + $0x38] sm:$0xff] }
  0x23   :  { %791 = vmatmul.mubr.bf16.vlgmr.msra.gmra.mrb[0].mxu0 %v1060_v35  ;;  %v1413_v35 = vld [vmem:[%s1808_s1 + $0x138] sm:$0xff]   ;;  %v1067_v46 = vcombine.high %v18_v40, %v22_v42  ;;  %v1066_v49 = vcombine.low %v18_v40, %v22_v42 }
  0x24   :  { %863 = vmatmul.mubr.bf16.vlgmr.msra.gmra.mrb[0].mxu1 %v1062_v38  ;;  %1257 = vmatpush3.bf16.msra.mxu0 %v1381_v41  ;;  %v17_v38 = vld [vmem:[%s1809_s0 + $0x10] sm:$0xff] }
  0x25   :  { %1303 = vmatpush3.bf16.msra.mxu1 %v1383_v43  ;;  %1258 = vmatprep.subr.bf16.mxu0 %v1384_v44  ;;  %v1065_v41 = vcombine.high %v17_v38, %v21_v39  ;;  %v25_v43 = vld [vmem:[%s1809_s0 + $0x50] sm:$0xff] }
  0x26   :  { %798 = vmatprep.mubr.bf16.mxu0 %v1069_v48  ;;  %870 = vmatprep.mubr.bf16.mxu1 %v1071_v52  ;;  %v29_v44 = vld [vmem:[%s1809_s0 + $0x70] sm:$0xff]  ;;  %v30_v48 = vld [vmem:[%s1809_s0 + $0x78] sm:$0xff] }
  0x27   :  { %1304 = vmatprep.subr.bf16.mxu1 %v1386_v53  ;;  %v1073_v50 = vcombine.high %v25_v43, %v29_v44  ;;  %v33_v52 = vld [vmem:[%s1809_s0 + $0x90] sm:$0xff] }
  0x28   :  { %1259 = vmatpush3.bf16.msra.mxu0 %v1385_v45  ;;  %v1064_v45 = vcombine.low %v17_v38, %v21_v39  ;;  %v37_v53 = vld [vmem:[%s1809_s0 + $0xb0] sm:$0xff] }
  0x29   :  { %1305 = vmatpush3.bf16.msra.mxu1 %v1387_v55  ;;  %1260 = vmatprep.subr.bf16.mxu0 %v1388_v56  ;;  %v38_v55 = vld [vmem:[%s1809_s0 + $0xb8] sm:$0xff]  ;;  %v1072_v56 = vcombine.low %v25_v43, %v29_v44 }
  0x2a   :  { %1306 = vmatprep.subr.bf16.mxu1 %v1390_v58  ;;  %v1081_v58 = vcombine.high %v33_v52, %v37_v53 }
  0x2b   :  { %799 = vmatmul.mubr.bf16.gmra.mrb[4].mxu0 %v1068_v51  ;;  %v1075_v51 = vcombine.high %v26_v47, %v30_v48 }
  0x2c   :  { %871 = vmatmul.mubr.bf16.gmra.mrb[4].mxu1 %v1070_v54  ;;  %1261 = vmatpush3.bf16.msra.mxu0 %v1389_v57  ;;  %v34_v54 = vld [vmem:[%s1809_s0 + $0x98] sm:$0xff]  ;;  %v1074_v57 = vcombine.low %v26_v47, %v30_v48 }
  0x2d   :  { %1307 = vmatpush3.bf16.msra.mxu1 %v1391_v59  ;;  %806 = vmatprep.mubr.bf16.mxu0 %v1077_v0  ;;  %v1083_v59 = vcombine.high %v34_v54, %v38_v55  ;;  %v1080_v0 = vcombine.low %v33_v52, %v37_v53 }
  0x2e   :  { %878 = vmatprep.mubr.bf16.mxu1 %v1079_v1  ;;  %1262 = vmatprep.subr.bf16.mxu0 %v1392_v2  ;;  %v1082_v1 = vcombine.low %v34_v54, %v38_v55  ;;  %v1089_v2 = vcombine.high %v41_v60, %v45_v61 }
  0x2f   :  { %1308 = vmatprep.subr.bf16.mxu1 %v1394_v6  ;;  %v1088_v6 = vcombine.low %v41_v60, %v45_v61 }
  0x30   :  { %1263 = vmatpush3.bf16.msra.mxu0 %v1393_v5  ;;  %v50_v5 = vld [vmem:[%s1809_s0 + $0x118] sm:$0xff] }
  0x31   :  { %1309 = vmatpush3.bf16.msra.mxu1 %v1395_v7  ;;  %1264 = vmatprep.subr.bf16.mxu0 %v1396_v8  ;;  %v1090_v7 = vcombine.low %v42_v62, %v46_v63  ;;  %v1098_v11 = vcombine.low %v50_v5, %v50_v5 }
  0x32   :  { %1310 = vmatprep.subr.bf16.mxu1 %v1398_v10 }
  0x33   :  { %807 = vmatmul.mubr.bf16.gmra.mrb[8].mxu0 %v1076_v3  ;;  %v1091_v3 = vcombine.high %v42_v62, %v46_v63 }
  0x34   :  { %879 = vmatmul.mubr.bf16.gmra.mrb[8].mxu1 %v1078_v4  ;;  %1265 = vmatpush3.bf16.msra.mxu0 %v1397_v9  ;;  %v49_v4 = vld [vmem:[%s1809_s0 + $0x110] sm:$0xff]  ;;  %v1099_v9 = vcombine.high %v50_v5, %v50_v5 }
  0x35   :  { %814 = vmatprep.mubr.bf16.mxu0 %v1085_v14  ;;  %886 = vmatprep.mubr.bf16.mxu1 %v1087_v17  ;;  %v1097_v8 = vcombine.high %v49_v4, %v49_v4  ;;  %v1096_v10 = vcombine.low %v49_v4, %v49_v4  ;;  %v1743_v14 = vld [vmem:[%s1810_s2] ss:$0 sm:$0xff] }
  0x36   :  { %1311 = vmatpush3.bf16.msra.mxu1 %v1399_v18  ;;  %1266 = vmatprep.subr.bf16.mxu0 %v1400_v20 }
  0x37   :  { %1312 = vmatprep.subr.bf16.mxu1 %v1402_v22 }
  0x38   :  { %1267 = vmatpush3.bf16.msra.mxu0 %v1401_v21 }
  0x39   :  { %1268 = vmatprep.subr.bf16.mxu0 %v1404_v24 }
  0x3a   :  { %1313 = vmatpush3.bf16.msra.mxu1 %v1403_v23 }
  0x3b   :  { %815 = vmatmul.mubr.bf16.gmra.mrb[12].mxu0 %v1084_v16  ;;  %1314 = vmatprep.subr.bf16.mxu1 %v1410_v31 }
  0x3c   :  { %887 = vmatmul.mubr.bf16.gmra.mrb[12].mxu1 %v1086_v19  ;;  %822 = vmatprep.mubr.bf16.mxu0 %v1093_v27 }
  0x3d   :  { %894 = vmatprep.mubr.bf16.mxu1 %v1095_v28  ;;  %1269 = vmatpush3.bf16.msra.mxu0 %v1407_v29 }
  0x3e   :  { %1315 = vmatpush3.bf16.msra.mxu1 %v1411_v33  ;;  %1270 = vmatprep.subr.bf16.mxu0 %v1412_v34 }
  0x3f   :  { %1316 = vmatprep.subr.bf16.mxu1 %v1414_v36 }
  0x41   :  { %1271 = vmatpush3.bf16.msra.mxu0 %v1413_v35 }
  0x42   :  { %1317 = vmatpush3.bf16.msra.mxu1 %v1415_v37 }
  0x43   :  { %823 = vmatmul.mubr.bf16.gmra.mrb[16].mxu0 %v1092_v30 }
  0x44   :  { %895 = vmatmul.mubr.bf16.gmra.mrb[16].mxu1 %v1094_v32  ;;  %934 = vmatprep.mubr.bf16.mxu0 %v1065_v41 }
  0x45   :  { %1006 = vmatprep.mubr.bf16.mxu1 %v1067_v46 }
  0x4b   :  { %935 = vmatmul.mubr.bf16.vlgmr.msra.gmra.mrb[20].mxu0 %v1064_v45 }
  0x4c   :  { %1007 = vmatmul.mubr.bf16.vlgmr.msra.gmra.mrb[20].mxu1 %v1066_v49  ;;  %942 = vmatprep.mubr.bf16.mxu0 %v1073_v50 }
  0x4d   :  { %1014 = vmatprep.mubr.bf16.mxu1 %v1075_v51 }
  0x53   :  { %943 = vmatmul.mubr.bf16.gmra.mrb[24].mxu0 %v1072_v56 }
  0x54   :  { %1015 = vmatmul.mubr.bf16.gmra.mrb[24].mxu1 %v1074_v57  ;;  %950 = vmatprep.mubr.bf16.mxu0 %v1081_v58 }
  0x55   :  { %1022 = vmatprep.mubr.bf16.mxu1 %v1083_v59 }
  0x5b   :  { %951 = vmatmul.mubr.bf16.gmra.mrb[28].mxu0 %v1080_v0 }
  0x5c   :  { %1023 = vmatmul.mubr.bf16.gmra.mrb[28].mxu1 %v1082_v1  ;;  %958 = vmatprep.mubr.bf16.mxu0 %v1089_v2 }
  0x5d   :  { %1030 = vmatprep.mubr.bf16.mxu1 %v1091_v3 }
  0x63   :  { %959 = vmatmul.mubr.bf16.gmra.mrb[32].mxu0 %v1088_v6 }
  0x64   :  { %1031 = vmatmul.mubr.bf16.gmra.mrb[32].mxu1 %v1090_v7  ;;  %966 = vmatprep.mubr.bf16.mxu0 %v1097_v8 }
  0x65   :  { %1038 = vmatprep.mubr.bf16.mxu1 %v1099_v9 }
  0x6b   :  { %967 = vmatmul.mubr.bf16.gmra.mrb[36].mxu0 %v1096_v10 }
  0x6c   :  { %1039 = vmatmul.mubr.bf16.gmra.mrb[36].mxu1 %v1098_v11 }
  0xf6   :  { %v1180_v12 = vpop.f32.mrb[0].mxu0 }
  0xf7   :  { %v1226_v13 = vpop.f32.mrb[0].mxu1  ;;  %v1181_v15 = vpop.f32.mrb[1].mxu0 }
  0xf8   :  { %v1182_v16 = vadd.f32 %v1181_v15, %v1180_v12  ;;  %v1227_v17 = vpop.f32.mrb[1].mxu1  ;;  %v1183_v18 = vpop.f32.mrb[2].mxu0 }
  0xf9   :  { %v1228_v19 = vadd.f32 %v1227_v17, %v1226_v13  ;;  %v1229_v20 = vpop.f32.mrb[2].mxu1  ;;  %v1184_v21 = vpop.f32.mrb[3].mxu0 }
  0xfa   :  { %v793_v22 = vadd.f32 %v1182_v16, %v1743_v14  ;;  %v1185_v23 = vadd.f32 %v1184_v21, %v1183_v18  ;;  %v1230_v24 = vpop.f32.mrb[3].mxu1 }
  0xfb   :  { %v1231_v25 = vadd.f32 %v1230_v24, %v1229_v20 }
  0xfc   :  { %v1746_v26 = vadd.f32 %v1228_v19, %v793_v22  ;;  %v796_v27 = vadd.f32 %v1185_v23, %v1743_v14 }
  0xfe   :  { %v1749_v28 = vadd.f32 %v1231_v25, %v796_v27  ;;  %v1186_v29 = vpop.f32.mrb[4].mxu0 }
  0xff   :  { %v1232_v30 = vpop.f32.mrb[4].mxu1  ;;  %v1187_v31 = vpop.f32.mrb[5].mxu0 }
 0x100   :  { %v1188_v32 = vadd.f32 %v1187_v31, %v1186_v29  ;;  %v1233_v33 = vpop.f32.mrb[5].mxu1  ;;  %v1189_v34 = vpop.f32.mrb[6].mxu0 }
 0x101   :  { %v1234_v35 = vadd.f32 %v1233_v33, %v1232_v30  ;;  %v1235_v36 = vpop.f32.mrb[6].mxu1  ;;  %v1190_v37 = vpop.f32.mrb[7].mxu0 }
 0x102   :  { %v801_v38 = vadd.f32 %v1188_v32, %v1743_v14  ;;  %v1191_v39 = vadd.f32 %v1190_v37, %v1189_v34  ;;  %v1236_v40 = vpop.f32.mrb[7].mxu1 }
 0x103   :  { %v1237_v41 = vadd.f32 %v1236_v40, %v1235_v36 }
 0x104   :  { %v1752_v42 = vadd.f32 %v1234_v35, %v801_v38  ;;  %v804_v43 = vadd.f32 %v1191_v39, %v1743_v14 }
 0x106   :  { %v1755_v44 = vadd.f32 %v1237_v41, %v804_v43  ;;  %v1192_v45 = vpop.f32.mrb[8].mxu0 }
 0x107   :  { %v1238_v46 = vpop.f32.mrb[8].mxu1  ;;  %v1193_v47 = vpop.f32.mrb[9].mxu0 }
 0x108   :  { %v1194_v48 = vadd.f32 %v1193_v47, %v1192_v45  ;;  %v1239_v49 = vpop.f32.mrb[9].mxu1  ;;  %v1195_v50 = vpop.f32.mrb[10].mxu0 }
 0x109   :  { %v1240_v51 = vadd.f32 %v1239_v49, %v1238_v46  ;;  %v1241_v52 = vpop.f32.mrb[10].mxu1  ;;  %v1196_v53 = vpop.f32.mrb[11].mxu0 }
 0x10a   :  { %v809_v54 = vadd.f32 %v1194_v48, %v1743_v14  ;;  %v1197_v55 = vadd.f32 %v1196_v53, %v1195_v50  ;;  %v1242_v56 = vpop.f32.mrb[11].mxu1 }
 0x10b   :  { %v1243_v57 = vadd.f32 %v1242_v56, %v1241_v52 }
 0x10c   :  { %v1758_v58 = vadd.f32 %v1240_v51, %v809_v54  ;;  %v812_v59 = vadd.f32 %v1197_v55, %v1743_v14 }
 0x10e   :  { %v1761_v60 = vadd.f32 %v1243_v57, %v812_v59  ;;  %v1198_v61 = vpop.f32.mrb[12].mxu0 }
 0x10f   :  { %v1244_v62 = vpop.f32.mrb[12].mxu1  ;;  %v1199_v63 = vpop.f32.mrb[13].mxu0 }
 0x110   :  { %v1200_v0 = vadd.f32 %v1199_v63, %v1198_v61  ;;  %v1245_v1 = vpop.f32.mrb[13].mxu1  ;;  %v1201_v2 = vpop.f32.mrb[14].mxu0 }
 0x111   :  { %v1246_v3 = vadd.f32 %v1245_v1, %v1244_v62  ;;  %v1247_v4 = vpop.f32.mrb[14].mxu1  ;;  %v1202_v5 = vpop.f32.mrb[15].mxu0 }
 0x112   :  { %v817_v6 = vadd.f32 %v1200_v0, %v1743_v14  ;;  %v1203_v7 = vadd.f32 %v1202_v5, %v1201_v2  ;;  %v1248_v8 = vpop.f32.mrb[15].mxu1 }
 0x113   :  { %v1249_v9 = vadd.f32 %v1248_v8, %v1247_v4 }
 0x114   :  { %v1764_v10 = vadd.f32 %v1246_v3, %v817_v6  ;;  %v820_v11 = vadd.f32 %v1203_v7, %v1743_v14 }
 0x116   :  { %v1767_v12 = vadd.f32 %v1249_v9, %v820_v11  ;;  %v1204_v13 = vpop.f32.mrb[16].mxu0 }
 0x117   :  { %v1250_v15 = vpop.f32.mrb[16].mxu1  ;;  %v1205_v16 = vpop.f32.mrb[17].mxu0 }
 0x118   :  { %v1206_v17 = vadd.f32 %v1205_v16, %v1204_v13  ;;  %v1251_v18 = vpop.f32.mrb[17].mxu1  ;;  %v1207_v19 = vpop.f32.mrb[18].mxu0 }
 0x119   :  { %v1252_v20 = vadd.f32 %v1251_v18, %v1250_v15  ;;  %v1253_v21 = vpop.f32.mrb[18].mxu1  ;;  %v1208_v22 = vpop.f32.mrb[19].mxu0 }
 0x11a   :  { %v825_v23 = vadd.f32 %v1206_v17, %v1743_v14  ;;  %v1254_v24 = vpop.f32.mrb[19].mxu1 }
 0x11c   :  { %v1770_v25 = vadd.f32 %v1252_v20, %v825_v23 }
 0x11e   :  { %v1272_v27 = vpop.f32.mrb[20].mxu0 }
 0x11f   :  { %v1318_v29 = vpop.f32.mrb[20].mxu1  ;;  %v1273_v30 = vpop.f32.mrb[21].mxu0 }
 0x120   :  { %v1274_v31 = vadd.f32 %v1273_v30, %v1272_v27  ;;  %v1319_v32 = vpop.f32.mrb[21].mxu1  ;;  %v1275_v33 = vpop.f32.mrb[22].mxu0 }
 0x121   :  { %v1320_v34 = vadd.f32 %v1319_v32, %v1318_v29  ;;  %v1321_v35 = vpop.f32.mrb[22].mxu1  ;;  %v1276_v36 = vpop.f32.mrb[23].mxu0 }
 0x122   :  { %v937_v37 = vadd.f32 %v1274_v31, %v1746_v26  ;;  %v1277_v38 = vadd.f32 %v1276_v36, %v1275_v33  ;;  %v1322_v39 = vpop.f32.mrb[23].mxu1 }
 0x123   :  { %v1323_v40 = vadd.f32 %v1322_v39, %v1321_v35 }
 0x124   :  { %v1009_v41 = vadd.f32 %v1320_v34, %v937_v37  ;;  %v940_v14 = vadd.f32 %v1277_v38, %v1749_v28 }
 0x126   :  { %1046 = vst [vmem:[%s1811_s3] sm:$0xff] %v1009_v41  ;;  %v1012_v43 = vadd.f32 %v1323_v40, %v940_v14  ;;  %v1278_v45 = vpop.f32.mrb[24].mxu0 }
 0x127   :  { %v1324_v46 = vpop.f32.mrb[24].mxu1  ;;  %v1279_v47 = vpop.f32.mrb[25].mxu0 }
 0x128   :  { %1047 = vst [vmem:[%s1811_s3 + $0x8] sm:$0xff] %v1012_v43  ;;  %v1280_v48 = vadd.f32 %v1279_v47, %v1278_v45  ;;  %v1325_v26 = vpop.f32.mrb[25].mxu1  ;;  %v1281_v49 = vpop.f32.mrb[26].mxu0 }
 0x129   :  { %v1326_v50 = vadd.f32 %v1325_v26, %v1324_v46  ;;  %v1327_v51 = vpop.f32.mrb[26].mxu1  ;;  %v1282_v52 = vpop.f32.mrb[27].mxu0 }
 0x12a   :  { %v945_v28 = vadd.f32 %v1280_v48, %v1752_v42  ;;  %v1283_v53 = vadd.f32 %v1282_v52, %v1281_v49  ;;  %v1328_v54 = vpop.f32.mrb[27].mxu1 }
 0x12b   :  { %v1329_v55 = vadd.f32 %v1328_v54, %v1327_v51 }
 0x12c   :  { %v1017_v56 = vadd.f32 %v1326_v50, %v945_v28  ;;  %v948_v57 = vadd.f32 %v1283_v53, %v1755_v44 }
 0x12e   :  { %1048 = vst [vmem:[%s1811_s3 + $0x10] sm:$0xff] %v1017_v56  ;;  %v1020_v59 = vadd.f32 %v1329_v55, %v948_v57  ;;  %v1284_v61 = vpop.f32.mrb[28].mxu0 }
 0x12f   :  { %v1330_v62 = vpop.f32.mrb[28].mxu1  ;;  %v1285_v63 = vpop.f32.mrb[29].mxu0 }
 0x130   :  { %1049 = vst [vmem:[%s1811_s3 + $0x18] sm:$0xff] %v1020_v59  ;;  %v1286_v0 = vadd.f32 %v1285_v63, %v1284_v61  ;;  %v1331_v42 = vpop.f32.mrb[29].mxu1  ;;  %v1287_v1 = vpop.f32.mrb[30].mxu0 }
 0x131   :  { %v1332_v2 = vadd.f32 %v1331_v42, %v1330_v62  ;;  %v1333_v3 = vpop.f32.mrb[30].mxu1  ;;  %v1288_v4 = vpop.f32.mrb[31].mxu0 }
 0x132   :  { %v953_v44 = vadd.f32 %v1286_v0, %v1758_v58  ;;  %v1289_v5 = vadd.f32 %v1288_v4, %v1287_v1  ;;  %v1334_v6 = vpop.f32.mrb[31].mxu1 }
 0x133   :  { %v1335_v7 = vadd.f32 %v1334_v6, %v1333_v3 }
 0x134   :  { %v1025_v8 = vadd.f32 %v1332_v2, %v953_v44  ;;  %v956_v9 = vadd.f32 %v1289_v5, %v1761_v60 }
 0x136   :  { %1050 = vst [vmem:[%s1811_s3 + $0x20] sm:$0xff] %v1025_v8  ;;  %v1028_v11 = vadd.f32 %v1335_v7, %v956_v9  ;;  %v1290_v13 = vpop.f32.mrb[32].mxu0 }
 0x137   :  { %v1336_v15 = vpop.f32.mrb[32].mxu1  ;;  %v1291_v16 = vpop.f32.mrb[33].mxu0 }
 0x138   :  { %1051 = vst [vmem:[%s1811_s3 + $0x28] sm:$0xff] %v1028_v11  ;;  %v1292_v17 = vadd.f32 %v1291_v16, %v1290_v13  ;;  %v1337_v58 = vpop.f32.mrb[33].mxu1  ;;  %v1293_v18 = vpop.f32.mrb[34].mxu0 }
 0x139   :  { %v1338_v19 = vadd.f32 %v1337_v58, %v1336_v15  ;;  %v1339_v20 = vpop.f32.mrb[34].mxu1  ;;  %v1294_v21 = vpop.f32.mrb[35].mxu0 }
 0x13a   :  { %v961_v60 = vadd.f32 %v1292_v17, %v1764_v10  ;;  %v1295_v22 = vadd.f32 %v1294_v21, %v1293_v18  ;;  %v1340_v23 = vpop.f32.mrb[35].mxu1 }
 0x13b   :  { %v1341_v24 = vadd.f32 %v1340_v23, %v1339_v20 }
 0x13c   :  { %v1033_v27 = vadd.f32 %v1338_v19, %v961_v60  ;;  %v964_v29 = vadd.f32 %v1295_v22, %v1767_v12 }
 0x13e   :  { %1052 = vst [vmem:[%s1811_s3 + $0x30] sm:$0xff] %v1033_v27  ;;  %v1036_v30 = vadd.f32 %v1341_v24, %v964_v29  ;;  %v1296_v31 = vpop.f32.mrb[36].mxu0 }
 0x13f   :  { %v1342_v32 = vpop.f32.mrb[36].mxu1  ;;  %v1297_v33 = vpop.f32.mrb[37].mxu0 }
 0x140   :  { %1053 = vst [vmem:[%s1811_s3 + $0x38] sm:$0xff] %v1036_v30  ;;  %v1298_v34 = vadd.f32 %v1297_v33, %v1296_v31  ;;  %v1343_v10 = vpop.f32.mrb[37].mxu1  ;;  %v1299_v35 = vpop.f32.mrb[38].mxu0 }
 0x141   :  { %v1344_v36 = vadd.f32 %v1343_v10, %v1342_v32  ;;  %v1345_v37 = vpop.f32.mrb[38].mxu1  ;;  %v1300_v38 = vpop.f32.mrb[39].mxu0 }
 0x142   :  { %v969_v12 = vadd.f32 %v1298_v34, %v1770_v25  ;;  %v1346_v39 = vpop.f32.mrb[39].mxu1 }
 0x144   :  { %v1041_v40 = vadd.f32 %v1344_v36, %v969_v12 }
 0x146   :  { %1054 = vst [vmem:[%s1811_s3 + $0x40] sm:$0xff] %v1041_v40 }

</bundles_post_ra>
